<compile_context>
chip_gen: v5e
topology: v5e:2x2
jax: 0.10.0
libtpu: 0.0.40
codegen_flags: <defaults>
</compile_context>

<pallas_src>
import random

import jax
import jax.numpy as jnp
from jax.experimental import pallas as pl
from jax.experimental.pallas import tpu as pltpu


# ----------------------------- shared LSTM cell -------------------------------

def _lstm_step(x, h, c, wx, wh, b):
    """One LSTM cell update.

    x: (B, E), h/c: (B, H) f32, wx: (E, 4H) bf16, wh: (H, 4H) bf16,
    b: (1, 4H) f32.  PyTorch gate order i, f, g, o.  MXU operands in bf16,
    f32 accumulation, element-wise math in f32 (v5e-safe).
    """
    H = h.shape[-1]
    gates = (jnp.dot(x.astype(jnp.bfloat16), wx, preferred_element_type=jnp.float32)
             + jnp.dot(h.astype(jnp.bfloat16), wh, preferred_element_type=jnp.float32)
             + b)
    i = jax.nn.sigmoid(gates[:, 0:H])
    f = jax.nn.sigmoid(gates[:, H:2 * H])
    g = jnp.tanh(gates[:, 2 * H:3 * H])
    o = jax.nn.sigmoid(gates[:, 3 * H:4 * H])
    c_new = f * c + i * g
    h_new = o * jnp.tanh(c_new)
    return h_new, c_new


# ----------------------------- fused seq2seq kernel ----------------------------

def seq2seq_kernel(tf_ref,                                    # SMEM: (tgt_len,) i32 flags
                   src_emb_ref, x0_ref, tgtoh_ref,            # activations
                   enc_wx_ref, enc_wh_ref, enc_b_ref,         # encoder LSTM
                   dec_emb_ref, dec_wx_ref, dec_wh_ref, dec_b_ref,  # decoder LSTM
                   dec_wo_ref, dec_bo_ref,                    # vocab projection
                   out_ref):                                  # (tgt_len, B, V) f32
    src_len, B, _ = src_emb_ref.shape
    H = enc_wh_ref.shape[0]
    steps = tgtoh_ref.shape[0]            # = tgt_len - 1
    V = dec_wo_ref.shape[1]

    # ---------------- Encoder: recurrence over source tokens (static unroll) ---
    enc_wx = enc_wx_ref[...]
    enc_wh = enc_wh_ref[...]
    enc_b = enc_b_ref[...]

    h = jnp.zeros((B, H), jnp.float32)
    c = jnp.zeros((B, H), jnp.float32)
    for t in range(src_len):              # small, fully unrolled at trace time
        h, c = _lstm_step(src_emb_ref[t], h, c, enc_wx, enc_wh, enc_b)

    # ---------------- Decoder ---------------------------------------------------
    out_ref[0] = jnp.zeros((B, V), jnp.float32)   # outputs[0] stays zero (as in ref)

    dec_emb = dec_emb_ref[...]
    dec_wx = dec_wx_ref[...]
    dec_wh = dec_wh_ref[...]
    dec_b = dec_b_ref[...]
    dec_wo = dec_wo_ref[...]
    dec_bo = dec_bo_ref[...]

    # Hoisted out of the loop (JAX does not CSE broadcast_in_dim).
    lane = jax.lax.broadcasted_iota(jnp.int32, (B, V), 1)

    x_oh = x0_ref[...]                    # (B, V) f32 one_hot(target[0])
    for t in range(steps):                # small, fully unrolled at trace time
        # Embedding lookup as one-hot @ table on the MXU (no in-kernel gather).
        x_emb = jnp.dot(x_oh.astype(jnp.bfloat16), dec_emb,
                        preferred_element_type=jnp.float32)

        h, c = _lstm_step(x_emb, h, c, dec_wx, dec_wh, dec_b)

        # Vocab projection; row i = t+1 of the output.
        logits = (jnp.dot(h.astype(jnp.bfloat16), dec_wo,
                          preferred_element_type=jnp.float32) + dec_bo)
        out_ref[t + 1] = logits

        if t + 1 < steps:                 # last step's next-input is never consumed
            # Greedy one-hot: first index achieving the row max (argmax tie-break).
            m = jnp.max(logits, axis=1, keepdims=True)
            cand = jnp.where(logits == m, lane, V)
            first = jnp.min(cand, axis=1, keepdims=True)
            best_oh = (lane == first).astype(jnp.float32)

            # Teacher-forcing select (coin flipped on host after step i = t+1).
            tf_f = (tf_ref[t + 1] == 1).astype(jnp.float32)   # scalar from SMEM
            x_oh = tf_f * tgtoh_ref[t] + (1.0 - tf_f) * best_oh


# ----------------------------- forward ----------------------------------------

def seq2seq_forward(source, target, tf_flags, params):
    """Mirrors Seq2Seq.forward: returns (target_len, batch, vocab) logits with
    row 0 left as zeros.  tf_flags[i] (i>=1) is the host-side teacher-forcing
    decision taken after decode step i (governs the input of step i+1)."""
    tgt_len, B = target.shape
    V = params["dec_w_out"].shape[1]

    # Encoder embedding lookup on the host side of the kernel; bf16 pre-cast
    # halves its HBM->VMEM DMA and makes it MXU-ready.
    src_emb = jnp.take(params["enc_emb"], source, axis=0).astype(jnp.bfloat16)

    # Decoder inputs as one-hot rows so the embedding lookup is an MXU matmul.
    # Kept f32: the teacher-forcing mix stays in f32 (v5e-safe element-wise math);
    # the only per-step cast is the (B,V) bf16 cast feeding the MXU.
    x0_oh = jax.nn.one_hot(target[0], V, dtype=jnp.float32)          # (B, V)
    tgt_next_oh = jax.nn.one_hot(target[1:], V, dtype=jnp.float32)   # (tgt_len-1, B, V)

    vmem = pl.BlockSpec(memory_space=pltpu.MemorySpace.VMEM)
    smem = pl.BlockSpec(memory_space=pltpu.MemorySpace.SMEM)

    return pl.pallas_call(
        seq2seq_kernel,
        out_shape=jax.ShapeDtypeStruct((tgt_len, B, V), jnp.float32),
        in_specs=[smem] + [vmem] * 12,
        out_specs=vmem,
    )(tf_flags, src_emb, x0_oh, tgt_next_oh,
      params["enc_wx"], params["enc_wh"], params["enc_b"],
      params["dec_emb"], params["dec_wx"], params["dec_wh"], params["dec_b"],
      params["dec_w_out"], params["dec_b_out"])


# ----------------------------- setup / main ------------------------------------

def init_params(key, src_vocab, tgt_vocab, E, H, V):
    ks = jax.random.split(key, 8)
    s = 0.1
    bf = lambda k, shape: (jax.random.normal(k, shape, jnp.float32) * s
                           ).astype(jnp.bfloat16)
    return {
        # MXU operands stored in bf16; biases / f32 encoder-embedding kept in f32.
        "enc_emb":   jax.random.normal(ks[0], (src_vocab, E), jnp.float32) * s,
        "enc_wx":    bf(ks[1], (E, 4 * H)),      # input->gates
        "enc_wh":    bf(ks[2], (H, 4 * H)),      # hidden->gates
        "enc_b":     jnp.zeros((1, 4 * H), jnp.float32),
        "dec_emb":   bf(ks[3], (tgt_vocab, E)),  # (V, E)
        "dec_wx":    bf(ks[4], (E, 4 * H)),
        "dec_wh":    bf(ks[5], (H, 4 * H)),
        "dec_b":     jnp.zeros((1, 4 * H), jnp.float32),
        "dec_w_out": bf(ks[6], (H, V)),
        "dec_b_out": jnp.zeros((1, V), jnp.float32),
    }


if __name__ == "__main__":
    random.seed(0)  # deterministic teacher-forcing coin flips (matches reference RNG use)
    key = jax.random.PRNGKey(0)
    kp, ks_, kt = jax.random.split(key, 3)

    SRC_LEN, TGT_LEN = 8, 8
    BATCH = 8                        # sublane-aligned
    EMB, HID = 128, 128              # lane-aligned -> whole-vreg gate tiles
    SRC_VOCAB, TGT_VOCAB = 128, 128  # reference hard-codes 10004; small here

    params = init_params(kp, SRC_VOCAB, TGT_VOCAB, EMB, HID, TGT_VOCAB)
    source = jax.random.randint(ks_, (SRC_LEN, BATCH), 0, SRC_VOCAB, jnp.int32)
    target = jax.random.randint(kt, (TGT_LEN, BATCH), 0, TGT_VOCAB, jnp.int32)

    # One coin per decode step i = 1..TGT_LEN-1, same stream as the reference:
    # flag[i] == 1  <=>  random.random() < tfr  (use target[i] as next input).
    tfr = 0.5
    tf_flags = jnp.array(
        [0] + [1 if random.random() < tfr else 0 for _ in range(1, TGT_LEN)],
        dtype=jnp.int32)

    forward = jax.jit(seq2seq_forward)
    outputs = jax.block_until_ready(forward(source, target, tf_flags, params))

    assert outputs.shape == (TGT_LEN, BATCH, TGT_VOCAB)
    assert bool(jnp.all(outputs[0] == 0.0))
    assert bool(jnp.all(jnp.isfinite(outputs)))
    print("KERNEL_OK")
</pallas_src>

<mosaic_0001>
module attributes {stable_mosaic.version = 11 : i64} {
  func.func @seq2seq_kernel(%arg0: memref<8xi32, #tpu.memory_space<smem>>, %arg1: memref<8x8x128xbf16, #tpu.memory_space<vmem>>, %arg2: memref<8x128xf32, #tpu.memory_space<vmem>>, %arg3: memref<7x8x128xf32, #tpu.memory_space<vmem>>, %arg4: memref<128x512xbf16, #tpu.memory_space<vmem>>, %arg5: memref<128x512xbf16, #tpu.memory_space<vmem>>, %arg6: memref<1x512xf32, #tpu.memory_space<vmem>>, %arg7: memref<128x128xbf16, #tpu.memory_space<vmem>>, %arg8: memref<128x512xbf16, #tpu.memory_space<vmem>>, %arg9: memref<128x512xbf16, #tpu.memory_space<vmem>>, %arg10: memref<1x512xf32, #tpu.memory_space<vmem>>, %arg11: memref<128x128xbf16, #tpu.memory_space<vmem>>, %arg12: memref<1x128xf32, #tpu.memory_space<vmem>>, %arg13: memref<8x8x128xf32, #tpu.memory_space<vmem>>) attributes {dimension_semantics = [], scalar_prefetch = 0 : i64, scratch_operands = 0 : i64, tpu.core_type = #tpu.core_type<tc>} {
    %c0 = arith.constant 0 : index
    %c0_0 = arith.constant 0 : index
    %0 = vector.load %arg4[%c0, %c0_0] : memref<128x512xbf16, #tpu.memory_space<vmem>>, vector<128x512xbf16>
    %c0_1 = arith.constant 0 : index
    %c0_2 = arith.constant 0 : index
    %1 = vector.load %arg5[%c0_1, %c0_2] : memref<128x512xbf16, #tpu.memory_space<vmem>>, vector<128x512xbf16>
    %c0_3 = arith.constant 0 : index
    %c0_4 = arith.constant 0 : index
    %2 = vector.load %arg6[%c0_3, %c0_4] : memref<1x512xf32, #tpu.memory_space<vmem>>, vector<1x512xf32>
    %cst = arith.constant 0.000000e+00 : f32
    %3 = vector.broadcast %cst : f32 to vector<8x128xf32>
    %cst_5 = arith.constant 0.000000e+00 : f32
    %4 = vector.broadcast %cst_5 : f32 to vector<8x128xf32>
    %c0_6 = arith.constant 0 : index
    %c0_7 = arith.constant 0 : index
    %c0_8 = arith.constant 0 : index
    %5 = vector.load %arg1[%c0_6, %c0_7, %c0_8] : memref<8x8x128xbf16, #tpu.memory_space<vmem>>, vector<1x8x128xbf16>
    %6 = vector.shape_cast %5 : vector<1x8x128xbf16> to vector<8x128xbf16>
    %cst_9 = arith.constant dense<0.000000e+00> : vector<8x512xf32>
    %7 = tpu.matmul %6, %0, %cst_9 {dimension_numbers = #tpu.dot_dimension_numbers<[1], [0], [0], [1], [0, 0, 1, 1], [], []>} : vector<8x128xbf16>, vector<128x512xbf16>, vector<8x512xf32> -> vector<8x512xf32>
    %8 = arith.truncf %3 : vector<8x128xf32> to vector<8x128xbf16>
    %cst_10 = arith.constant dense<0.000000e+00> : vector<8x512xf32>
    %9 = tpu.matmul %8, %1, %cst_10 {dimension_numbers = #tpu.dot_dimension_numbers<[1], [0], [0], [1], [0, 0, 1, 1], [], []>} : vector<8x128xbf16>, vector<128x512xbf16>, vector<8x512xf32> -> vector<8x512xf32>
    %10 = arith.addf %7, %9 : vector<8x512xf32>
    %11 = vector.broadcast %2 : vector<1x512xf32> to vector<8x512xf32>
    %12 = arith.addf %10, %11 : vector<8x512xf32>
    %13 = vector.extract_strided_slice %12 {offsets = [0, 0], sizes = [8, 128], strides = [1, 1]} : vector<8x512xf32> to vector<8x128xf32>
    %14 = arith.negf %13 : vector<8x128xf32>
    %15 = math.exp %14 : vector<8x128xf32>
    %cst_11 = arith.constant 1.000000e+00 : f32
    %16 = vector.broadcast %cst_11 : f32 to vector<8x128xf32>
    %17 = arith.addf %16, %15 : vector<8x128xf32>
    %18 = arith.divf %16, %17 : vector<8x128xf32>
    %19 = vector.extract_strided_slice %12 {offsets = [0, 128], sizes = [8, 128], strides = [1, 1]} : vector<8x512xf32> to vector<8x128xf32>
    %20 = arith.negf %19 : vector<8x128xf32>
    %21 = math.exp %20 : vector<8x128xf32>
    %cst_12 = arith.constant 1.000000e+00 : f32
    %22 = vector.broadcast %cst_12 : f32 to vector<8x128xf32>
    %23 = arith.addf %22, %21 : vector<8x128xf32>
    %24 = arith.divf %22, %23 : vector<8x128xf32>
    %25 = vector.extract_strided_slice %12 {offsets = [0, 256], sizes = [8, 128], strides = [1, 1]} : vector<8x512xf32> to vector<8x128xf32>
    %26 = math.tanh %25 : vector<8x128xf32>
    %27 = vector.extract_strided_slice %12 {offsets = [0, 384], sizes = [8, 128], strides = [1, 1]} : vector<8x512xf32> to vector<8x128xf32>
    %28 = arith.negf %27 : vector<8x128xf32>
    %29 = math.exp %28 : vector<8x128xf32>
    %cst_13 = arith.constant 1.000000e+00 : f32
    %30 = vector.broadcast %cst_13 : f32 to vector<8x128xf32>
    %31 = arith.addf %30, %29 : vector<8x128xf32>
    %32 = arith.divf %30, %31 : vector<8x128xf32>
    %33 = arith.mulf %24, %4 : vector<8x128xf32>
    %34 = arith.mulf %18, %26 : vector<8x128xf32>
    %35 = arith.addf %33, %34 : vector<8x128xf32>
    %36 = math.tanh %35 : vector<8x128xf32>
    %37 = arith.mulf %32, %36 : vector<8x128xf32>
    %c1 = arith.constant 1 : index
    %c0_14 = arith.constant 0 : index
    %c0_15 = arith.constant 0 : index
    %38 = vector.load %arg1[%c1, %c0_14, %c0_15] : memref<8x8x128xbf16, #tpu.memory_space<vmem>>, vector<1x8x128xbf16>
    %39 = vector.shape_cast %38 : vector<1x8x128xbf16> to vector<8x128xbf16>
    %cst_16 = arith.constant dense<0.000000e+00> : vector<8x512xf32>
    %40 = tpu.matmul %39, %0, %cst_16 {dimension_numbers = #tpu.dot_dimension_numbers<[1], [0], [0], [1], [0, 0, 1, 1], [], []>} : vector<8x128xbf16>, vector<128x512xbf16>, vector<8x512xf32> -> vector<8x512xf32>
    %41 = arith.truncf %37 : vector<8x128xf32> to vector<8x128xbf16>
    %cst_17 = arith.constant dense<0.000000e+00> : vector<8x512xf32>
    %42 = tpu.matmul %41, %1, %cst_17 {dimension_numbers = #tpu.dot_dimension_numbers<[1], [0], [0], [1], [0, 0, 1, 1], [], []>} : vector<8x128xbf16>, vector<128x512xbf16>, vector<8x512xf32> -> vector<8x512xf32>
    %43 = arith.addf %40, %42 : vector<8x512xf32>
    %44 = vector.broadcast %2 : vector<1x512xf32> to vector<8x512xf32>
    %45 = arith.addf %43, %44 : vector<8x512xf32>
    %46 = vector.extract_strided_slice %45 {offsets = [0, 0], sizes = [8, 128], strides = [1, 1]} : vector<8x512xf32> to vector<8x128xf32>
    %47 = arith.negf %46 : vector<8x128xf32>
    %48 = math.exp %47 : vector<8x128xf32>
    %cst_18 = arith.constant 1.000000e+00 : f32
    %49 = vector.broadcast %cst_18 : f32 to vector<8x128xf32>
    %50 = arith.addf %49, %48 : vector<8x128xf32>
    %51 = arith.divf %49, %50 : vector<8x128xf32>
    %52 = vector.extract_strided_slice %45 {offsets = [0, 128], sizes = [8, 128], strides = [1, 1]} : vector<8x512xf32> to vector<8x128xf32>
    %53 = arith.negf %52 : vector<8x128xf32>
    %54 = math.exp %53 : vector<8x128xf32>
    %cst_19 = arith.constant 1.000000e+00 : f32
    %55 = vector.broadcast %cst_19 : f32 to vector<8x128xf32>
    %56 = arith.addf %55, %54 : vector<8x128xf32>
    %57 = arith.divf %55, %56 : vector<8x128xf32>
    %58 = vector.extract_strided_slice %45 {offsets = [0, 256], sizes = [8, 128], strides = [1, 1]} : vector<8x512xf32> to vector<8x128xf32>
    %59 = math.tanh %58 : vector<8x128xf32>
    %60 = vector.extract_strided_slice %45 {offsets = [0, 384], sizes = [8, 128], strides = [1, 1]} : vector<8x512xf32> to vector<8x128xf32>
    %61 = arith.negf %60 : vector<8x128xf32>
    %62 = math.exp %61 : vector<8x128xf32>
    %cst_20 = arith.constant 1.000000e+00 : f32
    %63 = vector.broadcast %cst_20 : f32 to vector<8x128xf32>
    %64 = arith.addf %63, %62 : vector<8x128xf32>
    %65 = arith.divf %63, %64 : vector<8x128xf32>
    %66 = arith.mulf %57, %35 : vector<8x128xf32>
    %67 = arith.mulf %51, %59 : vector<8x128xf32>
    %68 = arith.addf %66, %67 : vector<8x128xf32>
    %69 = math.tanh %68 : vector<8x128xf32>
    %70 = arith.mulf %65, %69 : vector<8x128xf32>
    %c2 = arith.constant 2 : index
    %c0_21 = arith.constant 0 : index
    %c0_22 = arith.constant 0 : index
    %71 = vector.load %arg1[%c2, %c0_21, %c0_22] : memref<8x8x128xbf16, #tpu.memory_space<vmem>>, vector<1x8x128xbf16>
    %72 = vector.shape_cast %71 : vector<1x8x128xbf16> to vector<8x128xbf16>
    %cst_23 = arith.constant dense<0.000000e+00> : vector<8x512xf32>
    %73 = tpu.matmul %72, %0, %cst_23 {dimension_numbers = #tpu.dot_dimension_numbers<[1], [0], [0], [1], [0, 0, 1, 1], [], []>} : vector<8x128xbf16>, vector<128x512xbf16>, vector<8x512xf32> -> vector<8x512xf32>
    %74 = arith.truncf %70 : vector<8x128xf32> to vector<8x128xbf16>
    %cst_24 = arith.constant dense<0.000000e+00> : vector<8x512xf32>
    %75 = tpu.matmul %74, %1, %cst_24 {dimension_numbers = #tpu.dot_dimension_numbers<[1], [0], [0], [1], [0, 0, 1, 1], [], []>} : vector<8x128xbf16>, vector<128x512xbf16>, vector<8x512xf32> -> vector<8x512xf32>
    %76 = arith.addf %73, %75 : vector<8x512xf32>
    %77 = vector.broadcast %2 : vector<1x512xf32> to vector<8x512xf32>
    %78 = arith.addf %76, %77 : vector<8x512xf32>
    %79 = vector.extract_strided_slice %78 {offsets = [0, 0], sizes = [8, 128], strides = [1, 1]} : vector<8x512xf32> to vector<8x128xf32>
    %80 = arith.negf %79 : vector<8x128xf32>
    %81 = math.exp %80 : vector<8x128xf32>
    %cst_25 = arith.constant 1.000000e+00 : f32
    %82 = vector.broadcast %cst_25 : f32 to vector<8x128xf32>
    %83 = arith.addf %82, %81 : vector<8x128xf32>
    %84 = arith.divf %82, %83 : vector<8x128xf32>
    %85 = vector.extract_strided_slice %78 {offsets = [0, 128], sizes = [8, 128], strides = [1, 1]} : vector<8x512xf32> to vector<8x128xf32>
    %86 = arith.negf %85 : vector<8x128xf32>
    %87 = math.exp %86 : vector<8x128xf32>
    %cst_26 = arith.constant 1.000000e+00 : f32
    %88 = vector.broadcast %cst_26 : f32 to vector<8x128xf32>
    %89 = arith.addf %88, %87 : vector<8x128xf32>
    %90 = arith.divf %88, %89 : vector<8x128xf32>
    %91 = vector.extract_strided_slice %78 {offsets = [0, 256], sizes = [8, 128], strides = [1, 1]} : vector<8x512xf32> to vector<8x128xf32>
    %92 = math.tanh %91 : vector<8x128xf32>
    %93 = vector.extract_strided_slice %78 {offsets = [0, 384], sizes = [8, 128], strides = [1, 1]} : vector<8x512xf32> to vector<8x128xf32>
    %94 = arith.negf %93 : vector<8x128xf32>
    %95 = math.exp %94 : vector<8x128xf32>
    %cst_27 = arith.constant 1.000000e+00 : f32
    %96 = vector.broadcast %cst_27 : f32 to vector<8x128xf32>
    %97 = arith.addf %96, %95 : vector<8x128xf32>
    %98 = arith.divf %96, %97 : vector<8x128xf32>
    %99 = arith.mulf %90, %68 : vector<8x128xf32>
    %100 = arith.mulf %84, %92 : vector<8x128xf32>
    %101 = arith.addf %99, %100 : vector<8x128xf32>
    %102 = math.tanh %101 : vector<8x128xf32>
    %103 = arith.mulf %98, %102 : vector<8x128xf32>
    %c3 = arith.constant 3 : index
    %c0_28 = arith.constant 0 : index
    %c0_29 = arith.constant 0 : index
    %104 = vector.load %arg1[%c3, %c0_28, %c0_29] : memref<8x8x128xbf16, #tpu.memory_space<vmem>>, vector<1x8x128xbf16>
    %105 = vector.shape_cast %104 : vector<1x8x128xbf16> to vector<8x128xbf16>
    %cst_30 = arith.constant dense<0.000000e+00> : vector<8x512xf32>
    %106 = tpu.matmul %105, %0, %cst_30 {dimension_numbers = #tpu.dot_dimension_numbers<[1], [0], [0], [1], [0, 0, 1, 1], [], []>} : vector<8x128xbf16>, vector<128x512xbf16>, vector<8x512xf32> -> vector<8x512xf32>
    %107 = arith.truncf %103 : vector<8x128xf32> to vector<8x128xbf16>
    %cst_31 = arith.constant dense<0.000000e+00> : vector<8x512xf32>
    %108 = tpu.matmul %107, %1, %cst_31 {dimension_numbers = #tpu.dot_dimension_numbers<[1], [0], [0], [1], [0, 0, 1, 1], [], []>} : vector<8x128xbf16>, vector<128x512xbf16>, vector<8x512xf32> -> vector<8x512xf32>
    %109 = arith.addf %106, %108 : vector<8x512xf32>
    %110 = vector.broadcast %2 : vector<1x512xf32> to vector<8x512xf32>
    %111 = arith.addf %109, %110 : vector<8x512xf32>
    %112 = vector.extract_strided_slice %111 {offsets = [0, 0], sizes = [8, 128], strides = [1, 1]} : vector<8x512xf32> to vector<8x128xf32>
    %113 = arith.negf %112 : vector<8x128xf32>
    %114 = math.exp %113 : vector<8x128xf32>
    %cst_32 = arith.constant 1.000000e+00 : f32
    %115 = vector.broadcast %cst_32 : f32 to vector<8x128xf32>
    %116 = arith.addf %115, %114 : vector<8x128xf32>
    %117 = arith.divf %115, %116 : vector<8x128xf32>
    %118 = vector.extract_strided_slice %111 {offsets = [0, 128], sizes = [8, 128], strides = [1, 1]} : vector<8x512xf32> to vector<8x128xf32>
    %119 = arith.negf %118 : vector<8x128xf32>
    %120 = math.exp %119 : vector<8x128xf32>
    %cst_33 = arith.constant 1.000000e+00 : f32
    %121 = vector.broadcast %cst_33 : f32 to vector<8x128xf32>
    %122 = arith.addf %121, %120 : vector<8x128xf32>
    %123 = arith.divf %121, %122 : vector<8x128xf32>
    %124 = vector.extract_strided_slice %111 {offsets = [0, 256], sizes = [8, 128], strides = [1, 1]} : vector<8x512xf32> to vector<8x128xf32>
    %125 = math.tanh %124 : vector<8x128xf32>
    %126 = vector.extract_strided_slice %111 {offsets = [0, 384], sizes = [8, 128], strides = [1, 1]} : vector<8x512xf32> to vector<8x128xf32>
    %127 = arith.negf %126 : vector<8x128xf32>
    %128 = math.exp %127 : vector<8x128xf32>
    %cst_34 = arith.constant 1.000000e+00 : f32
    %129 = vector.broadcast %cst_34 : f32 to vector<8x128xf32>
    %130 = arith.addf %129, %128 : vector<8x128xf32>
    %131 = arith.divf %129, %130 : vector<8x128xf32>
    %132 = arith.mulf %123, %101 : vector<8x128xf32>
    %133 = arith.mulf %117, %125 : vector<8x128xf32>
    %134 = arith.addf %132, %133 : vector<8x128xf32>
    %135 = math.tanh %134 : vector<8x128xf32>
    %136 = arith.mulf %131, %135 : vector<8x128xf32>
    %c4 = arith.constant 4 : index
    %c0_35 = arith.constant 0 : index
    %c0_36 = arith.constant 0 : index
    %137 = vector.load %arg1[%c4, %c0_35, %c0_36] : memref<8x8x128xbf16, #tpu.memory_space<vmem>>, vector<1x8x128xbf16>
    %138 = vector.shape_cast %137 : vector<1x8x128xbf16> to vector<8x128xbf16>
    %cst_37 = arith.constant dense<0.000000e+00> : vector<8x512xf32>
    %139 = tpu.matmul %138, %0, %cst_37 {dimension_numbers = #tpu.dot_dimension_numbers<[1], [0], [0], [1], [0, 0, 1, 1], [], []>} : vector<8x128xbf16>, vector<128x512xbf16>, vector<8x512xf32> -> vector<8x512xf32>
    %140 = arith.truncf %136 : vector<8x128xf32> to vector<8x128xbf16>
    %cst_38 = arith.constant dense<0.000000e+00> : vector<8x512xf32>
    %141 = tpu.matmul %140, %1, %cst_38 {dimension_numbers = #tpu.dot_dimension_numbers<[1], [0], [0], [1], [0, 0, 1, 1], [], []>} : vector<8x128xbf16>, vector<128x512xbf16>, vector<8x512xf32> -> vector<8x512xf32>
    %142 = arith.addf %139, %141 : vector<8x512xf32>
    %143 = vector.broadcast %2 : vector<1x512xf32> to vector<8x512xf32>
    %144 = arith.addf %142, %143 : vector<8x512xf32>
    %145 = vector.extract_strided_slice %144 {offsets = [0, 0], sizes = [8, 128], strides = [1, 1]} : vector<8x512xf32> to vector<8x128xf32>
    %146 = arith.negf %145 : vector<8x128xf32>
    %147 = math.exp %146 : vector<8x128xf32>
    %cst_39 = arith.constant 1.000000e+00 : f32
    %148 = vector.broadcast %cst_39 : f32 to vector<8x128xf32>
    %149 = arith.addf %148, %147 : vector<8x128xf32>
    %150 = arith.divf %148, %149 : vector<8x128xf32>
    %151 = vector.extract_strided_slice %144 {offsets = [0, 128], sizes = [8, 128], strides = [1, 1]} : vector<8x512xf32> to vector<8x128xf32>
    %152 = arith.negf %151 : vector<8x128xf32>
    %153 = math.exp %152 : vector<8x128xf32>
    %cst_40 = arith.constant 1.000000e+00 : f32
    %154 = vector.broadcast %cst_40 : f32 to vector<8x128xf32>
    %155 = arith.addf %154, %153 : vector<8x128xf32>
    %156 = arith.divf %154, %155 : vector<8x128xf32>
    %157 = vector.extract_strided_slice %144 {offsets = [0, 256], sizes = [8, 128], strides = [1, 1]} : vector<8x512xf32> to vector<8x128xf32>
    %158 = math.tanh %157 : vector<8x128xf32>
    %159 = vector.extract_strided_slice %144 {offsets = [0, 384], sizes = [8, 128], strides = [1, 1]} : vector<8x512xf32> to vector<8x128xf32>
    %160 = arith.negf %159 : vector<8x128xf32>
    %161 = math.exp %160 : vector<8x128xf32>
    %cst_41 = arith.constant 1.000000e+00 : f32
    %162 = vector.broadcast %cst_41 : f32 to vector<8x128xf32>
    %163 = arith.addf %162, %161 : vector<8x128xf32>
    %164 = arith.divf %162, %163 : vector<8x128xf32>
    %165 = arith.mulf %156, %134 : vector<8x128xf32>
    %166 = arith.mulf %150, %158 : vector<8x128xf32>
    %167 = arith.addf %165, %166 : vector<8x128xf32>
    %168 = math.tanh %167 : vector<8x128xf32>
    %169 = arith.mulf %164, %168 : vector<8x128xf32>
    %c5 = arith.constant 5 : index
    %c0_42 = arith.constant 0 : index
    %c0_43 = arith.constant 0 : index
    %170 = vector.load %arg1[%c5, %c0_42, %c0_43] : memref<8x8x128xbf16, #tpu.memory_space<vmem>>, vector<1x8x128xbf16>
    %171 = vector.shape_cast %170 : vector<1x8x128xbf16> to vector<8x128xbf16>
    %cst_44 = arith.constant dense<0.000000e+00> : vector<8x512xf32>
    %172 = tpu.matmul %171, %0, %cst_44 {dimension_numbers = #tpu.dot_dimension_numbers<[1], [0], [0], [1], [0, 0, 1, 1], [], []>} : vector<8x128xbf16>, vector<128x512xbf16>, vector<8x512xf32> -> vector<8x512xf32>
    %173 = arith.truncf %169 : vector<8x128xf32> to vector<8x128xbf16>
    %cst_45 = arith.constant dense<0.000000e+00> : vector<8x512xf32>
    %174 = tpu.matmul %173, %1, %cst_45 {dimension_numbers = #tpu.dot_dimension_numbers<[1], [0], [0], [1], [0, 0, 1, 1], [], []>} : vector<8x128xbf16>, vector<128x512xbf16>, vector<8x512xf32> -> vector<8x512xf32>
    %175 = arith.addf %172, %174 : vector<8x512xf32>
    %176 = vector.broadcast %2 : vector<1x512xf32> to vector<8x512xf32>
    %177 = arith.addf %175, %176 : vector<8x512xf32>
    %178 = vector.extract_strided_slice %177 {offsets = [0, 0], sizes = [8, 128], strides = [1, 1]} : vector<8x512xf32> to vector<8x128xf32>
    %179 = arith.negf %178 : vector<8x128xf32>
    %180 = math.exp %179 : vector<8x128xf32>
    %cst_46 = arith.constant 1.000000e+00 : f32
    %181 = vector.broadcast %cst_46 : f32 to vector<8x128xf32>
    %182 = arith.addf %181, %180 : vector<8x128xf32>
    %183 = arith.divf %181, %182 : vector<8x128xf32>
    %184 = vector.extract_strided_slice %177 {offsets = [0, 128], sizes = [8, 128], strides = [1, 1]} : vector<8x512xf32> to vector<8x128xf32>
    %185 = arith.negf %184 : vector<8x128xf32>
    %186 = math.exp %185 : vector<8x128xf32>
    %cst_47 = arith.constant 1.000000e+00 : f32
    %187 = vector.broadcast %cst_47 : f32 to vector<8x128xf32>
    %188 = arith.addf %187, %186 : vector<8x128xf32>
    %189 = arith.divf %187, %188 : vector<8x128xf32>
    %190 = vector.extract_strided_slice %177 {offsets = [0, 256], sizes = [8, 128], strides = [1, 1]} : vector<8x512xf32> to vector<8x128xf32>
    %191 = math.tanh %190 : vector<8x128xf32>
    %192 = vector.extract_strided_slice %177 {offsets = [0, 384], sizes = [8, 128], strides = [1, 1]} : vector<8x512xf32> to vector<8x128xf32>
    %193 = arith.negf %192 : vector<8x128xf32>
    %194 = math.exp %193 : vector<8x128xf32>
    %cst_48 = arith.constant 1.000000e+00 : f32
    %195 = vector.broadcast %cst_48 : f32 to vector<8x128xf32>
    %196 = arith.addf %195, %194 : vector<8x128xf32>
    %197 = arith.divf %195, %196 : vector<8x128xf32>
    %198 = arith.mulf %189, %167 : vector<8x128xf32>
    %199 = arith.mulf %183, %191 : vector<8x128xf32>
    %200 = arith.addf %198, %199 : vector<8x128xf32>
    %201 = math.tanh %200 : vector<8x128xf32>
    %202 = arith.mulf %197, %201 : vector<8x128xf32>
    %c6 = arith.constant 6 : index
    %c0_49 = arith.constant 0 : index
    %c0_50 = arith.constant 0 : index
    %203 = vector.load %arg1[%c6, %c0_49, %c0_50] : memref<8x8x128xbf16, #tpu.memory_space<vmem>>, vector<1x8x128xbf16>
    %204 = vector.shape_cast %203 : vector<1x8x128xbf16> to vector<8x128xbf16>
    %cst_51 = arith.constant dense<0.000000e+00> : vector<8x512xf32>
    %205 = tpu.matmul %204, %0, %cst_51 {dimension_numbers = #tpu.dot_dimension_numbers<[1], [0], [0], [1], [0, 0, 1, 1], [], []>} : vector<8x128xbf16>, vector<128x512xbf16>, vector<8x512xf32> -> vector<8x512xf32>
    %206 = arith.truncf %202 : vector<8x128xf32> to vector<8x128xbf16>
    %cst_52 = arith.constant dense<0.000000e+00> : vector<8x512xf32>
    %207 = tpu.matmul %206, %1, %cst_52 {dimension_numbers = #tpu.dot_dimension_numbers<[1], [0], [0], [1], [0, 0, 1, 1], [], []>} : vector<8x128xbf16>, vector<128x512xbf16>, vector<8x512xf32> -> vector<8x512xf32>
    %208 = arith.addf %205, %207 : vector<8x512xf32>
    %209 = vector.broadcast %2 : vector<1x512xf32> to vector<8x512xf32>
    %210 = arith.addf %208, %209 : vector<8x512xf32>
    %211 = vector.extract_strided_slice %210 {offsets = [0, 0], sizes = [8, 128], strides = [1, 1]} : vector<8x512xf32> to vector<8x128xf32>
    %212 = arith.negf %211 : vector<8x128xf32>
    %213 = math.exp %212 : vector<8x128xf32>
    %cst_53 = arith.constant 1.000000e+00 : f32
    %214 = vector.broadcast %cst_53 : f32 to vector<8x128xf32>
    %215 = arith.addf %214, %213 : vector<8x128xf32>
    %216 = arith.divf %214, %215 : vector<8x128xf32>
    %217 = vector.extract_strided_slice %210 {offsets = [0, 128], sizes = [8, 128], strides = [1, 1]} : vector<8x512xf32> to vector<8x128xf32>
    %218 = arith.negf %217 : vector<8x128xf32>
    %219 = math.exp %218 : vector<8x128xf32>
    %cst_54 = arith.constant 1.000000e+00 : f32
    %220 = vector.broadcast %cst_54 : f32 to vector<8x128xf32>
    %221 = arith.addf %220, %219 : vector<8x128xf32>
    %222 = arith.divf %220, %221 : vector<8x128xf32>
    %223 = vector.extract_strided_slice %210 {offsets = [0, 256], sizes = [8, 128], strides = [1, 1]} : vector<8x512xf32> to vector<8x128xf32>
    %224 = math.tanh %223 : vector<8x128xf32>
    %225 = vector.extract_strided_slice %210 {offsets = [0, 384], sizes = [8, 128], strides = [1, 1]} : vector<8x512xf32> to vector<8x128xf32>
    %226 = arith.negf %225 : vector<8x128xf32>
    %227 = math.exp %226 : vector<8x128xf32>
    %cst_55 = arith.constant 1.000000e+00 : f32
    %228 = vector.broadcast %cst_55 : f32 to vector<8x128xf32>
    %229 = arith.addf %228, %227 : vector<8x128xf32>
    %230 = arith.divf %228, %229 : vector<8x128xf32>
    %231 = arith.mulf %222, %200 : vector<8x128xf32>
    %232 = arith.mulf %216, %224 : vector<8x128xf32>
    %233 = arith.addf %231, %232 : vector<8x128xf32>
    %234 = math.tanh %233 : vector<8x128xf32>
    %235 = arith.mulf %230, %234 : vector<8x128xf32>
    %c7 = arith.constant 7 : index
    %c0_56 = arith.constant 0 : index
    %c0_57 = arith.constant 0 : index
    %236 = vector.load %arg1[%c7, %c0_56, %c0_57] : memref<8x8x128xbf16, #tpu.memory_space<vmem>>, vector<1x8x128xbf16>
    %237 = vector.shape_cast %236 : vector<1x8x128xbf16> to vector<8x128xbf16>
    %cst_58 = arith.constant dense<0.000000e+00> : vector<8x512xf32>
    %238 = tpu.matmul %237, %0, %cst_58 {dimension_numbers = #tpu.dot_dimension_numbers<[1], [0], [0], [1], [0, 0, 1, 1], [], []>} : vector<8x128xbf16>, vector<128x512xbf16>, vector<8x512xf32> -> vector<8x512xf32>
    %239 = arith.truncf %235 : vector<8x128xf32> to vector<8x128xbf16>
    %cst_59 = arith.constant dense<0.000000e+00> : vector<8x512xf32>
    %240 = tpu.matmul %239, %1, %cst_59 {dimension_numbers = #tpu.dot_dimension_numbers<[1], [0], [0], [1], [0, 0, 1, 1], [], []>} : vector<8x128xbf16>, vector<128x512xbf16>, vector<8x512xf32> -> vector<8x512xf32>
    %241 = arith.addf %238, %240 : vector<8x512xf32>
    %242 = vector.broadcast %2 : vector<1x512xf32> to vector<8x512xf32>
    %243 = arith.addf %241, %242 : vector<8x512xf32>
    %244 = vector.extract_strided_slice %243 {offsets = [0, 0], sizes = [8, 128], strides = [1, 1]} : vector<8x512xf32> to vector<8x128xf32>
    %245 = arith.negf %244 : vector<8x128xf32>
    %246 = math.exp %245 : vector<8x128xf32>
    %cst_60 = arith.constant 1.000000e+00 : f32
    %247 = vector.broadcast %cst_60 : f32 to vector<8x128xf32>
    %248 = arith.addf %247, %246 : vector<8x128xf32>
    %249 = arith.divf %247, %248 : vector<8x128xf32>
    %250 = vector.extract_strided_slice %243 {offsets = [0, 128], sizes = [8, 128], strides = [1, 1]} : vector<8x512xf32> to vector<8x128xf32>
    %251 = arith.negf %250 : vector<8x128xf32>
    %252 = math.exp %251 : vector<8x128xf32>
    %cst_61 = arith.constant 1.000000e+00 : f32
    %253 = vector.broadcast %cst_61 : f32 to vector<8x128xf32>
    %254 = arith.addf %253, %252 : vector<8x128xf32>
    %255 = arith.divf %253, %254 : vector<8x128xf32>
    %256 = vector.extract_strided_slice %243 {offsets = [0, 256], sizes = [8, 128], strides = [1, 1]} : vector<8x512xf32> to vector<8x128xf32>
    %257 = math.tanh %256 : vector<8x128xf32>
    %258 = vector.extract_strided_slice %243 {offsets = [0, 384], sizes = [8, 128], strides = [1, 1]} : vector<8x512xf32> to vector<8x128xf32>
    %259 = arith.negf %258 : vector<8x128xf32>
    %260 = math.exp %259 : vector<8x128xf32>
    %cst_62 = arith.constant 1.000000e+00 : f32
    %261 = vector.broadcast %cst_62 : f32 to vector<8x128xf32>
    %262 = arith.addf %261, %260 : vector<8x128xf32>
    %263 = arith.divf %261, %262 : vector<8x128xf32>
    %264 = arith.mulf %255, %233 : vector<8x128xf32>
    %265 = arith.mulf %249, %257 : vector<8x128xf32>
    %266 = arith.addf %264, %265 : vector<8x128xf32>
    %267 = math.tanh %266 : vector<8x128xf32>
    %268 = arith.mulf %263, %267 : vector<8x128xf32>
    %cst_63 = arith.constant 0.000000e+00 : f32
    %269 = vector.broadcast %cst_63 : f32 to vector<8x128xf32>
    %c0_64 = arith.constant 0 : index
    %c0_65 = arith.constant 0 : index
    %c0_66 = arith.constant 0 : index
    %270 = vector.load %arg13[%c0_64, %c0_65, %c0_66] : memref<8x8x128xf32, #tpu.memory_space<vmem>>, vector<1x8x128xf32>
    %271 = vector.shape_cast %270 : vector<1x8x128xf32> to vector<8x128xf32>
    %272 = vector.shape_cast %269 : vector<8x128xf32> to vector<1x8x128xf32>
    tpu.vector_store %arg13[%c0_64, %c0_65, %c0_66], %272 {strides = array<i32>} : memref<8x8x128xf32, #tpu.memory_space<vmem>>, vector<1x8x128xf32>,
    %c0_67 = arith.constant 0 : index
    %c0_68 = arith.constant 0 : index
    %273 = vector.load %arg7[%c0_67, %c0_68] : memref<128x128xbf16, #tpu.memory_space<vmem>>, vector<128x128xbf16>
    %c0_69 = arith.constant 0 : index
    %c0_70 = arith.constant 0 : index
    %274 = vector.load %arg8[%c0_69, %c0_70] : memref<128x512xbf16, #tpu.memory_space<vmem>>, vector<128x512xbf16>
    %c0_71 = arith.constant 0 : index
    %c0_72 = arith.constant 0 : index
    %275 = vector.load %arg9[%c0_71, %c0_72] : memref<128x512xbf16, #tpu.memory_space<vmem>>, vector<128x512xbf16>
    %c0_73 = arith.constant 0 : index
    %c0_74 = arith.constant 0 : index
    %276 = vector.load %arg10[%c0_73, %c0_74] : memref<1x512xf32, #tpu.memory_space<vmem>>, vector<1x512xf32>
    %c0_75 = arith.constant 0 : index
    %c0_76 = arith.constant 0 : index
    %277 = vector.load %arg11[%c0_75, %c0_76] : memref<128x128xbf16, #tpu.memory_space<vmem>>, vector<128x128xbf16>
    %c0_77 = arith.constant 0 : index
    %c0_78 = arith.constant 0 : index
    %278 = vector.load %arg12[%c0_77, %c0_78] : memref<1x128xf32, #tpu.memory_space<vmem>>, vector<1x128xf32>
    %279 = tpu.iota {dimensions = array<i32: 1>} : vector<8x128xi32>
    %c0_79 = arith.constant 0 : index
    %c0_80 = arith.constant 0 : index
    %280 = vector.load %arg2[%c0_79, %c0_80] : memref<8x128xf32, #tpu.memory_space<vmem>>, vector<8x128xf32>
    %281 = arith.truncf %280 : vector<8x128xf32> to vector<8x128xbf16>
    %cst_81 = arith.constant dense<0.000000e+00> : vector<8x128xf32>
    %282 = tpu.matmul %281, %273, %cst_81 {dimension_numbers = #tpu.dot_dimension_numbers<[1], [0], [0], [1], [0, 0, 1, 1], [], []>} : vector<8x128xbf16>, vector<128x128xbf16>, vector<8x128xf32> -> vector<8x128xf32>
    %283 = arith.truncf %282 : vector<8x128xf32> to vector<8x128xbf16>
    %cst_82 = arith.constant dense<0.000000e+00> : vector<8x512xf32>
    %284 = tpu.matmul %283, %274, %cst_82 {dimension_numbers = #tpu.dot_dimension_numbers<[1], [0], [0], [1], [0, 0, 1, 1], [], []>} : vector<8x128xbf16>, vector<128x512xbf16>, vector<8x512xf32> -> vector<8x512xf32>
    %285 = arith.truncf %268 : vector<8x128xf32> to vector<8x128xbf16>
    %cst_83 = arith.constant dense<0.000000e+00> : vector<8x512xf32>
    %286 = tpu.matmul %285, %275, %cst_83 {dimension_numbers = #tpu.dot_dimension_numbers<[1], [0], [0], [1], [0, 0, 1, 1], [], []>} : vector<8x128xbf16>, vector<128x512xbf16>, vector<8x512xf32> -> vector<8x512xf32>
    %287 = arith.addf %284, %286 : vector<8x512xf32>
    %288 = vector.broadcast %276 : vector<1x512xf32> to vector<8x512xf32>
    %289 = arith.addf %287, %288 : vector<8x512xf32>
    %290 = vector.extract_strided_slice %289 {offsets = [0, 0], sizes = [8, 128], strides = [1, 1]} : vector<8x512xf32> to vector<8x128xf32>
    %291 = arith.negf %290 : vector<8x128xf32>
    %292 = math.exp %291 : vector<8x128xf32>
    %cst_84 = arith.constant 1.000000e+00 : f32
    %293 = vector.broadcast %cst_84 : f32 to vector<8x128xf32>
    %294 = arith.addf %293, %292 : vector<8x128xf32>
    %295 = arith.divf %293, %294 : vector<8x128xf32>
    %296 = vector.extract_strided_slice %289 {offsets = [0, 128], sizes = [8, 128], strides = [1, 1]} : vector<8x512xf32> to vector<8x128xf32>
    %297 = arith.negf %296 : vector<8x128xf32>
    %298 = math.exp %297 : vector<8x128xf32>
    %cst_85 = arith.constant 1.000000e+00 : f32
    %299 = vector.broadcast %cst_85 : f32 to vector<8x128xf32>
    %300 = arith.addf %299, %298 : vector<8x128xf32>
    %301 = arith.divf %299, %300 : vector<8x128xf32>
    %302 = vector.extract_strided_slice %289 {offsets = [0, 256], sizes = [8, 128], strides = [1, 1]} : vector<8x512xf32> to vector<8x128xf32>
    %303 = math.tanh %302 : vector<8x128xf32>
    %304 = vector.extract_strided_slice %289 {offsets = [0, 384], sizes = [8, 128], strides = [1, 1]} : vector<8x512xf32> to vector<8x128xf32>
    %305 = arith.negf %304 : vector<8x128xf32>
    %306 = math.exp %305 : vector<8x128xf32>
    %cst_86 = arith.constant 1.000000e+00 : f32
    %307 = vector.broadcast %cst_86 : f32 to vector<8x128xf32>
    %308 = arith.addf %307, %306 : vector<8x128xf32>
    %309 = arith.divf %307, %308 : vector<8x128xf32>
    %310 = arith.mulf %301, %266 : vector<8x128xf32>
    %311 = arith.mulf %295, %303 : vector<8x128xf32>
    %312 = arith.addf %310, %311 : vector<8x128xf32>
    %313 = math.tanh %312 : vector<8x128xf32>
    %314 = arith.mulf %309, %313 : vector<8x128xf32>
    %315 = arith.truncf %314 : vector<8x128xf32> to vector<8x128xbf16>
    %cst_87 = arith.constant dense<0.000000e+00> : vector<8x128xf32>
    %316 = tpu.matmul %315, %277, %cst_87 {dimension_numbers = #tpu.dot_dimension_numbers<[1], [0], [0], [1], [0, 0, 1, 1], [], []>} : vector<8x128xbf16>, vector<128x128xbf16>, vector<8x128xf32> -> vector<8x128xf32>
    %317 = vector.broadcast %278 : vector<1x128xf32> to vector<8x128xf32>
    %318 = arith.addf %316, %317 : vector<8x128xf32>
    %c1_88 = arith.constant 1 : index
    %c0_89 = arith.constant 0 : index
    %c0_90 = arith.constant 0 : index
    %319 = vector.load %arg13[%c1_88, %c0_89, %c0_90] : memref<8x8x128xf32, #tpu.memory_space<vmem>>, vector<1x8x128xf32>
    %320 = vector.shape_cast %319 : vector<1x8x128xf32> to vector<8x128xf32>
    %321 = vector.shape_cast %318 : vector<8x128xf32> to vector<1x8x128xf32>
    tpu.vector_store %arg13[%c1_88, %c0_89, %c0_90], %321 {strides = array<i32>} : memref<8x8x128xf32, #tpu.memory_space<vmem>>, vector<1x8x128xf32>,
    %cst_91 = arith.constant dense<0xFF800000> : vector<8xf32>
    %322 = vector.multi_reduction <maximumf>, %318, %cst_91 [1] : vector<8x128xf32> to vector<8xf32>
    %323 = vector.shape_cast %322 : vector<8xf32> to vector<8x1xf32>
    %324 = vector.broadcast %323 : vector<8x1xf32> to vector<8x128xf32>
    %325 = arith.cmpf oeq, %318, %324 : vector<8x128xf32>
    %c128_i32 = arith.constant 128 : i32
    %326 = vector.broadcast %c128_i32 : i32 to vector<8x128xi32>
    %327 = arith.select %325, %279, %326 : vector<8x128xi1>, vector<8x128xi32>
    %cst_92 = arith.constant dense<2147483647> : vector<8xi32>
    %328 = vector.multi_reduction <minsi>, %327, %cst_92 [1] : vector<8x128xi32> to vector<8xi32>
    %329 = vector.shape_cast %328 : vector<8xi32> to vector<8x1xi32>
    %330 = vector.broadcast %329 : vector<8x1xi32> to vector<8x128xi32>
    %331 = arith.cmpi eq, %279, %330 : vector<8x128xi32>
    %332 = arith.extui %331 : vector<8x128xi1> to vector<8x128xi32>
    %333 = arith.sitofp %332 : vector<8x128xi32> to vector<8x128xf32>
    %c1_93 = arith.constant 1 : index
    %334 = memref.load %arg0[%c1_93] : memref<8xi32, #tpu.memory_space<smem>>
    %c1_i32 = arith.constant 1 : i32
    %335 = arith.cmpi eq, %334, %c1_i32 : i32
    %336 = arith.extui %335 : i1 to i32
    %337 = arith.sitofp %336 : i32 to f32
    %c0_94 = arith.constant 0 : index
    %c0_95 = arith.constant 0 : index
    %c0_96 = arith.constant 0 : index
    %338 = vector.load %arg3[%c0_94, %c0_95, %c0_96] : memref<7x8x128xf32, #tpu.memory_space<vmem>>, vector<1x8x128xf32>
    %339 = vector.shape_cast %338 : vector<1x8x128xf32> to vector<8x128xf32>
    %340 = vector.broadcast %337 : f32 to vector<8x128xf32>
    %341 = arith.mulf %340, %339 : vector<8x128xf32>
    %cst_97 = arith.constant 1.000000e+00 : f32
    %342 = arith.subf %cst_97, %337 : f32
    %343 = vector.broadcast %342 : f32 to vector<8x128xf32>
    %344 = arith.mulf %343, %333 : vector<8x128xf32>
    %345 = arith.addf %341, %344 : vector<8x128xf32>
    %346 = arith.truncf %345 : vector<8x128xf32> to vector<8x128xbf16>
    %cst_98 = arith.constant dense<0.000000e+00> : vector<8x128xf32>
    %347 = tpu.matmul %346, %273, %cst_98 {dimension_numbers = #tpu.dot_dimension_numbers<[1], [0], [0], [1], [0, 0, 1, 1], [], []>} : vector<8x128xbf16>, vector<128x128xbf16>, vector<8x128xf32> -> vector<8x128xf32>
    %348 = arith.truncf %347 : vector<8x128xf32> to vector<8x128xbf16>
    %cst_99 = arith.constant dense<0.000000e+00> : vector<8x512xf32>
    %349 = tpu.matmul %348, %274, %cst_99 {dimension_numbers = #tpu.dot_dimension_numbers<[1], [0], [0], [1], [0, 0, 1, 1], [], []>} : vector<8x128xbf16>, vector<128x512xbf16>, vector<8x512xf32> -> vector<8x512xf32>
    %350 = arith.truncf %314 : vector<8x128xf32> to vector<8x128xbf16>
    %cst_100 = arith.constant dense<0.000000e+00> : vector<8x512xf32>
    %351 = tpu.matmul %350, %275, %cst_100 {dimension_numbers = #tpu.dot_dimension_numbers<[1], [0], [0], [1], [0, 0, 1, 1], [], []>} : vector<8x128xbf16>, vector<128x512xbf16>, vector<8x512xf32> -> vector<8x512xf32>
    %352 = arith.addf %349, %351 : vector<8x512xf32>
    %353 = vector.broadcast %276 : vector<1x512xf32> to vector<8x512xf32>
    %354 = arith.addf %352, %353 : vector<8x512xf32>
    %355 = vector.extract_strided_slice %354 {offsets = [0, 0], sizes = [8, 128], strides = [1, 1]} : vector<8x512xf32> to vector<8x128xf32>
    %356 = arith.negf %355 : vector<8x128xf32>
    %357 = math.exp %356 : vector<8x128xf32>
    %cst_101 = arith.constant 1.000000e+00 : f32
    %358 = vector.broadcast %cst_101 : f32 to vector<8x128xf32>
    %359 = arith.addf %358, %357 : vector<8x128xf32>
    %360 = arith.divf %358, %359 : vector<8x128xf32>
    %361 = vector.extract_strided_slice %354 {offsets = [0, 128], sizes = [8, 128], strides = [1, 1]} : vector<8x512xf32> to vector<8x128xf32>
    %362 = arith.negf %361 : vector<8x128xf32>
    %363 = math.exp %362 : vector<8x128xf32>
    %cst_102 = arith.constant 1.000000e+00 : f32
    %364 = vector.broadcast %cst_102 : f32 to vector<8x128xf32>
    %365 = arith.addf %364, %363 : vector<8x128xf32>
    %366 = arith.divf %364, %365 : vector<8x128xf32>
    %367 = vector.extract_strided_slice %354 {offsets = [0, 256], sizes = [8, 128], strides = [1, 1]} : vector<8x512xf32> to vector<8x128xf32>
    %368 = math.tanh %367 : vector<8x128xf32>
    %369 = vector.extract_strided_slice %354 {offsets = [0, 384], sizes = [8, 128], strides = [1, 1]} : vector<8x512xf32> to vector<8x128xf32>
    %370 = arith.negf %369 : vector<8x128xf32>
    %371 = math.exp %370 : vector<8x128xf32>
    %cst_103 = arith.constant 1.000000e+00 : f32
    %372 = vector.broadcast %cst_103 : f32 to vector<8x128xf32>
    %373 = arith.addf %372, %371 : vector<8x128xf32>
    %374 = arith.divf %372, %373 : vector<8x128xf32>
    %375 = arith.mulf %366, %312 : vector<8x128xf32>
    %376 = arith.mulf %360, %368 : vector<8x128xf32>
    %377 = arith.addf %375, %376 : vector<8x128xf32>
    %378 = math.tanh %377 : vector<8x128xf32>
    %379 = arith.mulf %374, %378 : vector<8x128xf32>
    %380 = arith.truncf %379 : vector<8x128xf32> to vector<8x128xbf16>
    %cst_104 = arith.constant dense<0.000000e+00> : vector<8x128xf32>
    %381 = tpu.matmul %380, %277, %cst_104 {dimension_numbers = #tpu.dot_dimension_numbers<[1], [0], [0], [1], [0, 0, 1, 1], [], []>} : vector<8x128xbf16>, vector<128x128xbf16>, vector<8x128xf32> -> vector<8x128xf32>
    %382 = vector.broadcast %278 : vector<1x128xf32> to vector<8x128xf32>
    %383 = arith.addf %381, %382 : vector<8x128xf32>
    %c2_105 = arith.constant 2 : index
    %c0_106 = arith.constant 0 : index
    %c0_107 = arith.constant 0 : index
    %384 = vector.load %arg13[%c2_105, %c0_106, %c0_107] : memref<8x8x128xf32, #tpu.memory_space<vmem>>, vector<1x8x128xf32>
    %385 = vector.shape_cast %384 : vector<1x8x128xf32> to vector<8x128xf32>
    %386 = vector.shape_cast %383 : vector<8x128xf32> to vector<1x8x128xf32>
    tpu.vector_store %arg13[%c2_105, %c0_106, %c0_107], %386 {strides = array<i32>} : memref<8x8x128xf32, #tpu.memory_space<vmem>>, vector<1x8x128xf32>,
    %cst_108 = arith.constant dense<0xFF800000> : vector<8xf32>
    %387 = vector.multi_reduction <maximumf>, %383, %cst_108 [1] : vector<8x128xf32> to vector<8xf32>
    %388 = vector.shape_cast %387 : vector<8xf32> to vector<8x1xf32>
    %389 = vector.broadcast %388 : vector<8x1xf32> to vector<8x128xf32>
    %390 = arith.cmpf oeq, %383, %389 : vector<8x128xf32>
    %c128_i32_109 = arith.constant 128 : i32
    %391 = vector.broadcast %c128_i32_109 : i32 to vector<8x128xi32>
    %392 = arith.select %390, %279, %391 : vector<8x128xi1>, vector<8x128xi32>
    %cst_110 = arith.constant dense<2147483647> : vector<8xi32>
    %393 = vector.multi_reduction <minsi>, %392, %cst_110 [1] : vector<8x128xi32> to vector<8xi32>
    %394 = vector.shape_cast %393 : vector<8xi32> to vector<8x1xi32>
    %395 = vector.broadcast %394 : vector<8x1xi32> to vector<8x128xi32>
    %396 = arith.cmpi eq, %279, %395 : vector<8x128xi32>
    %397 = arith.extui %396 : vector<8x128xi1> to vector<8x128xi32>
    %398 = arith.sitofp %397 : vector<8x128xi32> to vector<8x128xf32>
    %c2_111 = arith.constant 2 : index
    %399 = memref.load %arg0[%c2_111] : memref<8xi32, #tpu.memory_space<smem>>
    %c1_i32_112 = arith.constant 1 : i32
    %400 = arith.cmpi eq, %399, %c1_i32_112 : i32
    %401 = arith.extui %400 : i1 to i32
    %402 = arith.sitofp %401 : i32 to f32
    %c1_113 = arith.constant 1 : index
    %c0_114 = arith.constant 0 : index
    %c0_115 = arith.constant 0 : index
    %403 = vector.load %arg3[%c1_113, %c0_114, %c0_115] : memref<7x8x128xf32, #tpu.memory_space<vmem>>, vector<1x8x128xf32>
    %404 = vector.shape_cast %403 : vector<1x8x128xf32> to vector<8x128xf32>
    %405 = vector.broadcast %402 : f32 to vector<8x128xf32>
    %406 = arith.mulf %405, %404 : vector<8x128xf32>
    %cst_116 = arith.constant 1.000000e+00 : f32
    %407 = arith.subf %cst_116, %402 : f32
    %408 = vector.broadcast %407 : f32 to vector<8x128xf32>
    %409 = arith.mulf %408, %398 : vector<8x128xf32>
    %410 = arith.addf %406, %409 : vector<8x128xf32>
    %411 = arith.truncf %410 : vector<8x128xf32> to vector<8x128xbf16>
    %cst_117 = arith.constant dense<0.000000e+00> : vector<8x128xf32>
    %412 = tpu.matmul %411, %273, %cst_117 {dimension_numbers = #tpu.dot_dimension_numbers<[1], [0], [0], [1], [0, 0, 1, 1], [], []>} : vector<8x128xbf16>, vector<128x128xbf16>, vector<8x128xf32> -> vector<8x128xf32>
    %413 = arith.truncf %412 : vector<8x128xf32> to vector<8x128xbf16>
    %cst_118 = arith.constant dense<0.000000e+00> : vector<8x512xf32>
    %414 = tpu.matmul %413, %274, %cst_118 {dimension_numbers = #tpu.dot_dimension_numbers<[1], [0], [0], [1], [0, 0, 1, 1], [], []>} : vector<8x128xbf16>, vector<128x512xbf16>, vector<8x512xf32> -> vector<8x512xf32>
    %415 = arith.truncf %379 : vector<8x128xf32> to vector<8x128xbf16>
    %cst_119 = arith.constant dense<0.000000e+00> : vector<8x512xf32>
    %416 = tpu.matmul %415, %275, %cst_119 {dimension_numbers = #tpu.dot_dimension_numbers<[1], [0], [0], [1], [0, 0, 1, 1], [], []>} : vector<8x128xbf16>, vector<128x512xbf16>, vector<8x512xf32> -> vector<8x512xf32>
    %417 = arith.addf %414, %416 : vector<8x512xf32>
    %418 = vector.broadcast %276 : vector<1x512xf32> to vector<8x512xf32>
    %419 = arith.addf %417, %418 : vector<8x512xf32>
    %420 = vector.extract_strided_slice %419 {offsets = [0, 0], sizes = [8, 128], strides = [1, 1]} : vector<8x512xf32> to vector<8x128xf32>
    %421 = arith.negf %420 : vector<8x128xf32>
    %422 = math.exp %421 : vector<8x128xf32>
    %cst_120 = arith.constant 1.000000e+00 : f32
    %423 = vector.broadcast %cst_120 : f32 to vector<8x128xf32>
    %424 = arith.addf %423, %422 : vector<8x128xf32>
    %425 = arith.divf %423, %424 : vector<8x128xf32>
    %426 = vector.extract_strided_slice %419 {offsets = [0, 128], sizes = [8, 128], strides = [1, 1]} : vector<8x512xf32> to vector<8x128xf32>
    %427 = arith.negf %426 : vector<8x128xf32>
    %428 = math.exp %427 : vector<8x128xf32>
    %cst_121 = arith.constant 1.000000e+00 : f32
    %429 = vector.broadcast %cst_121 : f32 to vector<8x128xf32>
    %430 = arith.addf %429, %428 : vector<8x128xf32>
    %431 = arith.divf %429, %430 : vector<8x128xf32>
    %432 = vector.extract_strided_slice %419 {offsets = [0, 256], sizes = [8, 128], strides = [1, 1]} : vector<8x512xf32> to vector<8x128xf32>
    %433 = math.tanh %432 : vector<8x128xf32>
    %434 = vector.extract_strided_slice %419 {offsets = [0, 384], sizes = [8, 128], strides = [1, 1]} : vector<8x512xf32> to vector<8x128xf32>
    %435 = arith.negf %434 : vector<8x128xf32>
    %436 = math.exp %435 : vector<8x128xf32>
    %cst_122 = arith.constant 1.000000e+00 : f32
    %437 = vector.broadcast %cst_122 : f32 to vector<8x128xf32>
    %438 = arith.addf %437, %436 : vector<8x128xf32>
    %439 = arith.divf %437, %438 : vector<8x128xf32>
    %440 = arith.mulf %431, %377 : vector<8x128xf32>
    %441 = arith.mulf %425, %433 : vector<8x128xf32>
    %442 = arith.addf %440, %441 : vector<8x128xf32>
    %443 = math.tanh %442 : vector<8x128xf32>
    %444 = arith.mulf %439, %443 : vector<8x128xf32>
    %445 = arith.truncf %444 : vector<8x128xf32> to vector<8x128xbf16>
    %cst_123 = arith.constant dense<0.000000e+00> : vector<8x128xf32>
    %446 = tpu.matmul %445, %277, %cst_123 {dimension_numbers = #tpu.dot_dimension_numbers<[1], [0], [0], [1], [0, 0, 1, 1], [], []>} : vector<8x128xbf16>, vector<128x128xbf16>, vector<8x128xf32> -> vector<8x128xf32>
    %447 = vector.broadcast %278 : vector<1x128xf32> to vector<8x128xf32>
    %448 = arith.addf %446, %447 : vector<8x128xf32>
    %c3_124 = arith.constant 3 : index
    %c0_125 = arith.constant 0 : index
    %c0_126 = arith.constant 0 : index
    %449 = vector.load %arg13[%c3_124, %c0_125, %c0_126] : memref<8x8x128xf32, #tpu.memory_space<vmem>>, vector<1x8x128xf32>
    %450 = vector.shape_cast %449 : vector<1x8x128xf32> to vector<8x128xf32>
    %451 = vector.shape_cast %448 : vector<8x128xf32> to vector<1x8x128xf32>
    tpu.vector_store %arg13[%c3_124, %c0_125, %c0_126], %451 {strides = array<i32>} : memref<8x8x128xf32, #tpu.memory_space<vmem>>, vector<1x8x128xf32>,
    %cst_127 = arith.constant dense<0xFF800000> : vector<8xf32>
    %452 = vector.multi_reduction <maximumf>, %448, %cst_127 [1] : vector<8x128xf32> to vector<8xf32>
    %453 = vector.shape_cast %452 : vector<8xf32> to vector<8x1xf32>
    %454 = vector.broadcast %453 : vector<8x1xf32> to vector<8x128xf32>
    %455 = arith.cmpf oeq, %448, %454 : vector<8x128xf32>
    %c128_i32_128 = arith.constant 128 : i32
    %456 = vector.broadcast %c128_i32_128 : i32 to vector<8x128xi32>
    %457 = arith.select %455, %279, %456 : vector<8x128xi1>, vector<8x128xi32>
    %cst_129 = arith.constant dense<2147483647> : vector<8xi32>
    %458 = vector.multi_reduction <minsi>, %457, %cst_129 [1] : vector<8x128xi32> to vector<8xi32>
    %459 = vector.shape_cast %458 : vector<8xi32> to vector<8x1xi32>
    %460 = vector.broadcast %459 : vector<8x1xi32> to vector<8x128xi32>
    %461 = arith.cmpi eq, %279, %460 : vector<8x128xi32>
    %462 = arith.extui %461 : vector<8x128xi1> to vector<8x128xi32>
    %463 = arith.sitofp %462 : vector<8x128xi32> to vector<8x128xf32>
    %c3_130 = arith.constant 3 : index
    %464 = memref.load %arg0[%c3_130] : memref<8xi32, #tpu.memory_space<smem>>
    %c1_i32_131 = arith.constant 1 : i32
    %465 = arith.cmpi eq, %464, %c1_i32_131 : i32
    %466 = arith.extui %465 : i1 to i32
    %467 = arith.sitofp %466 : i32 to f32
    %c2_132 = arith.constant 2 : index
    %c0_133 = arith.constant 0 : index
    %c0_134 = arith.constant 0 : index
    %468 = vector.load %arg3[%c2_132, %c0_133, %c0_134] : memref<7x8x128xf32, #tpu.memory_space<vmem>>, vector<1x8x128xf32>
    %469 = vector.shape_cast %468 : vector<1x8x128xf32> to vector<8x128xf32>
    %470 = vector.broadcast %467 : f32 to vector<8x128xf32>
    %471 = arith.mulf %470, %469 : vector<8x128xf32>
    %cst_135 = arith.constant 1.000000e+00 : f32
    %472 = arith.subf %cst_135, %467 : f32
    %473 = vector.broadcast %472 : f32 to vector<8x128xf32>
    %474 = arith.mulf %473, %463 : vector<8x128xf32>
    %475 = arith.addf %471, %474 : vector<8x128xf32>
    %476 = arith.truncf %475 : vector<8x128xf32> to vector<8x128xbf16>
    %cst_136 = arith.constant dense<0.000000e+00> : vector<8x128xf32>
    %477 = tpu.matmul %476, %273, %cst_136 {dimension_numbers = #tpu.dot_dimension_numbers<[1], [0], [0], [1], [0, 0, 1, 1], [], []>} : vector<8x128xbf16>, vector<128x128xbf16>, vector<8x128xf32> -> vector<8x128xf32>
    %478 = arith.truncf %477 : vector<8x128xf32> to vector<8x128xbf16>
    %cst_137 = arith.constant dense<0.000000e+00> : vector<8x512xf32>
    %479 = tpu.matmul %478, %274, %cst_137 {dimension_numbers = #tpu.dot_dimension_numbers<[1], [0], [0], [1], [0, 0, 1, 1], [], []>} : vector<8x128xbf16>, vector<128x512xbf16>, vector<8x512xf32> -> vector<8x512xf32>
    %480 = arith.truncf %444 : vector<8x128xf32> to vector<8x128xbf16>
    %cst_138 = arith.constant dense<0.000000e+00> : vector<8x512xf32>
    %481 = tpu.matmul %480, %275, %cst_138 {dimension_numbers = #tpu.dot_dimension_numbers<[1], [0], [0], [1], [0, 0, 1, 1], [], []>} : vector<8x128xbf16>, vector<128x512xbf16>, vector<8x512xf32> -> vector<8x512xf32>
    %482 = arith.addf %479, %481 : vector<8x512xf32>
    %483 = vector.broadcast %276 : vector<1x512xf32> to vector<8x512xf32>
    %484 = arith.addf %482, %483 : vector<8x512xf32>
    %485 = vector.extract_strided_slice %484 {offsets = [0, 0], sizes = [8, 128], strides = [1, 1]} : vector<8x512xf32> to vector<8x128xf32>
    %486 = arith.negf %485 : vector<8x128xf32>
    %487 = math.exp %486 : vector<8x128xf32>
    %cst_139 = arith.constant 1.000000e+00 : f32
    %488 = vector.broadcast %cst_139 : f32 to vector<8x128xf32>
    %489 = arith.addf %488, %487 : vector<8x128xf32>
    %490 = arith.divf %488, %489 : vector<8x128xf32>
    %491 = vector.extract_strided_slice %484 {offsets = [0, 128], sizes = [8, 128], strides = [1, 1]} : vector<8x512xf32> to vector<8x128xf32>
    %492 = arith.negf %491 : vector<8x128xf32>
    %493 = math.exp %492 : vector<8x128xf32>
    %cst_140 = arith.constant 1.000000e+00 : f32
    %494 = vector.broadcast %cst_140 : f32 to vector<8x128xf32>
    %495 = arith.addf %494, %493 : vector<8x128xf32>
    %496 = arith.divf %494, %495 : vector<8x128xf32>
    %497 = vector.extract_strided_slice %484 {offsets = [0, 256], sizes = [8, 128], strides = [1, 1]} : vector<8x512xf32> to vector<8x128xf32>
    %498 = math.tanh %497 : vector<8x128xf32>
    %499 = vector.extract_strided_slice %484 {offsets = [0, 384], sizes = [8, 128], strides = [1, 1]} : vector<8x512xf32> to vector<8x128xf32>
    %500 = arith.negf %499 : vector<8x128xf32>
    %501 = math.exp %500 : vector<8x128xf32>
    %cst_141 = arith.constant 1.000000e+00 : f32
    %502 = vector.broadcast %cst_141 : f32 to vector<8x128xf32>
    %503 = arith.addf %502, %501 : vector<8x128xf32>
    %504 = arith.divf %502, %503 : vector<8x128xf32>
    %505 = arith.mulf %496, %442 : vector<8x128xf32>
    %506 = arith.mulf %490, %498 : vector<8x128xf32>
    %507 = arith.addf %505, %506 : vector<8x128xf32>
    %508 = math.tanh %507 : vector<8x128xf32>
    %509 = arith.mulf %504, %508 : vector<8x128xf32>
    %510 = arith.truncf %509 : vector<8x128xf32> to vector<8x128xbf16>
    %cst_142 = arith.constant dense<0.000000e+00> : vector<8x128xf32>
    %511 = tpu.matmul %510, %277, %cst_142 {dimension_numbers = #tpu.dot_dimension_numbers<[1], [0], [0], [1], [0, 0, 1, 1], [], []>} : vector<8x128xbf16>, vector<128x128xbf16>, vector<8x128xf32> -> vector<8x128xf32>
    %512 = vector.broadcast %278 : vector<1x128xf32> to vector<8x128xf32>
    %513 = arith.addf %511, %512 : vector<8x128xf32>
    %c4_143 = arith.constant 4 : index
    %c0_144 = arith.constant 0 : index
    %c0_145 = arith.constant 0 : index
    %514 = vector.load %arg13[%c4_143, %c0_144, %c0_145] : memref<8x8x128xf32, #tpu.memory_space<vmem>>, vector<1x8x128xf32>
    %515 = vector.shape_cast %514 : vector<1x8x128xf32> to vector<8x128xf32>
    %516 = vector.shape_cast %513 : vector<8x128xf32> to vector<1x8x128xf32>
    tpu.vector_store %arg13[%c4_143, %c0_144, %c0_145], %516 {strides = array<i32>} : memref<8x8x128xf32, #tpu.memory_space<vmem>>, vector<1x8x128xf32>,
    %cst_146 = arith.constant dense<0xFF800000> : vector<8xf32>
    %517 = vector.multi_reduction <maximumf>, %513, %cst_146 [1] : vector<8x128xf32> to vector<8xf32>
    %518 = vector.shape_cast %517 : vector<8xf32> to vector<8x1xf32>
    %519 = vector.broadcast %518 : vector<8x1xf32> to vector<8x128xf32>
    %520 = arith.cmpf oeq, %513, %519 : vector<8x128xf32>
    %c128_i32_147 = arith.constant 128 : i32
    %521 = vector.broadcast %c128_i32_147 : i32 to vector<8x128xi32>
    %522 = arith.select %520, %279, %521 : vector<8x128xi1>, vector<8x128xi32>
    %cst_148 = arith.constant dense<2147483647> : vector<8xi32>
    %523 = vector.multi_reduction <minsi>, %522, %cst_148 [1] : vector<8x128xi32> to vector<8xi32>
    %524 = vector.shape_cast %523 : vector<8xi32> to vector<8x1xi32>
    %525 = vector.broadcast %524 : vector<8x1xi32> to vector<8x128xi32>
    %526 = arith.cmpi eq, %279, %525 : vector<8x128xi32>
    %527 = arith.extui %526 : vector<8x128xi1> to vector<8x128xi32>
    %528 = arith.sitofp %527 : vector<8x128xi32> to vector<8x128xf32>
    %c4_149 = arith.constant 4 : index
    %529 = memref.load %arg0[%c4_149] : memref<8xi32, #tpu.memory_space<smem>>
    %c1_i32_150 = arith.constant 1 : i32
    %530 = arith.cmpi eq, %529, %c1_i32_150 : i32
    %531 = arith.extui %530 : i1 to i32
    %532 = arith.sitofp %531 : i32 to f32
    %c3_151 = arith.constant 3 : index
    %c0_152 = arith.constant 0 : index
    %c0_153 = arith.constant 0 : index
    %533 = vector.load %arg3[%c3_151, %c0_152, %c0_153] : memref<7x8x128xf32, #tpu.memory_space<vmem>>, vector<1x8x128xf32>
    %534 = vector.shape_cast %533 : vector<1x8x128xf32> to vector<8x128xf32>
    %535 = vector.broadcast %532 : f32 to vector<8x128xf32>
    %536 = arith.mulf %535, %534 : vector<8x128xf32>
    %cst_154 = arith.constant 1.000000e+00 : f32
    %537 = arith.subf %cst_154, %532 : f32
    %538 = vector.broadcast %537 : f32 to vector<8x128xf32>
    %539 = arith.mulf %538, %528 : vector<8x128xf32>
    %540 = arith.addf %536, %539 : vector<8x128xf32>
    %541 = arith.truncf %540 : vector<8x128xf32> to vector<8x128xbf16>
    %cst_155 = arith.constant dense<0.000000e+00> : vector<8x128xf32>
    %542 = tpu.matmul %541, %273, %cst_155 {dimension_numbers = #tpu.dot_dimension_numbers<[1], [0], [0], [1], [0, 0, 1, 1], [], []>} : vector<8x128xbf16>, vector<128x128xbf16>, vector<8x128xf32> -> vector<8x128xf32>
    %543 = arith.truncf %542 : vector<8x128xf32> to vector<8x128xbf16>
    %cst_156 = arith.constant dense<0.000000e+00> : vector<8x512xf32>
    %544 = tpu.matmul %543, %274, %cst_156 {dimension_numbers = #tpu.dot_dimension_numbers<[1], [0], [0], [1], [0, 0, 1, 1], [], []>} : vector<8x128xbf16>, vector<128x512xbf16>, vector<8x512xf32> -> vector<8x512xf32>
    %545 = arith.truncf %509 : vector<8x128xf32> to vector<8x128xbf16>
    %cst_157 = arith.constant dense<0.000000e+00> : vector<8x512xf32>
    %546 = tpu.matmul %545, %275, %cst_157 {dimension_numbers = #tpu.dot_dimension_numbers<[1], [0], [0], [1], [0, 0, 1, 1], [], []>} : vector<8x128xbf16>, vector<128x512xbf16>, vector<8x512xf32> -> vector<8x512xf32>
    %547 = arith.addf %544, %546 : vector<8x512xf32>
    %548 = vector.broadcast %276 : vector<1x512xf32> to vector<8x512xf32>
    %549 = arith.addf %547, %548 : vector<8x512xf32>
    %550 = vector.extract_strided_slice %549 {offsets = [0, 0], sizes = [8, 128], strides = [1, 1]} : vector<8x512xf32> to vector<8x128xf32>
    %551 = arith.negf %550 : vector<8x128xf32>
    %552 = math.exp %551 : vector<8x128xf32>
    %cst_158 = arith.constant 1.000000e+00 : f32
    %553 = vector.broadcast %cst_158 : f32 to vector<8x128xf32>
    %554 = arith.addf %553, %552 : vector<8x128xf32>
    %555 = arith.divf %553, %554 : vector<8x128xf32>
    %556 = vector.extract_strided_slice %549 {offsets = [0, 128], sizes = [8, 128], strides = [1, 1]} : vector<8x512xf32> to vector<8x128xf32>
    %557 = arith.negf %556 : vector<8x128xf32>
    %558 = math.exp %557 : vector<8x128xf32>
    %cst_159 = arith.constant 1.000000e+00 : f32
    %559 = vector.broadcast %cst_159 : f32 to vector<8x128xf32>
    %560 = arith.addf %559, %558 : vector<8x128xf32>
    %561 = arith.divf %559, %560 : vector<8x128xf32>
    %562 = vector.extract_strided_slice %549 {offsets = [0, 256], sizes = [8, 128], strides = [1, 1]} : vector<8x512xf32> to vector<8x128xf32>
    %563 = math.tanh %562 : vector<8x128xf32>
    %564 = vector.extract_strided_slice %549 {offsets = [0, 384], sizes = [8, 128], strides = [1, 1]} : vector<8x512xf32> to vector<8x128xf32>
    %565 = arith.negf %564 : vector<8x128xf32>
    %566 = math.exp %565 : vector<8x128xf32>
    %cst_160 = arith.constant 1.000000e+00 : f32
    %567 = vector.broadcast %cst_160 : f32 to vector<8x128xf32>
    %568 = arith.addf %567, %566 : vector<8x128xf32>
    %569 = arith.divf %567, %568 : vector<8x128xf32>
    %570 = arith.mulf %561, %507 : vector<8x128xf32>
    %571 = arith.mulf %555, %563 : vector<8x128xf32>
    %572 = arith.addf %570, %571 : vector<8x128xf32>
    %573 = math.tanh %572 : vector<8x128xf32>
    %574 = arith.mulf %569, %573 : vector<8x128xf32>
    %575 = arith.truncf %574 : vector<8x128xf32> to vector<8x128xbf16>
    %cst_161 = arith.constant dense<0.000000e+00> : vector<8x128xf32>
    %576 = tpu.matmul %575, %277, %cst_161 {dimension_numbers = #tpu.dot_dimension_numbers<[1], [0], [0], [1], [0, 0, 1, 1], [], []>} : vector<8x128xbf16>, vector<128x128xbf16>, vector<8x128xf32> -> vector<8x128xf32>
    %577 = vector.broadcast %278 : vector<1x128xf32> to vector<8x128xf32>
    %578 = arith.addf %576, %577 : vector<8x128xf32>
    %c5_162 = arith.constant 5 : index
    %c0_163 = arith.constant 0 : index
    %c0_164 = arith.constant 0 : index
    %579 = vector.load %arg13[%c5_162, %c0_163, %c0_164] : memref<8x8x128xf32, #tpu.memory_space<vmem>>, vector<1x8x128xf32>
    %580 = vector.shape_cast %579 : vector<1x8x128xf32> to vector<8x128xf32>
    %581 = vector.shape_cast %578 : vector<8x128xf32> to vector<1x8x128xf32>
    tpu.vector_store %arg13[%c5_162, %c0_163, %c0_164], %581 {strides = array<i32>} : memref<8x8x128xf32, #tpu.memory_space<vmem>>, vector<1x8x128xf32>,
    %cst_165 = arith.constant dense<0xFF800000> : vector<8xf32>
    %582 = vector.multi_reduction <maximumf>, %578, %cst_165 [1] : vector<8x128xf32> to vector<8xf32>
    %583 = vector.shape_cast %582 : vector<8xf32> to vector<8x1xf32>
    %584 = vector.broadcast %583 : vector<8x1xf32> to vector<8x128xf32>
    %585 = arith.cmpf oeq, %578, %584 : vector<8x128xf32>
    %c128_i32_166 = arith.constant 128 : i32
    %586 = vector.broadcast %c128_i32_166 : i32 to vector<8x128xi32>
    %587 = arith.select %585, %279, %586 : vector<8x128xi1>, vector<8x128xi32>
    %cst_167 = arith.constant dense<2147483647> : vector<8xi32>
    %588 = vector.multi_reduction <minsi>, %587, %cst_167 [1] : vector<8x128xi32> to vector<8xi32>
    %589 = vector.shape_cast %588 : vector<8xi32> to vector<8x1xi32>
    %590 = vector.broadcast %589 : vector<8x1xi32> to vector<8x128xi32>
    %591 = arith.cmpi eq, %279, %590 : vector<8x128xi32>
    %592 = arith.extui %591 : vector<8x128xi1> to vector<8x128xi32>
    %593 = arith.sitofp %592 : vector<8x128xi32> to vector<8x128xf32>
    %c5_168 = arith.constant 5 : index
    %594 = memref.load %arg0[%c5_168] : memref<8xi32, #tpu.memory_space<smem>>
    %c1_i32_169 = arith.constant 1 : i32
    %595 = arith.cmpi eq, %594, %c1_i32_169 : i32
    %596 = arith.extui %595 : i1 to i32
    %597 = arith.sitofp %596 : i32 to f32
    %c4_170 = arith.constant 4 : index
    %c0_171 = arith.constant 0 : index
    %c0_172 = arith.constant 0 : index
    %598 = vector.load %arg3[%c4_170, %c0_171, %c0_172] : memref<7x8x128xf32, #tpu.memory_space<vmem>>, vector<1x8x128xf32>
    %599 = vector.shape_cast %598 : vector<1x8x128xf32> to vector<8x128xf32>
    %600 = vector.broadcast %597 : f32 to vector<8x128xf32>
    %601 = arith.mulf %600, %599 : vector<8x128xf32>
    %cst_173 = arith.constant 1.000000e+00 : f32
    %602 = arith.subf %cst_173, %597 : f32
    %603 = vector.broadcast %602 : f32 to vector<8x128xf32>
    %604 = arith.mulf %603, %593 : vector<8x128xf32>
    %605 = arith.addf %601, %604 : vector<8x128xf32>
    %606 = arith.truncf %605 : vector<8x128xf32> to vector<8x128xbf16>
    %cst_174 = arith.constant dense<0.000000e+00> : vector<8x128xf32>
    %607 = tpu.matmul %606, %273, %cst_174 {dimension_numbers = #tpu.dot_dimension_numbers<[1], [0], [0], [1], [0, 0, 1, 1], [], []>} : vector<8x128xbf16>, vector<128x128xbf16>, vector<8x128xf32> -> vector<8x128xf32>
    %608 = arith.truncf %607 : vector<8x128xf32> to vector<8x128xbf16>
    %cst_175 = arith.constant dense<0.000000e+00> : vector<8x512xf32>
    %609 = tpu.matmul %608, %274, %cst_175 {dimension_numbers = #tpu.dot_dimension_numbers<[1], [0], [0], [1], [0, 0, 1, 1], [], []>} : vector<8x128xbf16>, vector<128x512xbf16>, vector<8x512xf32> -> vector<8x512xf32>
    %610 = arith.truncf %574 : vector<8x128xf32> to vector<8x128xbf16>
    %cst_176 = arith.constant dense<0.000000e+00> : vector<8x512xf32>
    %611 = tpu.matmul %610, %275, %cst_176 {dimension_numbers = #tpu.dot_dimension_numbers<[1], [0], [0], [1], [0, 0, 1, 1], [], []>} : vector<8x128xbf16>, vector<128x512xbf16>, vector<8x512xf32> -> vector<8x512xf32>
    %612 = arith.addf %609, %611 : vector<8x512xf32>
    %613 = vector.broadcast %276 : vector<1x512xf32> to vector<8x512xf32>
    %614 = arith.addf %612, %613 : vector<8x512xf32>
    %615 = vector.extract_strided_slice %614 {offsets = [0, 0], sizes = [8, 128], strides = [1, 1]} : vector<8x512xf32> to vector<8x128xf32>
    %616 = arith.negf %615 : vector<8x128xf32>
    %617 = math.exp %616 : vector<8x128xf32>
    %cst_177 = arith.constant 1.000000e+00 : f32
    %618 = vector.broadcast %cst_177 : f32 to vector<8x128xf32>
    %619 = arith.addf %618, %617 : vector<8x128xf32>
    %620 = arith.divf %618, %619 : vector<8x128xf32>
    %621 = vector.extract_strided_slice %614 {offsets = [0, 128], sizes = [8, 128], strides = [1, 1]} : vector<8x512xf32> to vector<8x128xf32>
    %622 = arith.negf %621 : vector<8x128xf32>
    %623 = math.exp %622 : vector<8x128xf32>
    %cst_178 = arith.constant 1.000000e+00 : f32
    %624 = vector.broadcast %cst_178 : f32 to vector<8x128xf32>
    %625 = arith.addf %624, %623 : vector<8x128xf32>
    %626 = arith.divf %624, %625 : vector<8x128xf32>
    %627 = vector.extract_strided_slice %614 {offsets = [0, 256], sizes = [8, 128], strides = [1, 1]} : vector<8x512xf32> to vector<8x128xf32>
    %628 = math.tanh %627 : vector<8x128xf32>
    %629 = vector.extract_strided_slice %614 {offsets = [0, 384], sizes = [8, 128], strides = [1, 1]} : vector<8x512xf32> to vector<8x128xf32>
    %630 = arith.negf %629 : vector<8x128xf32>
    %631 = math.exp %630 : vector<8x128xf32>
    %cst_179 = arith.constant 1.000000e+00 : f32
    %632 = vector.broadcast %cst_179 : f32 to vector<8x128xf32>
    %633 = arith.addf %632, %631 : vector<8x128xf32>
    %634 = arith.divf %632, %633 : vector<8x128xf32>
    %635 = arith.mulf %626, %572 : vector<8x128xf32>
    %636 = arith.mulf %620, %628 : vector<8x128xf32>
    %637 = arith.addf %635, %636 : vector<8x128xf32>
    %638 = math.tanh %637 : vector<8x128xf32>
    %639 = arith.mulf %634, %638 : vector<8x128xf32>
    %640 = arith.truncf %639 : vector<8x128xf32> to vector<8x128xbf16>
    %cst_180 = arith.constant dense<0.000000e+00> : vector<8x128xf32>
    %641 = tpu.matmul %640, %277, %cst_180 {dimension_numbers = #tpu.dot_dimension_numbers<[1], [0], [0], [1], [0, 0, 1, 1], [], []>} : vector<8x128xbf16>, vector<128x128xbf16>, vector<8x128xf32> -> vector<8x128xf32>
    %642 = vector.broadcast %278 : vector<1x128xf32> to vector<8x128xf32>
    %643 = arith.addf %641, %642 : vector<8x128xf32>
    %c6_181 = arith.constant 6 : index
    %c0_182 = arith.constant 0 : index
    %c0_183 = arith.constant 0 : index
    %644 = vector.load %arg13[%c6_181, %c0_182, %c0_183] : memref<8x8x128xf32, #tpu.memory_space<vmem>>, vector<1x8x128xf32>
    %645 = vector.shape_cast %644 : vector<1x8x128xf32> to vector<8x128xf32>
    %646 = vector.shape_cast %643 : vector<8x128xf32> to vector<1x8x128xf32>
    tpu.vector_store %arg13[%c6_181, %c0_182, %c0_183], %646 {strides = array<i32>} : memref<8x8x128xf32, #tpu.memory_space<vmem>>, vector<1x8x128xf32>,
    %cst_184 = arith.constant dense<0xFF800000> : vector<8xf32>
    %647 = vector.multi_reduction <maximumf>, %643, %cst_184 [1] : vector<8x128xf32> to vector<8xf32>
    %648 = vector.shape_cast %647 : vector<8xf32> to vector<8x1xf32>
    %649 = vector.broadcast %648 : vector<8x1xf32> to vector<8x128xf32>
    %650 = arith.cmpf oeq, %643, %649 : vector<8x128xf32>
    %c128_i32_185 = arith.constant 128 : i32
    %651 = vector.broadcast %c128_i32_185 : i32 to vector<8x128xi32>
    %652 = arith.select %650, %279, %651 : vector<8x128xi1>, vector<8x128xi32>
    %cst_186 = arith.constant dense<2147483647> : vector<8xi32>
    %653 = vector.multi_reduction <minsi>, %652, %cst_186 [1] : vector<8x128xi32> to vector<8xi32>
    %654 = vector.shape_cast %653 : vector<8xi32> to vector<8x1xi32>
    %655 = vector.broadcast %654 : vector<8x1xi32> to vector<8x128xi32>
    %656 = arith.cmpi eq, %279, %655 : vector<8x128xi32>
    %657 = arith.extui %656 : vector<8x128xi1> to vector<8x128xi32>
    %658 = arith.sitofp %657 : vector<8x128xi32> to vector<8x128xf32>
    %c6_187 = arith.constant 6 : index
    %659 = memref.load %arg0[%c6_187] : memref<8xi32, #tpu.memory_space<smem>>
    %c1_i32_188 = arith.constant 1 : i32
    %660 = arith.cmpi eq, %659, %c1_i32_188 : i32
    %661 = arith.extui %660 : i1 to i32
    %662 = arith.sitofp %661 : i32 to f32
    %c5_189 = arith.constant 5 : index
    %c0_190 = arith.constant 0 : index
    %c0_191 = arith.constant 0 : index
    %663 = vector.load %arg3[%c5_189, %c0_190, %c0_191] : memref<7x8x128xf32, #tpu.memory_space<vmem>>, vector<1x8x128xf32>
    %664 = vector.shape_cast %663 : vector<1x8x128xf32> to vector<8x128xf32>
    %665 = vector.broadcast %662 : f32 to vector<8x128xf32>
    %666 = arith.mulf %665, %664 : vector<8x128xf32>
    %cst_192 = arith.constant 1.000000e+00 : f32
    %667 = arith.subf %cst_192, %662 : f32
    %668 = vector.broadcast %667 : f32 to vector<8x128xf32>
    %669 = arith.mulf %668, %658 : vector<8x128xf32>
    %670 = arith.addf %666, %669 : vector<8x128xf32>
    %671 = arith.truncf %670 : vector<8x128xf32> to vector<8x128xbf16>
    %cst_193 = arith.constant dense<0.000000e+00> : vector<8x128xf32>
    %672 = tpu.matmul %671, %273, %cst_193 {dimension_numbers = #tpu.dot_dimension_numbers<[1], [0], [0], [1], [0, 0, 1, 1], [], []>} : vector<8x128xbf16>, vector<128x128xbf16>, vector<8x128xf32> -> vector<8x128xf32>
    %673 = arith.truncf %672 : vector<8x128xf32> to vector<8x128xbf16>
    %cst_194 = arith.constant dense<0.000000e+00> : vector<8x512xf32>
    %674 = tpu.matmul %673, %274, %cst_194 {dimension_numbers = #tpu.dot_dimension_numbers<[1], [0], [0], [1], [0, 0, 1, 1], [], []>} : vector<8x128xbf16>, vector<128x512xbf16>, vector<8x512xf32> -> vector<8x512xf32>
    %675 = arith.truncf %639 : vector<8x128xf32> to vector<8x128xbf16>
    %cst_195 = arith.constant dense<0.000000e+00> : vector<8x512xf32>
    %676 = tpu.matmul %675, %275, %cst_195 {dimension_numbers = #tpu.dot_dimension_numbers<[1], [0], [0], [1], [0, 0, 1, 1], [], []>} : vector<8x128xbf16>, vector<128x512xbf16>, vector<8x512xf32> -> vector<8x512xf32>
    %677 = arith.addf %674, %676 : vector<8x512xf32>
    %678 = vector.broadcast %276 : vector<1x512xf32> to vector<8x512xf32>
    %679 = arith.addf %677, %678 : vector<8x512xf32>
    %680 = vector.extract_strided_slice %679 {offsets = [0, 0], sizes = [8, 128], strides = [1, 1]} : vector<8x512xf32> to vector<8x128xf32>
    %681 = arith.negf %680 : vector<8x128xf32>
    %682 = math.exp %681 : vector<8x128xf32>
    %cst_196 = arith.constant 1.000000e+00 : f32
    %683 = vector.broadcast %cst_196 : f32 to vector<8x128xf32>
    %684 = arith.addf %683, %682 : vector<8x128xf32>
    %685 = arith.divf %683, %684 : vector<8x128xf32>
    %686 = vector.extract_strided_slice %679 {offsets = [0, 128], sizes = [8, 128], strides = [1, 1]} : vector<8x512xf32> to vector<8x128xf32>
    %687 = arith.negf %686 : vector<8x128xf32>
    %688 = math.exp %687 : vector<8x128xf32>
    %cst_197 = arith.constant 1.000000e+00 : f32
    %689 = vector.broadcast %cst_197 : f32 to vector<8x128xf32>
    %690 = arith.addf %689, %688 : vector<8x128xf32>
    %691 = arith.divf %689, %690 : vector<8x128xf32>
    %692 = vector.extract_strided_slice %679 {offsets = [0, 256], sizes = [8, 128], strides = [1, 1]} : vector<8x512xf32> to vector<8x128xf32>
    %693 = math.tanh %692 : vector<8x128xf32>
    %694 = vector.extract_strided_slice %679 {offsets = [0, 384], sizes = [8, 128], strides = [1, 1]} : vector<8x512xf32> to vector<8x128xf32>
    %695 = arith.negf %694 : vector<8x128xf32>
    %696 = math.exp %695 : vector<8x128xf32>
    %cst_198 = arith.constant 1.000000e+00 : f32
    %697 = vector.broadcast %cst_198 : f32 to vector<8x128xf32>
    %698 = arith.addf %697, %696 : vector<8x128xf32>
    %699 = arith.divf %697, %698 : vector<8x128xf32>
    %700 = arith.mulf %691, %637 : vector<8x128xf32>
    %701 = arith.mulf %685, %693 : vector<8x128xf32>
    %702 = arith.addf %700, %701 : vector<8x128xf32>
    %703 = math.tanh %702 : vector<8x128xf32>
    %704 = arith.mulf %699, %703 : vector<8x128xf32>
    %705 = arith.truncf %704 : vector<8x128xf32> to vector<8x128xbf16>
    %cst_199 = arith.constant dense<0.000000e+00> : vector<8x128xf32>
    %706 = tpu.matmul %705, %277, %cst_199 {dimension_numbers = #tpu.dot_dimension_numbers<[1], [0], [0], [1], [0, 0, 1, 1], [], []>} : vector<8x128xbf16>, vector<128x128xbf16>, vector<8x128xf32> -> vector<8x128xf32>
    %707 = vector.broadcast %278 : vector<1x128xf32> to vector<8x128xf32>
    %708 = arith.addf %706, %707 : vector<8x128xf32>
    %c7_200 = arith.constant 7 : index
    %c0_201 = arith.constant 0 : index
    %c0_202 = arith.constant 0 : index
    %709 = vector.load %arg13[%c7_200, %c0_201, %c0_202] : memref<8x8x128xf32, #tpu.memory_space<vmem>>, vector<1x8x128xf32>
    %710 = vector.shape_cast %709 : vector<1x8x128xf32> to vector<8x128xf32>
    %711 = vector.shape_cast %708 : vector<8x128xf32> to vector<1x8x128xf32>
    tpu.vector_store %arg13[%c7_200, %c0_201, %c0_202], %711 {strides = array<i32>} : memref<8x8x128xf32, #tpu.memory_space<vmem>>, vector<1x8x128xf32>,
    return
  }
}

</mosaic_0001>

<bundles_post_ra>
// kernel: seq2seq_forward.1
= control target key start
LH: loop header
LB: loop body
LE: loop exit
PB: predicated region body
PF: predicated region fallthrough
CT: control target
= control target key end

     0   :  { %18 = vsyncpa [#allocation5], 0  ;;  %s7458_s0 = inlined_call_operand.vmem [shape: s32[8], index: 0, kind: input, shape index: {}]   ;;  %s7459_s1 = inlined_call_operand.vmem [shape: bf16[8,8,128], index: 1, kind: input, shape index: {}]   ;;  %s7460_s2 = inlined_call_operand.vmem [shape: f32[8,128], index: 2, kind: input, shape index: {}]   ;;  %s7461_s3 = inlined_call_operand.vmem [shape: f32[7,8,128], index: 3, kind: input, shape index: {}]   ;;  %s7462_s4 = inlined_call_operand.vmem [shape: bf16[128,512], index: 4, kind: input, shape index: {}]   ;;  %s7463_s5 = inlined_call_operand.hbm [shape: bf16[128,512], index: 5, kind: input, shape index: {}]   ;;  %s7464_s6 = inlined_call_operand.vmem [shape: f32[1,512], index: 6, kind: input, shape index: {}]   ;;  %s7465_s7 = inlined_call_operand.vmem [shape: bf16[128,128], index: 7, kind: input, shape index: {}]   ;;  %s7466_s8 = inlined_call_operand.hbm [shape: bf16[128,512], index: 8, kind: input, shape index: {}]   ;;  %s7467_s9 = inlined_call_operand.hbm [shape: bf16[128,512], index: 9, kind: input, shape index: {}]   ;;  %s7468_s10 = inlined_call_operand.vmem [shape: f32[1,512], index: 10, kind: input, shape index: {}]   ;;  %s7469_s11 = inlined_call_operand.vmem [shape: bf16[128,128], index: 11, kind: input, shape index: {}]   ;;  %s7470_s12 = inlined_call_operand.vmem [shape: f32[1,128], index: 12, kind: input, shape index: {}]   ;;  %s7471_s13 = inlined_call_operand.hbm [shape: f32[8,8,128], index: 13, kind: output, shape index: {}]  }
   0x1   :  { %19 = vsyncpa [#allocation3], 0 }
   0x2   :  { %20 = vsyncpa [#allocation8], 0 }
   0x3   :  { %21 = vsyncpa [#allocation4], 0  ;;  %s60_s27 = sshll.u32 %s7466_s8, 4  ;;  %s5245_s28 = smov [#allocation7]   ;;  %s61_s27 = int_to_ptr.hbm [resolvable:$true] %s60_s27 }
   0x4   :  { %s62_s29 = sshll.u32 %s5245_s28, 4  ;;  %s27_s15 = sshll.u32 %s7458_s0, 4  ;;  %s63_s29 = int_to_ptr.vmem [resolvable:$true] %s62_s29  ;;  %s28_s15 = int_to_ptr.vmem [resolvable:$true] %s27_s15 }
   0x5   :  { %s5246_s16 = smov 256   ;;  %s5247_s17 = smov 16  }
   0x6   :  { %68 = dma.hbm_to_vmem [thread:$0]  %s61_s27, 4096, %s63_s29, [#allocation8], %s5246_s16, %s5246_s16, %s5247_s17  }
   0x7   :  { %s5248_s18 = smov [#allocation2]   ;;  %s43_s21 = sshll.u32 %s7463_s5, 4  ;;  %s44_s21 = int_to_ptr.hbm [resolvable:$true] %s43_s21 }
   0x8   :  { %30 = dma.vmem_to_smem %s28_s15, 16, %s5248_s18, [#allocation5]  }
   0x9   :  { %s5249_s8 = smov [#allocation6]   ;;  %s73_s25 = sshll.u32 %s7467_s9, 4  ;;  %s74_s25 = int_to_ptr.hbm [resolvable:$true] %s73_s25 }
   0xa   :  { %s45_s22 = sshll.u32 %s5249_s8, 4  ;;  %s5250_s0 = smov [#allocation9]   ;;  %s46_s22 = int_to_ptr.vmem [resolvable:$true] %s45_s22 }
   0xb   :  { %51 = dma.hbm_to_vmem [thread:$0]  %s44_s21, 4096, %s46_s22, [#allocation3], %s5246_s16, %s5246_s16, %s5247_s17  }
   0xc   :  { %s75_s26 = sshll.u32 %s5250_s0, 4  ;;  %s76_s26 = int_to_ptr.vmem [resolvable:$true] %s75_s26 }
   0xd   :  { %81 = dma.hbm_to_vmem [thread:$0]  %s74_s25, 4096, %s76_s26, [#allocation8], %s5246_s16, %s5246_s16, %s5247_s17  }
   0xe   :  { %5237 = dma.done.wait [#allocation5], 16  }
   0xf   :  { %5238 = vsyncadd [#allocation5], 4294967280 }
  0x10   :  { %5239 = dma.done.wait [#allocation3], 4096  }
  0x11   :  { %5240 = vsyncadd [#allocation3], 4294963200 }
  0x12   :  { %5241 = dma.done.wait [#allocation8], 8192  }
  0x13   :  { %5242 = vsyncadd [#allocation8], 4294959104 }
  0x14   :  { %104 = sfence }
  0x15   :  { %v4167_v0 = vld [vmem:[#allocation6 + $0xe0] sm:$0xf]  ;;  %v4760_v1 = vld [vmem:[#allocation6 + $0xec] sm:$0xf0]  ;;  %v4758_v2 = vld [vmem:[#allocation6 + $0xe4] sm:$0xf] }
  0x16   :  { %v5338_v3 = vor.u32 %v4760_v1, %v4167_v0  ;;  %v4169_v4 = vld [vmem:[#allocation6 + $0xf0] sm:$0xf0]  ;;  %v4175_v5 = vld [vmem:[#allocation6 + $0xe8] sm:$0xf]  ;;  %v4761_v6 = vld [vmem:[#allocation6 + $0xf4] sm:$0xf0] }
  0x17   :  { %v5340_v7 = vor.u32 %v4758_v2, %v4169_v4  ;;  %v5342_v8 = vor.u32 %v4761_v6, %v4175_v5  ;;  %v4759_v9 = vld [vmem:[#allocation6 + $0xec] sm:$0xf]  ;;  %v4177_v10 = vld [vmem:[#allocation6 + $0xf8] sm:$0xf0]  ;;  %v4151_v11 = vld [vmem:[#allocation6 + $0xc0] sm:$0xf] }
  0x18   :  { %332 = vmatpush.bf16.msra.mxu0 %v5338_v3  ;;  %v5345_v12 = vor.u32 %v4759_v9, %v4177_v10  ;;  %v4756_v13 = vld [vmem:[#allocation6 + $0xcc] sm:$0xf0]  ;;  %v4754_v14 = vld [vmem:[#allocation6 + $0xc4] sm:$0xf]  ;;  %v4153_v15 = vld [vmem:[#allocation6 + $0xd0] sm:$0xf0] }
  0x19   :  { %345 = vmatpush.bf16.msra.mxu1 %v5340_v7  ;;  %358 = vmatpush.bf16.msra.mxu2 %v5342_v8  ;;  %v5349_v16 = vor.u32 %v4756_v13, %v4151_v11  ;;  %v5351_v17 = vor.u32 %v4754_v14, %v4153_v15  ;;  %v4159_v18 = vld [vmem:[#allocation6 + $0xc8] sm:$0xf]  ;;  %v4757_v19 = vld [vmem:[#allocation6 + $0xd4] sm:$0xf0]  ;;  %v4755_v20 = vld [vmem:[#allocation6 + $0xcc] sm:$0xf] }
  0x1a   :  { %371 = vmatpush.bf16.msra.mxu3 %v5345_v12  ;;  %v5354_v21 = vor.u32 %v4757_v19, %v4159_v18  ;;  %v4161_v22 = vld [vmem:[#allocation6 + $0xd8] sm:$0xf0]  ;;  %v4135_v23 = vld [vmem:[#allocation6 + $0xa0] sm:$0xf]  ;;  %v4752_v24 = vld [vmem:[#allocation6 + $0xac] sm:$0xf0] }
  0x1b   :  { %v5356_v25 = vor.u32 %v4755_v20, %v4161_v22  ;;  %v4750_v26 = vld [vmem:[#allocation6 + $0xa4] sm:$0xf]  ;;  %v4137_v27 = vld [vmem:[#allocation6 + $0xb0] sm:$0xf0]  ;;  %v4143_v28 = vld [vmem:[#allocation6 + $0xa8] sm:$0xf]  ;;  %v5359_v29 = vor.u32 %v4752_v24, %v4135_v23 }
  0x1c   :  { %333 = vmatpush.bf16.msra.mxu0 %v5349_v16  ;;  %v4753_v30 = vld [vmem:[#allocation6 + $0xb4] sm:$0xf0]  ;;  %v4751_v31 = vld [vmem:[#allocation6 + $0xac] sm:$0xf]  ;;  %v4145_v32 = vld [vmem:[#allocation6 + $0xb8] sm:$0xf0]  ;;  %v5363_v33 = vor.u32 %v4750_v26, %v4137_v27 }
  0x1d   :  { %346 = vmatpush.bf16.msra.mxu1 %v5351_v17  ;;  %359 = vmatpush.bf16.msra.mxu2 %v5354_v21  ;;  %v5365_v34 = vor.u32 %v4753_v30, %v4143_v28  ;;  %v4119_v35 = vld [vmem:[#allocation6 + $0x80] sm:$0xf]  ;;  %v4748_v36 = vld [vmem:[#allocation6 + $0x8c] sm:$0xf0]  ;;  %v4746_v37 = vld [vmem:[#allocation6 + $0x84] sm:$0xf]  ;;  %v5368_v38 = vor.u32 %v4751_v31, %v4145_v32 }
  0x1e   :  { %372 = vmatpush.bf16.msra.mxu3 %v5356_v25  ;;  %v4121_v39 = vld [vmem:[#allocation6 + $0x90] sm:$0xf0]  ;;  %v4127_v40 = vld [vmem:[#allocation6 + $0x88] sm:$0xf]  ;;  %v4749_v41 = vld [vmem:[#allocation6 + $0x94] sm:$0xf0]  ;;  %v5371_v44 = vor.u32 %v4748_v36, %v4119_v35 }
  0x1f   :  { %v4747_v42 = vld [vmem:[#allocation6 + $0x8c] sm:$0xf]  ;;  %v4129_v43 = vld [vmem:[#allocation6 + $0x98] sm:$0xf0]  ;;  %v5375_v45 = vor.u32 %v4746_v37, %v4121_v39  ;;  %v5377_v46 = vor.u32 %v4749_v41, %v4127_v40  ;;  %v4103_v47 = vld [vmem:[#allocation6 + $0x60] sm:$0xf] }
  0x20   :  { %334 = vmatpush.bf16.msra.mxu0 %v5359_v29  ;;  %v4744_v48 = vld [vmem:[#allocation6 + $0x6c] sm:$0xf0]  ;;  %v4742_v49 = vld [vmem:[#allocation6 + $0x64] sm:$0xf]  ;;  %v5380_v50 = vor.u32 %v4747_v42, %v4129_v43  ;;  %v4105_v51 = vld [vmem:[#allocation6 + $0x70] sm:$0xf0] }
  0x21   :  { %347 = vmatpush.bf16.msra.mxu1 %v5363_v33  ;;  %360 = vmatpush.bf16.msra.mxu2 %v5365_v34  ;;  %v4111_v52 = vld [vmem:[#allocation6 + $0x68] sm:$0xf]  ;;  %v4745_v53 = vld [vmem:[#allocation6 + $0x74] sm:$0xf0]  ;;  %v4743_v54 = vld [vmem:[#allocation6 + $0x6c] sm:$0xf]  ;;  %v5383_v56 = vor.u32 %v4744_v48, %v4103_v47  ;;  %v5387_v57 = vor.u32 %v4742_v49, %v4105_v51 }
  0x22   :  { %373 = vmatpush.bf16.msra.mxu3 %v5368_v38  ;;  %v4113_v55 = vld [vmem:[#allocation6 + $0x78] sm:$0xf0]  ;;  %v5389_v58 = vor.u32 %v4745_v53, %v4111_v52  ;;  %v4087_v59 = vld [vmem:[#allocation6 + $0x40] sm:$0xf]  ;;  %v4740_v60 = vld [vmem:[#allocation6 + $0x4c] sm:$0xf0] }
  0x23   :  { %v4738_v61 = vld [vmem:[#allocation6 + $0x44] sm:$0xf]  ;;  %v5392_v62 = vor.u32 %v4743_v54, %v4113_v55  ;;  %v4089_v63 = vld [vmem:[#allocation6 + $0x50] sm:$0xf0]  ;;  %v4095_v0 = vld [vmem:[#allocation6 + $0x48] sm:$0xf]  ;;  %v5395_v5 = vor.u32 %v4740_v60, %v4087_v59 }
  0x24   :  { %335 = vmatpush.bf16.msra.mxu0 %v5371_v44  ;;  %v4741_v1 = vld [vmem:[#allocation6 + $0x54] sm:$0xf0]  ;;  %v4739_v2 = vld [vmem:[#allocation6 + $0x4c] sm:$0xf]  ;;  %v4097_v4 = vld [vmem:[#allocation6 + $0x58] sm:$0xf0]  ;;  %v5399_v6 = vor.u32 %v4738_v61, %v4089_v63 }
  0x25   :  { %348 = vmatpush.bf16.msra.mxu1 %v5375_v45  ;;  %361 = vmatpush.bf16.msra.mxu2 %v5377_v46  ;;  %v5401_v9 = vor.u32 %v4741_v1, %v4095_v0  ;;  %v4071_v10 = vld [vmem:[#allocation6 + $0x20] sm:$0xf]  ;;  %v4736_v11 = vld [vmem:[#allocation6 + $0x2c] sm:$0xf0]  ;;  %v4734_v13 = vld [vmem:[#allocation6 + $0x24] sm:$0xf]  ;;  %v5404_v14 = vor.u32 %v4739_v2, %v4097_v4 }
  0x26   :  { %374 = vmatpush.bf16.msra.mxu3 %v5380_v50  ;;  %v4073_v15 = vld [vmem:[#allocation6 + $0x30] sm:$0xf0]  ;;  %v4079_v18 = vld [vmem:[#allocation6 + $0x28] sm:$0xf]  ;;  %v4737_v19 = vld [vmem:[#allocation6 + $0x34] sm:$0xf0]  ;;  %v5407_v23 = vor.u32 %v4736_v11, %v4071_v10 }
  0x27   :  { %v4735_v20 = vld [vmem:[#allocation6 + $0x2c] sm:$0xf]  ;;  %v4081_v22 = vld [vmem:[#allocation6 + $0x38] sm:$0xf0]  ;;  %v4055_v24 = vld [vmem:[#allocation6] sm:$0xf]  ;;  %v5411_v27 = vor.u32 %v4734_v13, %v4073_v15  ;;  %v5413_v28 = vor.u32 %v4737_v19, %v4079_v18 }
  0x28   :  { %336 = vmatpush.bf16.msra.mxu0 %v5383_v56  ;;  %v4732_v26 = vld [vmem:[#allocation6 + $0xc] sm:$0xf0]  ;;  %v4730_v30 = vld [vmem:[#allocation6 + $0x4] sm:$0xf]  ;;  %v4057_v31 = vld [vmem:[#allocation6 + $0x10] sm:$0xf0]  ;;  %v5416_v35 = vor.u32 %v4735_v20, %v4081_v22 }
  0x29   :  { %349 = vmatpush.bf16.msra.mxu1 %v5387_v57  ;;  %362 = vmatpush.bf16.msra.mxu2 %v5389_v58  ;;  %v4063_v32 = vld [vmem:[#allocation6 + $0x8] sm:$0xf]  ;;  %v4733_v36 = vld [vmem:[#allocation6 + $0x14] sm:$0xf0]  ;;  %v4731_v37 = vld [vmem:[#allocation6 + $0xc] sm:$0xf]  ;;  %v5428_v43 = vor.u32 %v4732_v26, %v4055_v24  ;;  %v5441_v51 = vor.u32 %v4730_v30, %v4057_v31 }
  0x2a   :  { %375 = vmatpush.bf16.msra.mxu3 %v5392_v62  ;;  %v4065_v39 = vld [vmem:[#allocation6 + $0x18] sm:$0xf0]  ;;  %v4295_v40 = vld [vmem:[%s7462_s4 + $0xe0] sm:$0xf]  ;;  %v4728_v41 = vld [vmem:[%s7462_s4 + $0xec] sm:$0xf0]  ;;  %v5443_v52 = vor.u32 %v4733_v36, %v4063_v32 }
  0x2b   :  { %v4726_v42 = vld [vmem:[%s7462_s4 + $0xe4] sm:$0xf]  ;;  %v4297_v47 = vld [vmem:[%s7462_s4 + $0xf0] sm:$0xf0]  ;;  %v4303_v48 = vld [vmem:[%s7462_s4 + $0xe8] sm:$0xf]  ;;  %v5452_v55 = vor.u32 %v4731_v37, %v4065_v39  ;;  %v5454_v59 = vor.u32 %v4728_v41, %v4295_v40 }
  0x2c   :  { %337 = vmatpush.bf16.msra.mxu0 %v5395_v5  ;;  %v4729_v49 = vld [vmem:[%s7462_s4 + $0xf4] sm:$0xf0]  ;;  %v4727_v53 = vld [vmem:[%s7462_s4 + $0xec] sm:$0xf]  ;;  %v4305_v54 = vld [vmem:[%s7462_s4 + $0xf8] sm:$0xf0]  ;;  %v5456_v60 = vor.u32 %v4726_v42, %v4297_v47 }
  0x2d   :  { %350 = vmatpush.bf16.msra.mxu1 %v5399_v6  ;;  %363 = vmatpush.bf16.msra.mxu2 %v5401_v9  ;;  %v5458_v61 = vor.u32 %v4729_v49, %v4303_v48  ;;  %v4279_v63 = vld [vmem:[%s7462_s4 + $0xc0] sm:$0xf]  ;;  %v4724_v0 = vld [vmem:[%s7462_s4 + $0xcc] sm:$0xf0]  ;;  %v4722_v1 = vld [vmem:[%s7462_s4 + $0xc4] sm:$0xf]  ;;  %v5470_v2 = vor.u32 %v4727_v53, %v4305_v54 }
  0x2e   :  { %376 = vmatpush.bf16.msra.mxu3 %v5404_v14  ;;  %v4281_v4 = vld [vmem:[%s7462_s4 + $0xd0] sm:$0xf0]  ;;  %v4287_v10 = vld [vmem:[%s7462_s4 + $0xc8] sm:$0xf]  ;;  %v4725_v11 = vld [vmem:[%s7462_s4 + $0xd4] sm:$0xf0]  ;;  %v5491_v18 = vor.u32 %v4724_v0, %v4279_v63 }
  0x2f   :  { %v4723_v13 = vld [vmem:[%s7462_s4 + $0xcc] sm:$0xf]  ;;  %v4289_v15 = vld [vmem:[%s7462_s4 + $0xd8] sm:$0xf0]  ;;  %v5495_v19 = vor.u32 %v4722_v1, %v4281_v4  ;;  %v5497_v20 = vor.u32 %v4725_v11, %v4287_v10  ;;  %v4263_v22 = vld [vmem:[%s7462_s4 + $0xa0] sm:$0xf] }
  0x30   :  { %338 = vmatpush.bf16.msra.mxu0 %v5407_v23  ;;  %v4720_v24 = vld [vmem:[%s7462_s4 + $0xac] sm:$0xf0]  ;;  %v4718_v26 = vld [vmem:[%s7462_s4 + $0xa4] sm:$0xf]  ;;  %v5509_v30 = vor.u32 %v4723_v13, %v4289_v15  ;;  %v5251_v31 = vmov 0   ;;  %s4664_s5 = sld [smem:[#allocation2 + $0x1]] }
  0x31   :  { %351 = vmatpush.bf16.msra.mxu1 %v5411_v27  ;;  %364 = vmatpush.bf16.msra.mxu2 %v5413_v28  ;;  %7680 = vst [vmem:[#allocation15_spill] sm:$0xff] %v5497_v20  ;;  %v4265_v32 = vld [vmem:[%s7462_s4 + $0xb0] sm:$0xf0]  ;;  %v4271_v36 = vld [vmem:[%s7462_s4 + $0xa8] sm:$0xf]  ;;  %v5527_v41 = vor.u32 %v4720_v24, %v4263_v22  ;;  %s4681_s26 = sld [smem:[#allocation2 + $0x4]] }
  0x32   :  { %377 = vmatpush.bf16.msra.mxu3 %v5416_v35  ;;  %7681 = vst [vmem:[#allocation16_spill] sm:$0xff] %v5509_v30  ;;  %v4721_v37 = vld [vmem:[%s7462_s4 + $0xb4] sm:$0xf0]  ;;  %v4719_v39 = vld [vmem:[%s7462_s4 + $0xac] sm:$0xf]  ;;  %v5531_v42 = vor.u32 %v4718_v26, %v4265_v32  ;;  %s5254_s15 = smov 128  }
  0x33   :  { %v4273_v40 = vld [vmem:[%s7462_s4 + $0xb8] sm:$0xf0]  ;;  %7682 = vst [vmem:[#allocation17_spill] sm:$0xff] %v5527_v41  ;;  %v5533_v47 = vor.u32 %v4721_v37, %v4271_v36  ;;  %v4247_v48 = vld [vmem:[%s7462_s4 + $0x80] sm:$0xf]  ;;  %s5255_s16 = smov 8  }
  0x34   :  { %339 = vmatpush.bf16.msra.mxu0 %v5428_v43  ;;  %7683 = vst [vmem:[#allocation18_spill] sm:$0xff] %v5531_v42  ;;  %v4716_v49 = vld [vmem:[%s7462_s4 + $0x8c] sm:$0xf0]  ;;  %v4714_v53 = vld [vmem:[%s7462_s4 + $0x84] sm:$0xf]  ;;  %v5545_v54 = vor.u32 %v4719_v39, %v4273_v40 }
  0x35   :  { %352 = vmatpush.bf16.msra.mxu1 %v5441_v51  ;;  %365 = vmatpush.bf16.msra.mxu2 %v5443_v52  ;;  %7684 = vst [vmem:[#allocation19_spill] sm:$0xff] %v5533_v47  ;;  %v4249_v63 = vld [vmem:[%s7462_s4 + $0x90] sm:$0xf0]  ;;  %v4255_v0 = vld [vmem:[%s7462_s4 + $0x88] sm:$0xf]  ;;  %v5563_v11 = vor.u32 %v4716_v49, %v4247_v48 }
  0x36   :  { %378 = vmatpush.bf16.msra.mxu3 %v5452_v55  ;;  %7685 = vst [vmem:[#allocation20_spill] sm:$0xff] %v5545_v54  ;;  %v4717_v1 = vld [vmem:[%s7462_s4 + $0x94] sm:$0xf0]  ;;  %v4715_v4 = vld [vmem:[%s7462_s4 + $0x8c] sm:$0xf]  ;;  %v5570_v15 = vor.u32 %v4714_v53, %v4249_v63  ;;  %p2645_p0 = scmp.eq.s32.totalorder %s4664_s5, 1 }
  0x37   :  { %340 = vmatmul.bf16.vlgmr.msra.gmra.mxu0 %v5251_v31  ;;  %v4257_v10 = vld [vmem:[%s7462_s4 + $0x98] sm:$0xf0]  ;;  %7686 = vst [vmem:[#allocation21_spill] sm:$0xff] %v5563_v11  ;;  %v4231_v13 = vld [vmem:[%s7462_s4 + $0x60] sm:$0xf]  ;;  %v5572_v22 = vor.u32 %v4717_v1, %v4255_v0  ;;  %p3349_p3 = scmp.eq.s32.totalorder %s4681_s26, 1 }
  0x38   :  { %544 = vmatpush.bf16.msrb.mxu0 %v5454_v59  ;;  %353 = vmatmul.bf16.vlgmr.msra.gmra.mxu1 %v5251_v31  ;;  %7687 = vst [vmem:[#allocation22_spill] sm:$0xff] %v5570_v15  ;;  %v4712_v24 = vld [vmem:[%s7462_s4 + $0x6c] sm:$0xf0]  ;;  %v4710_v26 = vld [vmem:[%s7462_s4 + $0x64] sm:$0xf]  ;;  %v5584_v32 = vor.u32 %v4715_v4, %v4257_v10 }
  0x39   :  { %557 = vmatpush.bf16.msrb.mxu1 %v5456_v60  ;;  %570 = vmatpush.bf16.msrb.mxu2 %v5458_v61  ;;  %7688 = vst [vmem:[#allocation23_spill] sm:$0xff] %v5572_v22  ;;  %v4239_v36 = vld [vmem:[%s7462_s4 + $0x68] sm:$0xf]  ;;  %v4713_v37 = vld [vmem:[%s7462_s4 + $0x74] sm:$0xf0]  ;;  %v5599_v48 = vor.u32 %v4712_v24, %v4231_v13 }
  0x3a   :  { %583 = vmatpush.bf16.msrb.mxu3 %v5470_v2  ;;  %366 = vmatmul.bf16.vlgmr.msra.gmra.mxu2 %v5251_v31  ;;  %7689 = vst [vmem:[#allocation24_spill] sm:$0xff] %v5584_v32  ;;  %v4711_v39 = vld [vmem:[%s7462_s4 + $0x6c] sm:$0xf]  ;;  %v4241_v40 = vld [vmem:[%s7462_s4 + $0x78] sm:$0xf0]  ;;  %v5605_v53 = vor.u32 %v4713_v37, %v4239_v36 }
  0x3b   :  { %379 = vmatmul.bf16.vlgmr.msra.gmra.mxu3 %v5251_v31  ;;  %v4233_v31 = vld [vmem:[%s7462_s4 + $0x70] sm:$0xf0]  ;;  %7690 = vst [vmem:[#allocation25_spill] sm:$0xff] %v5599_v48  ;;  %v4215_v63 = vld [vmem:[%s7462_s4 + $0x40] sm:$0xf]  ;;  %v5617_v4 = vor.u32 %v4711_v39, %v4241_v40 }
  0x3c   :  { %545 = vmatpush.bf16.msrb.mxu0 %v5491_v18  ;;  %v5603_v49 = vor.u32 %v4710_v26, %v4233_v31  ;;  %7692 = vst [vmem:[#allocation27_spill] sm:$0xff] %v5605_v53  ;;  %v4708_v0 = vld [vmem:[%s7462_s4 + $0x4c] sm:$0xf0]  ;;  %v4706_v1 = vld [vmem:[%s7462_s4 + $0x44] sm:$0xf] }
  0x3d   :  { %558 = vmatpush.bf16.msrb.mxu1 %v5495_v19  ;;  %571 = vmatpush.bf16.msrb.mxu2 %v5497_v20  ;;  %7693 = vst [vmem:[#allocation28_spill] sm:$0xff] %v5617_v4  ;;  %v4217_v10 = vld [vmem:[%s7462_s4 + $0x50] sm:$0xf0]  ;;  %v4223_v13 = vld [vmem:[%s7462_s4 + $0x48] sm:$0xf]  ;;  %v5635_v36 = vor.u32 %v4708_v0, %v4215_v63 }
  0x3e   :  { %584 = vmatpush.bf16.msrb.mxu3 %v5509_v30  ;;  %7691 = vst [vmem:[#allocation26_spill] sm:$0xff] %v5603_v49  ;;  %v4709_v24 = vld [vmem:[%s7462_s4 + $0x54] sm:$0xf0]  ;;  %v4707_v26 = vld [vmem:[%s7462_s4 + $0x4c] sm:$0xf]  ;;  %v5639_v37 = vor.u32 %v4706_v1, %v4217_v10 }
  0x3f   :  { %v4225_v31 = vld [vmem:[%s7462_s4 + $0x58] sm:$0xf0]  ;;  %7694 = vst [vmem:[#allocation29_spill] sm:$0xff] %v5635_v36  ;;  %v5641_v39 = vor.u32 %v4709_v24, %v4223_v13  ;;  %v4199_v40 = vld [vmem:[%s7462_s4 + $0x20] sm:$0xf] }
  0x40   :  { %546 = vmatpush.bf16.msrb.mxu0 %v5527_v41  ;;  %7695 = vst [vmem:[#allocation30_spill] sm:$0xff] %v5639_v37  ;;  %v4702_v63 = vld [vmem:[%s7462_s4 + $0x24] sm:$0xf]  ;;  %v5653_v0 = vor.u32 %v4707_v26, %v4225_v31  ;;  %v4201_v1 = vld [vmem:[%s7462_s4 + $0x30] sm:$0xf0] }
  0x41   :  { %559 = vmatpush.bf16.msrb.mxu1 %v5531_v42  ;;  %572 = vmatpush.bf16.msrb.mxu2 %v5533_v47  ;;  %7696 = vst [vmem:[#allocation31_spill] sm:$0xff] %v5641_v39  ;;  %v4207_v10 = vld [vmem:[%s7462_s4 + $0x28] sm:$0xf]  ;;  %v4705_v13 = vld [vmem:[%s7462_s4 + $0x34] sm:$0xf0] }
  0x42   :  { %585 = vmatpush.bf16.msrb.mxu3 %v5545_v54  ;;  %7697 = vst [vmem:[#allocation32_spill] sm:$0xff] %v5653_v0  ;;  %v4703_v24 = vld [vmem:[%s7462_s4 + $0x2c] sm:$0xf]  ;;  %v4209_v26 = vld [vmem:[%s7462_s4 + $0x38] sm:$0xf0] }
  0x43   :  { %s2646_s9 = scalar_select %p2645_p0, 1, 0 }
  0x44   :  { %547 = vmatpush.bf16.msrb.mxu0 %v5563_v11  ;;  %s3350_s5 = scalar_select %p3349_p3, 1, 0 }
  0x45   :  { %560 = vmatpush.bf16.msrb.mxu1 %v5570_v15  ;;  %573 = vmatpush.bf16.msrb.mxu2 %v5572_v22  ;;  %s2647_s27 = scvt.s32.f32 %s2646_s9 }
  0x46   :  { %586 = vmatpush.bf16.msrb.mxu3 %v5584_v32  ;;  %v4704_v32 = vld [vmem:[%s7462_s4 + $0x2c] sm:$0xf0]  ;;  %s3351_s9 = scvt.s32.f32 %s3350_s5 }
  0x47   :  { %v5671_v31 = vor.u32 %v4704_v32, %v4199_v40  ;;  %v4698_v32 = vld [vmem:[%s7462_s4 + $0x4] sm:$0xf]  ;;  %v5689_v40 = vor.u32 %v4703_v24, %v4209_v26  ;;  %v4193_v24 = vld [vmem:[%s7462_s4 + $0x18] sm:$0xf0] }
  0x48   :  { %548 = vmatpush.bf16.msrb.mxu0 %v5599_v48  ;;  %v4700_v48 = vld [vmem:[%s7462_s4 + $0xc] sm:$0xf0] }
  0x49   :  { %561 = vmatpush.bf16.msrb.mxu1 %v5603_v49  ;;  %574 = vmatpush.bf16.msrb.mxu2 %v5605_v53  ;;  %7698 = vst [vmem:[#allocation33_spill] sm:$0xff] %v5671_v31  ;;  %v5677_v53 = vor.u32 %v4705_v13, %v4207_v10  ;;  %v4183_v49 = vld [vmem:[%s7462_s4] sm:$0xf]  ;;  %v4701_v10 = vld [vmem:[%s7462_s4 + $0x14] sm:$0xf0] }
  0x4a   :  { %587 = vmatpush.bf16.msrb.mxu3 %v5617_v4  ;;  %v5675_v4 = vor.u32 %v4702_v63, %v4201_v1  ;;  %7701 = vst [vmem:[#allocation36_spill] sm:$0xff] %v5689_v40  ;;  %v4185_v63 = vld [vmem:[%s7462_s4 + $0x10] sm:$0xf0]  ;;  %v4191_v1 = vld [vmem:[%s7462_s4 + $0x8] sm:$0xf]  ;;  %v5707_v26 = vor.u32 %v4700_v48, %v4183_v49 }
  0x4b   :  { %7700 = vst [vmem:[#allocation35_spill] sm:$0xff] %v5677_v53  ;;  %v4699_v13 = vld [vmem:[%s7462_s4 + $0xc] sm:$0xf]  ;;  %v7707_v49 = vld [vmem:[#allocation25_spill] sm:$0xff]  ;;  %s2651_s4 = ssub.f32 1.0, %s2647_s27 }
  0x4c   :  { %549 = vmatpush.bf16.msrb.mxu0 %v5635_v36  ;;  %7699 = vst [vmem:[#allocation34_spill] sm:$0xff] %v5675_v4  ;;  %v7706_v48 = vld [vmem:[#allocation24_spill] sm:$0xff] }
  0x4d   :  { %562 = vmatpush.bf16.msrb.mxu1 %v5639_v37  ;;  %575 = vmatpush.bf16.msrb.mxu2 %v5641_v39  ;;  %7702 = vst [vmem:[#allocation37_spill] sm:$0xff] %v5707_v26  ;;  %v5713_v39 = vor.u32 %v4701_v10, %v4191_v1  ;;  %v5716_v37 = vor.u32 %v4699_v13, %v4193_v24  ;;  %v7711_v1 = vld [vmem:[#allocation30_spill] sm:$0xff]  ;;  %v7712_v10 = vld [vmem:[#allocation31_spill] sm:$0xff]  ;;  %v7713_v13 = vld [vmem:[#allocation32_spill] sm:$0xff] }
  0x4e   :  { %588 = vmatpush.bf16.msrb.mxu3 %v5653_v0  ;;  %v5711_v0 = vor.u32 %v4698_v32, %v4185_v63  ;;  %v7709_v32 = vld [vmem:[#allocation27_spill] sm:$0xff]  ;;  %v7710_v63 = vld [vmem:[#allocation28_spill] sm:$0xff] }
  0x4f   :  { %7704 = vst [vmem:[#allocation39_spill] sm:$0xff] %v5713_v39 }
  0x50   :  { %550 = vmatpush.bf16.msrb.mxu0 %v5671_v31  ;;  %7703 = vst [vmem:[#allocation38_spill] sm:$0xff] %v5711_v0  ;;  %v171_v31 = vld [vmem:[%s7459_s1] sm:$0xf]  ;;  %v7714_v24 = vld [vmem:[#allocation33_spill] sm:$0xff] }
  0x51   :  { %563 = vmatpush.bf16.msrb.mxu1 %v5675_v4  ;;  %576 = vmatpush.bf16.msrb.mxu2 %v5677_v53  ;;  %7705 = vst [vmem:[#allocation40_spill] sm:$0xff] %v5716_v37 }
  0x52   :  { %589 = vmatpush.bf16.msrb.mxu3 %v5689_v40 }
  0x54   :  { %551 = vmatpush.bf16.msrb.mxu0 %v5707_v26 }
  0x55   :  { %564 = vmatpush.bf16.msrb.mxu1 %v5711_v0  ;;  %577 = vmatpush.bf16.msrb.mxu2 %v5713_v39 }
  0x56   :  { %590 = vmatpush.bf16.msrb.mxu3 %v5716_v37 }
  0x57   :  { %552 = vmatmul.bf16.vlgmr.msrb.gmra.mxu0 %v171_v31 }
  0x58   :  { %675 = vmatpush.bf16.msra.mxu0 %v5338_v3  ;;  %565 = vmatmul.bf16.vlgmr.msrb.gmra.mxu1 %v171_v31 }
  0x59   :  { %688 = vmatpush.bf16.msra.mxu1 %v5340_v7  ;;  %578 = vmatmul.bf16.vlgmr.msrb.gmra.mxu2 %v171_v31 }
  0x5a   :  { %591 = vmatmul.bf16.vlgmr.msrb.gmra.mxu3 %v171_v31  ;;  %701 = vmatpush.bf16.msra.mxu2 %v5342_v8  ;;  %v7708_v31 = vld [vmem:[#allocation26_spill] sm:$0xff] }
  0x5b   :  { %714 = vmatpush.bf16.msra.mxu3 %v5345_v12 }
  0x5c   :  { %676 = vmatpush.bf16.msra.mxu0 %v5349_v16 }
  0x5d   :  { %689 = vmatpush.bf16.msra.mxu1 %v5351_v17 }
  0x5e   :  { %702 = vmatpush.bf16.msra.mxu2 %v5354_v21 }
  0x5f   :  { %715 = vmatpush.bf16.msra.mxu3 %v5356_v25 }
  0x60   :  { %677 = vmatpush.bf16.msra.mxu0 %v5359_v29 }
  0x61   :  { %690 = vmatpush.bf16.msra.mxu1 %v5363_v33 }
  0x62   :  { %703 = vmatpush.bf16.msra.mxu2 %v5365_v34 }
  0x63   :  { %716 = vmatpush.bf16.msra.mxu3 %v5368_v38 }
  0x64   :  { %678 = vmatpush.bf16.msra.mxu0 %v5371_v44 }
  0x65   :  { %691 = vmatpush.bf16.msra.mxu1 %v5375_v45 }
  0x66   :  { %704 = vmatpush.bf16.msra.mxu2 %v5377_v46 }
  0x67   :  { %717 = vmatpush.bf16.msra.mxu3 %v5380_v50 }
  0x68   :  { %679 = vmatpush.bf16.msra.mxu0 %v5383_v56 }
  0x69   :  { %692 = vmatpush.bf16.msra.mxu1 %v5387_v57 }
  0x6a   :  { %705 = vmatpush.bf16.msra.mxu2 %v5389_v58 }
  0x6b   :  { %718 = vmatpush.bf16.msra.mxu3 %v5392_v62 }
  0x6c   :  { %680 = vmatpush.bf16.msra.mxu0 %v5395_v5 }
  0x6d   :  { %693 = vmatpush.bf16.msra.mxu1 %v5399_v6 }
  0x6e   :  { %706 = vmatpush.bf16.msra.mxu2 %v5401_v9 }
  0x6f   :  { %719 = vmatpush.bf16.msra.mxu3 %v5404_v14 }
  0x70   :  { %681 = vmatpush.bf16.msra.mxu0 %v5407_v23 }
  0x71   :  { %694 = vmatpush.bf16.msra.mxu1 %v5411_v27 }
  0x72   :  { %707 = vmatpush.bf16.msra.mxu2 %v5413_v28 }
  0x73   :  { %720 = vmatpush.bf16.msra.mxu3 %v5416_v35 }
  0x74   :  { %682 = vmatpush.bf16.msra.mxu0 %v5428_v43 }
  0x75   :  { %695 = vmatpush.bf16.msra.mxu1 %v5441_v51 }
  0x76   :  { %708 = vmatpush.bf16.msra.mxu2 %v5443_v52 }
  0x77   :  { %721 = vmatpush.bf16.msra.mxu3 %v5452_v55 }
  0x78   :  { %727 = vmatpush.bf16.msrb.mxu0 %v5454_v59 }
  0x79   :  { %740 = vmatpush.bf16.msrb.mxu1 %v5456_v60 }
  0x7a   :  { %753 = vmatpush.bf16.msrb.mxu2 %v5458_v61 }
  0x7b   :  { %766 = vmatpush.bf16.msrb.mxu3 %v5470_v2 }
  0x7c   :  { %728 = vmatpush.bf16.msrb.mxu0 %v5491_v18 }
  0x7d   :  { %741 = vmatpush.bf16.msrb.mxu1 %v5495_v19 }
  0x7e   :  { %754 = vmatpush.bf16.msrb.mxu2 %v5497_v20 }
  0x7f   :  { %767 = vmatpush.bf16.msrb.mxu3 %v5509_v30 }
  0x80   :  { %729 = vmatpush.bf16.msrb.mxu0 %v5527_v41 }
  0x81   :  { %742 = vmatpush.bf16.msrb.mxu1 %v5531_v42 }
  0x82   :  { %755 = vmatpush.bf16.msrb.mxu2 %v5533_v47 }
  0x83   :  { %768 = vmatpush.bf16.msrb.mxu3 %v5545_v54 }
  0x84   :  { %730 = vmatpush.bf16.msrb.mxu0 %v5563_v11 }
  0x85   :  { %743 = vmatpush.bf16.msrb.mxu1 %v5570_v15 }
  0x86   :  { %756 = vmatpush.bf16.msrb.mxu2 %v5572_v22 }
  0x87   :  { %769 = vmatpush.bf16.msrb.mxu3 %v7706_v48 }
  0x88   :  { %731 = vmatpush.bf16.msrb.mxu0 %v7707_v49 }
  0x89   :  { %744 = vmatpush.bf16.msrb.mxu1 %v7708_v31 }
  0x8a   :  { %757 = vmatpush.bf16.msrb.mxu2 %v7709_v32 }
  0x8b   :  { %770 = vmatpush.bf16.msrb.mxu3 %v7710_v63 }
  0x8c   :  { %732 = vmatpush.bf16.msrb.mxu0 %v5635_v36 }
  0x8d   :  { %745 = vmatpush.bf16.msrb.mxu1 %v7711_v1 }
  0x8e   :  { %758 = vmatpush.bf16.msrb.mxu2 %v7712_v10 }
  0x8f   :  { %771 = vmatpush.bf16.msrb.mxu3 %v7713_v13 }
  0x90   :  { %733 = vmatpush.bf16.msrb.mxu0 %v7714_v24 }
  0x91   :  { %746 = vmatpush.bf16.msrb.mxu1 %v5675_v4 }
  0x92   :  { %759 = vmatpush.bf16.msrb.mxu2 %v5677_v53 }
  0x93   :  { %772 = vmatpush.bf16.msrb.mxu3 %v5689_v40  ;;  %v170_v40 = vld [vmem:[%s7464_s6] sm:$0xf] }
  0x94   :  { %734 = vmatpush.bf16.msrb.mxu0 %v5707_v26  ;;  %v5792_v53 = vperm.slane %v170_v40, 0 }
  0x95   :  { %747 = vmatpush.bf16.msrb.mxu1 %v5711_v0  ;;  %v5794_v0 = vperm.slane %v170_v40, 1 }
  0x96   :  { %760 = vmatpush.bf16.msrb.mxu2 %v5713_v39  ;;  %7715 = vst [vmem:[#allocation41_spill] sm:$0xff] %v5792_v53 }
  0x97   :  { %773 = vmatpush.bf16.msrb.mxu3 %v5716_v37  ;;  %7716 = vst [vmem:[#allocation42_spill] sm:$0xff] %v5794_v0 }
  0xb4   :  { %v341_v1 = vpop.f32.mrf.mxu0 }
  0xb5   :  { %v354_v10 = vpop.f32.mrf.mxu1 }
  0xbc   :  { %v343_v13 = vpop.f32.mrf.mxu0 }
  0xbd   :  { %v367_v63 = vpop.f32.mrf.mxu2  ;;  %v356_v24 = vpop.f32.mrf.mxu1 }
  0xbe   :  { %v380_v36 = vpop.f32.mrf.mxu3 }
  0xc5   :  { %v369_v4 = vpop.f32.mrf.mxu2 }
  0xc6   :  { %v382_v32 = vpop.f32.mrf.mxu3 }
  0xc7   :  { %v5798_v32 = vperm.slane %v170_v40, 3 }
  0xc9   :  { %7717 = vst [vmem:[#allocation43_spill] sm:$0xff] %v5798_v32 }
  0xd4   :  { %v553_v26 = vpop.f32.mrf.mxu0 }
  0xd5   :  { %v554_v39 = vadd.f32 %v553_v26, %v341_v1  ;;  %v566_v31 = vpop.f32.mrf.mxu1 }
  0xd6   :  { %v567_v37 = vadd.f32 %v566_v31, %v354_v10 }
  0xd7   :  { %v605_v49 = vadd.f32 %v5792_v53, %v554_v39 }
  0xd8   :  { %v606_v13 = vadd.f32 %v5794_v0, %v567_v37 }
  0xd9   :  { %v4309_v48 = vmul.f32 -1.442695, %v605_v49 }
  0xda   :  { %v4310_v24 = vmul.f32 -1.442695, %v606_v13  ;;  %v5801_v13 = vperm.slane %v170_v40, 2 }
  0xdb   :  { %4854 = vpow2.f32 %v4309_v48 }
  0xdc   :  { %v579_v4 = vpop.f32.mrf.mxu2  ;;  %4856 = vpow2.f32 %v4310_v24  ;;  %v555_v15 = vpop.f32.mrf.mxu0  ;;  %7718 = vst [vmem:[#allocation44_spill] sm:$0xff] %v5801_v13 }
  0xdd   :  { %v592_v22 = vpop.f32.mrf.mxu3  ;;  %v568_v54 = vpop.f32.mrf.mxu1  ;;  %v580_v48 = vadd.f32 %v579_v4, %v367_v63 }
  0xde   :  { %v593_v11 = vadd.f32 %v592_v22, %v380_v36 }
  0xdf   :  { %v607_v15 = vadd.f32 %v5801_v13, %v580_v48 }
  0xe0   :  { %v608_v47 = vadd.f32 %v5798_v32, %v593_v11 }
  0xe1   :  { %v4855_v26 = vpop.eup %4854 }
  0xe2   :  { %v4311_v1 = vmul.f32 -1.442695, %v608_v47  ;;  %v4857_v31 = vpop.eup %4856  ;;  %v612_v10 = vadd.f32 1.0, %v4855_v26 }
  0xe3   :  { %v631_v39 = vadd.f32 1.0, %v4857_v31 }
  0xe4   :  { %4858 = vpow2.f32 %v4311_v1  ;;  %v581_v37 = vpop.f32.mrf.mxu2  ;;  %v624_v31 = vand.u32 2147483648, %v612_v10  ;;  %vm618_vm2 = vweird.f32 %v612_v10 }
  0xe5   :  { %4860 = vrcp.f32 %v612_v10  ;;  %v594_v49 = vpop.f32.mrf.mxu3  ;;  %v643_v1 = vand.u32 2147483648, %v631_v39  ;;  %v641_v40 = vand.u32 2147483647, %v631_v39  ;;  %vm637_vm3 = vweird.f32 %v631_v39 }
  0xe6   :  { %4862 = vrcp.f32 %v631_v39  ;;  %v622_v49 = vand.u32 2147483647, %v612_v10  ;;  %v625_v48 = vor.u32 1.1754944e-38, %v624_v31 }
  0xe7   :  { %v644_v13 = vor.u32 1.1754944e-38, %v643_v1  ;;  %vm642_vm7 = vcmp.eq.f32.partialorder %v641_v40, 8.507059e+37  ;;  %v7723_v40 = vld [vmem:[#allocation20_spill] sm:$0xff] }
  0xe8   :  { %vm623_vm5 = vcmp.eq.f32.partialorder %v622_v49, 8.507059e+37 }
  0xea   :  { %v4859_v24 = vpop.eup %4858 }
  0xeb   :  { %v4861_v0 = vpop.eup %4860  ;;  %v651_v54 = vadd.f32 1.0, %v4859_v24 }
  0xec   :  { %v4863_v22 = vpop.eup %4862  ;;  %v614_v11 = vmul.f32 %v4861_v0, %v612_v10  ;;  %vm619_vm0 = vweird.f32 %v4861_v0 }
  0xed   :  { %v633_v36 = vmul.f32 %v4863_v22, %v631_v39  ;;  %4864 = vrcp.f32 %v651_v54  ;;  %vm638_vm1 = vweird.f32 %v4863_v22  ;;  %vm620_vm4 = vmor %vm618_vm2, %vm619_vm0  ;;  %v663_v31 = vand.u32 2147483648, %v651_v54 }
  0xee   :  { %v615_v47 = vsub.f32 1.0, %v614_v11  ;;  %4866 = vtanh.f32 %v607_v15  ;;  %vm639_vm6 = vmor %vm637_vm3, %vm638_vm1  ;;  %vm657_vm9 = vweird.f32 %v651_v54 }
  0xef   :  { %v634_v26 = vsub.f32 1.0, %v633_v36  ;;  %v664_v49 = vor.u32 1.1754944e-38, %v663_v31  ;;  %v7734_v31 = vld [vmem:[#allocation31_spill] sm:$0xff] }
  0xf0   :  { %v616_v37 = vmul.f32 %v4861_v0, %v615_v47 }
  0xf1   :  { %v635_v63 = vmul.f32 %v4863_v22, %v634_v26 }
  0xf2   :  { %v617_v4 = vadd.f32 %v4861_v0, %v616_v37 }
  0xf3   :  { %v4865_v32 = vpop.eup %4864  ;;  %v636_v24 = vadd.f32 %v4863_v22, %v635_v63 }
  0xf4   :  { %v621_v53 = vsel %vm620_vm4, %v4861_v0, %v617_v4  ;;  %v653_v11 = vmul.f32 %v4865_v32, %v651_v54  ;;  %v4867_v15 = vpop.eup %4866  ;;  %vm658_vm8 = vweird.f32 %v4865_v32  ;;  %v661_v0 = vand.u32 2147483647, %v651_v54  ;;  %v7722_v54 = vld [vmem:[#allocation19_spill] sm:$0xff]  ;;  %v7724_v4 = vld [vmem:[#allocation21_spill] sm:$0xff] }
  0xf5   :  { %v626_v36 = vsel %vm623_vm5, %v625_v48, %v621_v53  ;;  %v640_v47 = vsel %vm639_vm6, %v4863_v22, %v636_v24  ;;  %vm659_vm10 = vmor %vm657_vm9, %vm658_vm8  ;;  %v7725_v48 = vld [vmem:[#allocation22_spill] sm:$0xff]  ;;  %v7726_v24 = vld [vmem:[#allocation23_spill] sm:$0xff] }
  0xf6   :  { %v645_v42 = vsel %vm642_vm7, %v644_v13, %v640_v47  ;;  %v668_v26 = vmul.f32 %v4867_v15, %v626_v36  ;;  %v654_v41 = vsub.f32 1.0, %v653_v11  ;;  %vm662_vm11 = vcmp.eq.f32.partialorder %v661_v0, 8.507059e+37  ;;  %v7727_v11 = vld [vmem:[#allocation24_spill] sm:$0xff]  ;;  %v7728_v15 = vld [vmem:[#allocation25_spill] sm:$0xff]  ;;  %v7729_v36 = vld [vmem:[#allocation26_spill] sm:$0xff] }
  0xf7   :  { %v667_v30 = vmul.f32 0.0, %v645_v42  ;;  %v7720_v42 = vld [vmem:[#allocation17_spill] sm:$0xff]  ;;  %v7730_v47 = vld [vmem:[#allocation27_spill] sm:$0xff]  ;;  %v7735_v0 = vld [vmem:[#allocation32_spill] sm:$0xff] }
  0xf8   :  { %v655_v37 = vmul.f32 %v4865_v32, %v654_v41  ;;  %v7719_v41 = vld [vmem:[#allocation16_spill] sm:$0xff] }
  0xf9   :  { %v5804_v10 = vadd.f32 %v668_v26, %v667_v30  ;;  %v4312_v30 = vld [vmem:[%s7459_s1 + $0x4] sm:$0xf]  ;;  %v7731_v26 = vld [vmem:[#allocation28_spill] sm:$0xff] }
  0xfa   :  { %v656_v39 = vadd.f32 %v4865_v32, %v655_v37  ;;  %v7732_v37 = vld [vmem:[#allocation29_spill] sm:$0xff] }
  0xfb   :  { %4868 = vtanh.f32 %v5804_v10 }
  0xfc   :  { %v660_v1 = vsel %vm659_vm10, %v4865_v32, %v656_v39  ;;  %v7721_v32 = vld [vmem:[#allocation18_spill] sm:$0xff] }
  0xfd   :  { %v665_v22 = vsel %vm662_vm11, %v664_v49, %v660_v1  ;;  %v7733_v39 = vld [vmem:[#allocation30_spill] sm:$0xff]  ;;  %v7736_v1 = vld [vmem:[#allocation33_spill] sm:$0xff] }
  0xfe   :  { %v7737_v49 = vld [vmem:[#allocation34_spill] sm:$0xff] }
 0x101   :  { %v4869_v53 = vpop.eup %4868 }
 0x102   :  { %v671_v13 = vmul.f32 %v4869_v53, %v665_v22  ;;  %v7738_v53 = vld [vmem:[#allocation35_spill] sm:$0xff]  ;;  %v7739_v22 = vld [vmem:[#allocation36_spill] sm:$0xff] }
 0x104   :  { %v674_v63 = vpack.c.bf16 %v671_v13, %v671_v13  ;;  %v7740_v13 = vld [vmem:[#allocation37_spill] sm:$0xff] }
 0x106   :  { %683 = vmatmul.bf16.vlgmr.msra.gmra.mxu0 %v674_v63  ;;  %696 = vmatmul.bf16.vlgmr.msra.gmra.mxu1 %v674_v63 }
 0x107   :  { %709 = vmatmul.bf16.vlgmr.msra.gmra.mxu2 %v674_v63  ;;  %722 = vmatmul.bf16.vlgmr.msra.gmra.mxu3 %v674_v63  ;;  %v7741_v63 = vld [vmem:[#allocation38_spill] sm:$0xff] }
 0x108   :  { %849 = vmatpush.bf16.msra.mxu0 %v5338_v3  ;;  %862 = vmatpush.bf16.msra.mxu1 %v5340_v7 }
 0x109   :  { %875 = vmatpush.bf16.msra.mxu2 %v5342_v8  ;;  %888 = vmatpush.bf16.msra.mxu3 %v5345_v12 }
 0x10c   :  { %850 = vmatpush.bf16.msra.mxu0 %v5349_v16  ;;  %863 = vmatpush.bf16.msra.mxu1 %v5351_v17 }
 0x10d   :  { %876 = vmatpush.bf16.msra.mxu2 %v5354_v21  ;;  %889 = vmatpush.bf16.msra.mxu3 %v5356_v25 }
 0x110   :  { %851 = vmatpush.bf16.msra.mxu0 %v5359_v29  ;;  %864 = vmatpush.bf16.msra.mxu1 %v5363_v33 }
 0x111   :  { %877 = vmatpush.bf16.msra.mxu2 %v5365_v34  ;;  %890 = vmatpush.bf16.msra.mxu3 %v5368_v38 }
 0x114   :  { %852 = vmatpush.bf16.msra.mxu0 %v5371_v44  ;;  %865 = vmatpush.bf16.msra.mxu1 %v5375_v45 }
 0x115   :  { %878 = vmatpush.bf16.msra.mxu2 %v5377_v46  ;;  %891 = vmatpush.bf16.msra.mxu3 %v5380_v50 }
 0x116   :  { %735 = vmatmul.bf16.vlgmr.msrb.gmra.mxu0 %v4312_v30  ;;  %748 = vmatmul.bf16.vlgmr.msrb.gmra.mxu1 %v4312_v30 }
 0x117   :  { %761 = vmatmul.bf16.vlgmr.msrb.gmra.mxu2 %v4312_v30  ;;  %774 = vmatmul.bf16.vlgmr.msrb.gmra.mxu3 %v4312_v30  ;;  %v7742_v30 = vld [vmem:[#allocation39_spill] sm:$0xff] }
 0x118   :  { %853 = vmatpush.bf16.msra.mxu0 %v5383_v56  ;;  %866 = vmatpush.bf16.msra.mxu1 %v5387_v57 }
 0x119   :  { %879 = vmatpush.bf16.msra.mxu2 %v5389_v58  ;;  %892 = vmatpush.bf16.msra.mxu3 %v5392_v62 }
 0x11c   :  { %854 = vmatpush.bf16.msra.mxu0 %v5395_v5  ;;  %867 = vmatpush.bf16.msra.mxu1 %v5399_v6 }
 0x11d   :  { %880 = vmatpush.bf16.msra.mxu2 %v5401_v9  ;;  %893 = vmatpush.bf16.msra.mxu3 %v5404_v14 }
 0x120   :  { %855 = vmatpush.bf16.msra.mxu0 %v5407_v23  ;;  %868 = vmatpush.bf16.msra.mxu1 %v5411_v27 }
 0x121   :  { %881 = vmatpush.bf16.msra.mxu2 %v5413_v28  ;;  %894 = vmatpush.bf16.msra.mxu3 %v5416_v35 }
 0x124   :  { %856 = vmatpush.bf16.msra.mxu0 %v5428_v43  ;;  %869 = vmatpush.bf16.msra.mxu1 %v5441_v51 }
 0x125   :  { %882 = vmatpush.bf16.msra.mxu2 %v5443_v52  ;;  %895 = vmatpush.bf16.msra.mxu3 %v5452_v55 }
 0x128   :  { %901 = vmatpush.bf16.msrb.mxu0 %v5454_v59  ;;  %914 = vmatpush.bf16.msrb.mxu1 %v5456_v60 }
 0x129   :  { %927 = vmatpush.bf16.msrb.mxu2 %v5458_v61  ;;  %940 = vmatpush.bf16.msrb.mxu3 %v5470_v2 }
 0x12c   :  { %902 = vmatpush.bf16.msrb.mxu0 %v5491_v18  ;;  %915 = vmatpush.bf16.msrb.mxu1 %v5495_v19 }
 0x12d   :  { %928 = vmatpush.bf16.msrb.mxu2 %v5497_v20  ;;  %941 = vmatpush.bf16.msrb.mxu3 %v7719_v41 }
 0x130   :  { %903 = vmatpush.bf16.msrb.mxu0 %v7720_v42  ;;  %916 = vmatpush.bf16.msrb.mxu1 %v7721_v32 }
 0x131   :  { %929 = vmatpush.bf16.msrb.mxu2 %v7722_v54  ;;  %942 = vmatpush.bf16.msrb.mxu3 %v7723_v40 }
 0x134   :  { %904 = vmatpush.bf16.msrb.mxu0 %v7724_v4  ;;  %917 = vmatpush.bf16.msrb.mxu1 %v7725_v48  ;;  %v7745_v48 = vld [vmem:[#allocation42_spill] sm:$0xff] }
 0x135   :  { %930 = vmatpush.bf16.msrb.mxu2 %v7726_v24  ;;  %943 = vmatpush.bf16.msrb.mxu3 %v7727_v11  ;;  %v7744_v24 = vld [vmem:[#allocation41_spill] sm:$0xff] }
 0x138   :  { %905 = vmatpush.bf16.msrb.mxu0 %v7728_v15  ;;  %918 = vmatpush.bf16.msrb.mxu1 %v7729_v36 }
 0x139   :  { %931 = vmatpush.bf16.msrb.mxu2 %v7730_v47  ;;  %944 = vmatpush.bf16.msrb.mxu3 %v7731_v26 }
 0x13c   :  { %906 = vmatpush.bf16.msrb.mxu0 %v7732_v37  ;;  %919 = vmatpush.bf16.msrb.mxu1 %v7733_v39  ;;  %v7743_v37 = vld [vmem:[#allocation40_spill] sm:$0xff] }
 0x13d   :  { %932 = vmatpush.bf16.msrb.mxu2 %v7734_v31  ;;  %945 = vmatpush.bf16.msrb.mxu3 %v7735_v0 }
 0x140   :  { %907 = vmatpush.bf16.msrb.mxu0 %v7736_v1  ;;  %920 = vmatpush.bf16.msrb.mxu1 %v7737_v49 }
 0x141   :  { %933 = vmatpush.bf16.msrb.mxu2 %v7738_v53  ;;  %946 = vmatpush.bf16.msrb.mxu3 %v7739_v22 }
 0x144   :  { %908 = vmatpush.bf16.msrb.mxu0 %v7740_v13  ;;  %921 = vmatpush.bf16.msrb.mxu1 %v7741_v63 }
 0x145   :  { %934 = vmatpush.bf16.msrb.mxu2 %v7742_v30  ;;  %947 = vmatpush.bf16.msrb.mxu3 %v7743_v37 }
 0x183   :  { %v684_v39 = vpop.f32.mrf.mxu0  ;;  %v697_v31 = vpop.f32.mrf.mxu1 }
 0x18a   :  { %v710_v26 = vpop.f32.mrf.mxu2  ;;  %v723_v0 = vpop.f32.mrf.mxu3 }
 0x18b   :  { %v686_v47 = vpop.f32.mrf.mxu0  ;;  %v699_v1 = vpop.f32.mrf.mxu1 }
 0x18c   :  { %v7746_v1 = vld [vmem:[#allocation43_spill] sm:$0xff] }
 0x192   :  { %v712_v36 = vpop.f32.mrf.mxu2  ;;  %v725_v49 = vpop.f32.mrf.mxu3 }
 0x193   :  { %v736_v15 = vpop.f32.mrf.mxu0  ;;  %v749_v53 = vpop.f32.mrf.mxu1 }
 0x194   :  { %v737_v11 = vadd.f32 %v736_v15, %v684_v39  ;;  %v750_v22 = vadd.f32 %v749_v53, %v697_v31 }
 0x196   :  { %v779_v13 = vadd.f32 %v737_v11, %v7744_v24  ;;  %v780_v63 = vadd.f32 %v750_v22, %v7745_v48 }
 0x198   :  { %v4313_v4 = vmul.f32 -1.442695, %v779_v13  ;;  %v4314_v30 = vmul.f32 -1.442695, %v780_v63  ;;  %v7747_v63 = vld [vmem:[#allocation44_spill] sm:$0xff] }
 0x19a   :  { %4870 = vpow2.f32 %v4313_v4  ;;  %v762_v37 = vpop.f32.mrf.mxu2  ;;  %v775_v40 = vpop.f32.mrf.mxu3 }
 0x19b   :  { %4872 = vpow2.f32 %v4314_v30  ;;  %v776_v54 = vadd.f32 %v775_v40, %v723_v0  ;;  %v738_v32 = vpop.f32.mrf.mxu0  ;;  %v751_v47 = vpop.f32.mrf.mxu1  ;;  %v763_v53 = vadd.f32 %v762_v37, %v710_v26 }
 0x19d   :  { %v782_v36 = vadd.f32 %v776_v54, %v7746_v1  ;;  %v781_v40 = vadd.f32 %v763_v53, %v7747_v63 }
 0x19f   :  { %v4315_v49 = vmul.f32 -1.442695, %v782_v36 }
 0x1a0   :  { %v4871_v42 = vpop.eup %4870 }
 0x1a1   :  { %v4873_v41 = vpop.eup %4872  ;;  %v786_v15 = vadd.f32 1.0, %v4871_v42  ;;  %4874 = vpow2.f32 %v4315_v49 }
 0x1a2   :  { %v805_v39 = vadd.f32 1.0, %v4873_v41  ;;  %v777_v11 = vpop.f32.mrf.mxu3  ;;  %v764_v31 = vpop.f32.mrf.mxu2 }
 0x1a3   :  { %4876 = vrcp.f32 %v786_v15  ;;  %v798_v36 = vand.u32 2147483648, %v786_v15  ;;  %v796_v49 = vand.u32 2147483647, %v786_v15  ;;  %vm792_vm14 = vweird.f32 %v786_v15 }
 0x1a4   :  { %4878 = vrcp.f32 %v805_v39  ;;  %v817_v42 = vand.u32 2147483648, %v805_v39  ;;  %v815_v26 = vand.u32 2147483647, %v805_v39  ;;  %vm811_vm15 = vweird.f32 %v805_v39 }
 0x1a5   :  { %v799_v53 = vor.u32 1.1754944e-38, %v798_v36  ;;  %vm797_vm2 = vcmp.eq.f32.partialorder %v796_v49, 8.507059e+37 }
 0x1a6   :  { %vm816_vm3 = vcmp.eq.f32.partialorder %v815_v26, 8.507059e+37  ;;  %v7752_v26 = vld [vmem:[#allocation19_spill] sm:$0xff] }
 0x1a7   :  { %v4875_v4 = vpop.eup %4874 }
 0x1a8   :  { %v825_v22 = vadd.f32 1.0, %v4875_v4 }
 0x1a9   :  { %v4877_v13 = vpop.eup %4876 }
 0x1aa   :  { %v4879_v32 = vpop.eup %4878  ;;  %v788_v0 = vmul.f32 %v4877_v13, %v786_v15  ;;  %4880 = vrcp.f32 %v825_v22  ;;  %vm793_vm12 = vweird.f32 %v4877_v13  ;;  %v837_v36 = vand.u32 2147483648, %v825_v22 }
 0x1ab   :  { %v807_v54 = vmul.f32 %v4879_v32, %v805_v39  ;;  %4882 = vtanh.f32 %v781_v40  ;;  %vm812_vm13 = vweird.f32 %v4879_v32  ;;  %vm794_vm0 = vmor %vm792_vm14, %vm793_vm12  ;;  %vm831_vm5 = vweird.f32 %v825_v22 }
 0x1ac   :  { %v789_v30 = vsub.f32 1.0, %v788_v0  ;;  %vm813_vm1 = vmor %vm811_vm15, %vm812_vm13  ;;  %v818_v0 = vor.u32 1.1754944e-38, %v817_v42  ;;  %v838_v49 = vor.u32 1.1754944e-38, %v837_v36  ;;  %v7764_v36 = vld [vmem:[#allocation31_spill] sm:$0xff] }
 0x1ad   :  { %v808_v47 = vsub.f32 1.0, %v807_v54 }
 0x1ae   :  { %v790_v41 = vmul.f32 %v4877_v13, %v789_v30 }
 0x1af   :  { %v809_v11 = vmul.f32 %v4879_v32, %v808_v47 }
 0x1b0   :  { %v4881_v37 = vpop.eup %4880  ;;  %v791_v31 = vadd.f32 %v4877_v13, %v790_v41 }
 0x1b1   :  { %v810_v4 = vadd.f32 %v4879_v32, %v809_v11  ;;  %v827_v63 = vmul.f32 %v4881_v37, %v825_v22  ;;  %v4883_v40 = vpop.eup %4882  ;;  %vm832_vm4 = vweird.f32 %v4881_v37 }
 0x1b2   :  { %v795_v54 = vsel %vm794_vm0, %v4877_v13, %v791_v31  ;;  %v835_v13 = vand.u32 2147483647, %v825_v22  ;;  %vm833_vm6 = vmor %vm831_vm5, %vm832_vm4  ;;  %v7751_v22 = vld [vmem:[#allocation18_spill] sm:$0xff]  ;;  %v7754_v31 = vld [vmem:[#allocation21_spill] sm:$0xff] }
 0x1b3   :  { %v800_v1 = vsel %vm797_vm2, %v799_v53, %v795_v54  ;;  %v814_v30 = vsel %vm813_vm1, %v4879_v32, %v810_v4  ;;  %v828_v48 = vsub.f32 1.0, %v827_v63  ;;  %v7755_v53 = vld [vmem:[#allocation22_spill] sm:$0xff]  ;;  %v7756_v4 = vld [vmem:[#allocation23_spill] sm:$0xff]  ;;  %v7758_v54 = vld [vmem:[#allocation25_spill] sm:$0xff] }
 0x1b4   :  { %v819_v47 = vsel %vm816_vm3, %v818_v0, %v814_v30  ;;  %v842_v24 = vmul.f32 %v4883_v40, %v800_v1  ;;  %vm836_vm7 = vcmp.eq.f32.partialorder %v835_v13, 8.507059e+37  ;;  %v7757_v0 = vld [vmem:[#allocation24_spill] sm:$0xff]  ;;  %v7759_v40 = vld [vmem:[#allocation26_spill] sm:$0xff]  ;;  %v7760_v30 = vld [vmem:[#allocation27_spill] sm:$0xff] }
 0x1b5   :  { %v841_v20 = vmul.f32 %v819_v47, %v5804_v10  ;;  %v829_v41 = vmul.f32 %v4881_v37, %v828_v48  ;;  %v7748_v10 = vld [vmem:[#allocation15_spill] sm:$0xff]  ;;  %v7749_v48 = vld [vmem:[#allocation16_spill] sm:$0xff] }
 0x1b6   :  { %v7761_v47 = vld [vmem:[#allocation28_spill] sm:$0xff] }
 0x1b7   :  { %v5879_v15 = vadd.f32 %v842_v24, %v841_v20  ;;  %v830_v39 = vadd.f32 %v4881_v37, %v829_v41  ;;  %v4316_v20 = vld [vmem:[%s7459_s1 + $0x8] sm:$0xf]  ;;  %v7750_v24 = vld [vmem:[#allocation17_spill] sm:$0xff] }
 0x1b8   :  { %v7762_v41 = vld [vmem:[#allocation29_spill] sm:$0xff]  ;;  %v7765_v13 = vld [vmem:[#allocation32_spill] sm:$0xff] }
 0x1b9   :  { %4884 = vtanh.f32 %v5879_v15  ;;  %v834_v42 = vsel %vm833_vm6, %v4881_v37, %v830_v39  ;;  %v7753_v37 = vld [vmem:[#allocation20_spill] sm:$0xff]  ;;  %v7763_v39 = vld [vmem:[#allocation30_spill] sm:$0xff] }
 0x1ba   :  { %v839_v63 = vsel %vm836_vm7, %v838_v49, %v834_v42  ;;  %v7766_v42 = vld [vmem:[#allocation33_spill] sm:$0xff]  ;;  %v7767_v49 = vld [vmem:[#allocation34_spill] sm:$0xff] }
 0x1bf   :  { %v4885_v32 = vpop.eup %4884 }
 0x1c0   :  { %v845_v11 = vmul.f32 %v4885_v32, %v839_v63  ;;  %v7768_v32 = vld [vmem:[#allocation35_spill] sm:$0xff]  ;;  %v7769_v63 = vld [vmem:[#allocation36_spill] sm:$0xff] }
 0x1c2   :  { %v848_v1 = vpack.c.bf16 %v845_v11, %v845_v11  ;;  %v7770_v11 = vld [vmem:[#allocation37_spill] sm:$0xff] }
 0x1c4   :  { %857 = vmatmul.bf16.vlgmr.msra.gmra.mxu0 %v848_v1  ;;  %870 = vmatmul.bf16.vlgmr.msra.gmra.mxu1 %v848_v1 }
 0x1c5   :  { %883 = vmatmul.bf16.vlgmr.msra.gmra.mxu2 %v848_v1  ;;  %896 = vmatmul.bf16.vlgmr.msra.gmra.mxu3 %v848_v1  ;;  %v7771_v1 = vld [vmem:[#allocation38_spill] sm:$0xff] }
 0x1c6   :  { %1023 = vmatpush.bf16.msra.mxu0 %v5338_v3  ;;  %1036 = vmatpush.bf16.msra.mxu1 %v5340_v7 }
 0x1c7   :  { %1049 = vmatpush.bf16.msra.mxu2 %v5342_v8  ;;  %1062 = vmatpush.bf16.msra.mxu3 %v5345_v12 }
 0x1ca   :  { %1024 = vmatpush.bf16.msra.mxu0 %v5349_v16  ;;  %1037 = vmatpush.bf16.msra.mxu1 %v5351_v17 }
 0x1cb   :  { %1050 = vmatpush.bf16.msra.mxu2 %v5354_v21  ;;  %1063 = vmatpush.bf16.msra.mxu3 %v5356_v25 }
 0x1ce   :  { %1025 = vmatpush.bf16.msra.mxu0 %v5359_v29  ;;  %1038 = vmatpush.bf16.msra.mxu1 %v5363_v33 }
 0x1cf   :  { %1051 = vmatpush.bf16.msra.mxu2 %v5365_v34  ;;  %1064 = vmatpush.bf16.msra.mxu3 %v5368_v38 }
 0x1d2   :  { %1026 = vmatpush.bf16.msra.mxu0 %v5371_v44  ;;  %1039 = vmatpush.bf16.msra.mxu1 %v5375_v45 }
 0x1d3   :  { %1052 = vmatpush.bf16.msra.mxu2 %v5377_v46  ;;  %1065 = vmatpush.bf16.msra.mxu3 %v5380_v50 }
 0x1d4   :  { %909 = vmatmul.bf16.vlgmr.msrb.gmra.mxu0 %v4316_v20  ;;  %922 = vmatmul.bf16.vlgmr.msrb.gmra.mxu1 %v4316_v20 }
 0x1d5   :  { %935 = vmatmul.bf16.vlgmr.msrb.gmra.mxu2 %v4316_v20  ;;  %948 = vmatmul.bf16.vlgmr.msrb.gmra.mxu3 %v4316_v20  ;;  %v7772_v20 = vld [vmem:[#allocation39_spill] sm:$0xff] }
 0x1d6   :  { %1027 = vmatpush.bf16.msra.mxu0 %v5383_v56  ;;  %1040 = vmatpush.bf16.msra.mxu1 %v5387_v57 }
 0x1d7   :  { %1053 = vmatpush.bf16.msra.mxu2 %v5389_v58  ;;  %1066 = vmatpush.bf16.msra.mxu3 %v5392_v62 }
 0x1da   :  { %1028 = vmatpush.bf16.msra.mxu0 %v5395_v5  ;;  %1041 = vmatpush.bf16.msra.mxu1 %v5399_v6 }
 0x1db   :  { %1054 = vmatpush.bf16.msra.mxu2 %v5401_v9  ;;  %1067 = vmatpush.bf16.msra.mxu3 %v5404_v14 }
 0x1de   :  { %1029 = vmatpush.bf16.msra.mxu0 %v5407_v23  ;;  %1042 = vmatpush.bf16.msra.mxu1 %v5411_v27 }
 0x1df   :  { %1055 = vmatpush.bf16.msra.mxu2 %v5413_v28  ;;  %1068 = vmatpush.bf16.msra.mxu3 %v5416_v35 }
 0x1e2   :  { %1030 = vmatpush.bf16.msra.mxu0 %v5428_v43  ;;  %1043 = vmatpush.bf16.msra.mxu1 %v5441_v51 }
 0x1e3   :  { %1056 = vmatpush.bf16.msra.mxu2 %v5443_v52  ;;  %1069 = vmatpush.bf16.msra.mxu3 %v5452_v55 }
 0x1e6   :  { %1075 = vmatpush.bf16.msrb.mxu0 %v5454_v59  ;;  %1088 = vmatpush.bf16.msrb.mxu1 %v5456_v60 }
 0x1e7   :  { %1101 = vmatpush.bf16.msrb.mxu2 %v5458_v61  ;;  %1114 = vmatpush.bf16.msrb.mxu3 %v5470_v2 }
 0x1ea   :  { %1076 = vmatpush.bf16.msrb.mxu0 %v5491_v18  ;;  %1089 = vmatpush.bf16.msrb.mxu1 %v5495_v19 }
 0x1eb   :  { %1102 = vmatpush.bf16.msrb.mxu2 %v7748_v10  ;;  %1115 = vmatpush.bf16.msrb.mxu3 %v7749_v48 }
 0x1ee   :  { %1077 = vmatpush.bf16.msrb.mxu0 %v7750_v24  ;;  %1090 = vmatpush.bf16.msrb.mxu1 %v7751_v22 }
 0x1ef   :  { %1103 = vmatpush.bf16.msrb.mxu2 %v7752_v26  ;;  %1116 = vmatpush.bf16.msrb.mxu3 %v7753_v37 }
 0x1f2   :  { %1078 = vmatpush.bf16.msrb.mxu0 %v7754_v31  ;;  %1091 = vmatpush.bf16.msrb.mxu1 %v7755_v53  ;;  %v7775_v53 = vld [vmem:[#allocation42_spill] sm:$0xff] }
 0x1f3   :  { %1104 = vmatpush.bf16.msrb.mxu2 %v7756_v4  ;;  %1117 = vmatpush.bf16.msrb.mxu3 %v7757_v0  ;;  %v7774_v4 = vld [vmem:[#allocation41_spill] sm:$0xff] }
 0x1f6   :  { %1079 = vmatpush.bf16.msrb.mxu0 %v7758_v54  ;;  %1092 = vmatpush.bf16.msrb.mxu1 %v7759_v40 }
 0x1f7   :  { %1105 = vmatpush.bf16.msrb.mxu2 %v7760_v30  ;;  %1118 = vmatpush.bf16.msrb.mxu3 %v7761_v47 }
 0x1fa   :  { %1080 = vmatpush.bf16.msrb.mxu0 %v7762_v41  ;;  %1093 = vmatpush.bf16.msrb.mxu1 %v7763_v39  ;;  %v7773_v41 = vld [vmem:[#allocation40_spill] sm:$0xff] }
 0x1fb   :  { %1106 = vmatpush.bf16.msrb.mxu2 %v7764_v36  ;;  %1119 = vmatpush.bf16.msrb.mxu3 %v7765_v13 }
 0x1fe   :  { %1081 = vmatpush.bf16.msrb.mxu0 %v7766_v42  ;;  %1094 = vmatpush.bf16.msrb.mxu1 %v7767_v49 }
 0x1ff   :  { %1107 = vmatpush.bf16.msrb.mxu2 %v7768_v32  ;;  %1120 = vmatpush.bf16.msrb.mxu3 %v7769_v63 }
 0x202   :  { %1082 = vmatpush.bf16.msrb.mxu0 %v7770_v11  ;;  %1095 = vmatpush.bf16.msrb.mxu1 %v7771_v1 }
 0x203   :  { %1108 = vmatpush.bf16.msrb.mxu2 %v7772_v20  ;;  %1121 = vmatpush.bf16.msrb.mxu3 %v7773_v41 }
 0x241   :  { %v858_v39 = vpop.f32.mrf.mxu0  ;;  %v871_v36 = vpop.f32.mrf.mxu1 }
 0x248   :  { %v884_v47 = vpop.f32.mrf.mxu2  ;;  %v897_v13 = vpop.f32.mrf.mxu3 }
 0x249   :  { %v860_v30 = vpop.f32.mrf.mxu0  ;;  %v873_v42 = vpop.f32.mrf.mxu1 }
 0x24a   :  { %v7776_v42 = vld [vmem:[#allocation43_spill] sm:$0xff] }
 0x250   :  { %v886_v40 = vpop.f32.mrf.mxu2  ;;  %v899_v49 = vpop.f32.mrf.mxu3 }
 0x251   :  { %v910_v54 = vpop.f32.mrf.mxu0  ;;  %v923_v32 = vpop.f32.mrf.mxu1 }
 0x252   :  { %v911_v0 = vadd.f32 %v910_v54, %v858_v39  ;;  %v924_v63 = vadd.f32 %v923_v32, %v871_v36 }
 0x254   :  { %v953_v11 = vadd.f32 %v911_v0, %v7774_v4  ;;  %v954_v1 = vadd.f32 %v924_v63, %v7775_v53 }
 0x256   :  { %v4317_v31 = vmul.f32 -1.442695, %v953_v11  ;;  %v4318_v20 = vmul.f32 -1.442695, %v954_v1  ;;  %v7777_v1 = vld [vmem:[#allocation44_spill] sm:$0xff] }
 0x258   :  { %4886 = vpow2.f32 %v4317_v31  ;;  %v936_v41 = vpop.f32.mrf.mxu2  ;;  %v949_v37 = vpop.f32.mrf.mxu3 }
 0x259   :  { %4888 = vpow2.f32 %v4318_v20  ;;  %v950_v26 = vadd.f32 %v949_v37, %v897_v13  ;;  %v912_v22 = vpop.f32.mrf.mxu0  ;;  %v925_v30 = vpop.f32.mrf.mxu1  ;;  %v937_v32 = vadd.f32 %v936_v41, %v884_v47 }
 0x25b   :  { %v956_v40 = vadd.f32 %v950_v26, %v7776_v42  ;;  %v955_v37 = vadd.f32 %v937_v32, %v7777_v1 }
 0x25d   :  { %v4319_v49 = vmul.f32 -1.442695, %v956_v40 }
 0x25e   :  { %v4887_v24 = vpop.eup %4886 }
 0x25f   :  { %v4889_v48 = vpop.eup %4888  ;;  %v960_v54 = vadd.f32 1.0, %v4887_v24  ;;  %4890 = vpow2.f32 %v4319_v49 }
 0x260   :  { %v979_v39 = vadd.f32 1.0, %v4889_v48  ;;  %v951_v0 = vpop.f32.mrf.mxu3  ;;  %v938_v36 = vpop.f32.mrf.mxu2 }
 0x261   :  { %4892 = vrcp.f32 %v960_v54  ;;  %v972_v40 = vand.u32 2147483648, %v960_v54  ;;  %v970_v49 = vand.u32 2147483647, %v960_v54  ;;  %vm966_vm10 = vweird.f32 %v960_v54 }
 0x262   :  { %4894 = vrcp.f32 %v979_v39  ;;  %v991_v24 = vand.u32 2147483648, %v979_v39  ;;  %v989_v47 = vand.u32 2147483647, %v979_v39  ;;  %vm985_vm11 = vweird.f32 %v979_v39 }
 0x263   :  { %v973_v32 = vor.u32 1.1754944e-38, %v972_v40  ;;  %vm971_vm14 = vcmp.eq.f32.partialorder %v970_v49, 8.507059e+37 }
 0x264   :  { %vm990_vm15 = vcmp.eq.f32.partialorder %v989_v47, 8.507059e+37  ;;  %v7782_v47 = vld [vmem:[#allocation19_spill] sm:$0xff] }
 0x265   :  { %v4891_v31 = vpop.eup %4890 }
 0x266   :  { %v999_v63 = vadd.f32 1.0, %v4891_v31 }
 0x267   :  { %v4893_v11 = vpop.eup %4892 }
 0x268   :  { %v4895_v22 = vpop.eup %4894  ;;  %v962_v13 = vmul.f32 %v4893_v11, %v960_v54  ;;  %4896 = vrcp.f32 %v999_v63  ;;  %vm967_vm8 = vweird.f32 %v4893_v11  ;;  %v1011_v40 = vand.u32 2147483648, %v999_v63 }
 0x269   :  { %v981_v26 = vmul.f32 %v4895_v22, %v979_v39  ;;  %4898 = vtanh.f32 %v955_v37  ;;  %vm986_vm9 = vweird.f32 %v4895_v22  ;;  %vm968_vm12 = vmor %vm966_vm10, %vm967_vm8  ;;  %vm1005_vm1 = vweird.f32 %v999_v63 }
 0x26a   :  { %v963_v20 = vsub.f32 1.0, %v962_v13  ;;  %vm987_vm13 = vmor %vm985_vm11, %vm986_vm9  ;;  %v992_v13 = vor.u32 1.1754944e-38, %v991_v24  ;;  %v1012_v49 = vor.u32 1.1754944e-38, %v1011_v40  ;;  %v7794_v40 = vld [vmem:[#allocation31_spill] sm:$0xff] }
 0x26b   :  { %v982_v30 = vsub.f32 1.0, %v981_v26 }
 0x26c   :  { %v964_v48 = vmul.f32 %v4893_v11, %v963_v20 }
 0x26d   :  { %v983_v0 = vmul.f32 %v4895_v22, %v982_v30 }
 0x26e   :  { %v4897_v41 = vpop.eup %4896  ;;  %v965_v36 = vadd.f32 %v4893_v11, %v964_v48 }
 0x26f   :  { %v984_v31 = vadd.f32 %v4895_v22, %v983_v0  ;;  %v1001_v1 = vmul.f32 %v4897_v41, %v999_v63  ;;  %v4899_v37 = vpop.eup %4898  ;;  %vm1006_vm0 = vweird.f32 %v4897_v41 }
 0x270   :  { %v969_v26 = vsel %vm968_vm12, %v4893_v11, %v965_v36  ;;  %v1009_v11 = vand.u32 2147483647, %v999_v63  ;;  %vm1007_vm2 = vmor %vm1005_vm1, %vm1006_vm0  ;;  %v7781_v63 = vld [vmem:[#allocation18_spill] sm:$0xff]  ;;  %v7784_v36 = vld [vmem:[#allocation21_spill] sm:$0xff] }
 0x271   :  { %v974_v42 = vsel %vm971_vm14, %v973_v32, %v969_v26  ;;  %v988_v20 = vsel %vm987_vm13, %v4895_v22, %v984_v31  ;;  %v1002_v53 = vsub.f32 1.0, %v1001_v1  ;;  %v7785_v32 = vld [vmem:[#allocation22_spill] sm:$0xff]  ;;  %v7786_v31 = vld [vmem:[#allocation23_spill] sm:$0xff]  ;;  %v7788_v26 = vld [vmem:[#allocation25_spill] sm:$0xff] }
 0x272   :  { %v993_v30 = vsel %vm990_vm15, %v992_v13, %v988_v20  ;;  %v1016_v4 = vmul.f32 %v4899_v37, %v974_v42  ;;  %vm1010_vm3 = vcmp.eq.f32.partialorder %v1009_v11, 8.507059e+37  ;;  %v7787_v13 = vld [vmem:[#allocation24_spill] sm:$0xff]  ;;  %v7789_v37 = vld [vmem:[#allocation26_spill] sm:$0xff]  ;;  %v7790_v20 = vld [vmem:[#allocation27_spill] sm:$0xff] }
 0x273   :  { %v1015_v10 = vmul.f32 %v993_v30, %v5879_v15  ;;  %v1003_v48 = vmul.f32 %v4897_v41, %v1002_v53  ;;  %v4320_v15 = vld [vmem:[%s7459_s1 + $0xc] sm:$0xf] }
 0x274   :  { %v7779_v53 = vld [vmem:[#allocation16_spill] sm:$0xff] }
 0x275   :  { %v5954_v54 = vadd.f32 %v1016_v4, %v1015_v10  ;;  %v1004_v39 = vadd.f32 %v4897_v41, %v1003_v48  ;;  %v7778_v10 = vld [vmem:[#allocation15_spill] sm:$0xff]  ;;  %v7780_v4 = vld [vmem:[#allocation17_spill] sm:$0xff]  ;;  %v7791_v30 = vld [vmem:[#allocation28_spill] sm:$0xff] }
 0x276   :  { %v7792_v48 = vld [vmem:[#allocation29_spill] sm:$0xff]  ;;  %v7795_v11 = vld [vmem:[#allocation32_spill] sm:$0xff] }
 0x277   :  { %4900 = vtanh.f32 %v5954_v54  ;;  %v1008_v24 = vsel %vm1007_vm2, %v4897_v41, %v1004_v39  ;;  %v7783_v41 = vld [vmem:[#allocation20_spill] sm:$0xff]  ;;  %v7793_v39 = vld [vmem:[#allocation30_spill] sm:$0xff] }
 0x278   :  { %v1013_v1 = vsel %vm1010_vm3, %v1012_v49, %v1008_v24  ;;  %v7796_v24 = vld [vmem:[#allocation33_spill] sm:$0xff]  ;;  %v7797_v49 = vld [vmem:[#allocation34_spill] sm:$0xff] }
 0x27d   :  { %v4901_v22 = vpop.eup %4900 }
 0x27e   :  { %v1019_v0 = vmul.f32 %v4901_v22, %v1013_v1  ;;  %v7798_v22 = vld [vmem:[#allocation35_spill] sm:$0xff]  ;;  %v7799_v1 = vld [vmem:[#allocation36_spill] sm:$0xff] }
 0x280   :  { %v1022_v42 = vpack.c.bf16 %v1019_v0, %v1019_v0  ;;  %v7800_v0 = vld [vmem:[#allocation37_spill] sm:$0xff] }
 0x282   :  { %1031 = vmatmul.bf16.vlgmr.msra.gmra.mxu0 %v1022_v42  ;;  %1044 = vmatmul.bf16.vlgmr.msra.gmra.mxu1 %v1022_v42 }
 0x283   :  { %1057 = vmatmul.bf16.vlgmr.msra.gmra.mxu2 %v1022_v42  ;;  %1070 = vmatmul.bf16.vlgmr.msra.gmra.mxu3 %v1022_v42  ;;  %v7801_v42 = vld [vmem:[#allocation38_spill] sm:$0xff] }
 0x284   :  { %1197 = vmatpush.bf16.msra.mxu0 %v5338_v3  ;;  %1210 = vmatpush.bf16.msra.mxu1 %v5340_v7 }
 0x285   :  { %1223 = vmatpush.bf16.msra.mxu2 %v5342_v8  ;;  %1236 = vmatpush.bf16.msra.mxu3 %v5345_v12 }
 0x288   :  { %1198 = vmatpush.bf16.msra.mxu0 %v5349_v16  ;;  %1211 = vmatpush.bf16.msra.mxu1 %v5351_v17 }
 0x289   :  { %1224 = vmatpush.bf16.msra.mxu2 %v5354_v21  ;;  %1237 = vmatpush.bf16.msra.mxu3 %v5356_v25 }
 0x28c   :  { %1199 = vmatpush.bf16.msra.mxu0 %v5359_v29  ;;  %1212 = vmatpush.bf16.msra.mxu1 %v5363_v33 }
 0x28d   :  { %1225 = vmatpush.bf16.msra.mxu2 %v5365_v34  ;;  %1238 = vmatpush.bf16.msra.mxu3 %v5368_v38 }
 0x290   :  { %1200 = vmatpush.bf16.msra.mxu0 %v5371_v44  ;;  %1213 = vmatpush.bf16.msra.mxu1 %v5375_v45 }
 0x291   :  { %1226 = vmatpush.bf16.msra.mxu2 %v5377_v46  ;;  %1239 = vmatpush.bf16.msra.mxu3 %v5380_v50 }
 0x292   :  { %1083 = vmatmul.bf16.vlgmr.msrb.gmra.mxu0 %v4320_v15  ;;  %1096 = vmatmul.bf16.vlgmr.msrb.gmra.mxu1 %v4320_v15 }
 0x293   :  { %1109 = vmatmul.bf16.vlgmr.msrb.gmra.mxu2 %v4320_v15  ;;  %1122 = vmatmul.bf16.vlgmr.msrb.gmra.mxu3 %v4320_v15  ;;  %v7802_v15 = vld [vmem:[#allocation39_spill] sm:$0xff] }
 0x294   :  { %1201 = vmatpush.bf16.msra.mxu0 %v5383_v56  ;;  %1214 = vmatpush.bf16.msra.mxu1 %v5387_v57 }
 0x295   :  { %1227 = vmatpush.bf16.msra.mxu2 %v5389_v58  ;;  %1240 = vmatpush.bf16.msra.mxu3 %v5392_v62 }
 0x298   :  { %1202 = vmatpush.bf16.msra.mxu0 %v5395_v5  ;;  %1215 = vmatpush.bf16.msra.mxu1 %v5399_v6 }
 0x299   :  { %1228 = vmatpush.bf16.msra.mxu2 %v5401_v9  ;;  %1241 = vmatpush.bf16.msra.mxu3 %v5404_v14 }
 0x29c   :  { %1203 = vmatpush.bf16.msra.mxu0 %v5407_v23  ;;  %1216 = vmatpush.bf16.msra.mxu1 %v5411_v27 }
 0x29d   :  { %1229 = vmatpush.bf16.msra.mxu2 %v5413_v28  ;;  %1242 = vmatpush.bf16.msra.mxu3 %v5416_v35 }
 0x2a0   :  { %1204 = vmatpush.bf16.msra.mxu0 %v5428_v43  ;;  %1217 = vmatpush.bf16.msra.mxu1 %v5441_v51 }
 0x2a1   :  { %1230 = vmatpush.bf16.msra.mxu2 %v5443_v52  ;;  %1243 = vmatpush.bf16.msra.mxu3 %v5452_v55 }
 0x2a4   :  { %1249 = vmatpush.bf16.msrb.mxu0 %v5454_v59  ;;  %1262 = vmatpush.bf16.msrb.mxu1 %v5456_v60 }
 0x2a5   :  { %1275 = vmatpush.bf16.msrb.mxu2 %v5458_v61  ;;  %1288 = vmatpush.bf16.msrb.mxu3 %v5470_v2 }
 0x2a8   :  { %1250 = vmatpush.bf16.msrb.mxu0 %v5491_v18  ;;  %1263 = vmatpush.bf16.msrb.mxu1 %v5495_v19 }
 0x2a9   :  { %1276 = vmatpush.bf16.msrb.mxu2 %v7778_v10  ;;  %1289 = vmatpush.bf16.msrb.mxu3 %v7779_v53 }
 0x2ac   :  { %1251 = vmatpush.bf16.msrb.mxu0 %v7780_v4  ;;  %1264 = vmatpush.bf16.msrb.mxu1 %v7781_v63 }
 0x2ad   :  { %1277 = vmatpush.bf16.msrb.mxu2 %v7782_v47  ;;  %1290 = vmatpush.bf16.msrb.mxu3 %v7783_v41 }
 0x2b0   :  { %1252 = vmatpush.bf16.msrb.mxu0 %v7784_v36  ;;  %1265 = vmatpush.bf16.msrb.mxu1 %v7785_v32  ;;  %v7805_v32 = vld [vmem:[#allocation42_spill] sm:$0xff] }
 0x2b1   :  { %1278 = vmatpush.bf16.msrb.mxu2 %v7786_v31  ;;  %1291 = vmatpush.bf16.msrb.mxu3 %v7787_v13  ;;  %v7804_v31 = vld [vmem:[#allocation41_spill] sm:$0xff] }
 0x2b4   :  { %1253 = vmatpush.bf16.msrb.mxu0 %v7788_v26  ;;  %1266 = vmatpush.bf16.msrb.mxu1 %v7789_v37 }
 0x2b5   :  { %1279 = vmatpush.bf16.msrb.mxu2 %v7790_v20  ;;  %1292 = vmatpush.bf16.msrb.mxu3 %v7791_v30 }
 0x2b8   :  { %1254 = vmatpush.bf16.msrb.mxu0 %v7792_v48  ;;  %1267 = vmatpush.bf16.msrb.mxu1 %v7793_v39  ;;  %v7803_v48 = vld [vmem:[#allocation40_spill] sm:$0xff] }
 0x2b9   :  { %1280 = vmatpush.bf16.msrb.mxu2 %v7794_v40  ;;  %1293 = vmatpush.bf16.msrb.mxu3 %v7795_v11 }
 0x2bc   :  { %1255 = vmatpush.bf16.msrb.mxu0 %v7796_v24  ;;  %1268 = vmatpush.bf16.msrb.mxu1 %v7797_v49 }
 0x2bd   :  { %1281 = vmatpush.bf16.msrb.mxu2 %v7798_v22  ;;  %1294 = vmatpush.bf16.msrb.mxu3 %v7799_v1 }
 0x2c0   :  { %1256 = vmatpush.bf16.msrb.mxu0 %v7800_v0  ;;  %1269 = vmatpush.bf16.msrb.mxu1 %v7801_v42 }
 0x2c1   :  { %1282 = vmatpush.bf16.msrb.mxu2 %v7802_v15  ;;  %1295 = vmatpush.bf16.msrb.mxu3 %v7803_v48 }
 0x2ff   :  { %v1032_v39 = vpop.f32.mrf.mxu0  ;;  %v1045_v40 = vpop.f32.mrf.mxu1 }
 0x306   :  { %v1058_v30 = vpop.f32.mrf.mxu2  ;;  %v1071_v11 = vpop.f32.mrf.mxu3 }
 0x307   :  { %v1034_v20 = vpop.f32.mrf.mxu0  ;;  %v1047_v24 = vpop.f32.mrf.mxu1 }
 0x308   :  { %v7806_v24 = vld [vmem:[#allocation43_spill] sm:$0xff] }
 0x30e   :  { %v1060_v37 = vpop.f32.mrf.mxu2  ;;  %v1073_v49 = vpop.f32.mrf.mxu3 }
 0x30f   :  { %v1084_v26 = vpop.f32.mrf.mxu0  ;;  %v1097_v22 = vpop.f32.mrf.mxu1 }
 0x310   :  { %v1085_v13 = vadd.f32 %v1084_v26, %v1032_v39  ;;  %v1098_v1 = vadd.f32 %v1097_v22, %v1045_v40 }
 0x312   :  { %v1127_v0 = vadd.f32 %v1085_v13, %v7804_v31  ;;  %v1128_v42 = vadd.f32 %v1098_v1, %v7805_v32 }
 0x314   :  { %v4321_v36 = vmul.f32 -1.442695, %v1127_v0  ;;  %v4322_v15 = vmul.f32 -1.442695, %v1128_v42  ;;  %v7807_v42 = vld [vmem:[#allocation44_spill] sm:$0xff] }
 0x316   :  { %4902 = vpow2.f32 %v4321_v36  ;;  %v1110_v48 = vpop.f32.mrf.mxu2  ;;  %v1123_v41 = vpop.f32.mrf.mxu3 }
 0x317   :  { %4904 = vpow2.f32 %v4322_v15  ;;  %v1124_v47 = vadd.f32 %v1123_v41, %v1071_v11  ;;  %v1086_v63 = vpop.f32.mrf.mxu0  ;;  %v1099_v20 = vpop.f32.mrf.mxu1  ;;  %v1111_v22 = vadd.f32 %v1110_v48, %v1058_v30 }
 0x319   :  { %v1130_v37 = vadd.f32 %v1124_v47, %v7806_v24  ;;  %v1129_v41 = vadd.f32 %v1111_v22, %v7807_v42 }
 0x31b   :  { %v4323_v49 = vmul.f32 -1.442695, %v1130_v37 }
 0x31c   :  { %v4903_v4 = vpop.eup %4902 }
 0x31d   :  { %v4905_v53 = vpop.eup %4904  ;;  %v1134_v26 = vadd.f32 1.0, %v4903_v4  ;;  %4906 = vpow2.f32 %v4323_v49 }
 0x31e   :  { %v1153_v39 = vadd.f32 1.0, %v4905_v53  ;;  %v1125_v13 = vpop.f32.mrf.mxu3  ;;  %v1112_v40 = vpop.f32.mrf.mxu2 }
 0x31f   :  { %4908 = vrcp.f32 %v1134_v26  ;;  %v1146_v37 = vand.u32 2147483648, %v1134_v26  ;;  %v1144_v49 = vand.u32 2147483647, %v1134_v26  ;;  %vm1140_vm6 = vweird.f32 %v1134_v26 }
 0x320   :  { %4910 = vrcp.f32 %v1153_v39  ;;  %v1165_v4 = vand.u32 2147483648, %v1153_v39  ;;  %v1163_v30 = vand.u32 2147483647, %v1153_v39  ;;  %vm1159_vm7 = vweird.f32 %v1153_v39 }
 0x321   :  { %v1147_v22 = vor.u32 1.1754944e-38, %v1146_v37  ;;  %vm1145_vm10 = vcmp.eq.f32.partialorder %v1144_v49, 8.507059e+37 }
 0x322   :  { %vm1164_vm11 = vcmp.eq.f32.partialorder %v1163_v30, 8.507059e+37  ;;  %v7812_v30 = vld [vmem:[#allocation19_spill] sm:$0xff] }
 0x323   :  { %v4907_v36 = vpop.eup %4906 }
 0x324   :  { %v1173_v1 = vadd.f32 1.0, %v4907_v36 }
 0x325   :  { %v4909_v0 = vpop.eup %4908 }
 0x326   :  { %v4911_v63 = vpop.eup %4910  ;;  %v1136_v11 = vmul.f32 %v4909_v0, %v1134_v26  ;;  %4912 = vrcp.f32 %v1173_v1  ;;  %vm1141_vm4 = vweird.f32 %v4909_v0  ;;  %v1185_v37 = vand.u32 2147483648, %v1173_v1 }
 0x327   :  { %v1155_v47 = vmul.f32 %v4911_v63, %v1153_v39  ;;  %4914 = vtanh.f32 %v1129_v41  ;;  %vm1160_vm5 = vweird.f32 %v4911_v63  ;;  %vm1142_vm8 = vmor %vm1140_vm6, %vm1141_vm4  ;;  %vm1179_vm13 = vweird.f32 %v1173_v1 }
 0x328   :  { %v1137_v15 = vsub.f32 1.0, %v1136_v11  ;;  %vm1161_vm9 = vmor %vm1159_vm7, %vm1160_vm5  ;;  %v1166_v11 = vor.u32 1.1754944e-38, %v1165_v4  ;;  %v1186_v49 = vor.u32 1.1754944e-38, %v1185_v37  ;;  %v7824_v37 = vld [vmem:[#allocation31_spill] sm:$0xff] }
 0x329   :  { %v1156_v20 = vsub.f32 1.0, %v1155_v47 }
 0x32a   :  { %v1138_v53 = vmul.f32 %v4909_v0, %v1137_v15 }
 0x32b   :  { %v1157_v13 = vmul.f32 %v4911_v63, %v1156_v20 }
 0x32c   :  { %v4913_v48 = vpop.eup %4912  ;;  %v1139_v40 = vadd.f32 %v4909_v0, %v1138_v53 }
 0x32d   :  { %v1158_v36 = vadd.f32 %v4911_v63, %v1157_v13  ;;  %v1175_v42 = vmul.f32 %v4913_v48, %v1173_v1  ;;  %v4915_v41 = vpop.eup %4914  ;;  %vm1180_vm12 = vweird.f32 %v4913_v48 }
 0x32e   :  { %v1143_v47 = vsel %vm1142_vm8, %v4909_v0, %v1139_v40  ;;  %v1183_v0 = vand.u32 2147483647, %v1173_v1  ;;  %vm1181_vm14 = vmor %vm1179_vm13, %vm1180_vm12  ;;  %v7811_v1 = vld [vmem:[#allocation18_spill] sm:$0xff]  ;;  %v7814_v40 = vld [vmem:[#allocation21_spill] sm:$0xff] }
 0x32f   :  { %v1148_v24 = vsel %vm1145_vm10, %v1147_v22, %v1143_v47  ;;  %v1162_v15 = vsel %vm1161_vm9, %v4911_v63, %v1158_v36  ;;  %v1176_v32 = vsub.f32 1.0, %v1175_v42  ;;  %v7815_v22 = vld [vmem:[#allocation22_spill] sm:$0xff]  ;;  %v7816_v36 = vld [vmem:[#allocation23_spill] sm:$0xff]  ;;  %v7818_v47 = vld [vmem:[#allocation25_spill] sm:$0xff] }
 0x330   :  { %v1167_v20 = vsel %vm1164_vm11, %v1166_v11, %v1162_v15  ;;  %v1190_v31 = vmul.f32 %v4915_v41, %v1148_v24  ;;  %vm1184_vm15 = vcmp.eq.f32.partialorder %v1183_v0, 8.507059e+37  ;;  %v7817_v11 = vld [vmem:[#allocation24_spill] sm:$0xff]  ;;  %v7819_v41 = vld [vmem:[#allocation26_spill] sm:$0xff]  ;;  %v7820_v15 = vld [vmem:[#allocation27_spill] sm:$0xff] }
 0x331   :  { %v1189_v10 = vmul.f32 %v1167_v20, %v5954_v54  ;;  %v1177_v53 = vmul.f32 %v4913_v48, %v1176_v32  ;;  %v4324_v54 = vld [vmem:[%s7459_s1 + $0x10] sm:$0xf]  ;;  %v7809_v32 = vld [vmem:[#allocation16_spill] sm:$0xff] }
 0x332   :  { %v7821_v20 = vld [vmem:[#allocation28_spill] sm:$0xff] }
 0x333   :  { %v6029_v26 = vadd.f32 %v1190_v31, %v1189_v10  ;;  %v1178_v39 = vadd.f32 %v4913_v48, %v1177_v53  ;;  %v7808_v10 = vld [vmem:[#allocation15_spill] sm:$0xff]  ;;  %v7810_v31 = vld [vmem:[#allocation17_spill] sm:$0xff]  ;;  %v7825_v0 = vld [vmem:[#allocation32_spill] sm:$0xff] }
 0x334   :  { %v7822_v53 = vld [vmem:[#allocation29_spill] sm:$0xff] }
 0x335   :  { %4916 = vtanh.f32 %v6029_v26  ;;  %v1182_v4 = vsel %vm1181_vm14, %v4913_v48, %v1178_v39  ;;  %v7813_v48 = vld [vmem:[#allocation20_spill] sm:$0xff]  ;;  %v7823_v39 = vld [vmem:[#allocation30_spill] sm:$0xff] }
 0x336   :  { %v1187_v42 = vsel %vm1184_vm15, %v1186_v49, %v1182_v4  ;;  %v7826_v4 = vld [vmem:[#allocation33_spill] sm:$0xff]  ;;  %v7827_v49 = vld [vmem:[#allocation34_spill] sm:$0xff] }
 0x33b   :  { %v4917_v63 = vpop.eup %4916 }
 0x33c   :  { %v1193_v13 = vmul.f32 %v4917_v63, %v1187_v42  ;;  %v7828_v63 = vld [vmem:[#allocation35_spill] sm:$0xff]  ;;  %v7829_v42 = vld [vmem:[#allocation36_spill] sm:$0xff] }
 0x33e   :  { %v1196_v24 = vpack.c.bf16 %v1193_v13, %v1193_v13  ;;  %v7830_v13 = vld [vmem:[#allocation37_spill] sm:$0xff] }
 0x340   :  { %1205 = vmatmul.bf16.vlgmr.msra.gmra.mxu0 %v1196_v24  ;;  %1218 = vmatmul.bf16.vlgmr.msra.gmra.mxu1 %v1196_v24 }
 0x341   :  { %1231 = vmatmul.bf16.vlgmr.msra.gmra.mxu2 %v1196_v24  ;;  %1244 = vmatmul.bf16.vlgmr.msra.gmra.mxu3 %v1196_v24  ;;  %v7831_v24 = vld [vmem:[#allocation38_spill] sm:$0xff] }
 0x342   :  { %1371 = vmatpush.bf16.msra.mxu0 %v5338_v3  ;;  %1384 = vmatpush.bf16.msra.mxu1 %v5340_v7 }
 0x343   :  { %1397 = vmatpush.bf16.msra.mxu2 %v5342_v8  ;;  %1410 = vmatpush.bf16.msra.mxu3 %v5345_v12 }
 0x346   :  { %1372 = vmatpush.bf16.msra.mxu0 %v5349_v16  ;;  %1385 = vmatpush.bf16.msra.mxu1 %v5351_v17 }
 0x347   :  { %1398 = vmatpush.bf16.msra.mxu2 %v5354_v21  ;;  %1411 = vmatpush.bf16.msra.mxu3 %v5356_v25 }
 0x34a   :  { %1373 = vmatpush.bf16.msra.mxu0 %v5359_v29  ;;  %1386 = vmatpush.bf16.msra.mxu1 %v5363_v33 }
 0x34b   :  { %1399 = vmatpush.bf16.msra.mxu2 %v5365_v34  ;;  %1412 = vmatpush.bf16.msra.mxu3 %v5368_v38 }
 0x34e   :  { %1374 = vmatpush.bf16.msra.mxu0 %v5371_v44  ;;  %1387 = vmatpush.bf16.msra.mxu1 %v5375_v45 }
 0x34f   :  { %1400 = vmatpush.bf16.msra.mxu2 %v5377_v46  ;;  %1413 = vmatpush.bf16.msra.mxu3 %v5380_v50 }
 0x350   :  { %1257 = vmatmul.bf16.vlgmr.msrb.gmra.mxu0 %v4324_v54  ;;  %1270 = vmatmul.bf16.vlgmr.msrb.gmra.mxu1 %v4324_v54 }
 0x351   :  { %1283 = vmatmul.bf16.vlgmr.msrb.gmra.mxu2 %v4324_v54  ;;  %1296 = vmatmul.bf16.vlgmr.msrb.gmra.mxu3 %v4324_v54  ;;  %v7832_v54 = vld [vmem:[#allocation39_spill] sm:$0xff] }
 0x352   :  { %1375 = vmatpush.bf16.msra.mxu0 %v5383_v56  ;;  %1388 = vmatpush.bf16.msra.mxu1 %v5387_v57 }
 0x353   :  { %1401 = vmatpush.bf16.msra.mxu2 %v5389_v58  ;;  %1414 = vmatpush.bf16.msra.mxu3 %v5392_v62 }
 0x356   :  { %1376 = vmatpush.bf16.msra.mxu0 %v5395_v5  ;;  %1389 = vmatpush.bf16.msra.mxu1 %v5399_v6 }
 0x357   :  { %1402 = vmatpush.bf16.msra.mxu2 %v5401_v9  ;;  %1415 = vmatpush.bf16.msra.mxu3 %v5404_v14 }
 0x35a   :  { %1377 = vmatpush.bf16.msra.mxu0 %v5407_v23  ;;  %1390 = vmatpush.bf16.msra.mxu1 %v5411_v27 }
 0x35b   :  { %1403 = vmatpush.bf16.msra.mxu2 %v5413_v28  ;;  %1416 = vmatpush.bf16.msra.mxu3 %v5416_v35 }
 0x35e   :  { %1378 = vmatpush.bf16.msra.mxu0 %v5428_v43  ;;  %1391 = vmatpush.bf16.msra.mxu1 %v5441_v51 }
 0x35f   :  { %1404 = vmatpush.bf16.msra.mxu2 %v5443_v52  ;;  %1417 = vmatpush.bf16.msra.mxu3 %v5452_v55 }
 0x362   :  { %1423 = vmatpush.bf16.msrb.mxu0 %v5454_v59  ;;  %1436 = vmatpush.bf16.msrb.mxu1 %v5456_v60 }
 0x363   :  { %1449 = vmatpush.bf16.msrb.mxu2 %v5458_v61  ;;  %1462 = vmatpush.bf16.msrb.mxu3 %v5470_v2 }
 0x366   :  { %1424 = vmatpush.bf16.msrb.mxu0 %v5491_v18  ;;  %1437 = vmatpush.bf16.msrb.mxu1 %v5495_v19 }
 0x367   :  { %1450 = vmatpush.bf16.msrb.mxu2 %v7808_v10  ;;  %1463 = vmatpush.bf16.msrb.mxu3 %v7809_v32 }
 0x36a   :  { %1425 = vmatpush.bf16.msrb.mxu0 %v7810_v31  ;;  %1438 = vmatpush.bf16.msrb.mxu1 %v7811_v1 }
 0x36b   :  { %1451 = vmatpush.bf16.msrb.mxu2 %v7812_v30  ;;  %1464 = vmatpush.bf16.msrb.mxu3 %v7813_v48 }
 0x36e   :  { %1426 = vmatpush.bf16.msrb.mxu0 %v7814_v40  ;;  %1439 = vmatpush.bf16.msrb.mxu1 %v7815_v22  ;;  %v7835_v22 = vld [vmem:[#allocation42_spill] sm:$0xff] }
 0x36f   :  { %1452 = vmatpush.bf16.msrb.mxu2 %v7816_v36  ;;  %1465 = vmatpush.bf16.msrb.mxu3 %v7817_v11  ;;  %v7834_v36 = vld [vmem:[#allocation41_spill] sm:$0xff] }
 0x372   :  { %1427 = vmatpush.bf16.msrb.mxu0 %v7818_v47  ;;  %1440 = vmatpush.bf16.msrb.mxu1 %v7819_v41 }
 0x373   :  { %1453 = vmatpush.bf16.msrb.mxu2 %v7820_v15  ;;  %1466 = vmatpush.bf16.msrb.mxu3 %v7821_v20 }
 0x376   :  { %1428 = vmatpush.bf16.msrb.mxu0 %v7822_v53  ;;  %1441 = vmatpush.bf16.msrb.mxu1 %v7823_v39  ;;  %v7833_v53 = vld [vmem:[#allocation40_spill] sm:$0xff] }
 0x377   :  { %1454 = vmatpush.bf16.msrb.mxu2 %v7824_v37  ;;  %1467 = vmatpush.bf16.msrb.mxu3 %v7825_v0 }
 0x37a   :  { %1429 = vmatpush.bf16.msrb.mxu0 %v7826_v4  ;;  %1442 = vmatpush.bf16.msrb.mxu1 %v7827_v49 }
 0x37b   :  { %1455 = vmatpush.bf16.msrb.mxu2 %v7828_v63  ;;  %1468 = vmatpush.bf16.msrb.mxu3 %v7829_v42 }
 0x37e   :  { %1430 = vmatpush.bf16.msrb.mxu0 %v7830_v13  ;;  %1443 = vmatpush.bf16.msrb.mxu1 %v7831_v24 }
 0x37f   :  { %1456 = vmatpush.bf16.msrb.mxu2 %v7832_v54  ;;  %1469 = vmatpush.bf16.msrb.mxu3 %v7833_v53 }
 0x3bd   :  { %v1206_v39 = vpop.f32.mrf.mxu0  ;;  %v1219_v37 = vpop.f32.mrf.mxu1 }
 0x3c4   :  { %v1232_v20 = vpop.f32.mrf.mxu2  ;;  %v1245_v0 = vpop.f32.mrf.mxu3 }
 0x3c5   :  { %v1208_v15 = vpop.f32.mrf.mxu0  ;;  %v1221_v4 = vpop.f32.mrf.mxu1 }
 0x3c6   :  { %v7836_v4 = vld [vmem:[#allocation43_spill] sm:$0xff] }
 0x3cc   :  { %v1234_v41 = vpop.f32.mrf.mxu2  ;;  %v1247_v49 = vpop.f32.mrf.mxu3 }
 0x3cd   :  { %v1258_v47 = vpop.f32.mrf.mxu0  ;;  %v1271_v63 = vpop.f32.mrf.mxu1 }
 0x3ce   :  { %v1259_v11 = vadd.f32 %v1258_v47, %v1206_v39  ;;  %v1272_v42 = vadd.f32 %v1271_v63, %v1219_v37 }
 0x3d0   :  { %v1301_v13 = vadd.f32 %v1259_v11, %v7834_v36  ;;  %v1302_v24 = vadd.f32 %v1272_v42, %v7835_v22 }
 0x3d2   :  { %v4325_v40 = vmul.f32 -1.442695, %v1301_v13  ;;  %v4326_v54 = vmul.f32 -1.442695, %v1302_v24  ;;  %v7837_v24 = vld [vmem:[#allocation44_spill] sm:$0xff] }
 0x3d4   :  { %4918 = vpow2.f32 %v4325_v40  ;;  %v1284_v53 = vpop.f32.mrf.mxu2  ;;  %v1297_v48 = vpop.f32.mrf.mxu3 }
 0x3d5   :  { %4920 = vpow2.f32 %v4326_v54  ;;  %v1298_v30 = vadd.f32 %v1297_v48, %v1245_v0  ;;  %v1260_v1 = vpop.f32.mrf.mxu0  ;;  %v1273_v15 = vpop.f32.mrf.mxu1  ;;  %v1285_v63 = vadd.f32 %v1284_v53, %v1232_v20 }
 0x3d7   :  { %v1304_v41 = vadd.f32 %v1298_v30, %v7836_v4  ;;  %v1303_v48 = vadd.f32 %v1285_v63, %v7837_v24 }
 0x3d9   :  { %v4327_v49 = vmul.f32 -1.442695, %v1304_v41 }
 0x3da   :  { %v4919_v31 = vpop.eup %4918 }
 0x3db   :  { %v4921_v32 = vpop.eup %4920  ;;  %v1308_v47 = vadd.f32 1.0, %v4919_v31  ;;  %4922 = vpow2.f32 %v4327_v49 }
 0x3dc   :  { %v1327_v39 = vadd.f32 1.0, %v4921_v32  ;;  %v1299_v11 = vpop.f32.mrf.mxu3  ;;  %v1286_v37 = vpop.f32.mrf.mxu2 }
 0x3dd   :  { %4924 = vrcp.f32 %v1308_v47  ;;  %v1320_v41 = vand.u32 2147483648, %v1308_v47  ;;  %v1318_v49 = vand.u32 2147483647, %v1308_v47  ;;  %vm1314_vm2 = vweird.f32 %v1308_v47 }
 0x3de   :  { %4926 = vrcp.f32 %v1327_v39  ;;  %v1339_v31 = vand.u32 2147483648, %v1327_v39  ;;  %v1337_v20 = vand.u32 2147483647, %v1327_v39  ;;  %vm1333_vm3 = vweird.f32 %v1327_v39 }
 0x3df   :  { %v1321_v63 = vor.u32 1.1754944e-38, %v1320_v41  ;;  %vm1319_vm6 = vcmp.eq.f32.partialorder %v1318_v49, 8.507059e+37 }
 0x3e0   :  { %vm1338_vm7 = vcmp.eq.f32.partialorder %v1337_v20, 8.507059e+37  ;;  %v7842_v20 = vld [vmem:[#allocation19_spill] sm:$0xff] }
 0x3e1   :  { %v4923_v40 = vpop.eup %4922 }
 0x3e2   :  { %v1347_v42 = vadd.f32 1.0, %v4923_v40 }
 0x3e3   :  { %v4925_v13 = vpop.eup %4924 }
 0x3e4   :  { %v4927_v1 = vpop.eup %4926  ;;  %v1310_v0 = vmul.f32 %v4925_v13, %v1308_v47  ;;  %4928 = vrcp.f32 %v1347_v42  ;;  %vm1315_vm0 = vweird.f32 %v4925_v13  ;;  %v1359_v41 = vand.u32 2147483648, %v1347_v42 }
 0x3e5   :  { %v1329_v30 = vmul.f32 %v4927_v1, %v1327_v39  ;;  %4930 = vtanh.f32 %v1303_v48  ;;  %vm1334_vm1 = vweird.f32 %v4927_v1  ;;  %vm1316_vm4 = vmor %vm1314_vm2, %vm1315_vm0  ;;  %vm1353_vm9 = vweird.f32 %v1347_v42 }
 0x3e6   :  { %v1311_v54 = vsub.f32 1.0, %v1310_v0  ;;  %vm1335_vm5 = vmor %vm1333_vm3, %vm1334_vm1  ;;  %v1340_v0 = vor.u32 1.1754944e-38, %v1339_v31  ;;  %v1360_v49 = vor.u32 1.1754944e-38, %v1359_v41  ;;  %v7854_v41 = vld [vmem:[#allocation31_spill] sm:$0xff] }
 0x3e7   :  { %v1330_v15 = vsub.f32 1.0, %v1329_v30 }
 0x3e8   :  { %v1312_v32 = vmul.f32 %v4925_v13, %v1311_v54 }
 0x3e9   :  { %v1331_v11 = vmul.f32 %v4927_v1, %v1330_v15 }
 0x3ea   :  { %v4929_v53 = vpop.eup %4928  ;;  %v1313_v37 = vadd.f32 %v4925_v13, %v1312_v32 }
 0x3eb   :  { %v1332_v40 = vadd.f32 %v4927_v1, %v1331_v11  ;;  %v1349_v24 = vmul.f32 %v4929_v53, %v1347_v42  ;;  %v4931_v48 = vpop.eup %4930  ;;  %vm1354_vm8 = vweird.f32 %v4929_v53 }
 0x3ec   :  { %v1317_v30 = vsel %vm1316_vm4, %v4925_v13, %v1313_v37  ;;  %v1357_v13 = vand.u32 2147483647, %v1347_v42  ;;  %vm1355_vm10 = vmor %vm1353_vm9, %vm1354_vm8  ;;  %v7841_v42 = vld [vmem:[#allocation18_spill] sm:$0xff]  ;;  %v7844_v37 = vld [vmem:[#allocation21_spill] sm:$0xff] }
 0x3ed   :  { %v1322_v4 = vsel %vm1319_vm6, %v1321_v63, %v1317_v30  ;;  %v1336_v54 = vsel %vm1335_vm5, %v4927_v1, %v1332_v40  ;;  %v1350_v22 = vsub.f32 1.0, %v1349_v24  ;;  %v7845_v63 = vld [vmem:[#allocation22_spill] sm:$0xff]  ;;  %v7846_v40 = vld [vmem:[#allocation23_spill] sm:$0xff]  ;;  %v7848_v30 = vld [vmem:[#allocation25_spill] sm:$0xff] }
 0x3ee   :  { %v1341_v15 = vsel %vm1338_vm7, %v1340_v0, %v1336_v54  ;;  %v1364_v36 = vmul.f32 %v4931_v48, %v1322_v4  ;;  %vm1358_vm11 = vcmp.eq.f32.partialorder %v1357_v13, 8.507059e+37  ;;  %v7847_v0 = vld [vmem:[#allocation24_spill] sm:$0xff]  ;;  %v7849_v48 = vld [vmem:[#allocation26_spill] sm:$0xff]  ;;  %v7850_v54 = vld [vmem:[#allocation27_spill] sm:$0xff] }
 0x3ef   :  { %v1363_v10 = vmul.f32 %v1341_v15, %v6029_v26  ;;  %v1351_v32 = vmul.f32 %v4929_v53, %v1350_v22  ;;  %v4328_v26 = vld [vmem:[%s7459_s1 + $0x14] sm:$0xf]  ;;  %v7839_v22 = vld [vmem:[#allocation16_spill] sm:$0xff] }
 0x3f0   :  { %v7851_v15 = vld [vmem:[#allocation28_spill] sm:$0xff] }
 0x3f1   :  { %v6104_v47 = vadd.f32 %v1364_v36, %v1363_v10  ;;  %v1352_v39 = vadd.f32 %v4929_v53, %v1351_v32  ;;  %v7838_v10 = vld [vmem:[#allocation15_spill] sm:$0xff]  ;;  %v7840_v36 = vld [vmem:[#allocation17_spill] sm:$0xff]  ;;  %v7855_v13 = vld [vmem:[#allocation32_spill] sm:$0xff] }
 0x3f2   :  { %v7852_v32 = vld [vmem:[#allocation29_spill] sm:$0xff] }
 0x3f3   :  { %4932 = vtanh.f32 %v6104_v47  ;;  %v1356_v31 = vsel %vm1355_vm10, %v4929_v53, %v1352_v39  ;;  %v7843_v53 = vld [vmem:[#allocation20_spill] sm:$0xff]  ;;  %v7853_v39 = vld [vmem:[#allocation30_spill] sm:$0xff] }
 0x3f4   :  { %v1361_v24 = vsel %vm1358_vm11, %v1360_v49, %v1356_v31  ;;  %v7856_v31 = vld [vmem:[#allocation33_spill] sm:$0xff]  ;;  %v7857_v49 = vld [vmem:[#allocation34_spill] sm:$0xff] }
 0x3f9   :  { %v4933_v1 = vpop.eup %4932 }
 0x3fa   :  { %v1367_v11 = vmul.f32 %v4933_v1, %v1361_v24  ;;  %v7858_v1 = vld [vmem:[#allocation35_spill] sm:$0xff]  ;;  %v7859_v24 = vld [vmem:[#allocation36_spill] sm:$0xff] }
 0x3fc   :  { %v1370_v4 = vpack.c.bf16 %v1367_v11, %v1367_v11  ;;  %v7860_v11 = vld [vmem:[#allocation37_spill] sm:$0xff] }
 0x3fe   :  { %1379 = vmatmul.bf16.vlgmr.msra.gmra.mxu0 %v1370_v4  ;;  %1392 = vmatmul.bf16.vlgmr.msra.gmra.mxu1 %v1370_v4 }
 0x3ff   :  { %1405 = vmatmul.bf16.vlgmr.msra.gmra.mxu2 %v1370_v4  ;;  %1418 = vmatmul.bf16.vlgmr.msra.gmra.mxu3 %v1370_v4  ;;  %v7861_v4 = vld [vmem:[#allocation38_spill] sm:$0xff] }
 0x400   :  { %1545 = vmatpush.bf16.msra.mxu0 %v5338_v3  ;;  %1558 = vmatpush.bf16.msra.mxu1 %v5340_v7 }
 0x401   :  { %1571 = vmatpush.bf16.msra.mxu2 %v5342_v8  ;;  %1584 = vmatpush.bf16.msra.mxu3 %v5345_v12 }
 0x404   :  { %1546 = vmatpush.bf16.msra.mxu0 %v5349_v16  ;;  %1559 = vmatpush.bf16.msra.mxu1 %v5351_v17 }
 0x405   :  { %1572 = vmatpush.bf16.msra.mxu2 %v5354_v21  ;;  %1585 = vmatpush.bf16.msra.mxu3 %v5356_v25 }
 0x408   :  { %1547 = vmatpush.bf16.msra.mxu0 %v5359_v29  ;;  %1560 = vmatpush.bf16.msra.mxu1 %v5363_v33 }
 0x409   :  { %1573 = vmatpush.bf16.msra.mxu2 %v5365_v34  ;;  %1586 = vmatpush.bf16.msra.mxu3 %v5368_v38 }
 0x40c   :  { %1548 = vmatpush.bf16.msra.mxu0 %v5371_v44  ;;  %1561 = vmatpush.bf16.msra.mxu1 %v5375_v45 }
 0x40d   :  { %1574 = vmatpush.bf16.msra.mxu2 %v5377_v46  ;;  %1587 = vmatpush.bf16.msra.mxu3 %v5380_v50 }
 0x40e   :  { %1431 = vmatmul.bf16.vlgmr.msrb.gmra.mxu0 %v4328_v26  ;;  %1444 = vmatmul.bf16.vlgmr.msrb.gmra.mxu1 %v4328_v26 }
 0x40f   :  { %1457 = vmatmul.bf16.vlgmr.msrb.gmra.mxu2 %v4328_v26  ;;  %1470 = vmatmul.bf16.vlgmr.msrb.gmra.mxu3 %v4328_v26  ;;  %v7862_v26 = vld [vmem:[#allocation39_spill] sm:$0xff] }
 0x410   :  { %1549 = vmatpush.bf16.msra.mxu0 %v5383_v56  ;;  %1562 = vmatpush.bf16.msra.mxu1 %v5387_v57 }
 0x411   :  { %1575 = vmatpush.bf16.msra.mxu2 %v5389_v58  ;;  %1588 = vmatpush.bf16.msra.mxu3 %v5392_v62 }
 0x414   :  { %1550 = vmatpush.bf16.msra.mxu0 %v5395_v5  ;;  %1563 = vmatpush.bf16.msra.mxu1 %v5399_v6 }
 0x415   :  { %1576 = vmatpush.bf16.msra.mxu2 %v5401_v9  ;;  %1589 = vmatpush.bf16.msra.mxu3 %v5404_v14 }
 0x418   :  { %1551 = vmatpush.bf16.msra.mxu0 %v5407_v23  ;;  %1564 = vmatpush.bf16.msra.mxu1 %v5411_v27 }
 0x419   :  { %1577 = vmatpush.bf16.msra.mxu2 %v5413_v28  ;;  %1590 = vmatpush.bf16.msra.mxu3 %v5416_v35 }
 0x41c   :  { %1552 = vmatpush.bf16.msra.mxu0 %v5428_v43  ;;  %1565 = vmatpush.bf16.msra.mxu1 %v5441_v51 }
 0x41d   :  { %1578 = vmatpush.bf16.msra.mxu2 %v5443_v52  ;;  %1591 = vmatpush.bf16.msra.mxu3 %v5452_v55 }
 0x420   :  { %1597 = vmatpush.bf16.msrb.mxu0 %v5454_v59  ;;  %1610 = vmatpush.bf16.msrb.mxu1 %v5456_v60 }
 0x421   :  { %1623 = vmatpush.bf16.msrb.mxu2 %v5458_v61  ;;  %1636 = vmatpush.bf16.msrb.mxu3 %v5470_v2 }
 0x424   :  { %1598 = vmatpush.bf16.msrb.mxu0 %v5491_v18  ;;  %1611 = vmatpush.bf16.msrb.mxu1 %v5495_v19 }
 0x425   :  { %1624 = vmatpush.bf16.msrb.mxu2 %v7838_v10  ;;  %1637 = vmatpush.bf16.msrb.mxu3 %v7839_v22 }
 0x428   :  { %1599 = vmatpush.bf16.msrb.mxu0 %v7840_v36  ;;  %1612 = vmatpush.bf16.msrb.mxu1 %v7841_v42 }
 0x429   :  { %1625 = vmatpush.bf16.msrb.mxu2 %v7842_v20  ;;  %1638 = vmatpush.bf16.msrb.mxu3 %v7843_v53 }
 0x42c   :  { %1600 = vmatpush.bf16.msrb.mxu0 %v7844_v37  ;;  %1613 = vmatpush.bf16.msrb.mxu1 %v7845_v63  ;;  %v7865_v63 = vld [vmem:[#allocation42_spill] sm:$0xff] }
 0x42d   :  { %1626 = vmatpush.bf16.msrb.mxu2 %v7846_v40  ;;  %1639 = vmatpush.bf16.msrb.mxu3 %v7847_v0  ;;  %v7864_v40 = vld [vmem:[#allocation41_spill] sm:$0xff] }
 0x430   :  { %1601 = vmatpush.bf16.msrb.mxu0 %v7848_v30  ;;  %1614 = vmatpush.bf16.msrb.mxu1 %v7849_v48 }
 0x431   :  { %1627 = vmatpush.bf16.msrb.mxu2 %v7850_v54  ;;  %1640 = vmatpush.bf16.msrb.mxu3 %v7851_v15 }
 0x434   :  { %1602 = vmatpush.bf16.msrb.mxu0 %v7852_v32  ;;  %1615 = vmatpush.bf16.msrb.mxu1 %v7853_v39  ;;  %v7863_v32 = vld [vmem:[#allocation40_spill] sm:$0xff] }
 0x435   :  { %1628 = vmatpush.bf16.msrb.mxu2 %v7854_v41  ;;  %1641 = vmatpush.bf16.msrb.mxu3 %v7855_v13 }
 0x438   :  { %1603 = vmatpush.bf16.msrb.mxu0 %v7856_v31  ;;  %1616 = vmatpush.bf16.msrb.mxu1 %v7857_v49 }
 0x439   :  { %1629 = vmatpush.bf16.msrb.mxu2 %v7858_v1  ;;  %1642 = vmatpush.bf16.msrb.mxu3 %v7859_v24 }
 0x43c   :  { %1604 = vmatpush.bf16.msrb.mxu0 %v7860_v11  ;;  %1617 = vmatpush.bf16.msrb.mxu1 %v7861_v4 }
 0x43d   :  { %1630 = vmatpush.bf16.msrb.mxu2 %v7862_v26  ;;  %1643 = vmatpush.bf16.msrb.mxu3 %v7863_v32 }
 0x47b   :  { %v1380_v39 = vpop.f32.mrf.mxu0  ;;  %v1393_v41 = vpop.f32.mrf.mxu1 }
 0x482   :  { %v1406_v15 = vpop.f32.mrf.mxu2  ;;  %v1419_v13 = vpop.f32.mrf.mxu3 }
 0x483   :  { %v1382_v54 = vpop.f32.mrf.mxu0  ;;  %v1395_v31 = vpop.f32.mrf.mxu1 }
 0x484   :  { %v7866_v31 = vld [vmem:[#allocation43_spill] sm:$0xff] }
 0x48a   :  { %v1408_v48 = vpop.f32.mrf.mxu2  ;;  %v1421_v49 = vpop.f32.mrf.mxu3 }
 0x48b   :  { %v1432_v30 = vpop.f32.mrf.mxu0  ;;  %v1445_v1 = vpop.f32.mrf.mxu1 }
 0x48c   :  { %v1433_v0 = vadd.f32 %v1432_v30, %v1380_v39  ;;  %v1446_v24 = vadd.f32 %v1445_v1, %v1393_v41 }
 0x48e   :  { %v1475_v11 = vadd.f32 %v1433_v0, %v7864_v40  ;;  %v1476_v4 = vadd.f32 %v1446_v24, %v7865_v63 }
 0x490   :  { %v4329_v37 = vmul.f32 -1.442695, %v1475_v11  ;;  %v4330_v26 = vmul.f32 -1.442695, %v1476_v4  ;;  %v7867_v4 = vld [vmem:[#allocation44_spill] sm:$0xff] }
 0x492   :  { %4934 = vpow2.f32 %v4329_v37  ;;  %v1458_v32 = vpop.f32.mrf.mxu2  ;;  %v1471_v53 = vpop.f32.mrf.mxu3 }
 0x493   :  { %4936 = vpow2.f32 %v4330_v26  ;;  %v1472_v20 = vadd.f32 %v1471_v53, %v1419_v13  ;;  %v1434_v42 = vpop.f32.mrf.mxu0  ;;  %v1447_v54 = vpop.f32.mrf.mxu1  ;;  %v1459_v1 = vadd.f32 %v1458_v32, %v1406_v15 }
 0x495   :  { %v1478_v48 = vadd.f32 %v1472_v20, %v7866_v31  ;;  %v1477_v53 = vadd.f32 %v1459_v1, %v7867_v4 }
 0x497   :  { %v4331_v49 = vmul.f32 -1.442695, %v1478_v48 }
 0x498   :  { %v4935_v36 = vpop.eup %4934 }
 0x499   :  { %v4937_v22 = vpop.eup %4936  ;;  %v1482_v30 = vadd.f32 1.0, %v4935_v36  ;;  %4938 = vpow2.f32 %v4331_v49 }
 0x49a   :  { %v1501_v39 = vadd.f32 1.0, %v4937_v22  ;;  %v1473_v0 = vpop.f32.mrf.mxu3  ;;  %v1460_v41 = vpop.f32.mrf.mxu2 }
 0x49b   :  { %4940 = vrcp.f32 %v1482_v30  ;;  %v1494_v48 = vand.u32 2147483648, %v1482_v30  ;;  %v1492_v49 = vand.u32 2147483647, %v1482_v30  ;;  %vm1488_vm14 = vweird.f32 %v1482_v30 }
 0x49c   :  { %4942 = vrcp.f32 %v1501_v39  ;;  %v1513_v36 = vand.u32 2147483648, %v1501_v39  ;;  %v1511_v15 = vand.u32 2147483647, %v1501_v39  ;;  %vm1507_vm15 = vweird.f32 %v1501_v39 }
 0x49d   :  { %v1495_v1 = vor.u32 1.1754944e-38, %v1494_v48  ;;  %vm1493_vm2 = vcmp.eq.f32.partialorder %v1492_v49, 8.507059e+37 }
 0x49e   :  { %vm1512_vm3 = vcmp.eq.f32.partialorder %v1511_v15, 8.507059e+37 }
 0x49f   :  { %v4939_v37 = vpop.eup %4938 }
 0x4a0   :  { %v1521_v24 = vadd.f32 1.0, %v4939_v37 }
 0x4a1   :  { %v4941_v11 = vpop.eup %4940 }
 0x4a2   :  { %v4943_v42 = vpop.eup %4942  ;;  %v1484_v13 = vmul.f32 %v4941_v11, %v1482_v30  ;;  %4944 = vrcp.f32 %v1521_v24  ;;  %vm1489_vm12 = vweird.f32 %v4941_v11  ;;  %v1533_v48 = vand.u32 2147483648, %v1521_v24 }
 0x4a3   :  { %v1503_v20 = vmul.f32 %v4943_v42, %v1501_v39  ;;  %4946 = vtanh.f32 %v1477_v53  ;;  %vm1508_vm13 = vweird.f32 %v4943_v42  ;;  %vm1490_vm0 = vmor %vm1488_vm14, %vm1489_vm12  ;;  %vm1527_vm5 = vweird.f32 %v1521_v24 }
 0x4a4   :  { %v1485_v26 = vsub.f32 1.0, %v1484_v13  ;;  %vm1509_vm1 = vmor %vm1507_vm15, %vm1508_vm13  ;;  %v1514_v13 = vor.u32 1.1754944e-38, %v1513_v36  ;;  %v1534_v49 = vor.u32 1.1754944e-38, %v1533_v48 }
 0x4a5   :  { %v1504_v54 = vsub.f32 1.0, %v1503_v20 }
 0x4a6   :  { %v1486_v22 = vmul.f32 %v4941_v11, %v1485_v26 }
 0x4a7   :  { %v1505_v0 = vmul.f32 %v4943_v42, %v1504_v54 }
 0x4a8   :  { %v4945_v32 = vpop.eup %4944  ;;  %v1487_v41 = vadd.f32 %v4941_v11, %v1486_v22 }
 0x4a9   :  { %v1506_v37 = vadd.f32 %v4943_v42, %v1505_v0  ;;  %v1523_v4 = vmul.f32 %v4945_v32, %v1521_v24  ;;  %v4947_v53 = vpop.eup %4946  ;;  %vm1528_vm4 = vweird.f32 %v4945_v32 }
 0x4aa   :  { %v1491_v20 = vsel %vm1490_vm0, %v4941_v11, %v1487_v41  ;;  %v1531_v11 = vand.u32 2147483647, %v1521_v24  ;;  %vm1529_vm6 = vmor %vm1527_vm5, %vm1528_vm4 }
 0x4ab   :  { %v1496_v31 = vsel %vm1493_vm2, %v1495_v1, %v1491_v20  ;;  %v1510_v26 = vsel %vm1509_vm1, %v4943_v42, %v1506_v37  ;;  %v1524_v63 = vsub.f32 1.0, %v1523_v4 }
 0x4ac   :  { %v1515_v54 = vsel %vm1512_vm3, %v1514_v13, %v1510_v26  ;;  %v1538_v40 = vmul.f32 %v4947_v53, %v1496_v31  ;;  %vm1532_vm7 = vcmp.eq.f32.partialorder %v1531_v11, 8.507059e+37  ;;  %v7896_v53 = vld [vmem:[#allocation43_spill] sm:$0xff] }
 0x4ad   :  { %v1537_v10 = vmul.f32 %v1515_v54, %v6104_v47  ;;  %v1525_v22 = vmul.f32 %v4945_v32, %v1524_v63 }
 0x4af   :  { %v6179_v30 = vadd.f32 %v1538_v40, %v1537_v10  ;;  %v1526_v39 = vadd.f32 %v4945_v32, %v1525_v22  ;;  %v7894_v10 = vld [vmem:[#allocation41_spill] sm:$0xff]  ;;  %v7895_v40 = vld [vmem:[#allocation42_spill] sm:$0xff] }
 0x4b1   :  { %4948 = vtanh.f32 %v6179_v30  ;;  %v1530_v36 = vsel %vm1529_vm6, %v4945_v32, %v1526_v39 }
 0x4b2   :  { %v1535_v4 = vsel %vm1532_vm7, %v1534_v49, %v1530_v36 }
 0x4b7   :  { %v4949_v42 = vpop.eup %4948 }
 0x4b8   :  { %v1541_v0 = vmul.f32 %v4949_v42, %v1535_v4 }
 0x4ba   :  { %v1544_v31 = vpack.c.bf16 %v1541_v0, %v1541_v0 }
 0x4bc   :  { %1553 = vmatmul.bf16.vlgmr.msra.gmra.mxu0 %v1544_v31  ;;  %1566 = vmatmul.bf16.vlgmr.msra.gmra.mxu1 %v1544_v31 }
 0x4bd   :  { %1579 = vmatmul.bf16.vlgmr.msra.gmra.mxu2 %v1544_v31  ;;  %1592 = vmatmul.bf16.vlgmr.msra.gmra.mxu3 %v1544_v31 }
 0x4be   :  { %1719 = vmatpush.bf16.msra.mxu0 %v5338_v3  ;;  %1732 = vmatpush.bf16.msra.mxu1 %v5340_v7  ;;  %v4332_v3 = vld [vmem:[%s7459_s1 + $0x18] sm:$0xf]  ;;  %v7868_v7 = vld [vmem:[#allocation15_spill] sm:$0xff] }
 0x4bf   :  { %1745 = vmatpush.bf16.msra.mxu2 %v5342_v8  ;;  %1758 = vmatpush.bf16.msra.mxu3 %v5345_v12  ;;  %v7869_v8 = vld [vmem:[#allocation16_spill] sm:$0xff]  ;;  %v7870_v12 = vld [vmem:[#allocation17_spill] sm:$0xff] }
 0x4c2   :  { %1720 = vmatpush.bf16.msra.mxu0 %v5349_v16  ;;  %1733 = vmatpush.bf16.msra.mxu1 %v5351_v17  ;;  %v7871_v16 = vld [vmem:[#allocation18_spill] sm:$0xff]  ;;  %v7872_v17 = vld [vmem:[#allocation19_spill] sm:$0xff] }
 0x4c3   :  { %1746 = vmatpush.bf16.msra.mxu2 %v5354_v21  ;;  %1759 = vmatpush.bf16.msra.mxu3 %v5356_v25  ;;  %v7873_v21 = vld [vmem:[#allocation20_spill] sm:$0xff]  ;;  %v7874_v25 = vld [vmem:[#allocation21_spill] sm:$0xff] }
 0x4c6   :  { %1721 = vmatpush.bf16.msra.mxu0 %v5359_v29  ;;  %1734 = vmatpush.bf16.msra.mxu1 %v5363_v33  ;;  %v7875_v29 = vld [vmem:[#allocation22_spill] sm:$0xff]  ;;  %v7876_v33 = vld [vmem:[#allocation23_spill] sm:$0xff] }
 0x4c7   :  { %1747 = vmatpush.bf16.msra.mxu2 %v5365_v34  ;;  %1760 = vmatpush.bf16.msra.mxu3 %v5368_v38  ;;  %v7877_v34 = vld [vmem:[#allocation24_spill] sm:$0xff]  ;;  %v7878_v38 = vld [vmem:[#allocation25_spill] sm:$0xff] }
 0x4ca   :  { %1722 = vmatpush.bf16.msra.mxu0 %v5371_v44  ;;  %1735 = vmatpush.bf16.msra.mxu1 %v5375_v45  ;;  %v7879_v44 = vld [vmem:[#allocation26_spill] sm:$0xff]  ;;  %v7880_v45 = vld [vmem:[#allocation27_spill] sm:$0xff] }
 0x4cb   :  { %1748 = vmatpush.bf16.msra.mxu2 %v5377_v46  ;;  %1761 = vmatpush.bf16.msra.mxu3 %v5380_v50  ;;  %v7881_v46 = vld [vmem:[#allocation28_spill] sm:$0xff]  ;;  %v7882_v50 = vld [vmem:[#allocation29_spill] sm:$0xff] }
 0x4cc   :  { %1605 = vmatmul.bf16.vlgmr.msrb.gmra.mxu0 %v4332_v3  ;;  %1618 = vmatmul.bf16.vlgmr.msrb.gmra.mxu1 %v4332_v3 }
 0x4cd   :  { %1631 = vmatmul.bf16.vlgmr.msrb.gmra.mxu2 %v4332_v3  ;;  %1644 = vmatmul.bf16.vlgmr.msrb.gmra.mxu3 %v4332_v3  ;;  %v7897_v3 = vld [vmem:[#allocation44_spill] sm:$0xff] }
 0x4ce   :  { %1723 = vmatpush.bf16.msra.mxu0 %v5383_v56  ;;  %1736 = vmatpush.bf16.msra.mxu1 %v5387_v57  ;;  %v7883_v56 = vld [vmem:[#allocation30_spill] sm:$0xff]  ;;  %v7884_v57 = vld [vmem:[#allocation31_spill] sm:$0xff] }
 0x4cf   :  { %1749 = vmatpush.bf16.msra.mxu2 %v5389_v58  ;;  %1762 = vmatpush.bf16.msra.mxu3 %v5392_v62  ;;  %v7885_v58 = vld [vmem:[#allocation32_spill] sm:$0xff]  ;;  %v7886_v62 = vld [vmem:[#allocation33_spill] sm:$0xff] }
 0x4d2   :  { %1724 = vmatpush.bf16.msra.mxu0 %v5395_v5  ;;  %1737 = vmatpush.bf16.msra.mxu1 %v5399_v6  ;;  %v7887_v5 = vld [vmem:[#allocation34_spill] sm:$0xff]  ;;  %v7888_v6 = vld [vmem:[#allocation35_spill] sm:$0xff] }
 0x4d3   :  { %1750 = vmatpush.bf16.msra.mxu2 %v5401_v9  ;;  %1763 = vmatpush.bf16.msra.mxu3 %v5404_v14  ;;  %v7889_v9 = vld [vmem:[#allocation36_spill] sm:$0xff]  ;;  %v7890_v14 = vld [vmem:[#allocation37_spill] sm:$0xff] }
 0x4d6   :  { %1725 = vmatpush.bf16.msra.mxu0 %v5407_v23  ;;  %1738 = vmatpush.bf16.msra.mxu1 %v5411_v27  ;;  %v7891_v23 = vld [vmem:[#allocation38_spill] sm:$0xff]  ;;  %v7892_v27 = vld [vmem:[#allocation39_spill] sm:$0xff] }
 0x4d7   :  { %1751 = vmatpush.bf16.msra.mxu2 %v5413_v28  ;;  %1764 = vmatpush.bf16.msra.mxu3 %v5416_v35  ;;  %v7893_v28 = vld [vmem:[#allocation40_spill] sm:$0xff] }
 0x4da   :  { %1726 = vmatpush.bf16.msra.mxu0 %v5428_v43  ;;  %1739 = vmatpush.bf16.msra.mxu1 %v5441_v51 }
 0x4db   :  { %1752 = vmatpush.bf16.msra.mxu2 %v5443_v52  ;;  %1765 = vmatpush.bf16.msra.mxu3 %v5452_v55 }
 0x4de   :  { %1771 = vmatpush.bf16.msrb.mxu0 %v5454_v59  ;;  %1784 = vmatpush.bf16.msrb.mxu1 %v5456_v60 }
 0x4df   :  { %1797 = vmatpush.bf16.msrb.mxu2 %v5458_v61  ;;  %1810 = vmatpush.bf16.msrb.mxu3 %v5470_v2 }
 0x4e2   :  { %1772 = vmatpush.bf16.msrb.mxu0 %v5491_v18  ;;  %1785 = vmatpush.bf16.msrb.mxu1 %v5495_v19 }
 0x4e3   :  { %1798 = vmatpush.bf16.msrb.mxu2 %v7868_v7  ;;  %1811 = vmatpush.bf16.msrb.mxu3 %v7869_v8 }
 0x4e6   :  { %1773 = vmatpush.bf16.msrb.mxu0 %v7870_v12  ;;  %1786 = vmatpush.bf16.msrb.mxu1 %v7871_v16 }
 0x4e7   :  { %1799 = vmatpush.bf16.msrb.mxu2 %v7872_v17  ;;  %1812 = vmatpush.bf16.msrb.mxu3 %v7873_v21 }
 0x4ea   :  { %1774 = vmatpush.bf16.msrb.mxu0 %v7874_v25  ;;  %1787 = vmatpush.bf16.msrb.mxu1 %v7875_v29 }
 0x4eb   :  { %1800 = vmatpush.bf16.msrb.mxu2 %v7876_v33  ;;  %1813 = vmatpush.bf16.msrb.mxu3 %v7877_v34 }
 0x4ee   :  { %1775 = vmatpush.bf16.msrb.mxu0 %v7878_v38  ;;  %1788 = vmatpush.bf16.msrb.mxu1 %v7879_v44 }
 0x4ef   :  { %1801 = vmatpush.bf16.msrb.mxu2 %v7880_v45  ;;  %1814 = vmatpush.bf16.msrb.mxu3 %v7881_v46 }
 0x4f2   :  { %1776 = vmatpush.bf16.msrb.mxu0 %v7882_v50  ;;  %1789 = vmatpush.bf16.msrb.mxu1 %v7883_v56 }
 0x4f3   :  { %1802 = vmatpush.bf16.msrb.mxu2 %v7884_v57  ;;  %1815 = vmatpush.bf16.msrb.mxu3 %v7885_v58 }
 0x4f6   :  { %1777 = vmatpush.bf16.msrb.mxu0 %v7886_v62  ;;  %1790 = vmatpush.bf16.msrb.mxu1 %v7887_v5 }
 0x4f7   :  { %1803 = vmatpush.bf16.msrb.mxu2 %v7888_v6  ;;  %1816 = vmatpush.bf16.msrb.mxu3 %v7889_v9 }
 0x4fa   :  { %1778 = vmatpush.bf16.msrb.mxu0 %v7890_v14  ;;  %1791 = vmatpush.bf16.msrb.mxu1 %v7891_v23 }
 0x4fb   :  { %1804 = vmatpush.bf16.msrb.mxu2 %v7892_v27  ;;  %1817 = vmatpush.bf16.msrb.mxu3 %v7893_v28 }
 0x539   :  { %v1554_v35 = vpop.f32.mrf.mxu0  ;;  %v1567_v43 = vpop.f32.mrf.mxu1 }
 0x540   :  { %v1580_v51 = vpop.f32.mrf.mxu2  ;;  %v1593_v52 = vpop.f32.mrf.mxu3 }
 0x541   :  { %v1556_v55 = vpop.f32.mrf.mxu0  ;;  %v1569_v59 = vpop.f32.mrf.mxu1 }
 0x548   :  { %v1582_v60 = vpop.f32.mrf.mxu2  ;;  %v1595_v61 = vpop.f32.mrf.mxu3 }
 0x549   :  { %v1606_v2 = vpop.f32.mrf.mxu0  ;;  %v1619_v18 = vpop.f32.mrf.mxu1 }
 0x54a   :  { %v1607_v19 = vadd.f32 %v1606_v2, %v1554_v35  ;;  %v1620_v47 = vadd.f32 %v1619_v18, %v1567_v43 }
 0x54c   :  { %v1649_v63 = vadd.f32 %v1607_v19, %v7894_v10  ;;  %v1650_v24 = vadd.f32 %v1620_v47, %v7895_v40  ;;  %v6266_v47 = vld [vmem:[%s7465_s7 + $0x30] sm:$0xff] }
 0x54e   :  { %v4333_v15 = vmul.f32 -1.442695, %v1649_v63  ;;  %v4334_v32 = vmul.f32 -1.442695, %v1650_v24  ;;  %v6272_v63 = vld [vmem:[%s7465_s7 + $0x28] sm:$0xff]  ;;  %v6278_v24 = vld [vmem:[%s7465_s7 + $0x20] sm:$0xff] }
 0x550   :  { %4950 = vpow2.f32 %v4333_v15  ;;  %v1632_v41 = vpop.f32.mrf.mxu2  ;;  %v1645_v1 = vpop.f32.mrf.mxu3  ;;  %v4336_v15 = vld [vmem:[%s7459_s1 + $0x1c] sm:$0xf] }
 0x551   :  { %4952 = vpow2.f32 %v4334_v32  ;;  %v1646_v37 = vadd.f32 %v1645_v1, %v1593_v52  ;;  %v1608_v13 = vpop.f32.mrf.mxu0  ;;  %v1621_v20 = vpop.f32.mrf.mxu1  ;;  %v1633_v42 = vadd.f32 %v1632_v41, %v1580_v51  ;;  %v6287_v32 = vld [vmem:[%s7465_s7 + $0x18] sm:$0xff]  ;;  %v6293_v41 = vld [vmem:[%s7465_s7 + $0x10] sm:$0xff]  ;;  %v6299_v1 = vld [vmem:[%s7465_s7 + $0x8] sm:$0xff] }
 0x552   :  { %v1991_v13 = vld [vmem:[%s7460_s2] sm:$0xff] }
 0x553   :  { %v1652_v26 = vadd.f32 %v1646_v37, %v7896_v53  ;;  %v1651_v7 = vadd.f32 %v1633_v42, %v7897_v3  ;;  %v6305_v37 = vld [vmem:[%s7465_s7] sm:$0xff]  ;;  %v1992_v20 = vpack.c.bf16 %v1991_v13, %v1991_v13 }
 0x555   :  { %v4335_v54 = vmul.f32 -1.442695, %v1652_v26  ;;  %v4486_v26 = vld [vmem:[#allocation9 + $0xe0] sm:$0xf] }
 0x556   :  { %v4951_v22 = vpop.eup %4950 }
 0x557   :  { %v4953_v39 = vpop.eup %4952  ;;  %v1656_v48 = vadd.f32 1.0, %v4951_v22  ;;  %4954 = vpow2.f32 %v4335_v54  ;;  %v4832_v54 = vld [vmem:[#allocation9 + $0xec] sm:$0xf0]  ;;  %v4830_v22 = vld [vmem:[#allocation9 + $0xe4] sm:$0xf] }
 0x558   :  { %v1675_v11 = vadd.f32 1.0, %v4953_v39  ;;  %v1647_v36 = vpop.f32.mrf.mxu3  ;;  %v1634_v49 = vpop.f32.mrf.mxu2  ;;  %v6311_v39 = vor.u32 %v4832_v54, %v4486_v26  ;;  %v4816_v26 = vld [vmem:[#allocation9 + $0x6c] sm:$0xf0]  ;;  %v4814_v54 = vld [vmem:[#allocation9 + $0x64] sm:$0xf] }
 0x559   :  { %4956 = vrcp.f32 %v1656_v48  ;;  %v1668_v25 = vand.u32 2147483648, %v1656_v48  ;;  %v1666_v34 = vand.u32 2147483647, %v1656_v48  ;;  %vm1662_vm10 = vweird.f32 %v1656_v48  ;;  %v4833_v36 = vld [vmem:[#allocation9 + $0xf4] sm:$0xf0] }
 0x55a   :  { %4958 = vrcp.f32 %v1675_v11  ;;  %v1687_v29 = vand.u32 2147483648, %v1675_v11  ;;  %v1685_v44 = vand.u32 2147483647, %v1675_v11  ;;  %vm1681_vm11 = vweird.f32 %v1675_v11  ;;  %7898 = vst [vmem:[#allocation15_spill] sm:$0xff] %v6311_v39 }
 0x55b   :  { %v1669_v50 = vor.u32 1.1754944e-38, %v1668_v25  ;;  %vm1667_vm14 = vcmp.eq.f32.partialorder %v1666_v34, 8.507059e+37  ;;  %v4829_v25 = vld [vmem:[#allocation9 + $0xd4] sm:$0xf0]  ;;  %v4827_v34 = vld [vmem:[#allocation9 + $0xcc] sm:$0xf] }
 0x55c   :  { %v1688_v58 = vor.u32 1.1754944e-38, %v1687_v29  ;;  %vm1686_vm15 = vcmp.eq.f32.partialorder %v1685_v44, 8.507059e+37 }
 0x55d   :  { %v4955_v4 = vpop.eup %4954 }
 0x55e   :  { %v1695_v0 = vadd.f32 1.0, %v4955_v4  ;;  %v4831_v4 = vld [vmem:[#allocation9 + $0xec] sm:$0xf] }
 0x55f   :  { %v4957_v31 = vpop.eup %4956 }
 0x560   :  { %v4959_v8 = vpop.eup %4958  ;;  %v1658_v12 = vmul.f32 %v4957_v31, %v1656_v48  ;;  %4960 = vrcp.f32 %v1695_v0  ;;  %vm1663_vm8 = vweird.f32 %v4957_v31  ;;  %v1707_v52 = vand.u32 2147483648, %v1695_v0  ;;  %v4488_v48 = vld [vmem:[#allocation9 + $0xf0] sm:$0xf0] }
 0x561   :  { %v1677_v16 = vmul.f32 %v4959_v8, %v1675_v11  ;;  %4962 = vtanh.f32 %v1651_v7  ;;  %vm1682_vm9 = vweird.f32 %v4959_v8  ;;  %vm1664_vm12 = vmor %vm1662_vm10, %vm1663_vm8  ;;  %vm1701_vm1 = vweird.f32 %v1695_v0  ;;  %v4494_v11 = vld [vmem:[#allocation9 + $0xe8] sm:$0xf]  ;;  %v4470_v7 = vld [vmem:[#allocation9 + $0xc0] sm:$0xf] }
 0x562   :  { %v1659_v17 = vsub.f32 1.0, %v1658_v12  ;;  %vm1683_vm13 = vmor %vm1681_vm11, %vm1682_vm9  ;;  %v1705_v55 = vand.u32 2147483647, %v1695_v0  ;;  %v1708_v60 = vor.u32 1.1754944e-38, %v1707_v52  ;;  %v6313_v49 = vor.u32 %v4830_v22, %v4488_v48  ;;  %v4826_v12 = vld [vmem:[#allocation9 + $0xc4] sm:$0xf] }
 0x563   :  { %v1678_v21 = vsub.f32 1.0, %v1677_v16  ;;  %v6315_v42 = vor.u32 %v4833_v36, %v4494_v11  ;;  %v4424_v48 = vld [vmem:[#allocation9 + $0x70] sm:$0xf0]  ;;  %v4430_v11 = vld [vmem:[#allocation9 + $0x68] sm:$0xf] }
 0x564   :  { %v1660_v33 = vmul.f32 %v4957_v31, %v1659_v17  ;;  %vm1706_vm3 = vcmp.eq.f32.partialorder %v1705_v55, 8.507059e+37  ;;  %7899 = vst [vmem:[#allocation16_spill] sm:$0xff] %v6313_v49  ;;  %v4472_v17 = vld [vmem:[#allocation9 + $0xd0] sm:$0xf0]  ;;  %v4817_v36 = vld [vmem:[#allocation9 + $0x74] sm:$0xf0] }
 0x565   :  { %v1679_v38 = vmul.f32 %v4959_v8, %v1678_v21  ;;  %7900 = vst [vmem:[#allocation17_spill] sm:$0xff] %v6315_v42  ;;  %v4478_v21 = vld [vmem:[#allocation9 + $0xc8] sm:$0xf]  ;;  %v6325_v29 = vor.u32 %v4826_v12, %v4472_v17 }
 0x566   :  { %v4961_v45 = vpop.eup %4960  ;;  %v1661_v46 = vadd.f32 %v4957_v31, %v1660_v33  ;;  %v6327_v33 = vor.u32 %v4829_v25, %v4478_v21  ;;  %v4406_v25 = vld [vmem:[#allocation9 + $0x40] sm:$0xf] }
 0x567   :  { %v1680_v56 = vadd.f32 %v4959_v8, %v1679_v38  ;;  %v1697_v57 = vmul.f32 %v4961_v45, %v1695_v0  ;;  %v4963_v5 = vpop.eup %4962  ;;  %vm1702_vm0 = vweird.f32 %v4961_v45  ;;  %v4496_v0 = vld [vmem:[#allocation9 + $0xf8] sm:$0xf0]  ;;  %7903 = vst [vmem:[#allocation20_spill] sm:$0xff] %v6325_v29 }
 0x568   :  { %v1665_v62 = vsel %vm1664_vm12, %v4957_v31, %v1661_v46  ;;  %vm1703_vm2 = vmor %vm1701_vm1, %vm1702_vm0  ;;  %v6318_v31 = vor.u32 %v4831_v4, %v4496_v0  ;;  %7904 = vst [vmem:[#allocation21_spill] sm:$0xff] %v6327_v33  ;;  %v4480_v38 = vld [vmem:[#allocation9 + $0xd8] sm:$0xf0]  ;;  %v4824_v46 = vld [vmem:[#allocation9 + $0xac] sm:$0xf0]  ;;  %v6365_v4 = vor.u32 %v4814_v54, %v4424_v48  ;;  %v6367_v0 = vor.u32 %v4817_v36, %v4430_v11 }
 0x569   :  { %v1670_v6 = vsel %vm1667_vm14, %v1669_v50, %v1665_v62  ;;  %v1684_v9 = vsel %vm1683_vm13, %v4959_v8, %v1680_v56  ;;  %v1698_v14 = vsub.f32 1.0, %v1697_v57  ;;  %v4828_v8 = vld [vmem:[#allocation9 + $0xcc] sm:$0xf0]  ;;  %v6330_v44 = vor.u32 %v4827_v34, %v4480_v38  ;;  %v4822_v50 = vld [vmem:[#allocation9 + $0xa4] sm:$0xf] }
 0x56a   :  { %v1689_v23 = vsel %vm1686_vm15, %v1688_v58, %v1684_v9  ;;  %v1712_v27 = vmul.f32 %v4963_v5, %v1670_v6  ;;  %7901 = vst [vmem:[#allocation18_spill] sm:$0xff] %v6318_v31  ;;  %v6323_v16 = vor.u32 %v4828_v8, %v4470_v7  ;;  %v4456_v57 = vld [vmem:[#allocation9 + $0xb0] sm:$0xf0]  ;;  %v4462_v58 = vld [vmem:[#allocation9 + $0xa8] sm:$0xf] }
 0x56b   :  { %v1711_v28 = vmul.f32 %v1689_v23, %v6179_v30  ;;  %v1699_v35 = vmul.f32 %v4961_v45, %v1698_v14  ;;  %v6260_v30 = vld [vmem:[%s7465_s7 + $0x38] sm:$0xff]  ;;  %7905 = vst [vmem:[#allocation22_spill] sm:$0xff] %v6330_v44  ;;  %v6337_v5 = vor.u32 %v4822_v50, %v4456_v57  ;;  %v4823_v9 = vld [vmem:[#allocation9 + $0xac] sm:$0xf]  ;;  %v4812_v34 = vld [vmem:[#allocation9 + $0x4c] sm:$0xf0] }
 0x56c   :  { %7902 = vst [vmem:[#allocation19_spill] sm:$0xff] %v6323_v16  ;;  %v4825_v62 = vld [vmem:[#allocation9 + $0xb4] sm:$0xf0]  ;;  %v4464_v14 = vld [vmem:[#allocation9 + $0xb8] sm:$0xf0]  ;;  %v6379_v50 = vor.u32 %v4812_v34, %v4406_v25 }
 0x56d   :  { %v6254_v43 = vadd.f32 %v1712_v27, %v1711_v28  ;;  %v1700_v51 = vadd.f32 %v4961_v45, %v1699_v35  ;;  %7907 = vst [vmem:[#allocation24_spill] sm:$0xff] %v6337_v5  ;;  %v6339_v6 = vor.u32 %v4825_v62, %v4462_v58  ;;  %v6342_v23 = vor.u32 %v4823_v9, %v4464_v14  ;;  %v4438_v27 = vld [vmem:[#allocation9 + $0x80] sm:$0xf]  ;;  %v4820_v28 = vld [vmem:[#allocation9 + $0x8c] sm:$0xf0] }
 0x56e   :  { %v4818_v35 = vld [vmem:[#allocation9 + $0x84] sm:$0xf]  ;;  %v6351_v55 = vor.u32 %v4820_v28, %v4438_v27  ;;  %7915 = vst [vmem:[#allocation32_spill] sm:$0xff] %v6365_v4  ;;  %v4815_v7 = vld [vmem:[#allocation9 + $0x6c] sm:$0xf] }
 0x56f   :  { %4964 = vtanh.f32 %v6254_v43  ;;  %v1704_v59 = vsel %vm1703_vm2, %v4961_v45, %v1700_v51  ;;  %v4454_v45 = vld [vmem:[#allocation9 + $0xa0] sm:$0xf]  ;;  %7908 = vst [vmem:[#allocation25_spill] sm:$0xff] %v6339_v6  ;;  %v4432_v8 = vld [vmem:[#allocation9 + $0x78] sm:$0xf0] }
 0x570   :  { %v1709_v2 = vsel %vm1706_vm3, %v1708_v60, %v1704_v59  ;;  %v6335_v56 = vor.u32 %v4824_v46, %v4454_v45  ;;  %7909 = vst [vmem:[#allocation26_spill] sm:$0xff] %v6342_v23  ;;  %v4440_v59 = vld [vmem:[#allocation9 + $0x90] sm:$0xf0]  ;;  %v4446_v60 = vld [vmem:[#allocation9 + $0x88] sm:$0xf]  ;;  %v6370_v12 = vor.u32 %v4815_v7, %v4432_v8 }
 0x571   :  { %7910 = vst [vmem:[#allocation27_spill] sm:$0xff] %v6351_v55  ;;  %v4810_v38 = vld [vmem:[#allocation9 + $0x44] sm:$0xf]  ;;  %v4408_v57 = vld [vmem:[#allocation9 + $0x50] sm:$0xf0] }
 0x572   :  { %7906 = vst [vmem:[#allocation23_spill] sm:$0xff] %v6335_v56  ;;  %v4414_v58 = vld [vmem:[#allocation9 + $0x48] sm:$0xf]  ;;  %v4813_v62 = vld [vmem:[#allocation9 + $0x54] sm:$0xf0]  ;;  %v6381_v9 = vor.u32 %v4810_v38, %v4408_v57 }
 0x573   :  { %7916 = vst [vmem:[#allocation33_spill] sm:$0xff] %v6367_v0  ;;  %v6383_v14 = vor.u32 %v4813_v62, %v4414_v58  ;;  %v4811_v27 = vld [vmem:[#allocation9 + $0x4c] sm:$0xf]  ;;  %v4416_v28 = vld [vmem:[#allocation9 + $0x58] sm:$0xf0] }
 0x574   :  { %7917 = vst [vmem:[#allocation34_spill] sm:$0xff] %v6370_v12  ;;  %v4807_v11 = vld [vmem:[#allocation9 + $0x2c] sm:$0xf]  ;;  %v4400_v36 = vld [vmem:[#allocation9 + $0x38] sm:$0xf0] }
 0x575   :  { %v4965_v61 = vpop.eup %4964  ;;  %7918 = vst [vmem:[#allocation35_spill] sm:$0xff] %v6379_v50  ;;  %v6398_v7 = vor.u32 %v4807_v11, %v4400_v36  ;;  %v4374_v34 = vld [vmem:[#allocation9] sm:$0xf]  ;;  %v4804_v38 = vld [vmem:[#allocation9 + $0xc] sm:$0xf0] }
 0x576   :  { %v1715_v18 = vmul.f32 %v4965_v61, %v1709_v2  ;;  %v4821_v61 = vld [vmem:[#allocation9 + $0x94] sm:$0xf0]  ;;  %v6353_v2 = vor.u32 %v4818_v35, %v4440_v59  ;;  %7919 = vst [vmem:[#allocation36_spill] sm:$0xff] %v6381_v9  ;;  %v6386_v35 = vor.u32 %v4811_v27, %v4416_v28  ;;  %v4390_v59 = vld [vmem:[#allocation9 + $0x20] sm:$0xf]  ;;  %v6403_v58 = vor.u32 %v4804_v38, %v4374_v34 }
 0x577   :  { %7920 = vst [vmem:[#allocation37_spill] sm:$0xff] %v6383_v14  ;;  %v4376_v62 = vld [vmem:[#allocation9 + $0x10] sm:$0xf0]  ;;  %v4382_v27 = vld [vmem:[#allocation9 + $0x8] sm:$0xf] }
 0x578   :  { %v1718_v19 = vpack.c.bf16 %v1715_v18, %v1715_v18  ;;  %7911 = vst [vmem:[#allocation28_spill] sm:$0xff] %v6353_v2  ;;  %v6355_v18 = vor.u32 %v4821_v61, %v4446_v60  ;;  %v4808_v60 = vld [vmem:[#allocation9 + $0x2c] sm:$0xf0]  ;;  %v4806_v61 = vld [vmem:[#allocation9 + $0x24] sm:$0xf] }
 0x579   :  { %7921 = vst [vmem:[#allocation38_spill] sm:$0xff] %v6386_v35  ;;  %v4805_v28 = vld [vmem:[#allocation9 + $0x14] sm:$0xf0]  ;;  %v4614_v11 = vld [vmem:[#allocation7 + $0xe0] sm:$0xf] }
 0x57a   :  { %1727 = vmatmul.bf16.vlgmr.msra.gmra.mxu0 %v1718_v19  ;;  %1740 = vmatmul.bf16.vlgmr.msra.gmra.mxu1 %v1718_v19  ;;  %7912 = vst [vmem:[#allocation29_spill] sm:$0xff] %v6355_v18  ;;  %v4616_v34 = vld [vmem:[#allocation7 + $0xf0] sm:$0xf0] }
 0x57b   :  { %1753 = vmatmul.bf16.vlgmr.msra.gmra.mxu2 %v1718_v19  ;;  %1766 = vmatmul.bf16.vlgmr.msra.gmra.mxu3 %v1718_v19  ;;  %v4819_v19 = vld [vmem:[#allocation9 + $0x8c] sm:$0xf]  ;;  %7925 = vst [vmem:[#allocation42_spill] sm:$0xff] %v6398_v7 }
 0x57c   :  { %2041 = vmatpush.bf16.msra.mxu0 %v6260_v30  ;;  %2216 = vmatpush.bf16.msra.mxu1 %v6311_v39  ;;  %7926 = vst [vmem:[#allocation43_spill] sm:$0xff] %v6403_v58 }
 0x57d   :  { %2229 = vmatpush.bf16.msra.mxu2 %v6313_v49  ;;  %2242 = vmatpush.bf16.msra.mxu3 %v6315_v42  ;;  %v4518_v42 = vld [vmem:[#allocation7 + $0x20] sm:$0xf] }
 0x580   :  { %2042 = vmatpush.bf16.msra.mxu0 %v6266_v47  ;;  %2217 = vmatpush.bf16.msra.mxu1 %v6323_v16 }
 0x581   :  { %2230 = vmatpush.bf16.msra.mxu2 %v6325_v29  ;;  %2243 = vmatpush.bf16.msra.mxu3 %v6327_v33  ;;  %v4780_v33 = vld [vmem:[#allocation7 + $0x4c] sm:$0xf0] }
 0x584   :  { %2043 = vmatpush.bf16.msra.mxu0 %v6272_v63  ;;  %2218 = vmatpush.bf16.msra.mxu1 %v6335_v56 }
 0x585   :  { %2231 = vmatpush.bf16.msra.mxu2 %v6337_v5  ;;  %2244 = vmatpush.bf16.msra.mxu3 %v6339_v6 }
 0x588   :  { %2044 = vmatpush.bf16.msra.mxu0 %v6278_v24  ;;  %2219 = vmatpush.bf16.msra.mxu1 %v6351_v55 }
 0x589   :  { %2232 = vmatpush.bf16.msra.mxu2 %v6353_v2  ;;  %2245 = vmatpush.bf16.msra.mxu3 %v6355_v18 }
 0x58a   :  { %1779 = vmatmul.bf16.vlgmr.msrb.gmra.mxu0 %v4336_v15  ;;  %1792 = vmatmul.bf16.vlgmr.msrb.gmra.mxu1 %v4336_v15 }
 0x58b   :  { %1805 = vmatmul.bf16.vlgmr.msrb.gmra.mxu2 %v4336_v15  ;;  %1818 = vmatmul.bf16.vlgmr.msrb.gmra.mxu3 %v4336_v15  ;;  %v4448_v15 = vld [vmem:[#allocation9 + $0x98] sm:$0xf0] }
 0x58c   :  { %2045 = vmatpush.bf16.msra.mxu0 %v6287_v32  ;;  %v6358_v13 = vor.u32 %v4819_v19, %v4448_v15  ;;  %v6391_v19 = vor.u32 %v4808_v60, %v4390_v59  ;;  %v4392_v15 = vld [vmem:[#allocation9 + $0x30] sm:$0xf0] }
 0x58d   :  { %2233 = vmatpush.bf16.msra.mxu2 %v6365_v4  ;;  %2246 = vmatpush.bf16.msra.mxu3 %v6367_v0  ;;  %v6393_v54 = vor.u32 %v4806_v61, %v4392_v15  ;;  %v6409_v15 = vor.u32 %v4805_v28, %v4382_v27  ;;  %v4624_v28 = vld [vmem:[#allocation7 + $0xf8] sm:$0xf0]  ;;  %v4584_v0 = vld [vmem:[#allocation7 + $0xb0] sm:$0xf0] }
 0x58e   :  { %7913 = vst [vmem:[#allocation30_spill] sm:$0xff] %v6358_v13 }
 0x58f   :  { %7922 = vst [vmem:[#allocation39_spill] sm:$0xff] %v6391_v19 }
 0x590   :  { %2046 = vmatpush.bf16.msra.mxu0 %v6293_v41  ;;  %7923 = vst [vmem:[#allocation40_spill] sm:$0xff] %v6393_v54 }
 0x591   :  { %2234 = vmatpush.bf16.msra.mxu2 %v6381_v9  ;;  %2247 = vmatpush.bf16.msra.mxu3 %v6383_v14  ;;  %7928 = vst [vmem:[#allocation45_spill] sm:$0xff] %v6409_v15  ;;  %v4792_v14 = vld [vmem:[#allocation7 + $0xac] sm:$0xf0] }
 0x594   :  { %2047 = vmatpush.bf16.msra.mxu0 %v6299_v1 }
 0x595   :  { %2235 = vmatpush.bf16.msra.mxu2 %v6393_v54 }
 0x598   :  { %2048 = vmatpush.bf16.msra.mxu0 %v6305_v37 }
 0x59b   :  { %2049 = vmatmul.bf16.vlgmr.msra.gmra.mxu0 %v1992_v20  ;;  %v4422_v20 = vld [vmem:[#allocation9 + $0x60] sm:$0xf] }
 0x59c   :  { %2255 = vmatpush.bf16.msrb.mxu0 %v6318_v31  ;;  %v6363_v22 = vor.u32 %v4816_v26, %v4422_v20  ;;  %v4398_v20 = vld [vmem:[#allocation9 + $0x28] sm:$0xf]  ;;  %v4809_v26 = vld [vmem:[#allocation9 + $0x34] sm:$0xf0] }
 0x59d   :  { %v6395_v48 = vor.u32 %v4809_v26, %v4398_v20  ;;  %v4803_v20 = vld [vmem:[#allocation9 + $0xc] sm:$0xf]  ;;  %v4384_v26 = vld [vmem:[#allocation9 + $0x18] sm:$0xf0] }
 0x59e   :  { %7914 = vst [vmem:[#allocation31_spill] sm:$0xff] %v6363_v22  ;;  %2220 = vmatpush.bf16.msra.mxu1 %v6363_v22  ;;  %v6412_v36 = vor.u32 %v4803_v20, %v4384_v26  ;;  %v4598_v20 = vld [vmem:[#allocation7 + $0xc0] sm:$0xf] }
 0x59f   :  { %7924 = vst [vmem:[#allocation41_spill] sm:$0xff] %v6395_v48  ;;  %2248 = vmatpush.bf16.msra.mxu3 %v6395_v48 }
 0x5a0   :  { %2256 = vmatpush.bf16.msrb.mxu0 %v6330_v44  ;;  %7929 = vst [vmem:[#allocation46_spill] sm:$0xff] %v6412_v36 }
 0x5a2   :  { %2221 = vmatpush.bf16.msra.mxu1 %v6379_v50 }
 0x5a3   :  { %2249 = vmatpush.bf16.msra.mxu3 %v6409_v15 }
 0x5a4   :  { %2257 = vmatpush.bf16.msrb.mxu0 %v6342_v23 }
 0x5a6   :  { %2222 = vmatpush.bf16.msra.mxu1 %v6391_v19 }
 0x5a8   :  { %2258 = vmatpush.bf16.msrb.mxu0 %v6358_v13 }
 0x5aa   :  { %2223 = vmatpush.bf16.msra.mxu1 %v6403_v58 }
 0x5ac   :  { %2259 = vmatpush.bf16.msrb.mxu0 %v6370_v12  ;;  %v4774_v12 = vld [vmem:[#allocation7 + $0x24] sm:$0xf] }
 0x5b0   :  { %2260 = vmatpush.bf16.msrb.mxu0 %v6386_v35 }
 0x5b4   :  { %2261 = vmatpush.bf16.msrb.mxu0 %v6398_v7 }
 0x5b8   :  { %2262 = vmatpush.bf16.msrb.mxu0 %v6412_v36  ;;  %v4776_v36 = vld [vmem:[#allocation7 + $0x2c] sm:$0xf0] }
 0x5f7   :  { %v6346_v51 = vpop.f32.mrf.mxu0  ;;  %v6348_v52 = vpop.f32.mrf.mxu1 }
 0x5fe   :  { %v6372_v17 = vpop.f32.mrf.mxu2  ;;  %v6374_v21 = vpop.f32.mrf.mxu3 }
 0x5ff   :  { %v1730_v45 = vpop.f32.mrf.mxu0  ;;  %v1743_v46 = vpop.f32.mrf.mxu1 }
 0x600   :  { %v4802_v45 = vld [vmem:[#allocation9 + $0x4] sm:$0xf] }
 0x601   :  { %v6407_v61 = vor.u32 %v4802_v45, %v4376_v62  ;;  %v4622_v45 = vld [vmem:[#allocation7 + $0xe8] sm:$0xf] }
 0x603   :  { %7927 = vst [vmem:[#allocation44_spill] sm:$0xff] %v6407_v61  ;;  %2236 = vmatpush.bf16.msra.mxu2 %v6407_v61 }
 0x606   :  { %v1756_v8 = vpop.f32.mrf.mxu2  ;;  %v1769_v25 = vpop.f32.mrf.mxu3 }
 0x607   :  { %v1780_v46 = vpop.f32.mrf.mxu0  ;;  %v1793_v57 = vpop.f32.mrf.mxu1  ;;  %v4800_v8 = vld [vmem:[#allocation7 + $0xec] sm:$0xf0]  ;;  %v4798_v25 = vld [vmem:[#allocation7 + $0xe4] sm:$0xf] }
 0x608   :  { %v1781_v59 = vadd.f32 %v1780_v46, %v6346_v51  ;;  %v1794_v60 = vadd.f32 %v1793_v57, %v6348_v52  ;;  %v6418_v52 = vor.u32 %v4800_v8, %v4614_v11  ;;  %v4801_v46 = vld [vmem:[#allocation7 + $0xf4] sm:$0xf0]  ;;  %v4799_v57 = vld [vmem:[#allocation7 + $0xec] sm:$0xf]  ;;  %v6421_v62 = vor.u32 %v4798_v25, %v4616_v34  ;;  %v4794_v11 = vld [vmem:[#allocation7 + $0xc4] sm:$0xf] }
 0x609   :  { %v6423_v27 = vor.u32 %v4801_v46, %v4622_v45  ;;  %v4600_v8 = vld [vmem:[#allocation7 + $0xd0] sm:$0xf0]  ;;  %v4606_v25 = vld [vmem:[#allocation7 + $0xc8] sm:$0xf]  ;;  %v4797_v34 = vld [vmem:[#allocation7 + $0xd4] sm:$0xf0] }
 0x60a   :  { %v1823_v38 = vadd.f32 %v1781_v59, %v7894_v10  ;;  %v1824_v51 = vadd.f32 %v1794_v60, %v7895_v40  ;;  %7930 = vst [vmem:[#allocation47_spill] sm:$0xff] %v6418_v52  ;;  %v4796_v10 = vld [vmem:[#allocation7 + $0xcc] sm:$0xf0]  ;;  %2428 = vmatpush.bf16.msrb.mxu1 %v6418_v52  ;;  %v6426_v60 = vor.u32 %v4799_v57, %v4624_v28  ;;  %v4795_v57 = vld [vmem:[#allocation7 + $0xcc] sm:$0xf] }
 0x60b   :  { %7931 = vst [vmem:[#allocation48_spill] sm:$0xff] %v6421_v62  ;;  %v6428_v26 = vor.u32 %v4796_v10, %v4598_v20  ;;  %2441 = vmatpush.bf16.msrb.mxu2 %v6421_v62  ;;  %2454 = vmatpush.bf16.msrb.mxu3 %v6423_v27  ;;  %v4608_v28 = vld [vmem:[#allocation7 + $0xd8] sm:$0xf0]  ;;  %v4582_v20 = vld [vmem:[#allocation7 + $0xa0] sm:$0xf] }
 0x60c   :  { %7932 = vst [vmem:[#allocation49_spill] sm:$0xff] %v6423_v27  ;;  %v4337_v59 = vmul.f32 -1.442695, %v1823_v38  ;;  %v4338_v40 = vmul.f32 -1.442695, %v1824_v51  ;;  %2467 = vmatpush.bf16.msra.mxu0 %v6426_v60  ;;  %v6433_v38 = vor.u32 %v4794_v11, %v4600_v8  ;;  %v6435_v51 = vor.u32 %v4797_v34, %v4606_v25 }
 0x60d   :  { %7933 = vst [vmem:[#allocation50_spill] sm:$0xff] %v6426_v60  ;;  %v6438_v48 = vor.u32 %v4795_v57, %v4608_v28  ;;  %v6441_v60 = vor.u32 %v4792_v14, %v4582_v20  ;;  %v4590_v11 = vld [vmem:[#allocation7 + $0xa8] sm:$0xf]  ;;  %v4793_v8 = vld [vmem:[#allocation7 + $0xb4] sm:$0xf0] }
 0x60e   :  { %7934 = vst [vmem:[#allocation51_spill] sm:$0xff] %v6428_v26  ;;  %4966 = vpow2.f32 %v4337_v59  ;;  %v1806_v45 = vpop.f32.mrf.mxu2  ;;  %v1819_v46 = vpop.f32.mrf.mxu3  ;;  %v4790_v59 = vld [vmem:[#allocation7 + $0xa4] sm:$0xf]  ;;  %2429 = vmatpush.bf16.msrb.mxu1 %v6428_v26  ;;  %v4791_v25 = vld [vmem:[#allocation7 + $0xac] sm:$0xf] }
 0x60f   :  { %7935 = vst [vmem:[#allocation52_spill] sm:$0xff] %v6433_v38  ;;  %4968 = vpow2.f32 %v4338_v40  ;;  %v1820_v10 = vadd.f32 %v1819_v46, %v6374_v21  ;;  %v1782_v15 = vpop.f32.mrf.mxu0  ;;  %v1795_v27 = vpop.f32.mrf.mxu1  ;;  %2442 = vmatpush.bf16.msrb.mxu2 %v6433_v38  ;;  %2455 = vmatpush.bf16.msrb.mxu3 %v6435_v51  ;;  %v6446_v21 = vor.u32 %v4790_v59, %v4584_v0  ;;  %v4566_v40 = vld [vmem:[#allocation7 + $0x80] sm:$0xf]  ;;  %v4788_v46 = vld [vmem:[#allocation7 + $0x8c] sm:$0xf0] }
 0x610   :  { %7936 = vst [vmem:[#allocation53_spill] sm:$0xff] %v6435_v51  ;;  %v6448_v15 = vor.u32 %v4793_v8, %v4590_v11  ;;  %v4592_v27 = vld [vmem:[#allocation7 + $0xb8] sm:$0xf0]  ;;  %2468 = vmatpush.bf16.msra.mxu0 %v6438_v48  ;;  %v4786_v57 = vld [vmem:[#allocation7 + $0x84] sm:$0xf]  ;;  %v6454_v0 = vor.u32 %v4788_v46, %v4566_v40 }
 0x611   :  { %7937 = vst [vmem:[#allocation54_spill] sm:$0xff] %v6438_v48  ;;  %v1826_v34 = vadd.f32 %v1820_v10, %v7896_v53  ;;  %v6451_v14 = vor.u32 %v4791_v25, %v4592_v27  ;;  %v4568_v28 = vld [vmem:[#allocation7 + $0x90] sm:$0xf0]  ;;  %v4574_v20 = vld [vmem:[#allocation7 + $0x88] sm:$0xf] }
 0x612   :  { %7938 = vst [vmem:[#allocation55_spill] sm:$0xff] %v6441_v60  ;;  %v4789_v53 = vld [vmem:[#allocation7 + $0x94] sm:$0xf0]  ;;  %v4787_v10 = vld [vmem:[#allocation7 + $0x8c] sm:$0xf]  ;;  %2430 = vmatpush.bf16.msrb.mxu1 %v6441_v60  ;;  %v6460_v25 = vor.u32 %v4786_v57, %v4568_v28 }
 0x613   :  { %7939 = vst [vmem:[#allocation56_spill] sm:$0xff] %v6446_v21  ;;  %v4339_v18 = vmul.f32 -1.442695, %v1826_v34  ;;  %v4576_v59 = vld [vmem:[#allocation7 + $0x98] sm:$0xf0]  ;;  %2443 = vmatpush.bf16.msrb.mxu2 %v6446_v21  ;;  %2456 = vmatpush.bf16.msrb.mxu3 %v6448_v15  ;;  %v6462_v27 = vor.u32 %v4789_v53, %v4574_v20 }
 0x614   :  { %7940 = vst [vmem:[#allocation57_spill] sm:$0xff] %v6448_v15  ;;  %v4967_v6 = vpop.eup %4966  ;;  %2469 = vmatpush.bf16.msra.mxu0 %v6451_v14  ;;  %v6467_v40 = vor.u32 %v4787_v10, %v4576_v59  ;;  %v4784_v46 = vld [vmem:[#allocation7 + $0x6c] sm:$0xf0]  ;;  %v4552_v57 = vld [vmem:[#allocation7 + $0x70] sm:$0xf0] }
 0x615   :  { %7941 = vst [vmem:[#allocation58_spill] sm:$0xff] %v6451_v14  ;;  %v4969_v11 = vpop.eup %4968  ;;  %v6456_v8 = vadd.f32 1.0, %v4967_v6  ;;  %4970 = vpow2.f32 %v4339_v18  ;;  %v1807_v6 = vadd.f32 %v1806_v45, %v6372_v17  ;;  %v4550_v18 = vld [vmem:[#allocation7 + $0x60] sm:$0xf]  ;;  %v4558_v45 = vld [vmem:[#allocation7 + $0x68] sm:$0xf] }
 0x616   :  { %7942 = vst [vmem:[#allocation59_spill] sm:$0xff] %v6454_v0  ;;  %v6464_v34 = vadd.f32 1.0, %v4969_v11  ;;  %v1821_v48 = vpop.f32.mrf.mxu3  ;;  %v1808_v51 = vpop.f32.mrf.mxu2  ;;  %2431 = vmatpush.bf16.msrb.mxu1 %v6454_v0  ;;  %v4785_v53 = vld [vmem:[#allocation7 + $0x74] sm:$0xf0]  ;;  %v4783_v14 = vld [vmem:[#allocation7 + $0x6c] sm:$0xf] }
 0x617   :  { %7943 = vst [vmem:[#allocation60_spill] sm:$0xff] %v6460_v25  ;;  %4972 = vrcp.f32 %v6456_v8  ;;  %2444 = vmatpush.bf16.msrb.mxu2 %v6460_v25  ;;  %2457 = vmatpush.bf16.msrb.mxu3 %v6462_v27  ;;  %v6475_v48 = vor.u32 %v4784_v46, %v4550_v18  ;;  %v4782_v51 = vld [vmem:[#allocation7 + $0x64] sm:$0xf]  ;;  %v1840_v20 = vand.u32 2147483647, %v6456_v8  ;;  %v1825_v59 = vadd.f32 %v1807_v6, %v7897_v3 }
 0x618   :  { %7944 = vst [vmem:[#allocation61_spill] sm:$0xff] %v6462_v27  ;;  %4974 = vrcp.f32 %v6464_v34  ;;  %v6477_v28 = vpop.f32.mrf.mxu0  ;;  %2470 = vmatpush.bf16.msra.mxu0 %v6467_v40  ;;  %v6481_v17 = vor.u32 %v4782_v51, %v4552_v57  ;;  %v6484_v11 = vor.u32 %v4785_v53, %v4558_v45  ;;  %v4560_v18 = vld [vmem:[#allocation7 + $0x78] sm:$0xf0]  ;;  %v4534_v46 = vld [vmem:[#allocation7 + $0x40] sm:$0xf]  ;;  %vm1855_vm7 = vweird.f32 %v6464_v34 }
 0x619   :  { %7945 = vst [vmem:[#allocation62_spill] sm:$0xff] %v6467_v40  ;;  %v6489_v15 = vor.u32 %v4783_v14, %v4560_v18  ;;  %v4778_v40 = vld [vmem:[#allocation7 + $0x44] sm:$0xf]  ;;  %v6495_v3 = vor.u32 %v4780_v33, %v4534_v46  ;;  %v4536_v6 = vld [vmem:[#allocation7 + $0x50] sm:$0xf0]  ;;  %v1861_v33 = vand.u32 2147483648, %v6464_v34  ;;  %vm1836_vm8 = vweird.f32 %v6456_v8 }
 0x61a   :  { %7946 = vst [vmem:[#allocation63_spill] sm:$0xff] %v6475_v48  ;;  %2432 = vmatpush.bf16.msrb.mxu1 %v6475_v48  ;;  %v4542_v57 = vld [vmem:[#allocation7 + $0x48] sm:$0xf]  ;;  %v4781_v45 = vld [vmem:[#allocation7 + $0x54] sm:$0xf0]  ;;  %v1842_v46 = vand.u32 2147483648, %v6456_v8  ;;  %v6508_v35 = vor.u32 %v4778_v40, %v4536_v6 }
 0x61b   :  { %7947 = vst [vmem:[#allocation64_spill] sm:$0xff] %v6481_v17  ;;  %v4971_v10 = vpop.eup %4970  ;;  %2445 = vmatpush.bf16.msrb.mxu2 %v6481_v17  ;;  %2458 = vmatpush.bf16.msrb.mxu3 %v6484_v11  ;;  %v4779_v14 = vld [vmem:[#allocation7 + $0x4c] sm:$0xf]  ;;  %v4544_v18 = vld [vmem:[#allocation7 + $0x58] sm:$0xf0]  ;;  %v6510_v17 = vor.u32 %v4781_v45, %v4542_v57  ;;  %vm6514_vm4 = vcmp.eq.f32.partialorder %v1840_v20, 8.507059e+37 }
 0x61c   :  { %7948 = vst [vmem:[#allocation65_spill] sm:$0xff] %v6484_v11  ;;  %v6486_v27 = vadd.f32 1.0, %v4971_v10  ;;  %2471 = vmatpush.bf16.msra.mxu0 %v6489_v15  ;;  %v4520_v48 = vld [vmem:[#allocation7 + $0x30] sm:$0xf0]  ;;  %v1859_v0 = vand.u32 2147483647, %v6464_v34 }
 0x61d   :  { %7949 = vst [vmem:[#allocation66_spill] sm:$0xff] %v6489_v15  ;;  %v6491_v51 = vpop.eup %4972  ;;  %v6512_v15 = vor.u32 %v4779_v14, %v4544_v18  ;;  %v6525_v6 = vor.u32 %v4774_v12, %v4520_v48  ;;  %v4777_v20 = vld [vmem:[#allocation7 + $0x34] sm:$0xf0]  ;;  %v4528_v57 = vld [vmem:[#allocation7 + $0x38] sm:$0xf0] }
 0x61e   :  { %7950 = vst [vmem:[#allocation67_spill] sm:$0xff] %v6495_v3  ;;  %v6497_v53 = vpop.eup %4974  ;;  %v1832_v10 = vmul.f32 %v6491_v51, %v6456_v8  ;;  %4976 = vrcp.f32 %v6486_v27  ;;  %2433 = vmatpush.bf16.msrb.mxu1 %v6495_v3  ;;  %vm1837_vm5 = vweird.f32 %v6491_v51  ;;  %v4770_v14 = vld [vmem:[#allocation7 + $0x4] sm:$0xf]  ;;  %v4504_v48 = vld [vmem:[#allocation7 + $0x10] sm:$0xf0]  ;;  %vm1860_vm11 = vcmp.eq.f32.partialorder %v1859_v0, 8.507059e+37 }
 0x61f   :  { %v1851_v11 = vmul.f32 %v6497_v53, %v6464_v34  ;;  %4978 = vtanh.f32 %v1825_v59  ;;  %7951 = vst [vmem:[#allocation68_spill] sm:$0xff] %v6508_v35  ;;  %v6519_v59 = vor.u32 %v4776_v36, %v4518_v42  ;;  %2446 = vmatpush.bf16.msrb.mxu2 %v6508_v35  ;;  %2459 = vmatpush.bf16.msrb.mxu3 %v6510_v17  ;;  %vm1856_vm6 = vweird.f32 %v6497_v53  ;;  %v4502_v36 = vld [vmem:[#allocation7] sm:$0xf]  ;;  %vm1838_vm9 = vmor %vm1836_vm8, %vm1837_vm5  ;;  %v4512_v3 = vld [vmem:[#allocation7 + $0x18] sm:$0xf0] }
 0x620   :  { %v1833_v7 = vsub.f32 1.0, %v1832_v10  ;;  %7952 = vst [vmem:[#allocation69_spill] sm:$0xff] %v6510_v17  ;;  %v4526_v10 = vld [vmem:[#allocation7 + $0x28] sm:$0xf]  ;;  %v2052_v21 = vpop.f32.mrf.mxu0  ;;  %2472 = vmatpush.bf16.msra.mxu0 %v6512_v15  ;;  %vm1857_vm10 = vmor %vm1855_vm7, %vm1856_vm6  ;;  %vm1875_vm13 = vweird.f32 %v6486_v27 }
 0x621   :  { %7953 = vst [vmem:[#allocation70_spill] sm:$0xff] %v6512_v15  ;;  %v1852_v25 = vsub.f32 1.0, %v1851_v11  ;;  %v4775_v11 = vld [vmem:[#allocation7 + $0x2c] sm:$0xf]  ;;  %v6530_v42 = vor.u32 %v4777_v20, %v4526_v10  ;;  %v4772_v21 = vld [vmem:[#allocation7 + $0xc] sm:$0xf0] }
 0x622   :  { %7956 = vst [vmem:[#allocation71_spill] sm:$0xff] %v6519_v59  ;;  %v1834_v40 = vmul.f32 %v6491_v51, %v1833_v7  ;;  %v6532_v7 = vor.u32 %v4775_v11, %v4528_v57  ;;  %2434 = vmatpush.bf16.msrb.mxu1 %v6519_v59  ;;  %v4510_v15 = vld [vmem:[#allocation7 + $0x8] sm:$0xf]  ;;  %v4773_v10 = vld [vmem:[#allocation7 + $0x14] sm:$0xf0]  ;;  %v1862_v11 = vor.u32 1.1754944e-38, %v1861_v33  ;;  %v6551_v33 = vor.u32 %v4770_v14, %v4504_v48 }
 0x623   :  { %7957 = vst [vmem:[#allocation72_spill] sm:$0xff] %v6525_v6  ;;  %v1853_v45 = vmul.f32 %v6497_v53, %v1852_v25  ;;  %v6538_v25 = vor.u32 %v4772_v21, %v4502_v36  ;;  %v1843_v57 = vor.u32 1.1754944e-38, %v1842_v46  ;;  %2447 = vmatpush.bf16.msrb.mxu2 %v6525_v6  ;;  %2460 = vmatpush.bf16.msrb.mxu3 %v6530_v42 }
 0x624   :  { %7958 = vst [vmem:[#allocation73_spill] sm:$0xff] %v6532_v7  ;;  %v4977_v18 = vpop.eup %4976  ;;  %v1835_v12 = vadd.f32 %v6491_v51, %v1834_v40  ;;  %v4771_v40 = vld [vmem:[#allocation7 + $0xc] sm:$0xf]  ;;  %v6553_v46 = vor.u32 %v4773_v10, %v4510_v15  ;;  %2473 = vmatpush.bf16.msra.mxu0 %v6532_v7  ;;  %v1881_v15 = vand.u32 2147483648, %v6486_v27 }
 0x625   :  { %7959 = vst [vmem:[#allocation74_spill] sm:$0xff] %v6538_v25  ;;  %v4979_v20 = vpop.eup %4978  ;;  %v1854_v17 = vadd.f32 %v6497_v53, %v1853_v45  ;;  %v1871_v35 = vmul.f32 %v4977_v18, %v6486_v27  ;;  %v6559_v34 = vor.u32 %v4771_v40, %v4512_v3  ;;  %vm1876_vm12 = vweird.f32 %v4977_v18  ;;  %v6625_v40 = vld [vmem:[%s7469_s11 + $0x38] sm:$0xff] }
 0x626   :  { %v1839_v8 = vsel %vm1838_vm9, %v6491_v51, %v1835_v12  ;;  %7960 = vst [vmem:[#allocation75_spill] sm:$0xff] %v6551_v33  ;;  %2435 = vmatpush.bf16.msrb.mxu1 %v6538_v25  ;;  %vm1877_vm14 = vmor %vm1875_vm13, %vm1876_vm12  ;;  %v1882_v3 = vor.u32 1.1754944e-38, %v1881_v15  ;;  %v6649_v15 = vld [vmem:[%s7469_s11 + $0x18] sm:$0xff] }
 0x627   :  { %7961 = vst [vmem:[#allocation76_spill] sm:$0xff] %v6553_v46  ;;  %v1844_v45 = vsel %vm6514_vm4, %v1843_v57, %v1839_v8  ;;  %v1858_v36 = vsel %vm1857_vm10, %v6497_v53, %v1854_v17  ;;  %v1872_v21 = vsub.f32 1.0, %v1871_v35  ;;  %2448 = vmatpush.bf16.msrb.mxu2 %v6551_v33  ;;  %2461 = vmatpush.bf16.msrb.mxu3 %v6553_v46  ;;  %v1879_v17 = vand.u32 2147483647, %v6486_v27  ;;  %v7974_v57 = vld [vmem:[#allocation46_spill] sm:$0xff]  ;;  %v6631_v8 = vld [vmem:[%s7469_s11 + $0x30] sm:$0xff] }
 0x628   :  { %7962 = vst [vmem:[#allocation77_spill] sm:$0xff] %v6559_v34  ;;  %v1863_v51 = vsel %vm1860_vm11, %v1862_v11, %v1858_v36  ;;  %v1886_v0 = vmul.f32 %v4979_v20, %v1844_v45  ;;  %2474 = vmatpush.bf16.msra.mxu0 %v6559_v34  ;;  %v2054_v27 = vpack.c.bf16 %v6477_v28, %v6477_v28  ;;  %v7971_v28 = vld [vmem:[#allocation38_spill] sm:$0xff] }
 0x629   :  { %v1885_v12 = vmul.f32 %v1863_v51, %v6254_v43  ;;  %v1873_v14 = vmul.f32 %v4977_v18, %v1872_v21  ;;  %vm1880_vm15 = vcmp.eq.f32.partialorder %v1879_v17, 8.507059e+37  ;;  %v7973_v11 = vld [vmem:[#allocation42_spill] sm:$0xff]  ;;  %v6637_v21 = vld [vmem:[%s7469_s11 + $0x28] sm:$0xff]  ;;  %v6643_v51 = vld [vmem:[%s7469_s11 + $0x20] sm:$0xff] }
 0x62a   :  { %v1971_v17 = vld [vmem:[%s7468_s10] sm:$0xf]  ;;  %s4669_s10 = sld [smem:[#allocation2 + $0x2]] }
 0x62b   :  { %v6565_v13 = vadd.f32 %v1886_v0, %v1885_v12  ;;  %v1874_v35 = vadd.f32 %v4977_v18, %v1873_v14 }
 0x62d   :  { %4980 = vtanh.f32 %v6565_v13  ;;  %v1878_v43 = vsel %vm1877_vm14, %v4977_v18, %v1874_v35  ;;  %v7972_v18 = vld [vmem:[#allocation68_spill] sm:$0xff] }
 0x62e   :  { %v1883_v48 = vsel %vm1880_vm15, %v1882_v3, %v1878_v43  ;;  %v6658_v43 = vld [vmem:[%s7469_s11 + $0x10] sm:$0xff] }
 0x630   :  { %p2879_p1 = scmp.eq.s32.totalorder %s4669_s10, 1 }
 0x632   :  { %s2880_s6 = scalar_select %p2879_p1, 1, 0 }
 0x633   :  { %v4981_v53 = vpop.eup %4980 }
 0x634   :  { %v1889_v10 = vmul.f32 %v4981_v53, %v1883_v48  ;;  %v6660_v48 = vperm.slane %v1971_v17, 0  ;;  %s2881_s30 = scvt.s32.f32 %s2880_s6 }
 0x636   :  { %v2055_v20 = vpack.c.bf16 %v1889_v10, %v1889_v10  ;;  %7975 = vst [vmem:[#allocation78_spill] sm:$0xff] %v6660_v48  ;;  %s2886_s14 = ssub.f32 1.0, %s2881_s30 }
 0x638   :  { %2224 = vmatmul.bf16.vlgmr.msra.gmra.mxu1 %v2055_v20  ;;  %2237 = vmatmul.bf16.vlgmr.msra.gmra.mxu2 %v2055_v20 }
 0x639   :  { %2250 = vmatmul.bf16.vlgmr.msra.gmra.mxu3 %v2055_v20  ;;  %2263 = vmatmul.bf16.vlgmr.msrb.gmra.mxu0 %v2055_v20  ;;  %v6663_v20 = vperm.slane %v1971_v17, 3 }
 0x63a   :  { %2670 = vmatpush.bf16.msra.mxu3 %v6311_v39  ;;  %2683 = vmatpush.bf16.msrb.mxu0 %v6313_v49 }
 0x63b   :  { %2656 = vmatpush.bf16.msra.mxu2 %v6260_v30  ;;  %v7963_v30 = vld [vmem:[#allocation56_spill] sm:$0xff]  ;;  %2608 = vmatpush.bf16.msra.mxu1 %v6625_v40  ;;  %7976 = vst [vmem:[#allocation79_spill] sm:$0xff] %v6663_v20 }
 0x63e   :  { %2671 = vmatpush.bf16.msra.mxu3 %v6323_v16  ;;  %2684 = vmatpush.bf16.msrb.mxu0 %v6325_v29 }
 0x63f   :  { %2657 = vmatpush.bf16.msra.mxu2 %v6266_v47  ;;  %v7964_v47 = vld [vmem:[#allocation59_spill] sm:$0xff]  ;;  %2609 = vmatpush.bf16.msra.mxu1 %v6631_v8 }
 0x642   :  { %2672 = vmatpush.bf16.msra.mxu3 %v6335_v56  ;;  %2685 = vmatpush.bf16.msrb.mxu0 %v6337_v5 }
 0x643   :  { %2658 = vmatpush.bf16.msra.mxu2 %v6272_v63  ;;  %v7965_v63 = vld [vmem:[#allocation30_spill] sm:$0xff]  ;;  %2610 = vmatpush.bf16.msra.mxu1 %v6637_v21 }
 0x646   :  { %2673 = vmatpush.bf16.msra.mxu3 %v6351_v55  ;;  %2686 = vmatpush.bf16.msrb.mxu0 %v6353_v2 }
 0x647   :  { %2659 = vmatpush.bf16.msra.mxu2 %v6278_v24  ;;  %v7966_v24 = vld [vmem:[#allocation60_spill] sm:$0xff]  ;;  %2611 = vmatpush.bf16.msra.mxu1 %v6643_v51 }
 0x648   :  { %2436 = vmatmul.bf16.vlgmr.msrb.gmra.mxu1 %v2054_v27  ;;  %2449 = vmatmul.bf16.vlgmr.msrb.gmra.mxu2 %v2054_v27 }
 0x649   :  { %2462 = vmatmul.bf16.vlgmr.msrb.gmra.mxu3 %v2054_v27  ;;  %2475 = vmatmul.bf16.vlgmr.msra.gmra.mxu0 %v2054_v27 }
 0x64a   :  { %2674 = vmatpush.bf16.msra.mxu3 %v6363_v22  ;;  %2687 = vmatpush.bf16.msrb.mxu0 %v6365_v4 }
 0x64b   :  { %2660 = vmatpush.bf16.msra.mxu2 %v6287_v32  ;;  %v7967_v32 = vld [vmem:[#allocation63_spill] sm:$0xff]  ;;  %2612 = vmatpush.bf16.msra.mxu1 %v6649_v15 }
 0x64e   :  { %2675 = vmatpush.bf16.msra.mxu3 %v6379_v50  ;;  %2688 = vmatpush.bf16.msrb.mxu0 %v6381_v9 }
 0x64f   :  { %2661 = vmatpush.bf16.msra.mxu2 %v6293_v41  ;;  %v7968_v41 = vld [vmem:[#allocation34_spill] sm:$0xff]  ;;  %2613 = vmatpush.bf16.msra.mxu1 %v6658_v43 }
 0x652   :  { %2676 = vmatpush.bf16.msra.mxu3 %v6391_v19  ;;  %2689 = vmatpush.bf16.msrb.mxu0 %v6393_v54 }
 0x653   :  { %2662 = vmatpush.bf16.msra.mxu2 %v6299_v1  ;;  %v7969_v1 = vld [vmem:[#allocation64_spill] sm:$0xff] }
 0x656   :  { %2677 = vmatpush.bf16.msra.mxu3 %v6403_v58  ;;  %2690 = vmatpush.bf16.msrb.mxu0 %v6407_v61 }
 0x657   :  { %2663 = vmatpush.bf16.msra.mxu2 %v6305_v37  ;;  %v7970_v37 = vld [vmem:[#allocation67_spill] sm:$0xff] }
 0x65a   :  { %2722 = vmatpush.bf16.msrb.mxu3 %v6418_v52  ;;  %2735 = vmatpush.bf16.msra.mxu0 %v6421_v62 }
 0x65b   :  { %2709 = vmatpush.bf16.msrb.mxu2 %v6318_v31 }
 0x65e   :  { %2723 = vmatpush.bf16.msrb.mxu3 %v6428_v26  ;;  %2736 = vmatpush.bf16.msra.mxu0 %v6433_v38 }
 0x65f   :  { %2710 = vmatpush.bf16.msrb.mxu2 %v6330_v44 }
 0x662   :  { %2724 = vmatpush.bf16.msrb.mxu3 %v6441_v60  ;;  %2737 = vmatpush.bf16.msra.mxu0 %v7963_v30 }
 0x663   :  { %2711 = vmatpush.bf16.msrb.mxu2 %v6342_v23 }
 0x666   :  { %2725 = vmatpush.bf16.msrb.mxu3 %v7964_v47  ;;  %2738 = vmatpush.bf16.msra.mxu0 %v7966_v24 }
 0x667   :  { %2712 = vmatpush.bf16.msrb.mxu2 %v7965_v63 }
 0x66a   :  { %2726 = vmatpush.bf16.msrb.mxu3 %v7967_v32  ;;  %2739 = vmatpush.bf16.msra.mxu0 %v7969_v1 }
 0x66b   :  { %2713 = vmatpush.bf16.msrb.mxu2 %v7968_v41 }
 0x66e   :  { %2727 = vmatpush.bf16.msrb.mxu3 %v7970_v37  ;;  %2740 = vmatpush.bf16.msra.mxu0 %v7972_v18 }
 0x66f   :  { %2714 = vmatpush.bf16.msrb.mxu2 %v7971_v28  ;;  %v7982_v28 = vld [vmem:[#allocation29_spill] sm:$0xff] }
 0x672   :  { %2728 = vmatpush.bf16.msrb.mxu3 %v6519_v59  ;;  %2741 = vmatpush.bf16.msra.mxu0 %v6525_v6 }
 0x673   :  { %2715 = vmatpush.bf16.msrb.mxu2 %v7973_v11 }
 0x676   :  { %2729 = vmatpush.bf16.msrb.mxu3 %v6538_v25  ;;  %2742 = vmatpush.bf16.msra.mxu0 %v6551_v33 }
 0x677   :  { %2716 = vmatpush.bf16.msrb.mxu2 %v7974_v57  ;;  %v6673_v57 = vperm.slane %v1971_v17, 1 }
 0x679   :  { %7977 = vst [vmem:[#allocation80_spill] sm:$0xff] %v6673_v57 }
 0x6b5   :  { %v2225_v45 = vpop.f32.mrf.mxu1 }
 0x6b6   :  { %v2264_v36 = vpop.f32.mrf.mxu0 }
 0x6bb   :  { %v2238_v0 = vpop.f32.mrf.mxu2 }
 0x6bc   :  { %v2251_v12 = vpop.f32.mrf.mxu3 }
 0x6bd   :  { %v2227_v14 = vpop.f32.mrf.mxu1 }
 0x6be   :  { %v2266_v35 = vpop.f32.mrf.mxu0 }
 0x6bf   :  { %v6668_v35 = vld [vmem:[%s7469_s11 + $0x8] sm:$0xff] }
 0x6c0   :  { %2614 = vmatpush.bf16.msra.mxu1 %v6668_v35 }
 0x6c3   :  { %v2240_v3 = vpop.f32.mrf.mxu2 }
 0x6c4   :  { %v2253_v53 = vpop.f32.mrf.mxu3 }
 0x6c5   :  { %v2437_v10 = vpop.f32.mrf.mxu1 }
 0x6c6   :  { %v2438_v27 = vadd.f32 %v2437_v10, %v2225_v45  ;;  %v2476_v14 = vpop.f32.mrf.mxu0  ;;  %v6678_v45 = vld [vmem:[%s7469_s11] sm:$0xff] }
 0x6c7   :  { %v2477_v33 = vadd.f32 %v2476_v14, %v2264_v36  ;;  %7978 = vst [vmem:[#allocation81_spill] sm:$0xff] %v6678_v45  ;;  %2615 = vmatpush.bf16.msra.mxu1 %v6678_v45 }
 0x6c8   :  { %v2489_v25 = vadd.f32 %v6660_v48, %v2438_v27  ;;  %v7979_v27 = vld [vmem:[#allocation17_spill] sm:$0xff] }
 0x6c9   :  { %v2492_v3 = vadd.f32 %v6663_v20, %v2477_v33  ;;  %v7980_v20 = vld [vmem:[#allocation21_spill] sm:$0xff] }
 0x6ca   :  { %v4628_v53 = vmul.f32 -1.442695, %v2489_v25 }
 0x6cb   :  { %v4630_v10 = vmul.f32 -1.442695, %v2492_v3  ;;  %v2450_v6 = vpop.f32.mrf.mxu2  ;;  %2696 = vmatpush.bf16.msrb.mxu1 %v7979_v27 }
 0x6cc   :  { %4982 = vpow2.f32 %v4628_v53  ;;  %v2451_v59 = vadd.f32 %v2450_v6, %v2238_v0  ;;  %v2463_v11 = vpop.f32.mrf.mxu3  ;;  %v7981_v6 = vld [vmem:[#allocation25_spill] sm:$0xff] }
 0x6cd   :  { %4984 = vpow2.f32 %v4630_v10  ;;  %v2439_v36 = vpop.f32.mrf.mxu1 }
 0x6ce   :  { %v2490_v25 = vadd.f32 %v6673_v57, %v2451_v59  ;;  %v2478_v33 = vpop.f32.mrf.mxu0  ;;  %v6686_v57 = vperm.slane %v1971_v17, 2  ;;  %v7986_v17 = vld [vmem:[#allocation41_spill] sm:$0xff] }
 0x6cf   :  { %2697 = vmatpush.bf16.msrb.mxu1 %v7980_v20  ;;  %v2464_v33 = vadd.f32 %v2463_v11, %v2251_v12 }
 0x6d0   :  { %v4629_v14 = vmul.f32 -1.442695, %v2490_v25  ;;  %7983 = vst [vmem:[#allocation82_spill] sm:$0xff] %v6686_v57 }
 0x6d1   :  { %v2491_v32 = vadd.f32 %v6686_v57, %v2464_v33 }
 0x6d2   :  { %v4983_v48 = vpop.eup %4982  ;;  %4986 = vpow2.f32 %v4629_v14  ;;  %v7984_v14 = vld [vmem:[#allocation33_spill] sm:$0xff] }
 0x6d3   :  { %v4985_v18 = vpop.eup %4984  ;;  %v2496_v3 = vadd.f32 1.0, %v4983_v48  ;;  %v2452_v37 = vpop.f32.mrf.mxu2  ;;  %2698 = vmatpush.bf16.msrb.mxu1 %v7981_v6 }
 0x6d4   :  { %v2465_v53 = vpop.f32.mrf.mxu3  ;;  %v2535_v0 = vadd.f32 1.0, %v4985_v18  ;;  %v7985_v18 = vld [vmem:[#allocation37_spill] sm:$0xff] }
 0x6d5   :  { %4988 = vrcp.f32 %v2496_v3  ;;  %v2508_v47 = vand.u32 2147483648, %v2496_v3  ;;  %vm2502_vm1 = vweird.f32 %v2496_v3  ;;  %v2506_v11 = vand.u32 2147483647, %v2496_v3 }
 0x6d6   :  { %4990 = vrcp.f32 %v2535_v0  ;;  %vm2541_vm9 = vweird.f32 %v2535_v0 }
 0x6d7   :  { %2699 = vmatpush.bf16.msrb.mxu1 %v7982_v28  ;;  %v2509_v57 = vor.u32 1.1754944e-38, %v2508_v47  ;;  %vm2507_vm5 = vcmp.eq.f32.partialorder %v2506_v11, 8.507059e+37  ;;  %v2547_v47 = vand.u32 2147483648, %v2535_v0 }
 0x6d8   :  { %v4987_v10 = vpop.eup %4986 }
 0x6d9   :  { %v2515_v36 = vadd.f32 1.0, %v4987_v10 }
 0x6db   :  { %v4989_v59 = vpop.eup %4988  ;;  %4992 = vrcp.f32 %v2515_v36  ;;  %2700 = vmatpush.bf16.msrb.mxu1 %v7984_v14  ;;  %v2527_v12 = vand.u32 2147483648, %v2515_v36  ;;  %v2525_v14 = vand.u32 2147483647, %v2515_v36  ;;  %vm2521_vm4 = vweird.f32 %v2515_v36 }
 0x6dc   :  { %v2498_v25 = vmul.f32 %v4989_v59, %v2496_v3  ;;  %v4991_v37 = vpop.eup %4990  ;;  %vm2503_vm0 = vweird.f32 %v4989_v59  ;;  %4994 = vtanh.f32 %v2491_v32 }
 0x6dd   :  { %v2537_v24 = vmul.f32 %v4991_v37, %v2535_v0  ;;  %vm2504_vm2 = vmor %vm2502_vm1, %vm2503_vm0  ;;  %vm2526_vm7 = vcmp.eq.f32.partialorder %v2525_v14, 8.507059e+37  ;;  %vm2542_vm8 = vweird.f32 %v4991_v37 }
 0x6de   :  { %v2499_v48 = vsub.f32 1.0, %v2498_v25  ;;  %vm2543_vm10 = vmor %vm2541_vm9, %vm2542_vm8 }
 0x6df   :  { %2701 = vmatpush.bf16.msrb.mxu1 %v7985_v18  ;;  %v2538_v33 = vsub.f32 1.0, %v2537_v24  ;;  %v2528_v18 = vor.u32 1.1754944e-38, %v2527_v12  ;;  %v7991_v12 = vld [vmem:[#allocation61_spill] sm:$0xff] }
 0x6e0   :  { %v2500_v53 = vmul.f32 %v4989_v59, %v2499_v48 }
 0x6e1   :  { %v4993_v1 = vpop.eup %4992  ;;  %v2539_v32 = vmul.f32 %v4991_v37, %v2538_v33  ;;  %v7993_v33 = vld [vmem:[#allocation69_spill] sm:$0xff] }
 0x6e2   :  { %v2517_v10 = vmul.f32 %v4993_v1, %v2515_v36  ;;  %v2501_v41 = vadd.f32 %v4989_v59, %v2500_v53  ;;  %vm2522_vm3 = vweird.f32 %v4993_v1  ;;  %v4995_v30 = vpop.eup %4994  ;;  %v2545_v36 = vand.u32 2147483647, %v2535_v0  ;;  %v7990_v0 = vld [vmem:[#allocation57_spill] sm:$0xff] }
 0x6e3   :  { %2702 = vmatpush.bf16.msrb.mxu1 %v7986_v17  ;;  %vm2523_vm6 = vmor %vm2521_vm4, %vm2522_vm3  ;;  %v2540_v24 = vadd.f32 %v4991_v37, %v2539_v32  ;;  %v6765_v32 = vld [vmem:[%s7465_s7] sm:$0xff] }
 0x6e4   :  { %v2518_v63 = vsub.f32 1.0, %v2517_v10  ;;  %v2505_v48 = vsel %vm2504_vm2, %v4989_v59, %v2501_v41  ;;  %v7987_v10 = vld [vmem:[#allocation45_spill] sm:$0xff]  ;;  %v2548_v59 = vor.u32 1.1754944e-38, %v2547_v47  ;;  %vm2546_vm11 = vcmp.eq.f32.partialorder %v2545_v36, 8.507059e+37 }
 0x6e5   :  { %v2510_v28 = vsel %vm2507_vm5, %v2509_v57, %v2505_v48  ;;  %v2544_v57 = vsel %vm2543_vm10, %v4991_v37, %v2540_v24  ;;  %v6723_v37 = vld [vmem:[%s7465_s7 + $0x28] sm:$0xff]  ;;  %v6740_v48 = vld [vmem:[%s7465_s7 + $0x18] sm:$0xff] }
 0x6e6   :  { %v2519_v25 = vmul.f32 %v4993_v1, %v2518_v63  ;;  %v2552_v17 = vmul.f32 %v4995_v30, %v2510_v28  ;;  %v2549_v14 = vsel %vm2546_vm11, %v2548_v59, %v2544_v57  ;;  %v7989_v30 = vld [vmem:[#allocation53_spill] sm:$0xff] }
 0x6e7   :  { %2703 = vmatpush.bf16.msrb.mxu1 %v7987_v10  ;;  %v6715_v28 = vld [vmem:[%s7465_s7 + $0x30] sm:$0xff] }
 0x6e8   :  { %v2520_v53 = vadd.f32 %v4993_v1, %v2519_v25  ;;  %v7992_v25 = vld [vmem:[#allocation65_spill] sm:$0xff] }
 0x6ea   :  { %v2524_v3 = vsel %vm2523_vm6, %v4993_v1, %v2520_v53  ;;  %v6748_v53 = vld [vmem:[%s7465_s7 + $0x10] sm:$0xff] }
 0x6eb   :  { %v2529_v60 = vsel %vm2526_vm7, %v2528_v18, %v2524_v3  ;;  %v6756_v3 = vld [vmem:[%s7465_s7 + $0x8] sm:$0xff] }
 0x6ec   :  { %v2551_v63 = vmul.f32 %v2529_v60, %v6565_v13  ;;  %v7988_v60 = vld [vmem:[#allocation49_spill] sm:$0xff]  ;;  %v6707_v13 = vld [vmem:[%s7465_s7 + $0x38] sm:$0xff] }
 0x6ed   :  { %7994 = vst [vmem:[#allocation49_spill] sm:$0xff] %v6765_v32 }
 0x6ee   :  { %v6694_v41 = vadd.f32 %v2552_v17, %v2551_v63  ;;  %v6731_v17 = vld [vmem:[%s7465_s7 + $0x20] sm:$0xff] }
 0x6ef   :  { %v6778_v63 = vld [vmem:[%s7470_s12] ss:$0 sm:$0xff] }
 0x6f0   :  { %4996 = vtanh.f32 %v6694_v41  ;;  %7995 = vst [vmem:[#allocation53_spill] sm:$0xff] %v6778_v63 }
 0x6f6   :  { %v4997_v1 = vpop.eup %4996 }
 0x6f7   :  { %v2555_v11 = vmul.f32 %v4997_v1, %v2549_v14 }
 0x6f9   :  { %v6697_v18 = vpack.c.bf16 %v2555_v11, %v2555_v11 }
 0x6fb   :  { %2616 = vmatmul.bf16.vlgmr.msra.gmra.mxu1 %v6697_v18  ;;  %2678 = vmatmul.bf16.vlgmr.msra.gmra.mxu3 %v6697_v18 }
 0x6fc   :  { %2691 = vmatmul.bf16.vlgmr.msrb.gmra.mxu0 %v6697_v18  ;;  %2748 = vmatpush.bf16.msra.mxu1 %v7988_v60 }
 0x6fd   :  { %2842 = vmatpush.bf16.msra.mxu3 %v6625_v40  ;;  %2891 = vmatpush.bf16.msrb.mxu0 %v6707_v13 }
 0x700   :  { %2749 = vmatpush.bf16.msra.mxu1 %v7989_v30 }
 0x701   :  { %2843 = vmatpush.bf16.msra.mxu3 %v6631_v8  ;;  %2892 = vmatpush.bf16.msrb.mxu0 %v6715_v28 }
 0x704   :  { %2750 = vmatpush.bf16.msra.mxu1 %v7990_v0 }
 0x705   :  { %2844 = vmatpush.bf16.msra.mxu3 %v6637_v21  ;;  %2893 = vmatpush.bf16.msrb.mxu0 %v6723_v37 }
 0x708   :  { %2751 = vmatpush.bf16.msra.mxu1 %v7991_v12 }
 0x709   :  { %2845 = vmatpush.bf16.msra.mxu3 %v6643_v51  ;;  %2894 = vmatpush.bf16.msrb.mxu0 %v6731_v17 }
 0x70b   :  { %2704 = vmatmul.bf16.vlgmr.msrb.gmra.mxu1 %v6697_v18 }
 0x70c   :  { %2752 = vmatpush.bf16.msra.mxu1 %v7992_v25 }
 0x70d   :  { %2846 = vmatpush.bf16.msra.mxu3 %v6649_v15  ;;  %2895 = vmatpush.bf16.msrb.mxu0 %v6740_v48 }
 0x710   :  { %2753 = vmatpush.bf16.msra.mxu1 %v7993_v33 }
 0x711   :  { %2847 = vmatpush.bf16.msra.mxu3 %v6658_v43  ;;  %2896 = vmatpush.bf16.msrb.mxu0 %v6748_v53 }
 0x714   :  { %2754 = vmatpush.bf16.msra.mxu1 %v6530_v42 }
 0x715   :  { %2848 = vmatpush.bf16.msra.mxu3 %v6668_v35  ;;  %2897 = vmatpush.bf16.msrb.mxu0 %v6756_v3 }
 0x718   :  { %2755 = vmatpush.bf16.msra.mxu1 %v6553_v46  ;;  %v8000_v46 = vld [vmem:[#allocation62_spill] sm:$0xff] }
 0x719   :  { %2849 = vmatpush.bf16.msra.mxu3 %v6678_v45  ;;  %2898 = vmatpush.bf16.msrb.mxu0 %v6765_v32  ;;  %v2652_v32 = vstv %s2651_s4 }
 0x71c   :  { %2905 = vmatpush.bf16.msrb.mxu1 %v6311_v39 }
 0x720   :  { %2906 = vmatpush.bf16.msrb.mxu1 %v6323_v16 }
 0x724   :  { %2907 = vmatpush.bf16.msrb.mxu1 %v6335_v56  ;;  %v7630_v56 = vmov 0.0  }
 0x725   :  { %1890 = vst [vmem:[#allocation10] sm:$0xff] %v7630_v56  ;;  %v2649_v56 = vstv %s2647_s27  ;;  %s4675_s27 = sld [smem:[#allocation2 + $0x3]] }
 0x728   :  { %2908 = vmatpush.bf16.msrb.mxu1 %v6351_v55 }
 0x72b   :  { %p3114_p2 = scmp.eq.s32.totalorder %s4675_s27, 1  ;;  %s3356_s27 = ssub.f32 1.0, %s3351_s9 }
 0x72c   :  { %2909 = vmatpush.bf16.msrb.mxu1 %v6363_v22 }
 0x72d   :  { %s3115_s4 = scalar_select %p3114_p2, 1, 0 }
 0x72f   :  { %s3116_s28 = scvt.s32.f32 %s3115_s4 }
 0x730   :  { %2910 = vmatpush.bf16.msrb.mxu1 %v6379_v50 }
 0x731   :  { %s3121_s29 = ssub.f32 1.0, %s3116_s28 }
 0x734   :  { %2911 = vmatpush.bf16.msrb.mxu1 %v6391_v19  ;;  %v1989_v19 = vlaneseq }
 0x736   :  { %v6787_v50 = vand.u32 127, %v1989_v19 }
 0x738   :  { %2912 = vmatpush.bf16.msrb.mxu1 %v6403_v58 }
 0x778   :  { %v2617_v24 = vpop.f32.mrf.mxu1 }
 0x779   :  { %v2618_v47 = vadd.f32 %v6778_v63, %v2617_v24  ;;  %v6781_v36 = vpop.f32.mrf.mxu0 }
 0x77b   :  { %2622 = vst [vmem:[#allocation10 + $0x8] sm:$0xff] %v2618_v47  ;;  %2623 = vmax.xlane.f32.xlu0 %v2618_v47 }
 0x77e   :  { %v6783_v57 = vpop.f32.mrf.mxu3 }
 0x780   :  { %v2619_v59 = vpop.f32.mrf.mxu1 }
 0x781   :  { %v2694_v1 = vpop.f32.mrf.mxu0 }
 0x786   :  { %v2681_v14 = vpop.f32.mrf.mxu3 }
 0x788   :  { %v6785_v11 = vpop.f32.mrf.mxu1 }
 0x790   :  { %v2707_v58 = vpop.f32.mrf.mxu1 }
 0x7ee   :  { %v2624_v22 = vpop.xlane.xlu0 %2623 }
 0x7ef   :  { %vm2625_vm12 = vcmp.eq.f32.partialorder %v2618_v47, %v2624_v22 }
 0x7f0   :  { %v2626_v55 = vsel %vm2625_vm12, %v6787_v50, 128 }
 0x7f1   :  { %v2628_v24 = vshra.s32 %v2626_v55, 16  ;;  %v2627_v16 = vand.u32 65535, %v2626_v55 }
 0x7f3   :  { %v2630_v63 = vcvt.s32.f32 %v2628_v24  ;;  %v2629_v1 = vcvt.s32.f32 %v2627_v16  ;;  %v2648_v24 = vld [vmem:[%s7461_s3] sm:$0xff] }
 0x7f4   :  { %v2650_v16 = vmul.f32 %v2649_v56, %v2648_v24  ;;  %v8002_v56 = vld [vmem:[#allocation70_spill] sm:$0xff] }
 0x7f5   :  { %2631 = vmin.xlane.f32.xlu0 %v2630_v63 }
 0x868   :  { %v2632_v59 = vpop.xlane.xlu0 %2631 }
 0x869   :  { %vm2633_vm13 = vcmp.eq.f32.partialorder %v2630_v63, %v2632_v59  ;;  %v2638_v19 = vcvt.f32.s32 %v2632_v59  ;;  %v7996_v63 = vmov 0.0   ;;  %v7997_v59 = vld [vmem:[#allocation50_spill] sm:$0xff] }
 0x86a   :  { %v2634_v14 = vsel %vm2633_vm13, %v2629_v1, inf }
 0x86b   :  { %2635 = vmin.xlane.f32.xlu1 %v2634_v14  ;;  %v2639_v58 = vshll.u32 %v2638_v19, 16  ;;  %v7998_v19 = vld [vmem:[#allocation54_spill] sm:$0xff] }
 0x8de   :  { %v2636_v22 = vpop.xlane.xlu1 %2635 }
 0x8df   :  { %v2637_v47 = vcvt.f32.s32 %v2636_v22  ;;  %v7999_v22 = vld [vmem:[#allocation58_spill] sm:$0xff] }
 0x8e1   :  { %v2640_v55 = vadd.s32 %v2639_v58, %v2637_v47  ;;  %v8001_v58 = vld [vmem:[#allocation66_spill] sm:$0xff]  ;;  %v8004_v47 = vld [vmem:[#allocation56_spill] sm:$0xff] }
 0x8e3   :  { %vm2641_vm14 = vcmp.eq.s32.totalorder %v6787_v50, %v2640_v55  ;;  %v8005_v55 = vld [vmem:[#allocation29_spill] sm:$0xff] }
 0x8e4   :  { %v4663_v1 = vsel %vm2641_vm14, 1.0, %v7996_v63 }
 0x8e5   :  { %v2653_v14 = vmul.f32 %v4663_v1, %v2652_v32  ;;  %v8003_v32 = vld [vmem:[#allocation55_spill] sm:$0xff] }
 0x8e6   :  { %v8007_v1 = vld [vmem:[#allocation59_spill] sm:$0xff] }
 0x8e7   :  { %v2654_v45 = vadd.f32 %v2653_v14, %v2650_v16  ;;  %v8006_v16 = vld [vmem:[#allocation30_spill] sm:$0xff]  ;;  %v8008_v14 = vld [vmem:[#allocation60_spill] sm:$0xff] }
 0x8e9   :  { %v2655_v39 = vpack.c.bf16 %v2654_v45, %v2654_v45 }
 0x8eb   :  { %2664 = vmatmul.bf16.vlgmr.msra.gmra.mxu2 %v2655_v39 }
 0x8ec   :  { %2761 = vmatpush.bf16.msra.mxu2 %v7997_v59 }
 0x8f0   :  { %2762 = vmatpush.bf16.msra.mxu2 %v7998_v19 }
 0x8f4   :  { %2763 = vmatpush.bf16.msra.mxu2 %v7999_v22 }
 0x8f8   :  { %2764 = vmatpush.bf16.msra.mxu2 %v8000_v46 }
 0x8fb   :  { %2717 = vmatmul.bf16.vlgmr.msrb.gmra.mxu2 %v6697_v18 }
 0x8fc   :  { %2765 = vmatpush.bf16.msra.mxu2 %v8001_v58 }
 0x900   :  { %2766 = vmatpush.bf16.msra.mxu2 %v8002_v56 }
 0x904   :  { %2767 = vmatpush.bf16.msra.mxu2 %v6532_v7 }
 0x908   :  { %2768 = vmatpush.bf16.msra.mxu2 %v6559_v34 }
 0x90c   :  { %2918 = vmatpush.bf16.msrb.mxu2 %v6313_v49 }
 0x910   :  { %2919 = vmatpush.bf16.msrb.mxu2 %v6325_v29 }
 0x914   :  { %2920 = vmatpush.bf16.msrb.mxu2 %v6337_v5 }
 0x918   :  { %2921 = vmatpush.bf16.msrb.mxu2 %v6353_v2 }
 0x91c   :  { %2922 = vmatpush.bf16.msrb.mxu2 %v6365_v4 }
 0x920   :  { %2923 = vmatpush.bf16.msrb.mxu2 %v6381_v9 }
 0x924   :  { %2924 = vmatpush.bf16.msrb.mxu2 %v6393_v54 }
 0x928   :  { %2925 = vmatpush.bf16.msrb.mxu2 %v6407_v61 }
 0x96e   :  { %v2665_v39 = vpop.f32.mrf.mxu2 }
 0x96f   :  { %v2669_v45 = vpack.c.bf16 %v2665_v39, %v2665_v39  ;;  %v8009_v39 = vld [vmem:[#allocation33_spill] sm:$0xff] }
 0x971   :  { %2730 = vmatmul.bf16.vlgmr.msrb.gmra.mxu3 %v2669_v45  ;;  %2743 = vmatmul.bf16.vlgmr.msra.gmra.mxu0 %v2669_v45 }
 0x972   :  { %2756 = vmatmul.bf16.vlgmr.msra.gmra.mxu1 %v2669_v45  ;;  %2769 = vmatmul.bf16.vlgmr.msra.gmra.mxu2 %v2669_v45  ;;  %v8010_v45 = vld [vmem:[#allocation34_spill] sm:$0xff] }
 0x973   :  { %2931 = vmatpush.bf16.msrb.mxu3 %v7979_v27  ;;  %2944 = vmatpush.bf16.msra.mxu0 %v6318_v31 }
 0x974   :  { %2957 = vmatpush.bf16.msra.mxu1 %v6418_v52  ;;  %2970 = vmatpush.bf16.msra.mxu2 %v6421_v62 }
 0x976   :  { %v2667_v18 = vpop.f32.mrf.mxu2 }
 0x977   :  { %2932 = vmatpush.bf16.msrb.mxu3 %v7980_v20  ;;  %2945 = vmatpush.bf16.msra.mxu0 %v6330_v44  ;;  %v8011_v18 = vld [vmem:[#allocation63_spill] sm:$0xff]  ;;  %v8025_v44 = vld [vmem:[#allocation78_spill] sm:$0xff] }
 0x978   :  { %2958 = vmatpush.bf16.msra.mxu1 %v6428_v26  ;;  %2971 = vmatpush.bf16.msra.mxu2 %v6433_v38 }
 0x97b   :  { %2933 = vmatpush.bf16.msrb.mxu3 %v7981_v6  ;;  %2946 = vmatpush.bf16.msra.mxu0 %v6342_v23  ;;  %v8012_v23 = vld [vmem:[#allocation64_spill] sm:$0xff]  ;;  %v8013_v6 = vld [vmem:[#allocation37_spill] sm:$0xff] }
 0x97c   :  { %2959 = vmatpush.bf16.msra.mxu1 %v8003_v32  ;;  %2972 = vmatpush.bf16.msra.mxu2 %v8004_v47  ;;  %v8014_v47 = vld [vmem:[#allocation38_spill] sm:$0xff] }
 0x97e   :  { %v2718_v24 = vpop.f32.mrf.mxu2 }
 0x97f   :  { %2934 = vmatpush.bf16.msrb.mxu3 %v8005_v55  ;;  %2947 = vmatpush.bf16.msra.mxu0 %v8006_v16  ;;  %v8015_v55 = vld [vmem:[#allocation67_spill] sm:$0xff]  ;;  %v8016_v16 = vld [vmem:[#allocation68_spill] sm:$0xff] }
 0x980   :  { %2960 = vmatpush.bf16.msra.mxu1 %v8007_v1  ;;  %2973 = vmatpush.bf16.msra.mxu2 %v8008_v14  ;;  %v8017_v1 = vld [vmem:[#allocation41_spill] sm:$0xff]  ;;  %v8018_v14 = vld [vmem:[#allocation42_spill] sm:$0xff] }
 0x983   :  { %2935 = vmatpush.bf16.msrb.mxu3 %v8009_v39  ;;  %2948 = vmatpush.bf16.msra.mxu0 %v8010_v45  ;;  %v8019_v39 = vld [vmem:[#allocation71_spill] sm:$0xff]  ;;  %v8020_v45 = vld [vmem:[#allocation72_spill] sm:$0xff] }
 0x984   :  { %2961 = vmatpush.bf16.msra.mxu1 %v8011_v18  ;;  %2974 = vmatpush.bf16.msra.mxu2 %v8012_v23  ;;  %v8021_v23 = vld [vmem:[#allocation46_spill] sm:$0xff]  ;;  %v8024_v18 = vld [vmem:[#allocation80_spill] sm:$0xff] }
 0x986   :  { %v2720_v32 = vpop.f32.mrf.mxu2 }
 0x987   :  { %2936 = vmatpush.bf16.msrb.mxu3 %v8013_v6  ;;  %2949 = vmatpush.bf16.msra.mxu0 %v8014_v47  ;;  %v8022_v32 = vld [vmem:[#allocation74_spill] sm:$0xff]  ;;  %v8023_v6 = vld [vmem:[#allocation75_spill] sm:$0xff] }
 0x988   :  { %2962 = vmatpush.bf16.msra.mxu1 %v8015_v55  ;;  %2975 = vmatpush.bf16.msra.mxu2 %v8016_v16 }
 0x98b   :  { %2937 = vmatpush.bf16.msrb.mxu3 %v8017_v1  ;;  %2950 = vmatpush.bf16.msra.mxu0 %v8018_v14 }
 0x98c   :  { %2963 = vmatpush.bf16.msra.mxu1 %v8019_v39  ;;  %2976 = vmatpush.bf16.msra.mxu2 %v8020_v45 }
 0x98f   :  { %2938 = vmatpush.bf16.msrb.mxu3 %v7987_v10  ;;  %2951 = vmatpush.bf16.msra.mxu0 %v8021_v23 }
 0x990   :  { %2964 = vmatpush.bf16.msra.mxu1 %v8022_v32  ;;  %2977 = vmatpush.bf16.msra.mxu2 %v8023_v6  ;;  %v8026_v32 = vld [vmem:[#allocation79_spill] sm:$0xff] }
 0x9ee   :  { %v2744_v47 = vpop.f32.mrf.mxu0 }
 0x9ef   :  { %v2745_v55 = vadd.f32 %v2744_v47, %v6781_v36  ;;  %v2757_v16 = vpop.f32.mrf.mxu1 }
 0x9f1   :  { %v2775_v1 = vadd.f32 %v2745_v55, %v8024_v18 }
 0x9f3   :  { %v4666_v38 = vmul.f32 -1.442695, %v2775_v1 }
 0x9f4   :  { %v2731_v14 = vpop.f32.mrf.mxu3 }
 0x9f5   :  { %4998 = vpow2.f32 %v4666_v38  ;;  %v2732_v39 = vadd.f32 %v2731_v14, %v6783_v57  ;;  %v2770_v45 = vpop.f32.mrf.mxu2 }
 0x9f6   :  { %v2771_v26 = vadd.f32 %v2770_v45, %v2718_v24  ;;  %v2746_v10 = vpop.f32.mrf.mxu0 }
 0x9f7   :  { %v2774_v23 = vadd.f32 %v2732_v39, %v8025_v44  ;;  %v2759_v20 = vpop.f32.mrf.mxu1  ;;  %v8027_v39 = vld [vmem:[#allocation82_spill] sm:$0xff] }
 0x9f8   :  { %v2777_v62 = vadd.f32 %v2771_v26, %v8026_v32  ;;  %v2758_v20 = vadd.f32 %v2757_v16, %v6785_v11 }
 0x9f9   :  { %v4665_v6 = vmul.f32 -1.442695, %v2774_v23 }
 0x9fa   :  { %v4667_v52 = vmul.f32 -1.442695, %v2777_v62 }
 0x9fb   :  { %v4999_v31 = vpop.eup %4998  ;;  %5000 = vpow2.f32 %v4665_v6  ;;  %v2776_v6 = vadd.f32 %v2758_v20, %v8027_v39 }
 0x9fc   :  { %v2800_v36 = vadd.f32 1.0, %v4999_v31  ;;  %5002 = vpow2.f32 %v4667_v52  ;;  %v2733_v47 = vpop.f32.mrf.mxu3 }
 0x9fd   :  { %v2772_v55 = vpop.f32.mrf.mxu2 }
 0x9fe   :  { %5004 = vrcp.f32 %v2800_v36  ;;  %v2812_v47 = vand.u32 2147483648, %v2800_v36  ;;  %vm2806_vm0 = vweird.f32 %v2800_v36 }
 0xa00   :  { %v2813_v16 = vor.u32 1.1754944e-38, %v2812_v47 }
 0xa01   :  { %v5001_v38 = vpop.eup %5000 }
 0xa02   :  { %v5003_v1 = vpop.eup %5002  ;;  %v2781_v57 = vadd.f32 1.0, %v5001_v38  ;;  %v2810_v38 = vand.u32 2147483647, %v2800_v36 }
 0xa03   :  { %v2820_v14 = vadd.f32 1.0, %v5003_v1 }
 0xa04   :  { %v5005_v24 = vpop.eup %5004  ;;  %5006 = vrcp.f32 %v2781_v57  ;;  %v2793_v18 = vand.u32 2147483648, %v2781_v57  ;;  %v2791_v11 = vand.u32 2147483647, %v2781_v57  ;;  %vm2811_vm3 = vcmp.eq.f32.partialorder %v2810_v38, 8.507059e+37 }
 0xa05   :  { %v2802_v10 = vmul.f32 %v5005_v24, %v2800_v36  ;;  %5008 = vrcp.f32 %v2820_v14  ;;  %vm2807_vm15 = vweird.f32 %v5005_v24  ;;  %vm2787_vm4 = vweird.f32 %v2781_v57 }
 0xa06   :  { %vm2808_vm1 = vmor %vm2806_vm0, %vm2807_vm15  ;;  %5010 = vtanh.f32 %v2776_v6  ;;  %vm2792_vm6 = vcmp.eq.f32.partialorder %v2791_v11, 8.507059e+37  ;;  %v2832_v47 = vand.u32 2147483648, %v2820_v14  ;;  %vm2826_vm8 = vweird.f32 %v2820_v14 }
 0xa07   :  { %v2803_v26 = vsub.f32 1.0, %v2802_v10 }
 0xa09   :  { %v2804_v23 = vmul.f32 %v5005_v24, %v2803_v26 }
 0xa0a   :  { %v5007_v62 = vpop.eup %5006 }
 0xa0b   :  { %v5009_v31 = vpop.eup %5008  ;;  %v2805_v52 = vadd.f32 %v5005_v24, %v2804_v23  ;;  %v2783_v45 = vmul.f32 %v5007_v62, %v2781_v57  ;;  %vm2788_vm2 = vweird.f32 %v5007_v62  ;;  %v2794_v23 = vor.u32 1.1754944e-38, %v2793_v18 }
 0xa0c   :  { %v2822_v55 = vmul.f32 %v5009_v31, %v2820_v14  ;;  %vm2789_vm5 = vmor %vm2787_vm4, %vm2788_vm2  ;;  %v5011_v27 = vpop.eup %5010  ;;  %vm2827_vm7 = vweird.f32 %v5009_v31  ;;  %v2833_v18 = vor.u32 1.1754944e-38, %v2832_v47 }
 0xa0d   :  { %v2784_v1 = vsub.f32 1.0, %v2783_v45  ;;  %v2809_v32 = vsel %vm2808_vm1, %v5005_v24, %v2805_v52  ;;  %vm2828_vm9 = vmor %vm2826_vm8, %vm2827_vm7 }
 0xa0e   :  { %v2823_v10 = vsub.f32 1.0, %v2822_v55  ;;  %v2814_v26 = vsel %vm2811_vm3, %v2813_v16, %v2809_v32 }
 0xa0f   :  { %v2785_v44 = vmul.f32 %v5007_v62, %v2784_v1  ;;  %v2836_v6 = vmul.f32 %v2814_v26, %v6694_v41  ;;  %v8036_v41 = vld [vmem:[#allocation35_spill] sm:$0xff]  ;;  %v8039_v1 = vld [vmem:[#allocation53_spill] sm:$0xff] }
 0xa10   :  { %v2824_v45 = vmul.f32 %v5009_v31, %v2823_v10 }
 0xa11   :  { %v2786_v20 = vadd.f32 %v5007_v62, %v2785_v44  ;;  %v2830_v44 = vand.u32 2147483647, %v2820_v14  ;;  %v8038_v14 = vld [vmem:[#allocation43_spill] sm:$0xff] }
 0xa12   :  { %v2825_v52 = vadd.f32 %v5009_v31, %v2824_v45 }
 0xa13   :  { %v2790_v39 = vsel %vm2789_vm5, %v5007_v62, %v2786_v20  ;;  %vm2831_vm10 = vcmp.eq.f32.partialorder %v2830_v44, 8.507059e+37 }
 0xa14   :  { %v2795_v36 = vsel %vm2792_vm6, %v2794_v23, %v2790_v39  ;;  %v2829_v32 = vsel %vm2828_vm9, %v5009_v31, %v2825_v52 }
 0xa15   :  { %v2837_v61 = vmul.f32 %v5011_v27, %v2795_v36  ;;  %v2834_v62 = vsel %vm2831_vm10, %v2833_v18, %v2829_v32  ;;  %v8035_v27 = vld [vmem:[#allocation31_spill] sm:$0xff] }
 0xa17   :  { %v6853_v24 = vadd.f32 %v2837_v61, %v2836_v6  ;;  %v8028_v61 = vld [vmem:[#allocation76_spill] sm:$0xff] }
 0xa19   :  { %5012 = vtanh.f32 %v6853_v24 }
 0xa1f   :  { %v5013_v57 = vpop.eup %5012 }
 0xa20   :  { %v2840_v39 = vmul.f32 %v5013_v57, %v2834_v62 }
 0xa22   :  { %v6856_v55 = vpack.c.bf16 %v2840_v39, %v2840_v39 }
 0xa24   :  { %2850 = vmatmul.bf16.vlgmr.msra.gmra.mxu3 %v6856_v55  ;;  %2913 = vmatmul.bf16.vlgmr.msrb.gmra.mxu1 %v6856_v55 }
 0xa25   :  { %2926 = vmatmul.bf16.vlgmr.msrb.gmra.mxu2 %v6856_v55  ;;  %2983 = vmatpush.bf16.msra.mxu3 %v7988_v60 }
 0xa26   :  { %3077 = vmatpush.bf16.msrb.mxu1 %v6625_v40  ;;  %3126 = vmatpush.bf16.msrb.mxu2 %v6707_v13  ;;  %v8029_v40 = vld [vmem:[#allocation15_spill] sm:$0xff] }
 0xa29   :  { %2984 = vmatpush.bf16.msra.mxu3 %v7989_v30 }
 0xa2a   :  { %3078 = vmatpush.bf16.msrb.mxu1 %v6631_v8  ;;  %3127 = vmatpush.bf16.msrb.mxu2 %v6715_v28  ;;  %v8030_v8 = vld [vmem:[#allocation81_spill] sm:$0xff] }
 0xa2d   :  { %2985 = vmatpush.bf16.msra.mxu3 %v7990_v0 }
 0xa2e   :  { %3079 = vmatpush.bf16.msrb.mxu1 %v6637_v21  ;;  %3128 = vmatpush.bf16.msrb.mxu2 %v6723_v37  ;;  %v8031_v21 = vld [vmem:[#allocation49_spill] sm:$0xff] }
 0xa31   :  { %2986 = vmatpush.bf16.msra.mxu3 %v7991_v12 }
 0xa32   :  { %3080 = vmatpush.bf16.msrb.mxu1 %v6643_v51  ;;  %3129 = vmatpush.bf16.msrb.mxu2 %v6731_v17  ;;  %v8032_v51 = vld [vmem:[#allocation19_spill] sm:$0xff] }
 0xa34   :  { %2939 = vmatmul.bf16.vlgmr.msrb.gmra.mxu3 %v6856_v55 }
 0xa35   :  { %2987 = vmatpush.bf16.msra.mxu3 %v7992_v25 }
 0xa36   :  { %3081 = vmatpush.bf16.msrb.mxu1 %v6649_v15  ;;  %3130 = vmatpush.bf16.msrb.mxu2 %v6740_v48  ;;  %v8033_v15 = vld [vmem:[#allocation23_spill] sm:$0xff] }
 0xa39   :  { %2988 = vmatpush.bf16.msra.mxu3 %v7993_v33 }
 0xa3a   :  { %3082 = vmatpush.bf16.msrb.mxu1 %v6658_v43  ;;  %3131 = vmatpush.bf16.msrb.mxu2 %v6748_v53  ;;  %v8034_v43 = vld [vmem:[#allocation27_spill] sm:$0xff] }
 0xa3d   :  { %2989 = vmatpush.bf16.msra.mxu3 %v6530_v42 }
 0xa3e   :  { %3083 = vmatpush.bf16.msrb.mxu1 %v6668_v35  ;;  %3132 = vmatpush.bf16.msrb.mxu2 %v6756_v3  ;;  %v8037_v35 = vld [vmem:[#allocation39_spill] sm:$0xff] }
 0xa41   :  { %2990 = vmatpush.bf16.msra.mxu3 %v8028_v61 }
 0xa42   :  { %3084 = vmatpush.bf16.msrb.mxu1 %v8030_v8  ;;  %3133 = vmatpush.bf16.msrb.mxu2 %v8031_v21 }
 0xa45   :  { %3140 = vmatpush.bf16.msrb.mxu3 %v8029_v40 }
 0xa49   :  { %3141 = vmatpush.bf16.msrb.mxu3 %v8032_v51 }
 0xa4d   :  { %3142 = vmatpush.bf16.msrb.mxu3 %v8033_v15 }
 0xa51   :  { %3143 = vmatpush.bf16.msrb.mxu3 %v8034_v43 }
 0xa55   :  { %3144 = vmatpush.bf16.msrb.mxu3 %v8035_v27 }
 0xa59   :  { %3145 = vmatpush.bf16.msrb.mxu3 %v8036_v41 }
 0xa5d   :  { %3146 = vmatpush.bf16.msrb.mxu3 %v8037_v35 }
 0xa61   :  { %3147 = vmatpush.bf16.msrb.mxu3 %v8038_v14 }
 0xaa1   :  { %v6894_v31 = vpop.f32.mrf.mxu1 }
 0xaa7   :  { %v2851_v38 = vpop.f32.mrf.mxu3 }
 0xaa8   :  { %v2852_v11 = vadd.f32 %v8039_v1, %v2851_v38  ;;  %v6897_v16 = vpop.f32.mrf.mxu2 }
 0xaa9   :  { %v2916_v10 = vpop.f32.mrf.mxu1 }
 0xaaa   :  { %2856 = vst [vmem:[#allocation10 + $0x10] sm:$0xff] %v2852_v11  ;;  %2857 = vmax.xlane.f32.xlu1 %v2852_v11  ;;  %v2884_v10 = vstv %s2881_s30 }
 0xaaf   :  { %v2853_v20 = vpop.f32.mrf.mxu3 }
 0xab0   :  { %v2929_v26 = vpop.f32.mrf.mxu2 }
 0xab1   :  { %v2887_v26 = vstv %s2886_s14 }
 0xab7   :  { %v6899_v23 = vpop.f32.mrf.mxu3 }
 0xabf   :  { %v2942_v36 = vpop.f32.mrf.mxu3 }
 0xb1d   :  { %v2858_v45 = vpop.xlane.xlu1 %2857 }
 0xb1e   :  { %vm2859_vm11 = vcmp.eq.f32.partialorder %v2852_v11, %v2858_v45  ;;  %v4670_v11 = vld [vmem:[%s7461_s3 + $0x8] sm:$0xff] }
 0xb1f   :  { %v2860_v6 = vsel %vm2859_vm11, %v6787_v50, 128  ;;  %v2885_v36 = vmul.f32 %v4670_v11, %v2884_v10  ;;  %v8046_v11 = vld [vmem:[#allocation22_spill] sm:$0xff]  ;;  %v8047_v10 = vld [vmem:[#allocation51_spill] sm:$0xff] }
 0xb20   :  { %v2862_v52 = vshra.s32 %v2860_v6, 16  ;;  %v2861_v44 = vand.u32 65535, %v2860_v6 }
 0xb22   :  { %v2864_v47 = vcvt.s32.f32 %v2862_v52  ;;  %v2863_v18 = vcvt.s32.f32 %v2861_v44 }
 0xb24   :  { %2865 = vmin.xlane.f32.xlu2 %v2864_v47 }
 0xb97   :  { %v2866_v32 = vpop.xlane.xlu2 %2865 }
 0xb98   :  { %vm2867_vm12 = vcmp.eq.f32.partialorder %v2864_v47, %v2866_v32  ;;  %v2872_v62 = vcvt.f32.s32 %v2866_v32 }
 0xb99   :  { %v2868_v57 = vsel %vm2867_vm12, %v2863_v18, inf  ;;  %v8041_v18 = vld [vmem:[#allocation17_spill] sm:$0xff] }
 0xb9a   :  { %2869 = vmin.xlane.f32.xlu2 %v2868_v57  ;;  %v2873_v8 = vshll.u32 %v2872_v62, 16  ;;  %v8042_v57 = vld [vmem:[#allocation18_spill] sm:$0xff]  ;;  %v8043_v62 = vld [vmem:[#allocation47_spill] sm:$0xff] }
 0xc0d   :  { %v2870_v39 = vpop.xlane.xlu2 %2869 }
 0xc0e   :  { %v2871_v38 = vcvt.f32.s32 %v2870_v39  ;;  %v8044_v39 = vld [vmem:[#allocation48_spill] sm:$0xff] }
 0xc10   :  { %v2874_v20 = vadd.s32 %v2873_v8, %v2871_v38  ;;  %v8045_v38 = vld [vmem:[#allocation21_spill] sm:$0xff] }
 0xc12   :  { %vm2875_vm13 = vcmp.eq.s32.totalorder %v6787_v50, %v2874_v20  ;;  %v8048_v20 = vld [vmem:[#allocation52_spill] sm:$0xff] }
 0xc13   :  { %v4668_v45 = vsel %vm2875_vm13, 1.0, %v7996_v63 }
 0xc14   :  { %v2888_v6 = vmul.f32 %v4668_v45, %v2887_v26  ;;  %v8049_v26 = vld [vmem:[#allocation25_spill] sm:$0xff]  ;;  %v8051_v45 = vld [vmem:[#allocation55_spill] sm:$0xff] }
 0xc16   :  { %v2889_v52 = vadd.f32 %v2888_v6, %v2885_v36  ;;  %v8050_v36 = vld [vmem:[#allocation26_spill] sm:$0xff]  ;;  %v8052_v6 = vld [vmem:[#allocation56_spill] sm:$0xff] }
 0xc18   :  { %v2890_v47 = vpack.c.bf16 %v2889_v52, %v2889_v52 }
 0xc1a   :  { %2899 = vmatmul.bf16.vlgmr.msrb.gmra.mxu0 %v2890_v47  ;;  %v8053_v47 = vld [vmem:[#allocation29_spill] sm:$0xff] }
 0xc1b   :  { %2996 = vmatpush.bf16.msrb.mxu0 %v7997_v59 }
 0xc1f   :  { %2997 = vmatpush.bf16.msrb.mxu0 %v7998_v19 }
 0xc23   :  { %2998 = vmatpush.bf16.msrb.mxu0 %v7999_v22 }
 0xc27   :  { %2999 = vmatpush.bf16.msrb.mxu0 %v8000_v46 }
 0xc2a   :  { %2952 = vmatmul.bf16.vlgmr.msra.gmra.mxu0 %v6856_v55  ;;  %v8040_v55 = vld [vmem:[#allocation44_spill] sm:$0xff] }
 0xc2b   :  { %3000 = vmatpush.bf16.msrb.mxu0 %v8001_v58 }
 0xc2f   :  { %3001 = vmatpush.bf16.msrb.mxu0 %v8002_v56 }
 0xc33   :  { %3002 = vmatpush.bf16.msrb.mxu0 %v6532_v7 }
 0xc37   :  { %3003 = vmatpush.bf16.msrb.mxu0 %v6559_v34 }
 0xc3b   :  { %3153 = vmatpush.bf16.msra.mxu0 %v6313_v49 }
 0xc3f   :  { %3154 = vmatpush.bf16.msra.mxu0 %v6325_v29 }
 0xc43   :  { %3155 = vmatpush.bf16.msra.mxu0 %v6337_v5 }
 0xc47   :  { %3156 = vmatpush.bf16.msra.mxu0 %v6353_v2 }
 0xc4b   :  { %3157 = vmatpush.bf16.msra.mxu0 %v6365_v4 }
 0xc4f   :  { %3158 = vmatpush.bf16.msra.mxu0 %v6381_v9 }
 0xc53   :  { %3159 = vmatpush.bf16.msra.mxu0 %v6393_v54 }
 0xc57   :  { %3160 = vmatpush.bf16.msra.mxu0 %v8040_v55 }
 0xc97   :  { %v2900_v44 = vpop.f32.mrf.mxu0 }
 0xc98   :  { %v2904_v32 = vpack.c.bf16 %v2900_v44, %v2900_v44  ;;  %v8054_v44 = vld [vmem:[#allocation30_spill] sm:$0xff] }
 0xc9a   :  { %2965 = vmatmul.bf16.vlgmr.msra.gmra.mxu1 %v2904_v32  ;;  %2978 = vmatmul.bf16.vlgmr.msra.gmra.mxu2 %v2904_v32 }
 0xc9b   :  { %2991 = vmatmul.bf16.vlgmr.msra.gmra.mxu3 %v2904_v32  ;;  %3004 = vmatmul.bf16.vlgmr.msrb.gmra.mxu0 %v2904_v32  ;;  %v8055_v32 = vld [vmem:[#allocation59_spill] sm:$0xff] }
 0xc9c   :  { %3166 = vmatpush.bf16.msra.mxu1 %v8041_v18  ;;  %3179 = vmatpush.bf16.msra.mxu2 %v8042_v57  ;;  %v8075_v18 = vld [vmem:[#allocation80_spill] sm:$0xff] }
 0xc9d   :  { %3192 = vmatpush.bf16.msra.mxu3 %v8043_v62  ;;  %3205 = vmatpush.bf16.msrb.mxu0 %v8044_v39 }
 0xc9f   :  { %v2902_v8 = vpop.f32.mrf.mxu0 }
 0xca0   :  { %3167 = vmatpush.bf16.msra.mxu1 %v8045_v38  ;;  %3180 = vmatpush.bf16.msra.mxu2 %v8046_v11  ;;  %v8056_v8 = vld [vmem:[#allocation60_spill] sm:$0xff]  ;;  %v8061_v11 = vld [vmem:[#allocation37_spill] sm:$0xff] }
 0xca1   :  { %3193 = vmatpush.bf16.msra.mxu3 %v8047_v10  ;;  %3206 = vmatpush.bf16.msrb.mxu0 %v8048_v20  ;;  %v8057_v10 = vld [vmem:[#allocation33_spill] sm:$0xff]  ;;  %v8058_v20 = vld [vmem:[#allocation34_spill] sm:$0xff] }
 0xca4   :  { %3168 = vmatpush.bf16.msra.mxu1 %v8049_v26  ;;  %3181 = vmatpush.bf16.msra.mxu2 %v8050_v36  ;;  %v8059_v26 = vld [vmem:[#allocation63_spill] sm:$0xff]  ;;  %v8060_v36 = vld [vmem:[#allocation64_spill] sm:$0xff] }
 0xca5   :  { %3194 = vmatpush.bf16.msra.mxu3 %v8051_v45  ;;  %3207 = vmatpush.bf16.msrb.mxu0 %v8052_v6  ;;  %v8062_v6 = vld [vmem:[#allocation38_spill] sm:$0xff] }
 0xca7   :  { %v2953_v52 = vpop.f32.mrf.mxu0 }
 0xca8   :  { %3169 = vmatpush.bf16.msra.mxu1 %v8053_v47  ;;  %3182 = vmatpush.bf16.msra.mxu2 %v8054_v44  ;;  %v8063_v47 = vld [vmem:[#allocation67_spill] sm:$0xff]  ;;  %v8064_v44 = vld [vmem:[#allocation68_spill] sm:$0xff] }
 0xca9   :  { %3195 = vmatpush.bf16.msra.mxu3 %v8055_v32  ;;  %3208 = vmatpush.bf16.msrb.mxu0 %v8056_v8  ;;  %v8065_v32 = vld [vmem:[#allocation41_spill] sm:$0xff]  ;;  %v8066_v8 = vld [vmem:[#allocation42_spill] sm:$0xff] }
 0xcac   :  { %3170 = vmatpush.bf16.msra.mxu1 %v8057_v10  ;;  %3183 = vmatpush.bf16.msra.mxu2 %v8058_v20  ;;  %v8067_v10 = vld [vmem:[#allocation71_spill] sm:$0xff]  ;;  %v8068_v20 = vld [vmem:[#allocation72_spill] sm:$0xff] }
 0xcad   :  { %3196 = vmatpush.bf16.msra.mxu3 %v8059_v26  ;;  %3209 = vmatpush.bf16.msrb.mxu0 %v8060_v36  ;;  %v8069_v26 = vld [vmem:[#allocation45_spill] sm:$0xff]  ;;  %v8070_v36 = vld [vmem:[#allocation46_spill] sm:$0xff] }
 0xcaf   :  { %v2955_v45 = vpop.f32.mrf.mxu0 }
 0xcb0   :  { %3171 = vmatpush.bf16.msra.mxu1 %v8061_v11  ;;  %3184 = vmatpush.bf16.msra.mxu2 %v8062_v6  ;;  %v8071_v45 = vld [vmem:[#allocation74_spill] sm:$0xff]  ;;  %v8072_v11 = vld [vmem:[#allocation75_spill] sm:$0xff] }
 0xcb1   :  { %3197 = vmatpush.bf16.msra.mxu3 %v8063_v47  ;;  %3210 = vmatpush.bf16.msrb.mxu0 %v8064_v44 }
 0xcb4   :  { %3172 = vmatpush.bf16.msra.mxu1 %v8065_v32  ;;  %3185 = vmatpush.bf16.msra.mxu2 %v8066_v8  ;;  %v8073_v32 = vld [vmem:[#allocation78_spill] sm:$0xff]  ;;  %v8074_v8 = vld [vmem:[#allocation79_spill] sm:$0xff] }
 0xcb5   :  { %3198 = vmatpush.bf16.msra.mxu3 %v8067_v10  ;;  %3211 = vmatpush.bf16.msrb.mxu0 %v8068_v20 }
 0xcb8   :  { %3173 = vmatpush.bf16.msra.mxu1 %v8069_v26  ;;  %3186 = vmatpush.bf16.msra.mxu2 %v8070_v36 }
 0xcb9   :  { %3199 = vmatpush.bf16.msra.mxu3 %v8071_v45  ;;  %3212 = vmatpush.bf16.msrb.mxu0 %v8072_v11 }
 0xd17   :  { %v2966_v6 = vpop.f32.mrf.mxu1 }
 0xd18   :  { %v2967_v47 = vadd.f32 %v2966_v6, %v6894_v31  ;;  %v3005_v44 = vpop.f32.mrf.mxu0 }
 0xd19   :  { %v3006_v38 = vadd.f32 %v3005_v44, %v2953_v52 }
 0xd1a   :  { %v3009_v39 = vadd.f32 %v2967_v47, %v8073_v32 }
 0xd1b   :  { %v3012_v62 = vadd.f32 %v3006_v38, %v8074_v8 }
 0xd1c   :  { %v4671_v10 = vmul.f32 -1.442695, %v3009_v39 }
 0xd1d   :  { %v4673_v57 = vmul.f32 -1.442695, %v3012_v62  ;;  %v2979_v20 = vpop.f32.mrf.mxu2 }
 0xd1e   :  { %5014 = vpow2.f32 %v4671_v10  ;;  %v2980_v26 = vadd.f32 %v2979_v20, %v6897_v16  ;;  %v2992_v36 = vpop.f32.mrf.mxu3 }
 0xd1f   :  { %5016 = vpow2.f32 %v4673_v57  ;;  %v2968_v45 = vpop.f32.mrf.mxu1  ;;  %v2993_v57 = vadd.f32 %v2992_v36, %v6899_v23 }
 0xd20   :  { %v3010_v11 = vadd.f32 %v2980_v26, %v8075_v18  ;;  %v3007_v55 = vpop.f32.mrf.mxu0  ;;  %v8076_v45 = vld [vmem:[#allocation82_spill] sm:$0xff] }
 0xd22   :  { %v4672_v54 = vmul.f32 -1.442695, %v3010_v11 }
 0xd24   :  { %v5015_v31 = vpop.eup %5014  ;;  %5018 = vpow2.f32 %v4672_v54  ;;  %v3011_v54 = vadd.f32 %v2993_v57, %v8076_v45 }
 0xd25   :  { %v5017_v6 = vpop.eup %5016  ;;  %v3016_v52 = vadd.f32 1.0, %v5015_v31  ;;  %v2981_v47 = vpop.f32.mrf.mxu2 }
 0xd26   :  { %v2994_v44 = vpop.f32.mrf.mxu3  ;;  %v3055_v39 = vadd.f32 1.0, %v5017_v6 }
 0xd27   :  { %5020 = vrcp.f32 %v3016_v52  ;;  %v3028_v44 = vand.u32 2147483648, %v3016_v52  ;;  %vm3022_vm15 = vweird.f32 %v3016_v52 }
 0xd28   :  { %5022 = vrcp.f32 %v3055_v39  ;;  %vm3061_vm7 = vweird.f32 %v3055_v39 }
 0xd2a   :  { %v5019_v62 = vpop.eup %5018 }
 0xd2b   :  { %v3035_v38 = vadd.f32 1.0, %v5019_v62  ;;  %v3026_v62 = vand.u32 2147483647, %v3016_v52 }
 0xd2d   :  { %v5021_v10 = vpop.eup %5020  ;;  %5024 = vrcp.f32 %v3035_v38  ;;  %v3047_v32 = vand.u32 2147483648, %v3035_v38  ;;  %v3045_v36 = vand.u32 2147483647, %v3035_v38  ;;  %vm3041_vm2 = vweird.f32 %v3035_v38 }
 0xd2e   :  { %v3018_v16 = vmul.f32 %v5021_v10, %v3016_v52  ;;  %v5023_v26 = vpop.eup %5022  ;;  %vm3023_vm14 = vweird.f32 %v5021_v10  ;;  %5026 = vtanh.f32 %v3011_v54  ;;  %vm3027_vm3 = vcmp.eq.f32.partialorder %v3026_v62, 8.507059e+37 }
 0xd2f   :  { %v3057_v47 = vmul.f32 %v5023_v26, %v3055_v39  ;;  %vm3024_vm0 = vmor %vm3022_vm15, %vm3023_vm14  ;;  %vm3046_vm5 = vcmp.eq.f32.partialorder %v3045_v36, 8.507059e+37  ;;  %vm3062_vm6 = vweird.f32 %v5023_v26 }
 0xd30   :  { %v3019_v20 = vsub.f32 1.0, %v3018_v16  ;;  %vm3063_vm8 = vmor %vm3061_vm7, %vm3062_vm6 }
 0xd31   :  { %v3058_v16 = vsub.f32 1.0, %v3057_v47 }
 0xd32   :  { %v3020_v55 = vmul.f32 %v5021_v10, %v3019_v20  ;;  %v3029_v20 = vor.u32 1.1754944e-38, %v3028_v44 }
 0xd33   :  { %v5025_v11 = vpop.eup %5024  ;;  %v3059_v4 = vmul.f32 %v5023_v26, %v3058_v16 }
 0xd34   :  { %v3037_v8 = vmul.f32 %v5025_v11, %v3035_v38  ;;  %v3021_v31 = vadd.f32 %v5021_v10, %v3020_v55  ;;  %vm3042_vm1 = vweird.f32 %v5025_v11  ;;  %v3048_v55 = vor.u32 1.1754944e-38, %v3047_v32 }
 0xd35   :  { %vm3043_vm4 = vmor %vm3041_vm2, %vm3042_vm1 }
 0xd36   :  { %v3038_v6 = vsub.f32 1.0, %v3037_v8  ;;  %v3025_v23 = vsel %vm3024_vm0, %v5021_v10, %v3021_v31  ;;  %v5027_v8 = vpop.eup %5026  ;;  %v3060_v10 = vadd.f32 %v5023_v26, %v3059_v4  ;;  %v3067_v31 = vand.u32 2147483648, %v3055_v39  ;;  %v6984_v4 = vld [vmem:[%s7469_s11 + $0x30] sm:$0xff] }
 0xd37   :  { %v3030_v45 = vsel %vm3027_vm3, %v3029_v20, %v3025_v23 }
 0xd38   :  { %v3039_v18 = vmul.f32 %v5025_v11, %v3038_v6  ;;  %v3072_v54 = vmul.f32 %v5027_v8, %v3030_v45  ;;  %v3064_v32 = vsel %vm3063_vm8, %v5023_v26, %v3060_v10  ;;  %v3068_v38 = vor.u32 1.1754944e-38, %v3067_v31 }
 0xd3a   :  { %v3040_v57 = vadd.f32 %v5025_v11, %v3039_v18  ;;  %v3065_v18 = vand.u32 2147483647, %v3055_v39 }
 0xd3c   :  { %v3044_v9 = vsel %vm3043_vm4, %v5025_v11, %v3040_v57  ;;  %vm3066_vm9 = vcmp.eq.f32.partialorder %v3065_v18, 8.507059e+37 }
 0xd3d   :  { %v3049_v52 = vsel %vm3046_vm5, %v3048_v55, %v3044_v9  ;;  %v3069_v47 = vsel %vm3066_vm9, %v3068_v38, %v3064_v32  ;;  %v4676_v38 = vld [vmem:[%s7461_s3 + $0x10] sm:$0xff] }
 0xd3e   :  { %v3071_v2 = vmul.f32 %v3049_v52, %v6853_v24  ;;  %v6992_v24 = vld [vmem:[%s7469_s11 + $0x28] sm:$0xff] }
 0xd40   :  { %v6964_v6 = vadd.f32 %v3072_v54, %v3071_v2  ;;  %v6976_v2 = vld [vmem:[%s7469_s11 + $0x38] sm:$0xff] }
 0xd42   :  { %5028 = vtanh.f32 %v6964_v6 }
 0xd48   :  { %v5029_v11 = vpop.eup %5028 }
 0xd49   :  { %v3075_v44 = vmul.f32 %v5029_v11, %v3069_v47  ;;  %v3119_v11 = vstv %s3116_s28 }
 0xd4b   :  { %v6967_v9 = vpack.c.bf16 %v3075_v44, %v3075_v44  ;;  %v3122_v44 = vstv %s3121_s29  ;;  %s4687_s29 = sld [smem:[#allocation2 + $0x5]] }
 0xd4d   :  { %3085 = vmatmul.bf16.vlgmr.msrb.gmra.mxu1 %v6967_v9  ;;  %3148 = vmatmul.bf16.vlgmr.msrb.gmra.mxu3 %v6967_v9 }
 0xd4e   :  { %3161 = vmatmul.bf16.vlgmr.msra.gmra.mxu0 %v6967_v9  ;;  %3218 = vmatpush.bf16.msrb.mxu1 %v7988_v60 }
 0xd4f   :  { %3312 = vmatpush.bf16.msrb.mxu3 %v6976_v2  ;;  %3361 = vmatpush.bf16.msra.mxu0 %v6707_v13  ;;  %v7000_v13 = vld [vmem:[%s7469_s11 + $0x20] sm:$0xff] }
 0xd51   :  { %p3584_p4 = scmp.eq.s32.totalorder %s4687_s29, 1 }
 0xd52   :  { %3219 = vmatpush.bf16.msrb.mxu1 %v7989_v30 }
 0xd53   :  { %3313 = vmatpush.bf16.msrb.mxu3 %v6984_v4  ;;  %3362 = vmatpush.bf16.msra.mxu0 %v6715_v28  ;;  %v7009_v28 = vld [vmem:[%s7469_s11 + $0x18] sm:$0xff]  ;;  %s3585_s10 = scalar_select %p3584_p4, 1, 0 }
 0xd55   :  { %s3586_s6 = scvt.s32.f32 %s3585_s10 }
 0xd56   :  { %3220 = vmatpush.bf16.msrb.mxu1 %v7990_v0 }
 0xd57   :  { %3314 = vmatpush.bf16.msrb.mxu3 %v6992_v24  ;;  %3363 = vmatpush.bf16.msra.mxu0 %v6723_v37  ;;  %v7017_v37 = vld [vmem:[%s7469_s11 + $0x10] sm:$0xff]  ;;  %s3591_s30 = ssub.f32 1.0, %s3586_s6 }
 0xd5a   :  { %3221 = vmatpush.bf16.msrb.mxu1 %v7991_v12 }
 0xd5b   :  { %3315 = vmatpush.bf16.msrb.mxu3 %v7000_v13  ;;  %3364 = vmatpush.bf16.msra.mxu0 %v6731_v17  ;;  %v7025_v17 = vld [vmem:[%s7469_s11 + $0x8] sm:$0xff] }
 0xd5d   :  { %3174 = vmatmul.bf16.vlgmr.msra.gmra.mxu1 %v6967_v9 }
 0xd5e   :  { %3222 = vmatpush.bf16.msrb.mxu1 %v7992_v25 }
 0xd5f   :  { %3316 = vmatpush.bf16.msrb.mxu3 %v7009_v28  ;;  %3365 = vmatpush.bf16.msra.mxu0 %v6740_v48  ;;  %v7034_v48 = vld [vmem:[%s7469_s11] sm:$0xff] }
 0xd62   :  { %3223 = vmatpush.bf16.msrb.mxu1 %v7993_v33 }
 0xd63   :  { %3317 = vmatpush.bf16.msrb.mxu3 %v7017_v37  ;;  %3366 = vmatpush.bf16.msra.mxu0 %v6748_v53 }
 0xd66   :  { %3224 = vmatpush.bf16.msrb.mxu1 %v6530_v42 }
 0xd67   :  { %3318 = vmatpush.bf16.msrb.mxu3 %v7025_v17  ;;  %3367 = vmatpush.bf16.msra.mxu0 %v6756_v3 }
 0xd6a   :  { %3225 = vmatpush.bf16.msrb.mxu1 %v8028_v61 }
 0xd6b   :  { %3319 = vmatpush.bf16.msrb.mxu3 %v7034_v48  ;;  %3368 = vmatpush.bf16.msra.mxu0 %v8031_v21 }
 0xd6e   :  { %3375 = vmatpush.bf16.msra.mxu1 %v8029_v40 }
 0xd72   :  { %3376 = vmatpush.bf16.msra.mxu1 %v8032_v51 }
 0xd76   :  { %3377 = vmatpush.bf16.msra.mxu1 %v8033_v15 }
 0xd7a   :  { %3378 = vmatpush.bf16.msra.mxu1 %v8034_v43 }
 0xd7e   :  { %3379 = vmatpush.bf16.msra.mxu1 %v8035_v27 }
 0xd82   :  { %3380 = vmatpush.bf16.msra.mxu1 %v8036_v41 }
 0xd86   :  { %3381 = vmatpush.bf16.msra.mxu1 %v8037_v35 }
 0xd8a   :  { %3382 = vmatpush.bf16.msra.mxu1 %v8038_v14 }
 0xdca   :  { %v3086_v53 = vpop.f32.mrf.mxu1 }
 0xdcb   :  { %v3087_v3 = vadd.f32 %v8039_v1, %v3086_v53  ;;  %v7046_v39 = vpop.f32.mrf.mxu0  ;;  %v3120_v53 = vmul.f32 %v4676_v38, %v3119_v11  ;;  %v8089_v38 = vld [vmem:[#allocation52_spill] sm:$0xff]  ;;  %v8090_v11 = vld [vmem:[#allocation25_spill] sm:$0xff] }
 0xdcd   :  { %3091 = vst [vmem:[#allocation10 + $0x18] sm:$0xff] %v3087_v3  ;;  %3092 = vmax.xlane.f32.xlu0 %v3087_v3 }
 0xdd0   :  { %v7048_v21 = vpop.f32.mrf.mxu3 }
 0xdd2   :  { %v3088_v26 = vpop.f32.mrf.mxu1 }
 0xdd3   :  { %v3164_v45 = vpop.f32.mrf.mxu0 }
 0xdd8   :  { %v3151_v62 = vpop.f32.mrf.mxu3 }
 0xdda   :  { %v7050_v23 = vpop.f32.mrf.mxu1 }
 0xde2   :  { %v3177_v36 = vpop.f32.mrf.mxu1 }
 0xde3   :  { %v8078_v36 = vld [vmem:[#allocation32_spill] sm:$0xff] }
 0xe40   :  { %v3093_v16 = vpop.xlane.xlu0 %3092 }
 0xe41   :  { %vm3094_vm10 = vcmp.eq.f32.partialorder %v3087_v3, %v3093_v16  ;;  %v8079_v16 = vld [vmem:[#allocation36_spill] sm:$0xff] }
 0xe42   :  { %v3095_v20 = vsel %vm3094_vm10, %v6787_v50, 128 }
 0xe43   :  { %v3097_v57 = vshra.s32 %v3095_v20, 16  ;;  %v3096_v1 = vand.u32 65535, %v3095_v20  ;;  %v8081_v20 = vld [vmem:[#allocation44_spill] sm:$0xff] }
 0xe45   :  { %v3099_v55 = vcvt.s32.f32 %v3097_v57  ;;  %v3098_v52 = vcvt.s32.f32 %v3096_v1  ;;  %v8082_v1 = vld [vmem:[#allocation17_spill] sm:$0xff] }
 0xe47   :  { %3100 = vmin.xlane.f32.xlu1 %v3099_v55 }
 0xeba   :  { %v3101_v8 = vpop.xlane.xlu1 %3100 }
 0xebb   :  { %vm3102_vm11 = vcmp.eq.f32.partialorder %v3099_v55, %v3101_v8  ;;  %v3107_v10 = vcvt.f32.s32 %v3101_v8  ;;  %v8083_v8 = vld [vmem:[#allocation18_spill] sm:$0xff] }
 0xebc   :  { %v3103_v54 = vsel %vm3102_vm11, %v3098_v52, inf  ;;  %v8084_v52 = vld [vmem:[#allocation47_spill] sm:$0xff] }
 0xebd   :  { %3104 = vmin.xlane.f32.xlu2 %v3103_v54  ;;  %v3108_v18 = vshll.u32 %v3107_v10, 16  ;;  %v8085_v54 = vld [vmem:[#allocation48_spill] sm:$0xff] }
 0xf30   :  { %v3105_v31 = vpop.xlane.xlu2 %3104 }
 0xf31   :  { %v3106_v32 = vcvt.f32.s32 %v3105_v31  ;;  %v8086_v31 = vld [vmem:[#allocation21_spill] sm:$0xff] }
 0xf33   :  { %v3109_v47 = vadd.s32 %v3108_v18, %v3106_v32  ;;  %v8087_v18 = vld [vmem:[#allocation22_spill] sm:$0xff]  ;;  %v8088_v32 = vld [vmem:[#allocation51_spill] sm:$0xff] }
 0xf35   :  { %vm3110_vm12 = vcmp.eq.s32.totalorder %v6787_v50, %v3109_v47  ;;  %v8091_v47 = vld [vmem:[#allocation26_spill] sm:$0xff] }
 0xf36   :  { %v4674_v3 = vsel %vm3110_vm12, 1.0, %v7996_v63  ;;  %v8077_v63 = vld [vmem:[#allocation28_spill] sm:$0xff] }
 0xf37   :  { %v3123_v26 = vmul.f32 %v4674_v3, %v3122_v44  ;;  %v8092_v44 = vld [vmem:[#allocation55_spill] sm:$0xff] }
 0xf39   :  { %v3124_v45 = vadd.f32 %v3123_v26, %v3120_v53  ;;  %v8093_v53 = vld [vmem:[#allocation56_spill] sm:$0xff]  ;;  %v8094_v26 = vld [vmem:[#allocation29_spill] sm:$0xff] }
 0xf3b   :  { %v3125_v62 = vpack.c.bf16 %v3124_v45, %v3124_v45  ;;  %v8095_v45 = vld [vmem:[#allocation30_spill] sm:$0xff] }
 0xf3d   :  { %3134 = vmatmul.bf16.vlgmr.msrb.gmra.mxu2 %v3125_v62  ;;  %v8096_v62 = vld [vmem:[#allocation59_spill] sm:$0xff] }
 0xf3e   :  { %3231 = vmatpush.bf16.msrb.mxu2 %v7997_v59 }
 0xf42   :  { %3232 = vmatpush.bf16.msrb.mxu2 %v7998_v19 }
 0xf46   :  { %3233 = vmatpush.bf16.msrb.mxu2 %v7999_v22 }
 0xf4a   :  { %3234 = vmatpush.bf16.msrb.mxu2 %v8000_v46 }
 0xf4d   :  { %3187 = vmatmul.bf16.vlgmr.msra.gmra.mxu2 %v6967_v9  ;;  %v8080_v9 = vld [vmem:[#allocation40_spill] sm:$0xff] }
 0xf4e   :  { %3235 = vmatpush.bf16.msrb.mxu2 %v8001_v58 }
 0xf52   :  { %3236 = vmatpush.bf16.msrb.mxu2 %v8002_v56 }
 0xf56   :  { %3237 = vmatpush.bf16.msrb.mxu2 %v6532_v7 }
 0xf5a   :  { %3238 = vmatpush.bf16.msrb.mxu2 %v6559_v34 }
 0xf5e   :  { %3388 = vmatpush.bf16.msra.mxu2 %v6313_v49 }
 0xf62   :  { %3389 = vmatpush.bf16.msra.mxu2 %v6325_v29 }
 0xf66   :  { %3390 = vmatpush.bf16.msra.mxu2 %v6337_v5 }
 0xf6a   :  { %3391 = vmatpush.bf16.msra.mxu2 %v8077_v63 }
 0xf6e   :  { %3392 = vmatpush.bf16.msra.mxu2 %v8078_v36 }
 0xf72   :  { %3393 = vmatpush.bf16.msra.mxu2 %v8079_v16 }
 0xf76   :  { %3394 = vmatpush.bf16.msra.mxu2 %v8080_v9 }
 0xf7a   :  { %3395 = vmatpush.bf16.msra.mxu2 %v8081_v20 }
 0xfc0   :  { %v3135_v57 = vpop.f32.mrf.mxu2 }
 0xfc1   :  { %v3139_v55 = vpack.c.bf16 %v3135_v57, %v3135_v57  ;;  %v8097_v57 = vld [vmem:[#allocation60_spill] sm:$0xff] }
 0xfc3   :  { %3200 = vmatmul.bf16.vlgmr.msra.gmra.mxu3 %v3139_v55  ;;  %3213 = vmatmul.bf16.vlgmr.msrb.gmra.mxu0 %v3139_v55 }
 0xfc4   :  { %3226 = vmatmul.bf16.vlgmr.msrb.gmra.mxu1 %v3139_v55  ;;  %3239 = vmatmul.bf16.vlgmr.msrb.gmra.mxu2 %v3139_v55  ;;  %v8098_v55 = vld [vmem:[#allocation33_spill] sm:$0xff] }
 0xfc5   :  { %3401 = vmatpush.bf16.msra.mxu3 %v8082_v1  ;;  %3414 = vmatpush.bf16.msrb.mxu0 %v8083_v8 }
 0xfc6   :  { %3427 = vmatpush.bf16.msrb.mxu1 %v8084_v52  ;;  %3440 = vmatpush.bf16.msrb.mxu2 %v8085_v54  ;;  %v8115_v54 = vld [vmem:[#allocation78_spill] sm:$0xff] }
 0xfc8   :  { %v3137_v10 = vpop.f32.mrf.mxu2 }
 0xfc9   :  { %3402 = vmatpush.bf16.msra.mxu3 %v8086_v31  ;;  %3415 = vmatpush.bf16.msrb.mxu0 %v8087_v18  ;;  %v8099_v10 = vld [vmem:[#allocation34_spill] sm:$0xff] }
 0xfca   :  { %3428 = vmatpush.bf16.msrb.mxu1 %v8088_v32  ;;  %3441 = vmatpush.bf16.msrb.mxu2 %v8089_v38  ;;  %v8102_v38 = vld [vmem:[#allocation37_spill] sm:$0xff]  ;;  %v8114_v32 = vld [vmem:[#allocation80_spill] sm:$0xff] }
 0xfcd   :  { %3403 = vmatpush.bf16.msra.mxu3 %v8090_v11  ;;  %3416 = vmatpush.bf16.msrb.mxu0 %v8091_v47  ;;  %v8100_v11 = vld [vmem:[#allocation63_spill] sm:$0xff]  ;;  %v8101_v47 = vld [vmem:[#allocation64_spill] sm:$0xff] }
 0xfce   :  { %3429 = vmatpush.bf16.msrb.mxu1 %v8092_v44  ;;  %3442 = vmatpush.bf16.msrb.mxu2 %v8093_v53  ;;  %v8103_v53 = vld [vmem:[#allocation38_spill] sm:$0xff] }
 0xfd0   :  { %v3188_v3 = vpop.f32.mrf.mxu2 }
 0xfd1   :  { %3404 = vmatpush.bf16.msra.mxu3 %v8094_v26  ;;  %3417 = vmatpush.bf16.msrb.mxu0 %v8095_v45  ;;  %v8104_v26 = vld [vmem:[#allocation67_spill] sm:$0xff]  ;;  %v8105_v45 = vld [vmem:[#allocation68_spill] sm:$0xff] }
 0xfd2   :  { %3430 = vmatpush.bf16.msrb.mxu1 %v8096_v62  ;;  %3443 = vmatpush.bf16.msrb.mxu2 %v8097_v57  ;;  %v8106_v62 = vld [vmem:[#allocation41_spill] sm:$0xff]  ;;  %v8107_v57 = vld [vmem:[#allocation42_spill] sm:$0xff] }
 0xfd5   :  { %3405 = vmatpush.bf16.msra.mxu3 %v8098_v55  ;;  %3418 = vmatpush.bf16.msrb.mxu0 %v8099_v10  ;;  %v8108_v55 = vld [vmem:[#allocation71_spill] sm:$0xff]  ;;  %v8109_v10 = vld [vmem:[#allocation72_spill] sm:$0xff] }
 0xfd6   :  { %3431 = vmatpush.bf16.msrb.mxu1 %v8100_v11  ;;  %3444 = vmatpush.bf16.msrb.mxu2 %v8101_v47  ;;  %v8110_v11 = vld [vmem:[#allocation45_spill] sm:$0xff]  ;;  %v8111_v47 = vld [vmem:[#allocation46_spill] sm:$0xff] }
 0xfd8   :  { %v3190_v44 = vpop.f32.mrf.mxu2 }
 0xfd9   :  { %3406 = vmatpush.bf16.msra.mxu3 %v8102_v38  ;;  %3419 = vmatpush.bf16.msrb.mxu0 %v8103_v53  ;;  %v8112_v44 = vld [vmem:[#allocation74_spill] sm:$0xff]  ;;  %v8113_v38 = vld [vmem:[#allocation75_spill] sm:$0xff] }
 0xfda   :  { %3432 = vmatpush.bf16.msrb.mxu1 %v8104_v26  ;;  %3445 = vmatpush.bf16.msrb.mxu2 %v8105_v45 }
 0xfdd   :  { %3407 = vmatpush.bf16.msra.mxu3 %v8106_v62  ;;  %3420 = vmatpush.bf16.msrb.mxu0 %v8107_v57 }
 0xfde   :  { %3433 = vmatpush.bf16.msrb.mxu1 %v8108_v55  ;;  %3446 = vmatpush.bf16.msrb.mxu2 %v8109_v10 }
 0xfe1   :  { %3408 = vmatpush.bf16.msra.mxu3 %v8110_v11  ;;  %3421 = vmatpush.bf16.msrb.mxu0 %v8111_v47 }
 0xfe2   :  { %3434 = vmatpush.bf16.msrb.mxu1 %v8112_v44  ;;  %3447 = vmatpush.bf16.msrb.mxu2 %v8113_v38  ;;  %v8116_v44 = vld [vmem:[#allocation79_spill] sm:$0xff] }
0x1040   :  { %v3214_v53 = vpop.f32.mrf.mxu0 }
0x1041   :  { %v3215_v26 = vadd.f32 %v3214_v53, %v7046_v39  ;;  %v3227_v45 = vpop.f32.mrf.mxu1 }
0x1043   :  { %v3245_v62 = vadd.f32 %v3215_v26, %v8114_v32 }
0x1045   :  { %v4678_v18 = vmul.f32 -1.442695, %v3245_v62 }
0x1046   :  { %v3201_v57 = vpop.f32.mrf.mxu3 }
0x1047   :  { %5030 = vpow2.f32 %v4678_v18  ;;  %v3202_v55 = vadd.f32 %v3201_v57, %v7048_v21  ;;  %v3240_v10 = vpop.f32.mrf.mxu2 }
0x1048   :  { %v3241_v31 = vadd.f32 %v3240_v10, %v3188_v3  ;;  %v3216_v11 = vpop.f32.mrf.mxu0 }
0x1049   :  { %v3244_v47 = vadd.f32 %v3202_v55, %v8115_v54  ;;  %v3229_v52 = vpop.f32.mrf.mxu1  ;;  %v8117_v55 = vld [vmem:[#allocation82_spill] sm:$0xff] }
0x104a   :  { %v3247_v8 = vadd.f32 %v3241_v31, %v8116_v44  ;;  %v3228_v52 = vadd.f32 %v3227_v45, %v7050_v23 }
0x104b   :  { %v4677_v38 = vmul.f32 -1.442695, %v3244_v47 }
0x104c   :  { %v4679_v1 = vmul.f32 -1.442695, %v3247_v8 }
0x104d   :  { %v5031_v20 = vpop.eup %5030  ;;  %5032 = vpow2.f32 %v4677_v38  ;;  %v3246_v38 = vadd.f32 %v3228_v52, %v8117_v55 }
0x104e   :  { %v3270_v39 = vadd.f32 1.0, %v5031_v20  ;;  %5034 = vpow2.f32 %v4679_v1  ;;  %v3203_v53 = vpop.f32.mrf.mxu3 }
0x104f   :  { %v3242_v26 = vpop.f32.mrf.mxu2 }
0x1050   :  { %5036 = vrcp.f32 %v3270_v39  ;;  %v3282_v53 = vand.u32 2147483648, %v3270_v39  ;;  %vm3276_vm14 = vweird.f32 %v3270_v39 }
0x1052   :  { %v3283_v45 = vor.u32 1.1754944e-38, %v3282_v53 }
0x1053   :  { %v5033_v18 = vpop.eup %5032 }
0x1054   :  { %v5035_v62 = vpop.eup %5034  ;;  %v3251_v21 = vadd.f32 1.0, %v5033_v18  ;;  %v3280_v18 = vand.u32 2147483647, %v3270_v39 }
0x1055   :  { %v3290_v57 = vadd.f32 1.0, %v5035_v62 }
0x1056   :  { %v5037_v3 = vpop.eup %5036  ;;  %5038 = vrcp.f32 %v3251_v21  ;;  %v3263_v32 = vand.u32 2147483648, %v3251_v21  ;;  %v3261_v23 = vand.u32 2147483647, %v3251_v21  ;;  %vm3281_vm1 = vcmp.eq.f32.partialorder %v3280_v18, 8.507059e+37  ;;  %v7169_v18 = vld [vmem:[%s7465_s7 + $0x10] sm:$0xff] }
0x1057   :  { %v3272_v11 = vmul.f32 %v5037_v3, %v3270_v39  ;;  %5040 = vrcp.f32 %v3290_v57  ;;  %vm3277_vm13 = vweird.f32 %v5037_v3  ;;  %vm3257_vm2 = vweird.f32 %v3251_v21 }
0x1058   :  { %vm3278_vm15 = vmor %vm3276_vm14, %vm3277_vm13  ;;  %5042 = vtanh.f32 %v3246_v38  ;;  %vm3262_vm4 = vcmp.eq.f32.partialorder %v3261_v23, 8.507059e+37  ;;  %v3302_v53 = vand.u32 2147483648, %v3290_v57  ;;  %vm3296_vm6 = vweird.f32 %v3290_v57  ;;  %v7186_v23 = vld [vmem:[%s7465_s7] sm:$0xff] }
0x1059   :  { %v3273_v31 = vsub.f32 1.0, %v3272_v11 }
0x105b   :  { %v3274_v47 = vmul.f32 %v5037_v3, %v3273_v31 }
0x105c   :  { %v5039_v8 = vpop.eup %5038 }
0x105d   :  { %v5041_v20 = vpop.eup %5040  ;;  %v3275_v1 = vadd.f32 %v5037_v3, %v3274_v47  ;;  %v3253_v10 = vmul.f32 %v5039_v8, %v3251_v21  ;;  %vm3258_vm0 = vweird.f32 %v5039_v8  ;;  %v3264_v47 = vor.u32 1.1754944e-38, %v3263_v32 }
0x105e   :  { %v3292_v26 = vmul.f32 %v5041_v20, %v3290_v57  ;;  %vm3259_vm3 = vmor %vm3257_vm2, %vm3258_vm0  ;;  %v5043_v9 = vpop.eup %5042  ;;  %vm3297_vm5 = vweird.f32 %v5041_v20  ;;  %v3303_v32 = vor.u32 1.1754944e-38, %v3302_v53 }
0x105f   :  { %v3254_v62 = vsub.f32 1.0, %v3253_v10  ;;  %v3279_v44 = vsel %vm3278_vm15, %v5037_v3, %v3275_v1  ;;  %vm3298_vm7 = vmor %vm3296_vm6, %vm3297_vm5 }
0x1060   :  { %v3293_v11 = vsub.f32 1.0, %v3292_v26  ;;  %v3284_v31 = vsel %vm3281_vm1, %v3283_v45, %v3279_v44 }
0x1061   :  { %v3255_v54 = vmul.f32 %v5039_v8, %v3254_v62  ;;  %v3306_v38 = vmul.f32 %v3284_v31, %v6964_v6  ;;  %v7128_v6 = vld [vmem:[%s7465_s7 + $0x38] sm:$0xff]  ;;  %v7177_v62 = vld [vmem:[%s7465_s7 + $0x8] sm:$0xff] }
0x1062   :  { %v3294_v10 = vmul.f32 %v5041_v20, %v3293_v11 }
0x1063   :  { %v3256_v52 = vadd.f32 %v5039_v8, %v3255_v54  ;;  %v3300_v54 = vand.u32 2147483647, %v3290_v57  ;;  %v7152_v57 = vld [vmem:[%s7465_s7 + $0x20] sm:$0xff] }
0x1064   :  { %v3295_v1 = vadd.f32 %v5041_v20, %v3294_v10 }
0x1065   :  { %v3260_v55 = vsel %vm3259_vm3, %v5039_v8, %v3256_v52  ;;  %vm3301_vm8 = vcmp.eq.f32.partialorder %v3300_v54, 8.507059e+37  ;;  %v7201_v52 = vld [vmem:[%s7470_s12] ss:$0 sm:$0xff] }
0x1066   :  { %v3265_v39 = vsel %vm3262_vm4, %v3264_v47, %v3260_v55  ;;  %v3299_v44 = vsel %vm3298_vm7, %v5041_v20, %v3295_v1  ;;  %v7161_v20 = vld [vmem:[%s7465_s7 + $0x18] sm:$0xff]  ;;  %8118 = vst [vmem:[#allocation57_spill] sm:$0xff] %v7201_v52 }
0x1067   :  { %v3307_v16 = vmul.f32 %v5043_v9, %v3265_v39  ;;  %v3304_v8 = vsel %vm3301_vm8, %v3303_v32, %v3299_v44  ;;  %v7144_v9 = vld [vmem:[%s7465_s7 + $0x28] sm:$0xff] }
0x1069   :  { %v7115_v3 = vadd.f32 %v3307_v16, %v3306_v38  ;;  %v7136_v16 = vld [vmem:[%s7465_s7 + $0x30] sm:$0xff] }
0x106b   :  { %5044 = vtanh.f32 %v7115_v3 }
0x1071   :  { %v5045_v21 = vpop.eup %5044 }
0x1072   :  { %v3310_v55 = vmul.f32 %v5045_v21, %v3304_v8 }
0x1074   :  { %v7118_v26 = vpack.c.bf16 %v3310_v55, %v3310_v55 }
0x1076   :  { %3320 = vmatmul.bf16.vlgmr.msrb.gmra.mxu3 %v7118_v26  ;;  %3383 = vmatmul.bf16.vlgmr.msra.gmra.mxu1 %v7118_v26 }
0x1077   :  { %3396 = vmatmul.bf16.vlgmr.msra.gmra.mxu2 %v7118_v26  ;;  %3453 = vmatpush.bf16.msrb.mxu3 %v7988_v60 }
0x1078   :  { %3547 = vmatpush.bf16.msra.mxu1 %v6976_v2  ;;  %3596 = vmatpush.bf16.msra.mxu2 %v7128_v6 }
0x107b   :  { %3454 = vmatpush.bf16.msrb.mxu3 %v7989_v30 }
0x107c   :  { %3548 = vmatpush.bf16.msra.mxu1 %v6984_v4  ;;  %3597 = vmatpush.bf16.msra.mxu2 %v7136_v16 }
0x107f   :  { %3455 = vmatpush.bf16.msrb.mxu3 %v7990_v0 }
0x1080   :  { %3549 = vmatpush.bf16.msra.mxu1 %v6992_v24  ;;  %3598 = vmatpush.bf16.msra.mxu2 %v7144_v9 }
0x1083   :  { %3456 = vmatpush.bf16.msrb.mxu3 %v7991_v12 }
0x1084   :  { %3550 = vmatpush.bf16.msra.mxu1 %v7000_v13  ;;  %3599 = vmatpush.bf16.msra.mxu2 %v7152_v57 }
0x1086   :  { %3409 = vmatmul.bf16.vlgmr.msra.gmra.mxu3 %v7118_v26 }
0x1087   :  { %3457 = vmatpush.bf16.msrb.mxu3 %v7992_v25 }
0x1088   :  { %3551 = vmatpush.bf16.msra.mxu1 %v7009_v28  ;;  %3600 = vmatpush.bf16.msra.mxu2 %v7161_v20 }
0x108b   :  { %3458 = vmatpush.bf16.msrb.mxu3 %v7993_v33 }
0x108c   :  { %3552 = vmatpush.bf16.msra.mxu1 %v7017_v37  ;;  %3601 = vmatpush.bf16.msra.mxu2 %v7169_v18 }
0x108f   :  { %3459 = vmatpush.bf16.msrb.mxu3 %v6530_v42 }
0x1090   :  { %3553 = vmatpush.bf16.msra.mxu1 %v7025_v17  ;;  %3602 = vmatpush.bf16.msra.mxu2 %v7177_v62 }
0x1093   :  { %3460 = vmatpush.bf16.msrb.mxu3 %v8028_v61 }
0x1094   :  { %3554 = vmatpush.bf16.msra.mxu1 %v7034_v48  ;;  %3603 = vmatpush.bf16.msra.mxu2 %v7186_v23 }
0x1097   :  { %3610 = vmatpush.bf16.msra.mxu3 %v8029_v40 }
0x109b   :  { %3611 = vmatpush.bf16.msra.mxu3 %v8032_v51 }
0x109f   :  { %3612 = vmatpush.bf16.msra.mxu3 %v8033_v15 }
0x10a3   :  { %3613 = vmatpush.bf16.msra.mxu3 %v8034_v43 }
0x10a7   :  { %3614 = vmatpush.bf16.msra.mxu3 %v8035_v27 }
0x10ab   :  { %3615 = vmatpush.bf16.msra.mxu3 %v8036_v41 }
0x10af   :  { %3616 = vmatpush.bf16.msra.mxu3 %v8037_v35 }
0x10b3   :  { %3617 = vmatpush.bf16.msra.mxu3 %v8038_v14 }
0x10f3   :  { %v7196_v45 = vpop.f32.mrf.mxu1 }
0x10f9   :  { %v3321_v11 = vpop.f32.mrf.mxu3 }
0x10fa   :  { %v3322_v31 = vadd.f32 %v7201_v52, %v3321_v11  ;;  %v7204_v47 = vpop.f32.mrf.mxu2 }
0x10fb   :  { %v3386_v39 = vpop.f32.mrf.mxu1 }
0x10fc   :  { %3326 = vst [vmem:[#allocation10 + $0x20] sm:$0xff] %v3322_v31  ;;  %3327 = vmax.xlane.f32.xlu0 %v3322_v31 }
0x1101   :  { %v3323_v10 = vpop.f32.mrf.mxu3 }
0x1102   :  { %v3399_v38 = vpop.f32.mrf.mxu2 }
0x1109   :  { %v7206_v1 = vpop.f32.mrf.mxu3 }
0x1111   :  { %v3412_v53 = vpop.f32.mrf.mxu3 }
0x1112   :  { %v4682_v53 = vld [vmem:[%s7461_s3 + $0x18] sm:$0xff] }
0x116f   :  { %v3328_v54 = vpop.xlane.xlu0 %3327 }
0x1170   :  { %vm3329_vm9 = vcmp.eq.f32.partialorder %v3322_v31, %v3328_v54  ;;  %v3354_v54 = vstv %s3351_s9 }
0x1171   :  { %v3330_v44 = vsel %vm3329_vm9, %v6787_v50, 128 }
0x1172   :  { %v3332_v32 = vshra.s32 %v3330_v44, 16  ;;  %v3331_v8 = vand.u32 65535, %v3330_v44 }
0x1174   :  { %v3334_v21 = vcvt.s32.f32 %v3332_v32  ;;  %v3333_v11 = vcvt.s32.f32 %v3331_v8  ;;  %v3357_v32 = vstv %s3356_s27  ;;  %v3355_v8 = vmul.f32 %v4682_v53, %v3354_v54  ;;  %v8123_v53 = vld [vmem:[#allocation18_spill] sm:$0xff]  ;;  %v8124_v54 = vld [vmem:[#allocation47_spill] sm:$0xff] }
0x1176   :  { %3335 = vmin.xlane.f32.xlu1 %v3334_v21 }
0x11e9   :  { %v3336_v55 = vpop.xlane.xlu1 %3335 }
0x11ea   :  { %vm3337_vm10 = vcmp.eq.f32.partialorder %v3334_v21, %v3336_v55  ;;  %v3342_v39 = vcvt.f32.s32 %v3336_v55 }
0x11eb   :  { %v3338_v52 = vsel %vm3337_vm10, %v3333_v11, inf }
0x11ec   :  { %3339 = vmin.xlane.f32.xlu2 %v3338_v52  ;;  %v3343_v38 = vshll.u32 %v3342_v39, 16  ;;  %v7213_v52 = vld [vmem:[#allocation10] sm:$0xff]  ;;  %v8121_v39 = vld [vmem:[#allocation44_spill] sm:$0xff] }
0x125f   :  { %v3340_v10 = vpop.xlane.xlu2 %3339 }
0x1260   :  { %v3341_v31 = vcvt.f32.s32 %v3340_v10 }
0x1262   :  { %v3344_v44 = vadd.s32 %v3343_v38, %v3341_v31  ;;  %v8122_v31 = vld [vmem:[#allocation17_spill] sm:$0xff] }
0x1264   :  { %vm3345_vm11 = vcmp.eq.s32.totalorder %v6787_v50, %v3344_v44  ;;  %v8125_v44 = vld [vmem:[#allocation48_spill] sm:$0xff] }
0x1265   :  { %v4680_v21 = vsel %vm3345_vm11, 1.0, %v7213_v52 }
0x1266   :  { %v3358_v11 = vmul.f32 %v4680_v21, %v3357_v32  ;;  %v8127_v21 = vld [vmem:[#allocation22_spill] sm:$0xff] }
0x1268   :  { %v3359_v55 = vadd.f32 %v3358_v11, %v3355_v8  ;;  %v8126_v8 = vld [vmem:[#allocation21_spill] sm:$0xff]  ;;  %v8128_v11 = vld [vmem:[#allocation51_spill] sm:$0xff] }
0x126a   :  { %v3360_v14 = vpack.c.bf16 %v3359_v55, %v3359_v55  ;;  %v8129_v55 = vld [vmem:[#allocation52_spill] sm:$0xff] }
0x126c   :  { %3369 = vmatmul.bf16.vlgmr.msra.gmra.mxu0 %v3360_v14  ;;  %v8119_v14 = vld [vmem:[#allocation36_spill] sm:$0xff] }
0x126d   :  { %3466 = vmatpush.bf16.msra.mxu0 %v7997_v59 }
0x1271   :  { %3467 = vmatpush.bf16.msra.mxu0 %v7998_v19 }
0x1275   :  { %3468 = vmatpush.bf16.msra.mxu0 %v7999_v22 }
0x1279   :  { %3469 = vmatpush.bf16.msra.mxu0 %v8000_v46 }
0x127c   :  { %3422 = vmatmul.bf16.vlgmr.msrb.gmra.mxu0 %v7118_v26  ;;  %v8120_v26 = vld [vmem:[#allocation40_spill] sm:$0xff] }
0x127d   :  { %3470 = vmatpush.bf16.msra.mxu0 %v8001_v58 }
0x1281   :  { %3471 = vmatpush.bf16.msra.mxu0 %v8002_v56 }
0x1285   :  { %3472 = vmatpush.bf16.msra.mxu0 %v6532_v7 }
0x1289   :  { %3473 = vmatpush.bf16.msra.mxu0 %v6559_v34 }
0x128d   :  { %3623 = vmatpush.bf16.msrb.mxu0 %v6313_v49 }
0x1291   :  { %3624 = vmatpush.bf16.msrb.mxu0 %v6325_v29 }
0x1295   :  { %3625 = vmatpush.bf16.msrb.mxu0 %v6337_v5  ;;  %v8156_v5 = vld [vmem:[#allocation80_spill] sm:$0xff] }
0x1299   :  { %3626 = vmatpush.bf16.msrb.mxu0 %v8077_v63 }
0x129d   :  { %3627 = vmatpush.bf16.msrb.mxu0 %v8078_v36 }
0x12a1   :  { %3628 = vmatpush.bf16.msrb.mxu0 %v8119_v14 }
0x12a5   :  { %3629 = vmatpush.bf16.msrb.mxu0 %v8120_v26 }
0x12a9   :  { %3630 = vmatpush.bf16.msrb.mxu0 %v8121_v39  ;;  %v8134_v39 = vld [vmem:[#allocation29_spill] sm:$0xff] }
0x12e9   :  { %v3370_v10 = vpop.f32.mrf.mxu0 }
0x12ea   :  { %v3374_v38 = vpack.c.bf16 %v3370_v10, %v3370_v10  ;;  %v8130_v10 = vld [vmem:[#allocation25_spill] sm:$0xff] }
0x12ec   :  { %3435 = vmatmul.bf16.vlgmr.msrb.gmra.mxu1 %v3374_v38  ;;  %3448 = vmatmul.bf16.vlgmr.msrb.gmra.mxu2 %v3374_v38 }
0x12ed   :  { %3461 = vmatmul.bf16.vlgmr.msrb.gmra.mxu3 %v3374_v38  ;;  %3474 = vmatmul.bf16.vlgmr.msra.gmra.mxu0 %v3374_v38  ;;  %v8131_v38 = vld [vmem:[#allocation26_spill] sm:$0xff] }
0x12ee   :  { %3636 = vmatpush.bf16.msrb.mxu1 %v8122_v31  ;;  %3649 = vmatpush.bf16.msrb.mxu2 %v8123_v53  ;;  %v8132_v31 = vld [vmem:[#allocation55_spill] sm:$0xff]  ;;  %v8133_v53 = vld [vmem:[#allocation56_spill] sm:$0xff] }
0x12ef   :  { %3662 = vmatpush.bf16.msrb.mxu3 %v8124_v54  ;;  %3675 = vmatpush.bf16.msra.mxu0 %v8125_v44  ;;  %v8142_v44 = vld [vmem:[#allocation37_spill] sm:$0xff] }
0x12f1   :  { %v3372_v32 = vpop.f32.mrf.mxu0 }
0x12f2   :  { %3637 = vmatpush.bf16.msrb.mxu1 %v8126_v8  ;;  %3650 = vmatpush.bf16.msrb.mxu2 %v8127_v21  ;;  %v8135_v32 = vld [vmem:[#allocation30_spill] sm:$0xff]  ;;  %v8136_v8 = vld [vmem:[#allocation59_spill] sm:$0xff]  ;;  %v8137_v21 = vld [vmem:[#allocation60_spill] sm:$0xff] }
0x12f3   :  { %3663 = vmatpush.bf16.msrb.mxu3 %v8128_v11  ;;  %3676 = vmatpush.bf16.msra.mxu0 %v8129_v55  ;;  %v8138_v11 = vld [vmem:[#allocation33_spill] sm:$0xff]  ;;  %v8139_v55 = vld [vmem:[#allocation34_spill] sm:$0xff] }
0x12f6   :  { %3638 = vmatpush.bf16.msrb.mxu1 %v8130_v10  ;;  %3651 = vmatpush.bf16.msrb.mxu2 %v8131_v38  ;;  %v8140_v10 = vld [vmem:[#allocation63_spill] sm:$0xff]  ;;  %v8141_v38 = vld [vmem:[#allocation64_spill] sm:$0xff] }
0x12f7   :  { %3664 = vmatpush.bf16.msrb.mxu3 %v8132_v31  ;;  %3677 = vmatpush.bf16.msra.mxu0 %v8133_v53  ;;  %v8143_v53 = vld [vmem:[#allocation38_spill] sm:$0xff] }
0x12f9   :  { %v3423_v54 = vpop.f32.mrf.mxu0 }
0x12fa   :  { %3639 = vmatpush.bf16.msrb.mxu1 %v8134_v39  ;;  %3652 = vmatpush.bf16.msrb.mxu2 %v8135_v32  ;;  %v8144_v39 = vld [vmem:[#allocation67_spill] sm:$0xff]  ;;  %v8145_v32 = vld [vmem:[#allocation68_spill] sm:$0xff] }
0x12fb   :  { %3665 = vmatpush.bf16.msrb.mxu3 %v8136_v8  ;;  %3678 = vmatpush.bf16.msra.mxu0 %v8137_v21  ;;  %v8146_v8 = vld [vmem:[#allocation41_spill] sm:$0xff]  ;;  %v8147_v21 = vld [vmem:[#allocation42_spill] sm:$0xff] }
0x12fe   :  { %3640 = vmatpush.bf16.msrb.mxu1 %v8138_v11  ;;  %3653 = vmatpush.bf16.msrb.mxu2 %v8139_v55  ;;  %v8148_v11 = vld [vmem:[#allocation71_spill] sm:$0xff]  ;;  %v8149_v55 = vld [vmem:[#allocation72_spill] sm:$0xff] }
0x12ff   :  { %3666 = vmatpush.bf16.msrb.mxu3 %v8140_v10  ;;  %3679 = vmatpush.bf16.msra.mxu0 %v8141_v38  ;;  %v8150_v10 = vld [vmem:[#allocation45_spill] sm:$0xff]  ;;  %v8151_v38 = vld [vmem:[#allocation46_spill] sm:$0xff] }
0x1301   :  { %v3425_v31 = vpop.f32.mrf.mxu0 }
0x1302   :  { %3641 = vmatpush.bf16.msrb.mxu1 %v8142_v44  ;;  %3654 = vmatpush.bf16.msrb.mxu2 %v8143_v53  ;;  %v8152_v31 = vld [vmem:[#allocation74_spill] sm:$0xff]  ;;  %v8153_v44 = vld [vmem:[#allocation75_spill] sm:$0xff] }
0x1303   :  { %3667 = vmatpush.bf16.msrb.mxu3 %v8144_v39  ;;  %3680 = vmatpush.bf16.msra.mxu0 %v8145_v32 }
0x1306   :  { %3642 = vmatpush.bf16.msrb.mxu1 %v8146_v8  ;;  %3655 = vmatpush.bf16.msrb.mxu2 %v8147_v21  ;;  %v8154_v8 = vld [vmem:[#allocation78_spill] sm:$0xff]  ;;  %v8155_v21 = vld [vmem:[#allocation79_spill] sm:$0xff] }
0x1307   :  { %3668 = vmatpush.bf16.msrb.mxu3 %v8148_v11  ;;  %3681 = vmatpush.bf16.msra.mxu0 %v8149_v55 }
0x130a   :  { %3643 = vmatpush.bf16.msrb.mxu1 %v8150_v10  ;;  %3656 = vmatpush.bf16.msrb.mxu2 %v8151_v38 }
0x130b   :  { %3669 = vmatpush.bf16.msrb.mxu3 %v8152_v31  ;;  %3682 = vmatpush.bf16.msra.mxu0 %v8153_v44 }
0x1369   :  { %v3436_v53 = vpop.f32.mrf.mxu1 }
0x136a   :  { %v3437_v39 = vadd.f32 %v3436_v53, %v7196_v45  ;;  %v3475_v32 = vpop.f32.mrf.mxu0 }
0x136b   :  { %v3476_v26 = vadd.f32 %v3475_v32, %v3423_v54 }
0x136c   :  { %v3479_v14 = vadd.f32 %v3437_v39, %v8154_v8 }
0x136d   :  { %v3482_v36 = vadd.f32 %v3476_v26, %v8155_v21 }
0x136e   :  { %v4683_v11 = vmul.f32 -1.442695, %v3479_v14 }
0x136f   :  { %v4685_v63 = vmul.f32 -1.442695, %v3482_v36  ;;  %v3449_v55 = vpop.f32.mrf.mxu2 }
0x1370   :  { %5046 = vpow2.f32 %v4683_v11  ;;  %v3450_v10 = vadd.f32 %v3449_v55, %v7204_v47  ;;  %v3462_v38 = vpop.f32.mrf.mxu3 }
0x1371   :  { %5048 = vpow2.f32 %v4685_v63  ;;  %v3438_v31 = vpop.f32.mrf.mxu1  ;;  %v3463_v63 = vadd.f32 %v3462_v38, %v7206_v1 }
0x1372   :  { %v3480_v44 = vadd.f32 %v3450_v10, %v8156_v5  ;;  %v3477_v29 = vpop.f32.mrf.mxu0  ;;  %v8157_v31 = vld [vmem:[#allocation82_spill] sm:$0xff] }
0x1374   :  { %v4684_v49 = vmul.f32 -1.442695, %v3480_v44 }
0x1376   :  { %v5047_v45 = vpop.eup %5046  ;;  %5050 = vpow2.f32 %v4684_v49  ;;  %v3481_v49 = vadd.f32 %v3463_v63, %v8157_v31 }
0x1377   :  { %v5049_v53 = vpop.eup %5048  ;;  %v3486_v54 = vadd.f32 1.0, %v5047_v45  ;;  %v3451_v39 = vpop.f32.mrf.mxu2 }
0x1378   :  { %v3464_v32 = vpop.f32.mrf.mxu3  ;;  %v3525_v14 = vadd.f32 1.0, %v5049_v53 }
0x1379   :  { %5052 = vrcp.f32 %v3486_v54  ;;  %v3498_v32 = vand.u32 2147483648, %v3486_v54  ;;  %vm3492_vm13 = vweird.f32 %v3486_v54 }
0x137a   :  { %5054 = vrcp.f32 %v3525_v14  ;;  %vm3531_vm5 = vweird.f32 %v3525_v14 }
0x137c   :  { %v5051_v36 = vpop.eup %5050 }
0x137d   :  { %v3505_v26 = vadd.f32 1.0, %v5051_v36  ;;  %v3496_v36 = vand.u32 2147483647, %v3486_v54 }
0x137f   :  { %v5053_v11 = vpop.eup %5052  ;;  %5056 = vrcp.f32 %v3505_v26  ;;  %v3517_v8 = vand.u32 2147483648, %v3505_v26  ;;  %v3515_v38 = vand.u32 2147483647, %v3505_v26  ;;  %vm3511_vm0 = vweird.f32 %v3505_v26 }
0x1380   :  { %v3488_v47 = vmul.f32 %v5053_v11, %v3486_v54  ;;  %v5055_v10 = vpop.eup %5054  ;;  %vm3493_vm12 = vweird.f32 %v5053_v11  ;;  %5058 = vtanh.f32 %v3481_v49  ;;  %vm3497_vm1 = vcmp.eq.f32.partialorder %v3496_v36, 8.507059e+37 }
0x1381   :  { %v3527_v39 = vmul.f32 %v5055_v10, %v3525_v14  ;;  %vm3494_vm14 = vmor %vm3492_vm13, %vm3493_vm12  ;;  %vm3516_vm3 = vcmp.eq.f32.partialorder %v3515_v38, 8.507059e+37  ;;  %vm3532_vm4 = vweird.f32 %v5055_v10 }
0x1382   :  { %v3489_v55 = vsub.f32 1.0, %v3488_v47  ;;  %vm3533_vm6 = vmor %vm3531_vm5, %vm3532_vm4 }
0x1383   :  { %v3528_v47 = vsub.f32 1.0, %v3527_v39 }
0x1384   :  { %v3490_v29 = vmul.f32 %v5053_v11, %v3489_v55  ;;  %v3499_v55 = vor.u32 1.1754944e-38, %v3498_v32 }
0x1385   :  { %v5057_v44 = vpop.eup %5056  ;;  %v3529_v7 = vmul.f32 %v5055_v10, %v3528_v47  ;;  %v8160_v47 = vld [vmem:[#allocation70_spill] sm:$0xff] }
0x1386   :  { %v3507_v21 = vmul.f32 %v5057_v44, %v3505_v26  ;;  %v3491_v45 = vadd.f32 %v5053_v11, %v3490_v29  ;;  %vm3512_vm15 = vweird.f32 %v5057_v44  ;;  %v3518_v29 = vor.u32 1.1754944e-38, %v3517_v8 }
0x1387   :  { %vm3513_vm2 = vmor %vm3511_vm0, %vm3512_vm15 }
0x1388   :  { %v3508_v53 = vsub.f32 1.0, %v3507_v21  ;;  %v3495_v1 = vsel %vm3494_vm14, %v5053_v11, %v3491_v45  ;;  %v5059_v21 = vpop.eup %5058  ;;  %v3530_v11 = vadd.f32 %v5055_v10, %v3529_v7  ;;  %v3537_v45 = vand.u32 2147483648, %v3525_v14  ;;  %v8158_v7 = vld [vmem:[#allocation43_spill] sm:$0xff] }
0x1389   :  { %v3500_v31 = vsel %vm3497_vm1, %v3499_v55, %v3495_v1  ;;  %v8161_v55 = vld [vmem:[#allocation73_spill] sm:$0xff] }
0x138a   :  { %v3509_v5 = vmul.f32 %v5057_v44, %v3508_v53  ;;  %v3542_v49 = vmul.f32 %v5059_v21, %v3500_v31  ;;  %v3534_v8 = vsel %vm3533_vm6, %v5055_v10, %v3530_v11  ;;  %v3538_v26 = vor.u32 1.1754944e-38, %v3537_v45  ;;  %v8164_v21 = vld [vmem:[#allocation20_spill] sm:$0xff] }
0x138b   :  { %v8167_v11 = vld [vmem:[#allocation32_spill] sm:$0xff] }
0x138c   :  { %v3510_v63 = vadd.f32 %v5057_v44, %v3509_v5  ;;  %v3535_v5 = vand.u32 2147483647, %v3525_v14  ;;  %v3592_v14 = vstv %s3591_s30  ;;  %v8168_v45 = vld [vmem:[#allocation36_spill] sm:$0xff]  ;;  %s4038_s30 = sshll.u32 %s7471_s13, 4  ;;  %s4039_s30 = int_to_ptr.hbm [resolvable:$true] %s4038_s30 }
0x138e   :  { %v3514_v34 = vsel %vm3513_vm2, %v5057_v44, %v3510_v63  ;;  %vm3536_vm7 = vcmp.eq.f32.partialorder %v3535_v5, 8.507059e+37  ;;  %v8162_v63 = vld [vmem:[#allocation77_spill] sm:$0xff]  ;;  %v8169_v5 = vld [vmem:[#allocation40_spill] sm:$0xff] }
0x138f   :  { %v3519_v54 = vsel %vm3516_vm3, %v3518_v29, %v3514_v34  ;;  %v3539_v39 = vsel %vm3536_vm7, %v3538_v26, %v3534_v8  ;;  %v8163_v29 = vld [vmem:[#allocation16_spill] sm:$0xff] }
0x1390   :  { %v3541_v56 = vmul.f32 %v3519_v54, %v7115_v3  ;;  %v8165_v54 = vld [vmem:[#allocation24_spill] sm:$0xff] }
0x1391   :  { %v8170_v8 = vld [vmem:[#allocation44_spill] sm:$0xff] }
0x1392   :  { %v7273_v53 = vadd.f32 %v3542_v49, %v3541_v56  ;;  %v8166_v49 = vld [vmem:[#allocation28_spill] sm:$0xff] }
0x1394   :  { %5060 = vtanh.f32 %v7273_v53 }
0x139a   :  { %v5061_v44 = vpop.eup %5060 }
0x139b   :  { %v3545_v32 = vmul.f32 %v5061_v44, %v3539_v39  ;;  %v8171_v39 = vld [vmem:[#allocation17_spill] sm:$0xff] }
0x139d   :  { %v7276_v34 = vpack.c.bf16 %v3545_v32, %v3545_v32  ;;  %v8172_v32 = vld [vmem:[#allocation18_spill] sm:$0xff] }
0x139f   :  { %3555 = vmatmul.bf16.vlgmr.msra.gmra.mxu1 %v7276_v34  ;;  %3618 = vmatmul.bf16.vlgmr.msra.gmra.mxu3 %v7276_v34 }
0x13a0   :  { %3631 = vmatmul.bf16.vlgmr.msrb.gmra.mxu0 %v7276_v34  ;;  %3688 = vmatpush.bf16.msra.mxu1 %v7988_v60 }
0x13a1   :  { %3782 = vmatpush.bf16.msra.mxu3 %v6976_v2  ;;  %3831 = vmatpush.bf16.msrb.mxu0 %v7128_v6 }
0x13a4   :  { %3689 = vmatpush.bf16.msra.mxu1 %v7989_v30 }
0x13a5   :  { %3783 = vmatpush.bf16.msra.mxu3 %v6984_v4  ;;  %3832 = vmatpush.bf16.msrb.mxu0 %v7136_v16 }
0x13a8   :  { %3690 = vmatpush.bf16.msra.mxu1 %v7990_v0 }
0x13a9   :  { %3784 = vmatpush.bf16.msra.mxu3 %v6992_v24  ;;  %3833 = vmatpush.bf16.msrb.mxu0 %v7144_v9 }
0x13ac   :  { %3691 = vmatpush.bf16.msra.mxu1 %v7991_v12 }
0x13ad   :  { %3785 = vmatpush.bf16.msra.mxu3 %v7000_v13  ;;  %3834 = vmatpush.bf16.msrb.mxu0 %v7152_v57 }
0x13af   :  { %3644 = vmatmul.bf16.vlgmr.msrb.gmra.mxu1 %v7276_v34 }
0x13b0   :  { %3692 = vmatpush.bf16.msra.mxu1 %v7992_v25 }
0x13b1   :  { %3786 = vmatpush.bf16.msra.mxu3 %v7009_v28  ;;  %3835 = vmatpush.bf16.msrb.mxu0 %v7161_v20 }
0x13b4   :  { %3693 = vmatpush.bf16.msra.mxu1 %v7993_v33 }
0x13b5   :  { %3787 = vmatpush.bf16.msra.mxu3 %v7017_v37  ;;  %3836 = vmatpush.bf16.msrb.mxu0 %v7169_v18  ;;  %v4688_v18 = vld [vmem:[%s7461_s3 + $0x20] sm:$0xff] }
0x13b8   :  { %3694 = vmatpush.bf16.msra.mxu1 %v6530_v42 }
0x13b9   :  { %3788 = vmatpush.bf16.msra.mxu3 %v7025_v17  ;;  %3837 = vmatpush.bf16.msrb.mxu0 %v7177_v62  ;;  %v3589_v62 = vstv %s3586_s6 }
0x13ba   :  { %v3590_v10 = vmul.f32 %v4688_v18, %v3589_v62  ;;  %v8191_v62 = vld [vmem:[#allocation37_spill] sm:$0xff] }
0x13bc   :  { %3695 = vmatpush.bf16.msra.mxu1 %v8028_v61 }
0x13bd   :  { %3789 = vmatpush.bf16.msra.mxu3 %v7034_v48  ;;  %3838 = vmatpush.bf16.msrb.mxu0 %v7186_v23 }
0x13c0   :  { %3845 = vmatpush.bf16.msrb.mxu1 %v8029_v40  ;;  %v8159_v40 = vld [vmem:[#allocation57_spill] sm:$0xff] }
0x13c4   :  { %3846 = vmatpush.bf16.msrb.mxu1 %v8032_v51 }
0x13c8   :  { %3847 = vmatpush.bf16.msrb.mxu1 %v8033_v15 }
0x13cc   :  { %3848 = vmatpush.bf16.msrb.mxu1 %v8034_v43 }
0x13d0   :  { %3849 = vmatpush.bf16.msrb.mxu1 %v8035_v27 }
0x13d4   :  { %3850 = vmatpush.bf16.msrb.mxu1 %v8036_v41 }
0x13d8   :  { %3851 = vmatpush.bf16.msrb.mxu1 %v8037_v35 }
0x13dc   :  { %3852 = vmatpush.bf16.msrb.mxu1 %v8158_v7  ;;  %v8174_v7 = vld [vmem:[#allocation48_spill] sm:$0xff] }
0x141c   :  { %v3556_v56 = vpop.f32.mrf.mxu1 }
0x141d   :  { %v3557_v2 = vadd.f32 %v8159_v40, %v3556_v56  ;;  %v7315_v4 = vpop.f32.mrf.mxu0 }
0x141f   :  { %3561 = vst [vmem:[#allocation10 + $0x28] sm:$0xff] %v3557_v2  ;;  %3562 = vmax.xlane.f32.xlu0 %v3557_v2 }
0x1422   :  { %v7317_v51 = vpop.f32.mrf.mxu3 }
0x1424   :  { %v3558_v15 = vpop.f32.mrf.mxu1 }
0x1425   :  { %v3634_v24 = vpop.f32.mrf.mxu0  ;;  %v8176_v15 = vld [vmem:[#allocation22_spill] sm:$0xff] }
0x1426   :  { %v8177_v24 = vld [vmem:[#allocation51_spill] sm:$0xff] }
0x142a   :  { %v3621_v43 = vpop.f32.mrf.mxu3 }
0x142b   :  { %v8178_v43 = vld [vmem:[#allocation52_spill] sm:$0xff] }
0x142c   :  { %v7319_v13 = vpop.f32.mrf.mxu1 }
0x1434   :  { %v3647_v27 = vpop.f32.mrf.mxu1 }
0x1435   :  { %v8179_v27 = vld [vmem:[#allocation25_spill] sm:$0xff] }
0x1492   :  { %v3563_v41 = vpop.xlane.xlu0 %3562 }
0x1493   :  { %vm3564_vm8 = vcmp.eq.f32.partialorder %v3557_v2, %v3563_v41  ;;  %v8175_v2 = vld [vmem:[#allocation21_spill] sm:$0xff]  ;;  %v8180_v41 = vld [vmem:[#allocation26_spill] sm:$0xff] }
0x1494   :  { %v3565_v35 = vsel %vm3564_vm8, %v6787_v50, 128 }
0x1495   :  { %v3567_v28 = vshra.s32 %v3565_v35, 16  ;;  %v3566_v17 = vand.u32 65535, %v3565_v35  ;;  %v8181_v35 = vld [vmem:[#allocation55_spill] sm:$0xff] }
0x1497   :  { %v3569_v37 = vcvt.s32.f32 %v3567_v28  ;;  %v3568_v3 = vcvt.s32.f32 %v3566_v17  ;;  %v8182_v28 = vld [vmem:[#allocation56_spill] sm:$0xff]  ;;  %v8183_v17 = vld [vmem:[#allocation29_spill] sm:$0xff] }
0x1499   :  { %3570 = vmin.xlane.f32.xlu1 %v3569_v37 }
0x150c   :  { %v3571_v48 = vpop.xlane.xlu1 %3570 }
0x150d   :  { %vm3572_vm9 = vcmp.eq.f32.partialorder %v3569_v37, %v3571_v48  ;;  %v3577_v16 = vcvt.f32.s32 %v3571_v48  ;;  %v8184_v48 = vld [vmem:[#allocation30_spill] sm:$0xff] }
0x150e   :  { %v3573_v6 = vsel %vm3572_vm9, %v3568_v3, inf  ;;  %v8185_v3 = vld [vmem:[#allocation59_spill] sm:$0xff] }
0x150f   :  { %3574 = vmin.xlane.f32.xlu2 %v3573_v6  ;;  %v3578_v57 = vshll.u32 %v3577_v16, 16  ;;  %v8186_v6 = vld [vmem:[#allocation60_spill] sm:$0xff]  ;;  %v8187_v16 = vld [vmem:[#allocation33_spill] sm:$0xff] }
0x1582   :  { %v3575_v9 = vpop.xlane.xlu2 %3574 }
0x1583   :  { %v3576_v20 = vcvt.f32.s32 %v3575_v9  ;;  %v8188_v9 = vld [vmem:[#allocation34_spill] sm:$0xff] }
0x1585   :  { %v3579_v23 = vadd.s32 %v3578_v57, %v3576_v20  ;;  %v8189_v57 = vld [vmem:[#allocation63_spill] sm:$0xff]  ;;  %v8190_v20 = vld [vmem:[#allocation64_spill] sm:$0xff] }
0x1587   :  { %vm3580_vm10 = vcmp.eq.s32.totalorder %v6787_v50, %v3579_v23  ;;  %v8192_v23 = vld [vmem:[#allocation38_spill] sm:$0xff] }
0x1588   :  { %v4686_v31 = vsel %vm3580_vm10, 1.0, %v7213_v52 }
0x1589   :  { %v3593_v36 = vmul.f32 %v4686_v31, %v3592_v14  ;;  %v8193_v14 = vld [vmem:[#allocation67_spill] sm:$0xff]  ;;  %v8195_v31 = vld [vmem:[#allocation41_spill] sm:$0xff] }
0x158b   :  { %v3594_v1 = vadd.f32 %v3593_v36, %v3590_v10  ;;  %v8194_v10 = vld [vmem:[#allocation68_spill] sm:$0xff]  ;;  %v8196_v36 = vld [vmem:[#allocation42_spill] sm:$0xff] }
0x158d   :  { %v3595_v38 = vpack.c.bf16 %v3594_v1, %v3594_v1  ;;  %v8197_v1 = vld [vmem:[#allocation71_spill] sm:$0xff] }
0x158f   :  { %3604 = vmatmul.bf16.vlgmr.msra.gmra.mxu2 %v3595_v38  ;;  %v8198_v38 = vld [vmem:[#allocation72_spill] sm:$0xff] }
0x1590   :  { %3701 = vmatpush.bf16.msra.mxu2 %v7997_v59 }
0x1594   :  { %3702 = vmatpush.bf16.msra.mxu2 %v7998_v19 }
0x1598   :  { %3703 = vmatpush.bf16.msra.mxu2 %v7999_v22 }
0x159c   :  { %3704 = vmatpush.bf16.msra.mxu2 %v8000_v46 }
0x159f   :  { %3657 = vmatmul.bf16.vlgmr.msrb.gmra.mxu2 %v7276_v34  ;;  %v8173_v34 = vld [vmem:[#allocation47_spill] sm:$0xff] }
0x15a0   :  { %3705 = vmatpush.bf16.msra.mxu2 %v8001_v58 }
0x15a4   :  { %3706 = vmatpush.bf16.msra.mxu2 %v8160_v47 }
0x15a8   :  { %3707 = vmatpush.bf16.msra.mxu2 %v8161_v55 }
0x15ac   :  { %3708 = vmatpush.bf16.msra.mxu2 %v8162_v63 }
0x15b0   :  { %3858 = vmatpush.bf16.msrb.mxu2 %v8163_v29  ;;  %v8199_v29 = vld [vmem:[#allocation45_spill] sm:$0xff] }
0x15b4   :  { %3859 = vmatpush.bf16.msrb.mxu2 %v8164_v21  ;;  %v8200_v21 = vld [vmem:[#allocation46_spill] sm:$0xff] }
0x15b8   :  { %3860 = vmatpush.bf16.msrb.mxu2 %v8165_v54  ;;  %v8201_v54 = vld [vmem:[#allocation74_spill] sm:$0xff] }
0x15bc   :  { %3861 = vmatpush.bf16.msrb.mxu2 %v8166_v49  ;;  %v8202_v49 = vld [vmem:[#allocation75_spill] sm:$0xff] }
0x15c0   :  { %3862 = vmatpush.bf16.msrb.mxu2 %v8167_v11 }
0x15c4   :  { %3863 = vmatpush.bf16.msrb.mxu2 %v8168_v45 }
0x15c8   :  { %3864 = vmatpush.bf16.msrb.mxu2 %v8169_v5 }
0x15cc   :  { %3865 = vmatpush.bf16.msrb.mxu2 %v8170_v8  ;;  %v8203_v8 = vld [vmem:[#allocation80_spill] sm:$0xff] }
0x1612   :  { %v3605_v26 = vpop.f32.mrf.mxu2 }
0x1613   :  { %v3609_v44 = vpack.c.bf16 %v3605_v26, %v3605_v26 }
0x1615   :  { %3670 = vmatmul.bf16.vlgmr.msrb.gmra.mxu3 %v3609_v44  ;;  %3683 = vmatmul.bf16.vlgmr.msra.gmra.mxu0 %v3609_v44 }
0x1616   :  { %3696 = vmatmul.bf16.vlgmr.msra.gmra.mxu1 %v3609_v44  ;;  %3709 = vmatmul.bf16.vlgmr.msra.gmra.mxu2 %v3609_v44 }
0x1617   :  { %3871 = vmatpush.bf16.msrb.mxu3 %v8171_v39  ;;  %3884 = vmatpush.bf16.msra.mxu0 %v8172_v32 }
0x1618   :  { %3897 = vmatpush.bf16.msra.mxu1 %v8173_v34  ;;  %3910 = vmatpush.bf16.msra.mxu2 %v8174_v7 }
0x161a   :  { %v3607_v56 = vpop.f32.mrf.mxu2 }
0x161b   :  { %3872 = vmatpush.bf16.msrb.mxu3 %v8175_v2  ;;  %3885 = vmatpush.bf16.msra.mxu0 %v8176_v15  ;;  %v8204_v2 = vld [vmem:[#allocation78_spill] sm:$0xff] }
0x161c   :  { %3898 = vmatpush.bf16.msra.mxu1 %v8177_v24  ;;  %3911 = vmatpush.bf16.msra.mxu2 %v8178_v43  ;;  %v8205_v43 = vld [vmem:[#allocation79_spill] sm:$0xff] }
0x161f   :  { %3873 = vmatpush.bf16.msrb.mxu3 %v8179_v27  ;;  %3886 = vmatpush.bf16.msra.mxu0 %v8180_v41 }
0x1620   :  { %3899 = vmatpush.bf16.msra.mxu1 %v8181_v35  ;;  %3912 = vmatpush.bf16.msra.mxu2 %v8182_v28 }
0x1622   :  { %v3658_v37 = vpop.f32.mrf.mxu2 }
0x1623   :  { %3874 = vmatpush.bf16.msrb.mxu3 %v8183_v17  ;;  %3887 = vmatpush.bf16.msra.mxu0 %v8184_v48 }
0x1624   :  { %3900 = vmatpush.bf16.msra.mxu1 %v8185_v3  ;;  %3913 = vmatpush.bf16.msra.mxu2 %v8186_v6 }
0x1627   :  { %3875 = vmatpush.bf16.msrb.mxu3 %v8187_v16  ;;  %3888 = vmatpush.bf16.msra.mxu0 %v8188_v9 }
0x1628   :  { %3901 = vmatpush.bf16.msra.mxu1 %v8189_v57  ;;  %3914 = vmatpush.bf16.msra.mxu2 %v8190_v20 }
0x162a   :  { %v3660_v18 = vpop.f32.mrf.mxu2 }
0x162b   :  { %3876 = vmatpush.bf16.msrb.mxu3 %v8191_v62  ;;  %3889 = vmatpush.bf16.msra.mxu0 %v8192_v23  ;;  %v8206_v23 = vld [vmem:[#allocation82_spill] sm:$0xff] }
0x162c   :  { %3902 = vmatpush.bf16.msra.mxu1 %v8193_v14  ;;  %3915 = vmatpush.bf16.msra.mxu2 %v8194_v10 }
0x162f   :  { %3877 = vmatpush.bf16.msrb.mxu3 %v8195_v31  ;;  %3890 = vmatpush.bf16.msra.mxu0 %v8196_v36 }
0x1630   :  { %3903 = vmatpush.bf16.msra.mxu1 %v8197_v1  ;;  %3916 = vmatpush.bf16.msra.mxu2 %v8198_v38 }
0x1633   :  { %3878 = vmatpush.bf16.msrb.mxu3 %v8199_v29  ;;  %3891 = vmatpush.bf16.msra.mxu0 %v8200_v21 }
0x1634   :  { %3904 = vmatpush.bf16.msra.mxu1 %v8201_v54  ;;  %3917 = vmatpush.bf16.msra.mxu2 %v8202_v49 }
0x1692   :  { %v3684_v11 = vpop.f32.mrf.mxu0 }
0x1693   :  { %v3685_v45 = vadd.f32 %v3684_v11, %v7315_v4  ;;  %v3697_v5 = vpop.f32.mrf.mxu1 }
0x1694   :  { %v3698_v57 = vadd.f32 %v3697_v5, %v7319_v13 }
0x1695   :  { %v3715_v26 = vadd.f32 %v3685_v45, %v8203_v8 }
0x1696   :  { %v3716_v14 = vadd.f32 %v3698_v57, %v8206_v23 }
0x1697   :  { %v4690_v44 = vmul.f32 -1.442695, %v3715_v26 }
0x1698   :  { %v3671_v39 = vpop.f32.mrf.mxu3 }
0x1699   :  { %5062 = vpow2.f32 %v4690_v44  ;;  %v3672_v32 = vadd.f32 %v3671_v39, %v7317_v51  ;;  %v3710_v34 = vpop.f32.mrf.mxu2 }
0x169a   :  { %v3711_v7 = vadd.f32 %v3710_v34, %v3658_v37  ;;  %v3686_v56 = vpop.f32.mrf.mxu0 }
0x169b   :  { %v3714_v15 = vadd.f32 %v3672_v32, %v8204_v2  ;;  %v3699_v24 = vpop.f32.mrf.mxu1 }
0x169c   :  { %v3717_v27 = vadd.f32 %v3711_v7, %v8205_v43 }
0x169d   :  { %v4689_v41 = vmul.f32 -1.442695, %v3714_v15 }
0x169e   :  { %v4691_v35 = vmul.f32 -1.442695, %v3717_v27 }
0x169f   :  { %v5063_v28 = vpop.eup %5062  ;;  %5064 = vpow2.f32 %v4689_v41 }
0x16a0   :  { %v3740_v4 = vadd.f32 1.0, %v5063_v28  ;;  %5066 = vpow2.f32 %v4691_v35  ;;  %v3673_v17 = vpop.f32.mrf.mxu3 }
0x16a1   :  { %v3712_v48 = vpop.f32.mrf.mxu2 }
0x16a2   :  { %5068 = vrcp.f32 %v3740_v4  ;;  %v3752_v1 = vand.u32 2147483648, %v3740_v4  ;;  %vm3746_vm12 = vweird.f32 %v3740_v4  ;;  %v3750_v29 = vand.u32 2147483647, %v3740_v4 }
0x16a4   :  { %v3753_v45 = vor.u32 1.1754944e-38, %v3752_v1  ;;  %vm3751_vm15 = vcmp.eq.f32.partialorder %v3750_v29, 8.507059e+37 }
0x16a5   :  { %v5065_v3 = vpop.eup %5064 }
0x16a6   :  { %v5067_v6 = vpop.eup %5066  ;;  %v3721_v51 = vadd.f32 1.0, %v5065_v3 }
0x16a7   :  { %v3760_v16 = vadd.f32 1.0, %v5067_v6 }
0x16a8   :  { %v5069_v37 = vpop.eup %5068  ;;  %5070 = vrcp.f32 %v3721_v51  ;;  %v3733_v54 = vand.u32 2147483648, %v3721_v51  ;;  %v3731_v13 = vand.u32 2147483647, %v3721_v51  ;;  %vm3727_vm0 = vweird.f32 %v3721_v51 }
0x16a9   :  { %v3742_v9 = vmul.f32 %v5069_v37, %v3740_v4  ;;  %5072 = vrcp.f32 %v3760_v16  ;;  %vm3747_vm11 = vweird.f32 %v5069_v37  ;;  %v3772_v35 = vand.u32 2147483648, %v3760_v16 }
0x16aa   :  { %vm3748_vm13 = vmor %vm3746_vm12, %vm3747_vm11  ;;  %5074 = vtanh.f32 %v3716_v14  ;;  %v3734_v39 = vor.u32 1.1754944e-38, %v3733_v54  ;;  %vm3732_vm2 = vcmp.eq.f32.partialorder %v3731_v13, 8.507059e+37  ;;  %vm3766_vm4 = vweird.f32 %v3760_v16 }
0x16ab   :  { %v3743_v20 = vsub.f32 1.0, %v3742_v9  ;;  %v3770_v28 = vand.u32 2147483647, %v3760_v16  ;;  %v3773_v17 = vor.u32 1.1754944e-38, %v3772_v35 }
0x16ad   :  { %v3744_v18 = vmul.f32 %v5069_v37, %v3743_v20  ;;  %vm3771_vm6 = vcmp.eq.f32.partialorder %v3770_v28, 8.507059e+37 }
0x16ae   :  { %v5071_v62 = vpop.eup %5070 }
0x16af   :  { %v5073_v10 = vpop.eup %5072  ;;  %v3745_v31 = vadd.f32 %v5069_v37, %v3744_v18  ;;  %v3723_v36 = vmul.f32 %v5071_v62, %v3721_v51  ;;  %vm3728_vm14 = vweird.f32 %v5071_v62 }
0x16b0   :  { %v3762_v38 = vmul.f32 %v5073_v10, %v3760_v16  ;;  %vm3729_vm1 = vmor %vm3727_vm0, %vm3728_vm14  ;;  %v5075_v34 = vpop.eup %5074  ;;  %vm3767_vm3 = vweird.f32 %v5073_v10  ;;  %v5121_v16 = vld [vmem:[%s7469_s11 + $0x30] sm:$0xff] }
0x16b1   :  { %v3724_v21 = vsub.f32 1.0, %v3723_v36  ;;  %v3749_v49 = vsel %vm3748_vm13, %v5069_v37, %v3745_v31  ;;  %vm3768_vm5 = vmor %vm3766_vm4, %vm3767_vm3  ;;  %v5122_v37 = vld [vmem:[%s7469_s11 + $0x28] sm:$0xff] }
0x16b2   :  { %v3763_v5 = vsub.f32 1.0, %v3762_v38  ;;  %v3754_v44 = vsel %vm3751_vm15, %v3753_v45, %v3749_v49  ;;  %v4694_v45 = vld [vmem:[%s7461_s3 + $0x28] sm:$0xff]  ;;  %s5253_s3 = smov [#allocation10]  }
0x16b3   :  { %v3725_v11 = vmul.f32 %v5071_v62, %v3724_v21  ;;  %v3776_v15 = vmul.f32 %v3754_v44, %v7273_v53  ;;  %v5120_v53 = vld [vmem:[%s7469_s11 + $0x38] sm:$0xff]  ;;  %s4036_s29 = sshll.u32 %s5253_s3, 4  ;;  %s4037_s29 = int_to_ptr.vmem [resolvable:$true] %s4036_s29 }
0x16b4   :  { %v3764_v56 = vmul.f32 %v5073_v10, %v3763_v5 }
0x16b5   :  { %v3726_v26 = vadd.f32 %v5071_v62, %v3725_v11 }
0x16b6   :  { %v3765_v41 = vadd.f32 %v5073_v10, %v3764_v56 }
0x16b7   :  { %v3730_v32 = vsel %vm3729_vm1, %v5071_v62, %v3726_v26 }
0x16b8   :  { %v3735_v7 = vsel %vm3732_vm2, %v3734_v39, %v3730_v32  ;;  %v3769_v4 = vsel %vm3768_vm5, %v5073_v10, %v3765_v41 }
0x16b9   :  { %v3777_v24 = vmul.f32 %v5075_v34, %v3735_v7  ;;  %v3774_v3 = vsel %vm3771_vm6, %v3773_v17, %v3769_v4 }
0x16bb   :  { %v7384_v27 = vadd.f32 %v3777_v24, %v3776_v15 }
0x16bd   :  { %5076 = vtanh.f32 %v7384_v27 }
0x16c3   :  { %v5077_v48 = vpop.eup %5076 }
0x16c4   :  { %v3780_v6 = vmul.f32 %v5077_v48, %v3774_v3 }
0x16c6   :  { %v7387_v51 = vpack.c.bf16 %v3780_v6, %v3780_v6 }
0x16c8   :  { %3790 = vmatmul.bf16.vlgmr.msra.gmra.mxu3 %v7387_v51  ;;  %3853 = vmatmul.bf16.vlgmr.msrb.gmra.mxu1 %v7387_v51 }
0x16c9   :  { %3866 = vmatmul.bf16.vlgmr.msrb.gmra.mxu2 %v7387_v51  ;;  %3923 = vmatpush.bf16.msra.mxu3 %v7988_v60  ;;  %v5123_v60 = vld [vmem:[%s7469_s11 + $0x20] sm:$0xff] }
0x16ca   :  { %4017 = vmatpush.bf16.msrb.mxu1 %v5120_v53 }
0x16cd   :  { %3924 = vmatpush.bf16.msra.mxu3 %v7989_v30  ;;  %v5124_v30 = vld [vmem:[%s7469_s11 + $0x18] sm:$0xff] }
0x16ce   :  { %4018 = vmatpush.bf16.msrb.mxu1 %v5121_v16 }
0x16d1   :  { %3925 = vmatpush.bf16.msra.mxu3 %v7990_v0  ;;  %v5125_v0 = vld [vmem:[%s7469_s11 + $0x10] sm:$0xff] }
0x16d2   :  { %4019 = vmatpush.bf16.msrb.mxu1 %v5122_v37 }
0x16d5   :  { %3926 = vmatpush.bf16.msra.mxu3 %v7991_v12  ;;  %v5126_v12 = vld [vmem:[%s7469_s11 + $0x8] sm:$0xff] }
0x16d6   :  { %4020 = vmatpush.bf16.msrb.mxu1 %v5123_v60 }
0x16d8   :  { %3879 = vmatmul.bf16.vlgmr.msrb.gmra.mxu3 %v7387_v51 }
0x16d9   :  { %3927 = vmatpush.bf16.msra.mxu3 %v7992_v25  ;;  %v5127_v25 = vld [vmem:[%s7469_s11] sm:$0xff]  ;;  %s4693_s11 = sld [smem:[#allocation2 + $0x6]] }
0x16da   :  { %4021 = vmatpush.bf16.msrb.mxu1 %v5124_v30 }
0x16dd   :  { %3928 = vmatpush.bf16.msra.mxu3 %v7993_v33 }
0x16de   :  { %4022 = vmatpush.bf16.msrb.mxu1 %v5125_v0 }
0x16df   :  { %p3819_p5 = scmp.eq.s32.totalorder %s4693_s11, 1 }
0x16e1   :  { %3929 = vmatpush.bf16.msra.mxu3 %v6530_v42  ;;  %s3820_s5 = scalar_select %p3819_p5, 1, 0 }
0x16e2   :  { %4023 = vmatpush.bf16.msrb.mxu1 %v5126_v12 }
0x16e3   :  { %s3821_s9 = scvt.s32.f32 %s3820_s5 }
0x16e5   :  { %3930 = vmatpush.bf16.msra.mxu3 %v8028_v61  ;;  %s3826_s27 = ssub.f32 1.0, %s3821_s9  ;;  %v3824_v5 = vstv %s3821_s9 }
0x16e6   :  { %4024 = vmatpush.bf16.msrb.mxu1 %v5127_v25  ;;  %v3825_v39 = vmul.f32 %v4694_v45, %v3824_v5 }
0x16e7   :  { %v3827_v44 = vstv %s3826_s27 }
0x1745   :  { %v3854_v33 = vpop.f32.mrf.mxu1 }
0x174b   :  { %v3791_v9 = vpop.f32.mrf.mxu3 }
0x174c   :  { %v3792_v57 = vadd.f32 %v8159_v40, %v3791_v9  ;;  %v7426_v20 = vpop.f32.mrf.mxu2 }
0x174d   :  { %v3856_v18 = vpop.f32.mrf.mxu1 }
0x174e   :  { %3796 = vst [vmem:[#allocation10 + $0x30] sm:$0xff] %v3792_v57  ;;  %3797 = vmax.xlane.f32.xlu0 %v3792_v57 }
0x1753   :  { %v3793_v42 = vpop.f32.mrf.mxu3 }
0x1754   :  { %v3869_v62 = vpop.f32.mrf.mxu2 }
0x175b   :  { %v7428_v14 = vpop.f32.mrf.mxu3 }
0x1763   :  { %v3882_v10 = vpop.f32.mrf.mxu3 }
0x17c1   :  { %v3798_v61 = vpop.xlane.xlu0 %3797 }
0x17c2   :  { %vm3799_vm7 = vcmp.eq.f32.partialorder %v3792_v57, %v3798_v61 }
0x17c3   :  { %v3800_v31 = vsel %vm3799_vm7, %v6787_v50, 128 }
0x17c4   :  { %v3802_v36 = vshra.s32 %v3800_v31, 16  ;;  %v3801_v38 = vand.u32 65535, %v3800_v31 }
0x17c6   :  { %v3804_v1 = vcvt.s32.f32 %v3802_v36  ;;  %v3803_v40 = vcvt.s32.f32 %v3801_v38 }
0x17c8   :  { %3805 = vmin.xlane.f32.xlu1 %v3804_v1 }
0x183b   :  { %v3806_v29 = vpop.xlane.xlu1 %3805 }
0x183c   :  { %vm3807_vm8 = vcmp.eq.f32.partialorder %v3804_v1, %v3806_v29  ;;  %v3812_v54 = vcvt.f32.s32 %v3806_v29 }
0x183d   :  { %v3808_v21 = vsel %vm3807_vm8, %v3803_v40, inf }
0x183e   :  { %3809 = vmin.xlane.f32.xlu2 %v3808_v21  ;;  %v3813_v11 = vshll.u32 %v3812_v54, 16 }
0x18b1   :  { %v3810_v49 = vpop.xlane.xlu2 %3809 }
0x18b2   :  { %v3811_v13 = vcvt.f32.s32 %v3810_v49 }
0x18b4   :  { %v3814_v26 = vadd.s32 %v3813_v11, %v3811_v13 }
0x18b6   :  { %vm3815_vm9 = vcmp.eq.s32.totalorder %v6787_v50, %v3814_v26 }
0x18b7   :  { %v4692_v32 = vsel %vm3815_vm9, 1.0, %v7213_v52 }
0x18b8   :  { %v3828_v34 = vmul.f32 %v4692_v32, %v3827_v44 }
0x18ba   :  { %v3829_v7 = vadd.f32 %v3828_v34, %v3825_v39 }
0x18bc   :  { %v3830_v56 = vpack.c.bf16 %v3829_v7, %v3829_v7 }
0x18be   :  { %3839 = vmatmul.bf16.vlgmr.msrb.gmra.mxu0 %v3830_v56 }
0x18bf   :  { %3936 = vmatpush.bf16.msrb.mxu0 %v7997_v59 }
0x18c3   :  { %3937 = vmatpush.bf16.msrb.mxu0 %v7998_v19 }
0x18c7   :  { %3938 = vmatpush.bf16.msrb.mxu0 %v7999_v22 }
0x18cb   :  { %3939 = vmatpush.bf16.msrb.mxu0 %v8000_v46 }
0x18ce   :  { %3892 = vmatmul.bf16.vlgmr.msra.gmra.mxu0 %v7387_v51 }
0x18cf   :  { %3940 = vmatpush.bf16.msrb.mxu0 %v8001_v58 }
0x18d3   :  { %3941 = vmatpush.bf16.msrb.mxu0 %v8160_v47 }
0x18d7   :  { %3942 = vmatpush.bf16.msrb.mxu0 %v8161_v55 }
0x18db   :  { %3943 = vmatpush.bf16.msrb.mxu0 %v8162_v63 }
0x193b   :  { %v3840_v50 = vpop.f32.mrf.mxu0 }
0x193c   :  { %v3844_v52 = vpack.c.bf16 %v3840_v50, %v3840_v50 }
0x193e   :  { %3905 = vmatmul.bf16.vlgmr.msra.gmra.mxu1 %v3844_v52  ;;  %3918 = vmatmul.bf16.vlgmr.msra.gmra.mxu2 %v3844_v52 }
0x193f   :  { %3931 = vmatmul.bf16.vlgmr.msra.gmra.mxu3 %v3844_v52  ;;  %3944 = vmatmul.bf16.vlgmr.msrb.gmra.mxu0 %v3844_v52 }
0x1943   :  { %v3842_v59 = vpop.f32.mrf.mxu0 }
0x194b   :  { %v3893_v19 = vpop.f32.mrf.mxu0 }
0x1953   :  { %v3895_v22 = vpop.f32.mrf.mxu0 }
0x1954   :  { %v5128_v22 = vld [vmem:[%s7470_s12] ss:$0 sm:$0xff] }
0x19bb   :  { %v3906_v46 = vpop.f32.mrf.mxu1 }
0x19bc   :  { %v3907_v15 = vadd.f32 %v3906_v46, %v3854_v33  ;;  %v3945_v24 = vpop.f32.mrf.mxu0 }
0x19bd   :  { %v3946_v41 = vadd.f32 %v3945_v24, %v3893_v19 }
0x19be   :  { %v3949_v58 = vadd.f32 %v3907_v15, %v8204_v2 }
0x19bf   :  { %v3952_v47 = vadd.f32 %v3946_v41, %v8205_v43 }
0x19c0   :  { %v4695_v55 = vmul.f32 -1.442695, %v3949_v58 }
0x19c1   :  { %v4697_v35 = vmul.f32 -1.442695, %v3952_v47  ;;  %v3919_v63 = vpop.f32.mrf.mxu2 }
0x19c2   :  { %5078 = vpow2.f32 %v4695_v55  ;;  %v3920_v28 = vadd.f32 %v3919_v63, %v7426_v20  ;;  %v3932_v4 = vpop.f32.mrf.mxu3 }
0x19c3   :  { %5080 = vpow2.f32 %v4697_v35  ;;  %v3908_v17 = vpop.f32.mrf.mxu1  ;;  %v3933_v25 = vadd.f32 %v3932_v4, %v7428_v14 }
0x19c4   :  { %v3950_v48 = vadd.f32 %v3920_v28, %v8203_v8  ;;  %v3947_v3 = vpop.f32.mrf.mxu0 }
0x19c5   :  { %v3951_v20 = vadd.f32 %v3933_v25, %v8206_v23 }
0x19c6   :  { %v4696_v6 = vmul.f32 -1.442695, %v3950_v48 }
0x19c8   :  { %v5079_v51 = vpop.eup %5078  ;;  %5082 = vpow2.f32 %v4696_v6 }
0x19c9   :  { %v5081_v53 = vpop.eup %5080  ;;  %v3956_v16 = vadd.f32 1.0, %v5079_v51  ;;  %v3921_v2 = vpop.f32.mrf.mxu2 }
0x19ca   :  { %v3934_v37 = vpop.f32.mrf.mxu3  ;;  %v3995_v43 = vadd.f32 1.0, %v5081_v53 }
0x19cb   :  { %5084 = vrcp.f32 %v3956_v16  ;;  %v3968_v10 = vand.u32 2147483648, %v3956_v16  ;;  %vm3962_vm11 = vweird.f32 %v3956_v16  ;;  %v3966_v31 = vand.u32 2147483647, %v3956_v16 }
0x19cc   :  { %5086 = vrcp.f32 %v3995_v43  ;;  %v4007_v32 = vand.u32 2147483648, %v3995_v43  ;;  %vm4001_vm3 = vweird.f32 %v3995_v43  ;;  %v4005_v34 = vand.u32 2147483647, %v3995_v43 }
0x19cd   :  { %v3969_v40 = vor.u32 1.1754944e-38, %v3968_v10  ;;  %vm3967_vm15 = vcmp.eq.f32.partialorder %v3966_v31, 8.507059e+37 }
0x19ce   :  { %v5083_v60 = vpop.eup %5082  ;;  %v4008_v56 = vor.u32 1.1754944e-38, %v4007_v32  ;;  %vm4006_vm5 = vcmp.eq.f32.partialorder %v4005_v34, 8.507059e+37 }
0x19cf   :  { %v3975_v30 = vadd.f32 1.0, %v5083_v60 }
0x19d1   :  { %v5085_v0 = vpop.eup %5084  ;;  %5088 = vrcp.f32 %v3975_v30  ;;  %v3987_v36 = vand.u32 2147483648, %v3975_v30  ;;  %v3985_v38 = vand.u32 2147483647, %v3975_v30  ;;  %vm3981_vm14 = vweird.f32 %v3975_v30 }
0x19d2   :  { %v3958_v12 = vmul.f32 %v5085_v0, %v3956_v16  ;;  %v5087_v8 = vpop.eup %5086  ;;  %vm3963_vm10 = vweird.f32 %v5085_v0  ;;  %5090 = vtanh.f32 %v3951_v20 }
0x19d3   :  { %v3997_v62 = vmul.f32 %v5087_v8, %v3995_v43  ;;  %vm3964_vm12 = vmor %vm3962_vm11, %vm3963_vm10  ;;  %v3988_v21 = vor.u32 1.1754944e-38, %v3987_v36  ;;  %vm3986_vm1 = vcmp.eq.f32.partialorder %v3985_v38, 8.507059e+37  ;;  %vm4002_vm2 = vweird.f32 %v5087_v8 }
0x19d4   :  { %v3959_v33 = vsub.f32 1.0, %v3958_v12  ;;  %vm4003_vm4 = vmor %vm4001_vm3, %vm4002_vm2 }
0x19d5   :  { %v3998_v29 = vsub.f32 1.0, %v3997_v62 }
0x19d6   :  { %v3960_v9 = vmul.f32 %v5085_v0, %v3959_v33 }
0x19d7   :  { %v5089_v57 = vpop.eup %5088  ;;  %v3999_v13 = vmul.f32 %v5087_v8, %v3998_v29 }
0x19d8   :  { %v3977_v18 = vmul.f32 %v5089_v57, %v3975_v30  ;;  %v3961_v42 = vadd.f32 %v5085_v0, %v3960_v9  ;;  %vm3982_vm13 = vweird.f32 %v5089_v57  ;;  %v5091_v11 = vpop.eup %5090 }
0x19d9   :  { %vm3983_vm0 = vmor %vm3981_vm14, %vm3982_vm13  ;;  %v4000_v39 = vadd.f32 %v5087_v8, %v3999_v13 }
0x19da   :  { %v3978_v61 = vsub.f32 1.0, %v3977_v18  ;;  %v3965_v14 = vsel %vm3964_vm12, %v5085_v0, %v3961_v42 }
0x19db   :  { %v3970_v54 = vsel %vm3967_vm15, %v3969_v40, %v3965_v14  ;;  %v4004_v7 = vsel %vm4003_vm4, %v5087_v8, %v4000_v39 }
0x19dc   :  { %v3979_v1 = vmul.f32 %v5089_v57, %v3978_v61  ;;  %v4012_v26 = vmul.f32 %v5091_v11, %v3970_v54  ;;  %v4009_v52 = vsel %vm4006_vm5, %v4008_v56, %v4004_v7 }
0x19de   :  { %v3980_v23 = vadd.f32 %v5089_v57, %v3979_v1 }
0x19e0   :  { %v3984_v49 = vsel %vm3983_vm0, %v5089_v57, %v3980_v23 }
0x19e1   :  { %v3989_v45 = vsel %vm3986_vm1, %v3988_v21, %v3984_v49 }
0x19e2   :  { %v4011_v5 = vmul.f32 %v3989_v45, %v7384_v27 }
0x19e4   :  { %v4013_v44 = vadd.f32 %v4012_v26, %v4011_v5 }
0x19e6   :  { %5092 = vtanh.f32 %v4013_v44 }
0x19ec   :  { %v5093_v50 = vpop.eup %5092 }
0x19ed   :  { %v4015_v59 = vmul.f32 %v5093_v50, %v4009_v52 }
0x19ef   :  { %v4016_v19 = vpack.c.bf16 %v4015_v59, %v4015_v59 }
0x19f1   :  { %4025 = vmatmul.bf16.vlgmr.msrb.gmra.mxu1 %v4016_v19 }
0x1a6e   :  { %v4026_v27 = vpop.f32.mrf.mxu1 }
0x1a6f   :  { %v4027_v46 = vadd.f32 %v5128_v22, %v4026_v27 }
0x1a71   :  { %4031 = vst [vmem:[#allocation10 + $0x38] sm:$0xff] %v4027_v46 }
0x1a72   :  { %4044 = dma.vmem_to_hbm [thread:$0]  %s4037_s29, 1024, %s4039_s30, [#allocation4], %s5254_s15, %s5254_s15, %s5255_s16  }
0x1a76   :  { %v4028_v15 = vpop.f32.mrf.mxu1 }
0x1a77   :  { %5243 = dma.done.wait [#allocation4], 1024  }
0x1a78   :  { %5244 = vsyncadd [#allocation4], 4294966272 }
0x1a79   :  { %4049 = vsyncpa [#allocation3], 1 }
0x1a7a   :  { %4050 = vsyncpa [#allocation8], 1 }
0x1a7b   :  { %4051 = vsyncpa [#allocation4], 1 }
0x1a7c   :  { %4052 = vsyncpa [#allocation5], 1 }

</bundles_post_ra>
